<compile_context>
chip_gen: v5e
topology: v5e:2x2
jax: 0.10.0
libtpu: 0.0.40
codegen_flags: <defaults>
</compile_context>

<pallas_src>
from functools import partial
from typing import NamedTuple

import jax
import jax.numpy as jnp
import numpy as np
from jax.experimental import pallas as pl
from jax.experimental.pallas import tpu as pltpu

EPS = 1e-5
LANE = 128
_VMEM_BUDGET = 20 * 1024 * 1024  # conservative: fits every generation's scoped VMEM


def _round_up(x, m):
    return ((x + m - 1) // m) * m


class _Geom(NamedTuple):
    N: int
    D: int
    H: int
    W: int
    rows: int       # true number of voxels N*D*H*W
    rows_pad: int   # rows rounded up to a multiple of 128
    halo: int       # flat-row halo (>= H*W + W + 1), multiple of 128
    tm: int         # row tile (multiple of 128, divides rows_pad)
    cin_pad: int    # channel count padded to a multiple of 8


# ---------------------------------------------------------------------------
# In-kernel helpers shared by both passes.
# ---------------------------------------------------------------------------
def _copy_window(x_ref, xwin_ref, sem, i, tm, halo):
    """Lane-aligned VMEM->VMEM DMA of the haloed row window for tile i."""
    cp = pltpu.make_async_copy(
        x_ref.at[:, pl.ds(i * tm, tm + 2 * halo)], xwin_ref, sem)
    cp.start()
    cp.wait()


def _conv_tile(w_ref, xwin_ref, bits, *, tm, halo, H, W, cout):
    """f32 (cout, tm) conv accumulator for one row tile.

    w_ref:    (27, cout, cin_pad) bf16 weights
    xwin_ref: (cin_pad, tm + 2*halo) bf16 haloed activation window
    bits:     (1, tm) int32 boundary bitmask (bit0=valid row, bits1..6 =
              d>0, d<D-1, h>0, h<H-1, w>0, w<W-1)
    """
    acc = jnp.zeros((cout, tm), jnp.float32)
    t = 0
    for dd in (-1, 0, 1):
        for dh in (-1, 0, 1):
            for dw in (-1, 0, 1):
                need = 1                      # valid (non-padded) row
                if dd == -1:
                    need |= 1 << 1
                if dd == +1:
                    need |= 1 << 2
                if dh == -1:
                    need |= 1 << 3
                if dh == +1:
                    need |= 1 << 4
                if dw == -1:
                    need |= 1 << 5
                if dw == +1:
                    need |= 1 << 6
                m = (bits & need) == need                     # (1, tm) bool
                off = (dd * H + dh) * W + dw                  # static int
                tap = xwin_ref[:, pl.ds(halo + off, tm)]      # static slice
                tap = jnp.where(m, tap, jnp.zeros_like(tap))  # zero-pad taps
                acc = acc + jnp.dot(w_ref[t], tap,
                                    preferred_element_type=jnp.float32)
                t += 1
    return acc


# ---------------------------------------------------------------------------
# Pass 1: conv + per-tile BN partial sums (no conv output written to HBM).
# ---------------------------------------------------------------------------
def _conv_stats_kernel(w_ref, x_ref, bmask_ref, stats_ref, xwin_ref, sem, *,
                       tm, halo, H, W, cout):
    i = pl.program_id(0)
    _copy_window(x_ref, xwin_ref, sem, i, tm, halo)
    acc = _conv_tile(w_ref, xwin_ref, bmask_ref[...],
                     tm=tm, halo=halo, H=H, W=W, cout=cout)
    # merged sum / sumsq -> single tiny per-tile write-back
    stats_ref[...] = jnp.concatenate(
        [jnp.sum(acc, axis=1, keepdims=True),
         jnp.sum(acc * acc, axis=1, keepdims=True)], axis=1)


# ---------------------------------------------------------------------------
# Pass 2: recompute conv, fuse BN normalize/affine (+ residual) + ReLU.
# ---------------------------------------------------------------------------
def _conv_bn_act_kernel(*refs, tm, halo, H, W, cout, has_res):
    if has_res:
        w_ref, x_ref, bmask_ref, scale_ref, shift_ref, res_ref, out_ref, \
            xwin_ref, sem = refs
    else:
        w_ref, x_ref, bmask_ref, scale_ref, shift_ref, out_ref, \
            xwin_ref, sem = refs
        res_ref = None
    i = pl.program_id(0)
    _copy_window(x_ref, xwin_ref, sem, i, tm, halo)
    acc = _conv_tile(w_ref, xwin_ref, bmask_ref[...],
                     tm=tm, halo=halo, H=H, W=W, cout=cout)
    y = acc * scale_ref[...] + shift_ref[...]
    if has_res:
        y = y + res_ref[...]
    out_ref[...] = jnp.maximum(y, 0.0).astype(out_ref.dtype)


# ---------------------------------------------------------------------------
# Host-side geometry / layout helpers.
# ---------------------------------------------------------------------------
def _choose_block_rows(rows_pad, cin_pad, cout, halo):
    """Largest 128-multiple row tile that divides rows_pad and fits the VMEM
    budget, preferring >= 4 grid steps (megacore balance + pipeline depth)."""
    cands = [c for c in (2048, 1024, 512, 256, 128)
             if c <= rows_pad and rows_pad % c == 0]
    if not cands:
        return rows_pad

    def fits(tm):
        per_step = (cin_pad * (tm + 2 * halo) * 2      # haloed window scratch
                    + 4 * cout * tm * 4                # out + residual tiles (x2 buf)
                    + 2 * tm * 4)                      # boundary bitmask tile
        return per_step <= _VMEM_BUDGET // 4

    for want_nt in (4, 2, 1):
        for tm in cands:
            if rows_pad // tm >= want_nt and fits(tm):
                return tm
    return cands[-1]


def _make_geom(N, C, D, H, W):
    rows = N * D * H * W
    rows_pad = _round_up(rows, LANE)
    halo = _round_up(H * W + W + 1, LANE)
    cin_pad = _round_up(max(C, 8), 8)
    tm = _choose_block_rows(rows_pad, cin_pad, C, halo)
    cols = rows_pad + 2 * halo
    resident = 2 * cin_pad * cols * 2 + 2 * 27 * C * cin_pad * 2
    per_step = cin_pad * (tm + 2 * halo) * 2 + 4 * C * tm * 4 + 2 * tm * 4
    # TODO(synk): large activations need the pl.ANY + double-buffered haloed
    # HBM->VMEM variant instead of the resident-VMEM path.
    assert resident + per_step <= _VMEM_BUDGET, \
        "activation too large for the resident-VMEM conv path"
    return _Geom(N=N, D=D, H=H, W=W, rows=rows, rows_pad=rows_pad,
                 halo=halo, tm=tm, cin_pad=cin_pad)


def _boundary_bits(g: _Geom):
    """Static (1, rows_pad) int32 bitmask encoding 3x3x3 boundary validity."""
    r = np.arange(g.rows_pad, dtype=np.int64)
    w = r % g.W
    h = (r // g.W) % g.H
    d = (r // (g.W * g.H)) % g.D
    bits = ((r < g.rows).astype(np.int32)
            | ((d > 0).astype(np.int32) << 1)
            | ((d < g.D - 1).astype(np.int32) << 2)
            | ((h > 0).astype(np.int32) << 3)
            | ((h < g.H - 1).astype(np.int32) << 4)
            | ((w > 0).astype(np.int32) << 5)
            | ((w < g.W - 1).astype(np.int32) << 6))
    return jnp.asarray(bits.reshape(1, g.rows_pad), dtype=jnp.int32)


def _prep_resident(x_flat, g: _Geom):
    """(C, r) -> (cin_pad, halo + rows_pad + halo) bf16 resident activation."""
    c, r = x_flat.shape
    return jnp.pad(x_flat.astype(jnp.bfloat16),
                   ((0, g.cin_pad - c), (g.halo, g.halo + g.rows_pad - r)))


# ---------------------------------------------------------------------------
# One fused layer: 3x3x3 conv (pad=1, stride=1) + BatchNorm3d(train) [+res] + ReLU.
# ---------------------------------------------------------------------------
def conv3d_bn_relu(x_res, bmask, w, gamma, beta, *, g: _Geom,
                   residual=None, out_dtype=jnp.float32):
    cin = w.shape[3]
    cout = w.shape[4]
    nt = g.rows_pad // g.tm
    cols = g.rows_pad + 2 * g.halo

    # (3,3,3,Cin,Cout) -> (27, Cout, Cin_pad) bf16  (tap order matches kernel)
    wt = jnp.transpose(w.reshape(27, cin, cout), (0, 2, 1))
    wt = jnp.pad(wt, ((0, 0), (0, 0), (0, g.cin_pad - cin))).astype(jnp.bfloat16)

    kernel_kw = dict(tm=g.tm, halo=g.halo, H=g.H, W=g.W, cout=cout)
    cparams = pltpu.CompilerParams(
        dimension_semantics=("parallel",),
        vmem_limit_bytes=32 * 1024 * 1024)

    w_spec = pl.BlockSpec((27, cout, g.cin_pad), lambda i: (0, 0, 0))
    x_spec = pl.BlockSpec((g.cin_pad, cols), lambda i: (0, 0))   # resident
    bmask_spec = pl.BlockSpec((1, g.tm), lambda i: (0, i))
    row_spec = pl.BlockSpec((cout, g.tm), lambda i: (0, i))
    scratch = [pltpu.VMEM((g.cin_pad, g.tm + 2 * g.halo), jnp.bfloat16),
               pltpu.SemaphoreType.DMA]

    # --- pass 1: conv + per-tile BN partial sums (tiny HBM writes only) -----
    stats = pl.pallas_call(
        partial(_conv_stats_kernel, **kernel_kw),
        grid=(nt,),
        in_specs=[w_spec, x_spec, bmask_spec],
        out_specs=pl.BlockSpec((None, cout, 2), lambda i: (i, 0, 0)),
        out_shape=jax.ShapeDtypeStruct((nt, cout, 2), jnp.float32),
        scratch_shapes=scratch,
        compiler_params=cparams,
    )(wt, x_res, bmask)

    # --- tiny cross-tile reduction -> BN scale/shift (XLA, O(Cout) work) ----
    s = jnp.sum(stats[:, :, 0], axis=0)
    ss = jnp.sum(stats[:, :, 1], axis=0)
    mean = s / g.rows
    var = jnp.maximum(ss / g.rows - mean * mean, 0.0)   # biased variance
    inv = jax.lax.rsqrt(var + EPS)
    g32 = gamma.astype(jnp.float32)
    b32 = beta.astype(jnp.float32)
    scale = (g32 * inv).reshape(cout, 1)
    shift = (b32 - mean * g32 * inv).reshape(cout, 1)

    # --- pass 2: recompute conv (MXU has slack) + fused BN/residual/ReLU ----
    has_res = residual is not None
    inputs = [wt, x_res, bmask, scale, shift]
    in_specs = [w_spec, x_spec, bmask_spec,
                pl.BlockSpec((cout, 1), lambda i: (0, 0)),
                pl.BlockSpec((cout, 1), lambda i: (0, 0))]
    if has_res:
        inputs.append(residual)
        in_specs.append(row_spec)

    return pl.pallas_call(
        partial(_conv_bn_act_kernel, has_res=has_res, **kernel_kw),
        grid=(nt,),
        in_specs=in_specs,
        out_specs=row_spec,
        out_shape=jax.ShapeDtypeStruct((cout, g.rows_pad), out_dtype),
        scratch_shapes=scratch,
        compiler_params=cparams,
    )(*inputs)


# ---------------------------------------------------------------------------
# The block.
# ---------------------------------------------------------------------------
class ResNetBlockPallas:
    """ResNetBlock(in_planes, planes, stride=1, downsample=None, semi=False)."""

    def __init__(self, in_planes, planes, key):
        assert in_planes == planes, "downsample=None path needs matching channels"
        k1, k2, k3, k4, k5, k6 = jax.random.split(key, 6)
        fan = in_planes * 27
        self.w1 = jax.random.normal(k1, (3, 3, 3, in_planes, planes),
                                    jnp.float32) * (2.0 / fan) ** 0.5
        self.w2 = jax.random.normal(k2, (3, 3, 3, planes, planes),
                                    jnp.float32) * (2.0 / fan) ** 0.5
        self.g1 = 1.0 + 0.1 * jax.random.normal(k3, (planes,), jnp.float32)
        self.b1 = 0.1 * jax.random.normal(k4, (planes,), jnp.float32)
        self.g2 = 1.0 + 0.1 * jax.random.normal(k5, (planes,), jnp.float32)
        self.b2 = 0.1 * jax.random.normal(k6, (planes,), jnp.float32)

    def __call__(self, x_ncdhw):
        N, C, D, H, W = x_ncdhw.shape
        g = _make_geom(N, C, D, H, W)
        bmask = _boundary_bits(g)

        # Single layout change at each boundary: NCDHW <-> lane-dense (C, rows).
        x_flat = jnp.transpose(x_ncdhw, (1, 0, 2, 3, 4)).astype(
            jnp.float32).reshape(C, g.rows)
        res = jnp.pad(x_flat, ((0, 0), (0, g.rows_pad - g.rows)))   # f32 residual

        x_res = _prep_resident(x_flat, g)
        # layer 1: conv1 + bn1 + relu, emitted directly in bf16 (its only
        # consumer is conv2, which computes in bf16 anyway).
        h1 = conv3d_bn_relu(x_res, bmask, self.w1, self.g1, self.b1, g=g,
                            residual=None, out_dtype=jnp.bfloat16)
        h1_res = _prep_resident(h1, g)
        # layer 2: conv2 + bn2 + residual + relu, f32 block output.
        out = conv3d_bn_relu(h1_res, bmask, self.w2, self.g2, self.b2, g=g,
                             residual=res, out_dtype=jnp.float32)

        out = out[:, :g.rows].reshape(C, N, D, H, W)
        return jnp.transpose(out, (1, 0, 2, 3, 4))


# ---------------------------------------------------------------------------
# Pure-JAX reference (lax conv + batch-stat BN); conv inputs in bf16 like the
# kernel (f32 accumulation), so the comparison isolates kernel correctness.
# ---------------------------------------------------------------------------
def _reference_forward(x_ncdhw, blk, compute_dtype=jnp.bfloat16):
    x = x_ncdhw.astype(jnp.float32)

    def conv(z, w):
        return jax.lax.conv_general_dilated(
            z.astype(compute_dtype), w.astype(compute_dtype),
            window_strides=(1, 1, 1),
            padding=((1, 1), (1, 1), (1, 1)),
            dimension_numbers=("NCDHW", "DHWIO", "NCDHW"),
            preferred_element_type=jnp.float32)

    def bn(z, g, b):
        mean = z.mean(axis=(0, 2, 3, 4), keepdims=True)
        var = ((z - mean) ** 2).mean(axis=(0, 2, 3, 4), keepdims=True)
        return (z - mean) * jax.lax.rsqrt(var + EPS) * g.reshape(1, -1, 1, 1, 1) \
            + b.reshape(1, -1, 1, 1, 1)

    out = jnp.maximum(bn(conv(x, blk.w1), blk.g1, blk.b1), 0.0)
    out = bn(conv(out, blk.w2), blk.g2, blk.b2) + x
    return jnp.maximum(out, 0.0)


if __name__ == "__main__":
    key = jax.random.PRNGKey(0)
    kx, kp = jax.random.split(key)

    N, C, D, H, W = 2, 4, 8, 8, 8  # small NCDHW input; in_planes == planes == 4
    x = jax.random.normal(kx, (N, C, D, H, W), jnp.float32)

    block = ResNetBlockPallas(in_planes=C, planes=C, key=kp)

    out = jax.block_until_ready(jax.jit(block.__call__)(x))
    ref = jax.block_until_ready(_reference_forward(x, block))

    np.testing.assert_allclose(np.asarray(out), np.asarray(ref),
                               atol=5e-3, rtol=5e-3)
    assert out.shape == (N, C, D, H, W)
    print("KERNEL_OK")
</pallas_src>

<mosaic_0001>
module attributes {stable_mosaic.version = 11 : i64} {
  func.func @_conv_stats_kernel(%arg0: i32, %arg1: memref<27x4x8xbf16, #tpu.memory_space<vmem>>, %arg2: memref<8x1280xbf16, #tpu.memory_space<vmem>>, %arg3: memref<1x256xi32, #tpu.memory_space<vmem>>, %arg4: memref<1x4x2xf32, #tpu.memory_space<vmem>>, %arg5: memref<8x512xbf16, #tpu.memory_space<vmem>>, %arg6: memref<!tpu.dma_semaphore, #tpu.memory_space<semaphore_mem>>) attributes {dimension_semantics = [#tpu.dimension_semantics<parallel>], iteration_bounds = array<i64: 4>, scalar_prefetch = 0 : i64, scratch_operands = 2 : i64, tpu.core_type = #tpu.core_type<tc>, window_params = [{pipeline_mode = #tpu.pipeline_mode<synchronous>, transform_indices = @transform_0, window_bounds = array<i64: 27, 4, 8>}, {pipeline_mode = #tpu.pipeline_mode<synchronous>, transform_indices = @transform_1, window_bounds = array<i64: 8, 1280>}, {transform_indices = @transform_2, window_bounds = array<i64: 1, 256>}, {transform_indices = @transform_3, window_bounds = array<i64: 1, 4, 2>}]} {
    %c256_i32 = arith.constant 256 : i32
    %0 = arith.muli %arg0, %c256_i32 : i32
    %c0_i32 = arith.constant 0 : i32
    %1 = tpu.memref_slice %arg2[%c0_i32, %0] : memref<8x1280xbf16, #tpu.memory_space<vmem>> -> memref<8x512xbf16, #tpu.memory_space<vmem>>
    tpu.enqueue_dma source(%1 : memref<8x512xbf16, #tpu.memory_space<vmem>>) target(%arg5 : memref<8x512xbf16, #tpu.memory_space<vmem>>) target_semaphore(%arg6 : memref<!tpu.dma_semaphore, #tpu.memory_space<semaphore_mem>>)
    %c0_i32_0 = arith.constant 0 : i32
    %2 = tpu.memref_slice %arg2[%c0_i32_0, %0] : memref<8x1280xbf16, #tpu.memory_space<vmem>> -> memref<8x512xbf16, #tpu.memory_space<vmem>>
    tpu.wait_dma2 semaphore(%arg6 : memref<!tpu.dma_semaphore, #tpu.memory_space<semaphore_mem>>) src(%2 : memref<8x512xbf16, #tpu.memory_space<vmem>>) dst(%arg5 : memref<8x512xbf16, #tpu.memory_space<vmem>>)
    %c0 = arith.constant 0 : index
    %c0_1 = arith.constant 0 : index
    %3 = vector.load %arg3[%c0, %c0_1] : memref<1x256xi32, #tpu.memory_space<vmem>>, vector<1x256xi32>
    %cst = arith.constant 0.000000e+00 : f32
    %4 = vector.broadcast %cst : f32 to vector<4x256xf32>
    %c43_i32 = arith.constant 43 : i32
    %5 = vector.broadcast %c43_i32 : i32 to vector<1x256xi32>
    %6 = arith.andi %3, %5 : vector<1x256xi32>
    %c43_i32_2 = arith.constant 43 : i32
    %7 = vector.broadcast %c43_i32_2 : i32 to vector<1x256xi32>
    %8 = arith.cmpi eq, %6, %7 : vector<1x256xi32>
    %c0_3 = arith.constant 0 : index
    %c55 = arith.constant 55 : index
    %9 = vector.load %arg5[%c0_3, %c55] : memref<8x512xbf16, #tpu.memory_space<vmem>>, vector<8x256xbf16>
    %cst_4 = arith.constant 0.000000e+00 : bf16
    %10 = vector.broadcast %cst_4 : bf16 to vector<8x256xbf16>
    %11 = vector.shape_cast %8 : vector<1x256xi1> to vector<1x256xi1>
    %12 = vector.broadcast %11 : vector<1x256xi1> to vector<8x256xi1>
    %13 = arith.select %12, %9, %10 : vector<8x256xi1>, vector<8x256xbf16>
    %c0_5 = arith.constant 0 : index
    %c0_6 = arith.constant 0 : index
    %c0_7 = arith.constant 0 : index
    %14 = vector.load %arg1[%c0_5, %c0_6, %c0_7] : memref<27x4x8xbf16, #tpu.memory_space<vmem>>, vector<1x4x8xbf16>
    %15 = vector.shape_cast %14 : vector<1x4x8xbf16> to vector<4x8xbf16>
    %cst_8 = arith.constant dense<0.000000e+00> : vector<4x256xf32>
    %16 = tpu.matmul %15, %13, %cst_8 {dimension_numbers = #tpu.dot_dimension_numbers<[1], [0], [0], [1], [0, 0, 1, 1], [], []>} : vector<4x8xbf16>, vector<8x256xbf16>, vector<4x256xf32> -> vector<4x256xf32>
    %17 = arith.addf %4, %16 : vector<4x256xf32>
    %c11_i32 = arith.constant 11 : i32
    %18 = vector.broadcast %c11_i32 : i32 to vector<1x256xi32>
    %19 = arith.andi %3, %18 : vector<1x256xi32>
    %c11_i32_9 = arith.constant 11 : i32
    %20 = vector.broadcast %c11_i32_9 : i32 to vector<1x256xi32>
    %21 = arith.cmpi eq, %19, %20 : vector<1x256xi32>
    %c0_10 = arith.constant 0 : index
    %c56 = arith.constant 56 : index
    %22 = vector.load %arg5[%c0_10, %c56] : memref<8x512xbf16, #tpu.memory_space<vmem>>, vector<8x256xbf16>
    %cst_11 = arith.constant 0.000000e+00 : bf16
    %23 = vector.broadcast %cst_11 : bf16 to vector<8x256xbf16>
    %24 = vector.shape_cast %21 : vector<1x256xi1> to vector<1x256xi1>
    %25 = vector.broadcast %24 : vector<1x256xi1> to vector<8x256xi1>
    %26 = arith.select %25, %22, %23 : vector<8x256xi1>, vector<8x256xbf16>
    %c1 = arith.constant 1 : index
    %c0_12 = arith.constant 0 : index
    %c0_13 = arith.constant 0 : index
    %27 = vector.load %arg1[%c1, %c0_12, %c0_13] : memref<27x4x8xbf16, #tpu.memory_space<vmem>>, vector<1x4x8xbf16>
    %28 = vector.shape_cast %27 : vector<1x4x8xbf16> to vector<4x8xbf16>
    %cst_14 = arith.constant dense<0.000000e+00> : vector<4x256xf32>
    %29 = tpu.matmul %28, %26, %cst_14 {dimension_numbers = #tpu.dot_dimension_numbers<[1], [0], [0], [1], [0, 0, 1, 1], [], []>} : vector<4x8xbf16>, vector<8x256xbf16>, vector<4x256xf32> -> vector<4x256xf32>
    %30 = arith.addf %17, %29 : vector<4x256xf32>
    %c75_i32 = arith.constant 75 : i32
    %31 = vector.broadcast %c75_i32 : i32 to vector<1x256xi32>
    %32 = arith.andi %3, %31 : vector<1x256xi32>
    %c75_i32_15 = arith.constant 75 : i32
    %33 = vector.broadcast %c75_i32_15 : i32 to vector<1x256xi32>
    %34 = arith.cmpi eq, %32, %33 : vector<1x256xi32>
    %c0_16 = arith.constant 0 : index
    %c57 = arith.constant 57 : index
    %35 = vector.load %arg5[%c0_16, %c57] : memref<8x512xbf16, #tpu.memory_space<vmem>>, vector<8x256xbf16>
    %cst_17 = arith.constant 0.000000e+00 : bf16
    %36 = vector.broadcast %cst_17 : bf16 to vector<8x256xbf16>
    %37 = vector.shape_cast %34 : vector<1x256xi1> to vector<1x256xi1>
    %38 = vector.broadcast %37 : vector<1x256xi1> to vector<8x256xi1>
    %39 = arith.select %38, %35, %36 : vector<8x256xi1>, vector<8x256xbf16>
    %c2 = arith.constant 2 : index
    %c0_18 = arith.constant 0 : index
    %c0_19 = arith.constant 0 : index
    %40 = vector.load %arg1[%c2, %c0_18, %c0_19] : memref<27x4x8xbf16, #tpu.memory_space<vmem>>, vector<1x4x8xbf16>
    %41 = vector.shape_cast %40 : vector<1x4x8xbf16> to vector<4x8xbf16>
    %cst_20 = arith.constant dense<0.000000e+00> : vector<4x256xf32>
    %42 = tpu.matmul %41, %39, %cst_20 {dimension_numbers = #tpu.dot_dimension_numbers<[1], [0], [0], [1], [0, 0, 1, 1], [], []>} : vector<4x8xbf16>, vector<8x256xbf16>, vector<4x256xf32> -> vector<4x256xf32>
    %43 = arith.addf %30, %42 : vector<4x256xf32>
    %c35_i32 = arith.constant 35 : i32
    %44 = vector.broadcast %c35_i32 : i32 to vector<1x256xi32>
    %45 = arith.andi %3, %44 : vector<1x256xi32>
    %c35_i32_21 = arith.constant 35 : i32
    %46 = vector.broadcast %c35_i32_21 : i32 to vector<1x256xi32>
    %47 = arith.cmpi eq, %45, %46 : vector<1x256xi32>
    %c0_22 = arith.constant 0 : index
    %c63 = arith.constant 63 : index
    %48 = vector.load %arg5[%c0_22, %c63] : memref<8x512xbf16, #tpu.memory_space<vmem>>, vector<8x256xbf16>
    %cst_23 = arith.constant 0.000000e+00 : bf16
    %49 = vector.broadcast %cst_23 : bf16 to vector<8x256xbf16>
    %50 = vector.shape_cast %47 : vector<1x256xi1> to vector<1x256xi1>
    %51 = vector.broadcast %50 : vector<1x256xi1> to vector<8x256xi1>
    %52 = arith.select %51, %48, %49 : vector<8x256xi1>, vector<8x256xbf16>
    %c3 = arith.constant 3 : index
    %c0_24 = arith.constant 0 : index
    %c0_25 = arith.constant 0 : index
    %53 = vector.load %arg1[%c3, %c0_24, %c0_25] : memref<27x4x8xbf16, #tpu.memory_space<vmem>>, vector<1x4x8xbf16>
    %54 = vector.shape_cast %53 : vector<1x4x8xbf16> to vector<4x8xbf16>
    %cst_26 = arith.constant dense<0.000000e+00> : vector<4x256xf32>
    %55 = tpu.matmul %54, %52, %cst_26 {dimension_numbers = #tpu.dot_dimension_numbers<[1], [0], [0], [1], [0, 0, 1, 1], [], []>} : vector<4x8xbf16>, vector<8x256xbf16>, vector<4x256xf32> -> vector<4x256xf32>
    %56 = arith.addf %43, %55 : vector<4x256xf32>
    %c3_i32 = arith.constant 3 : i32
    %57 = vector.broadcast %c3_i32 : i32 to vector<1x256xi32>
    %58 = arith.andi %3, %57 : vector<1x256xi32>
    %c3_i32_27 = arith.constant 3 : i32
    %59 = vector.broadcast %c3_i32_27 : i32 to vector<1x256xi32>
    %60 = arith.cmpi eq, %58, %59 : vector<1x256xi32>
    %c0_28 = arith.constant 0 : index
    %c64 = arith.constant 64 : index
    %61 = vector.load %arg5[%c0_28, %c64] : memref<8x512xbf16, #tpu.memory_space<vmem>>, vector<8x256xbf16>
    %cst_29 = arith.constant 0.000000e+00 : bf16
    %62 = vector.broadcast %cst_29 : bf16 to vector<8x256xbf16>
    %63 = vector.shape_cast %60 : vector<1x256xi1> to vector<1x256xi1>
    %64 = vector.broadcast %63 : vector<1x256xi1> to vector<8x256xi1>
    %65 = arith.select %64, %61, %62 : vector<8x256xi1>, vector<8x256xbf16>
    %c4 = arith.constant 4 : index
    %c0_30 = arith.constant 0 : index
    %c0_31 = arith.constant 0 : index
    %66 = vector.load %arg1[%c4, %c0_30, %c0_31] : memref<27x4x8xbf16, #tpu.memory_space<vmem>>, vector<1x4x8xbf16>
    %67 = vector.shape_cast %66 : vector<1x4x8xbf16> to vector<4x8xbf16>
    %cst_32 = arith.constant dense<0.000000e+00> : vector<4x256xf32>
    %68 = tpu.matmul %67, %65, %cst_32 {dimension_numbers = #tpu.dot_dimension_numbers<[1], [0], [0], [1], [0, 0, 1, 1], [], []>} : vector<4x8xbf16>, vector<8x256xbf16>, vector<4x256xf32> -> vector<4x256xf32>
    %69 = arith.addf %56, %68 : vector<4x256xf32>
    %c67_i32 = arith.constant 67 : i32
    %70 = vector.broadcast %c67_i32 : i32 to vector<1x256xi32>
    %71 = arith.andi %3, %70 : vector<1x256xi32>
    %c67_i32_33 = arith.constant 67 : i32
    %72 = vector.broadcast %c67_i32_33 : i32 to vector<1x256xi32>
    %73 = arith.cmpi eq, %71, %72 : vector<1x256xi32>
    %c0_34 = arith.constant 0 : index
    %c65 = arith.constant 65 : index
    %74 = vector.load %arg5[%c0_34, %c65] : memref<8x512xbf16, #tpu.memory_space<vmem>>, vector<8x256xbf16>
    %cst_35 = arith.constant 0.000000e+00 : bf16
    %75 = vector.broadcast %cst_35 : bf16 to vector<8x256xbf16>
    %76 = vector.shape_cast %73 : vector<1x256xi1> to vector<1x256xi1>
    %77 = vector.broadcast %76 : vector<1x256xi1> to vector<8x256xi1>
    %78 = arith.select %77, %74, %75 : vector<8x256xi1>, vector<8x256xbf16>
    %c5 = arith.constant 5 : index
    %c0_36 = arith.constant 0 : index
    %c0_37 = arith.constant 0 : index
    %79 = vector.load %arg1[%c5, %c0_36, %c0_37] : memref<27x4x8xbf16, #tpu.memory_space<vmem>>, vector<1x4x8xbf16>
    %80 = vector.shape_cast %79 : vector<1x4x8xbf16> to vector<4x8xbf16>
    %cst_38 = arith.constant dense<0.000000e+00> : vector<4x256xf32>
    %81 = tpu.matmul %80, %78, %cst_38 {dimension_numbers = #tpu.dot_dimension_numbers<[1], [0], [0], [1], [0, 0, 1, 1], [], []>} : vector<4x8xbf16>, vector<8x256xbf16>, vector<4x256xf32> -> vector<4x256xf32>
    %82 = arith.addf %69, %81 : vector<4x256xf32>
    %c51_i32 = arith.constant 51 : i32
    %83 = vector.broadcast %c51_i32 : i32 to vector<1x256xi32>
    %84 = arith.andi %3, %83 : vector<1x256xi32>
    %c51_i32_39 = arith.constant 51 : i32
    %85 = vector.broadcast %c51_i32_39 : i32 to vector<1x256xi32>
    %86 = arith.cmpi eq, %84, %85 : vector<1x256xi32>
    %c0_40 = arith.constant 0 : index
    %c71 = arith.constant 71 : index
    %87 = vector.load %arg5[%c0_40, %c71] : memref<8x512xbf16, #tpu.memory_space<vmem>>, vector<8x256xbf16>
    %cst_41 = arith.constant 0.000000e+00 : bf16
    %88 = vector.broadcast %cst_41 : bf16 to vector<8x256xbf16>
    %89 = vector.shape_cast %86 : vector<1x256xi1> to vector<1x256xi1>
    %90 = vector.broadcast %89 : vector<1x256xi1> to vector<8x256xi1>
    %91 = arith.select %90, %87, %88 : vector<8x256xi1>, vector<8x256xbf16>
    %c6 = arith.constant 6 : index
    %c0_42 = arith.constant 0 : index
    %c0_43 = arith.constant 0 : index
    %92 = vector.load %arg1[%c6, %c0_42, %c0_43] : memref<27x4x8xbf16, #tpu.memory_space<vmem>>, vector<1x4x8xbf16>
    %93 = vector.shape_cast %92 : vector<1x4x8xbf16> to vector<4x8xbf16>
    %cst_44 = arith.constant dense<0.000000e+00> : vector<4x256xf32>
    %94 = tpu.matmul %93, %91, %cst_44 {dimension_numbers = #tpu.dot_dimension_numbers<[1], [0], [0], [1], [0, 0, 1, 1], [], []>} : vector<4x8xbf16>, vector<8x256xbf16>, vector<4x256xf32> -> vector<4x256xf32>
    %95 = arith.addf %82, %94 : vector<4x256xf32>
    %c19_i32 = arith.constant 19 : i32
    %96 = vector.broadcast %c19_i32 : i32 to vector<1x256xi32>
    %97 = arith.andi %3, %96 : vector<1x256xi32>
    %c19_i32_45 = arith.constant 19 : i32
    %98 = vector.broadcast %c19_i32_45 : i32 to vector<1x256xi32>
    %99 = arith.cmpi eq, %97, %98 : vector<1x256xi32>
    %c0_46 = arith.constant 0 : index
    %c72 = arith.constant 72 : index
    %100 = vector.load %arg5[%c0_46, %c72] : memref<8x512xbf16, #tpu.memory_space<vmem>>, vector<8x256xbf16>
    %cst_47 = arith.constant 0.000000e+00 : bf16
    %101 = vector.broadcast %cst_47 : bf16 to vector<8x256xbf16>
    %102 = vector.shape_cast %99 : vector<1x256xi1> to vector<1x256xi1>
    %103 = vector.broadcast %102 : vector<1x256xi1> to vector<8x256xi1>
    %104 = arith.select %103, %100, %101 : vector<8x256xi1>, vector<8x256xbf16>
    %c7 = arith.constant 7 : index
    %c0_48 = arith.constant 0 : index
    %c0_49 = arith.constant 0 : index
    %105 = vector.load %arg1[%c7, %c0_48, %c0_49] : memref<27x4x8xbf16, #tpu.memory_space<vmem>>, vector<1x4x8xbf16>
    %106 = vector.shape_cast %105 : vector<1x4x8xbf16> to vector<4x8xbf16>
    %cst_50 = arith.constant dense<0.000000e+00> : vector<4x256xf32>
    %107 = tpu.matmul %106, %104, %cst_50 {dimension_numbers = #tpu.dot_dimension_numbers<[1], [0], [0], [1], [0, 0, 1, 1], [], []>} : vector<4x8xbf16>, vector<8x256xbf16>, vector<4x256xf32> -> vector<4x256xf32>
    %108 = arith.addf %95, %107 : vector<4x256xf32>
    %c83_i32 = arith.constant 83 : i32
    %109 = vector.broadcast %c83_i32 : i32 to vector<1x256xi32>
    %110 = arith.andi %3, %109 : vector<1x256xi32>
    %c83_i32_51 = arith.constant 83 : i32
    %111 = vector.broadcast %c83_i32_51 : i32 to vector<1x256xi32>
    %112 = arith.cmpi eq, %110, %111 : vector<1x256xi32>
    %c0_52 = arith.constant 0 : index
    %c73 = arith.constant 73 : index
    %113 = vector.load %arg5[%c0_52, %c73] : memref<8x512xbf16, #tpu.memory_space<vmem>>, vector<8x256xbf16>
    %cst_53 = arith.constant 0.000000e+00 : bf16
    %114 = vector.broadcast %cst_53 : bf16 to vector<8x256xbf16>
    %115 = vector.shape_cast %112 : vector<1x256xi1> to vector<1x256xi1>
    %116 = vector.broadcast %115 : vector<1x256xi1> to vector<8x256xi1>
    %117 = arith.select %116, %113, %114 : vector<8x256xi1>, vector<8x256xbf16>
    %c8 = arith.constant 8 : index
    %c0_54 = arith.constant 0 : index
    %c0_55 = arith.constant 0 : index
    %118 = vector.load %arg1[%c8, %c0_54, %c0_55] : memref<27x4x8xbf16, #tpu.memory_space<vmem>>, vector<1x4x8xbf16>
    %119 = vector.shape_cast %118 : vector<1x4x8xbf16> to vector<4x8xbf16>
    %cst_56 = arith.constant dense<0.000000e+00> : vector<4x256xf32>
    %120 = tpu.matmul %119, %117, %cst_56 {dimension_numbers = #tpu.dot_dimension_numbers<[1], [0], [0], [1], [0, 0, 1, 1], [], []>} : vector<4x8xbf16>, vector<8x256xbf16>, vector<4x256xf32> -> vector<4x256xf32>
    %121 = arith.addf %108, %120 : vector<4x256xf32>
    %c41_i32 = arith.constant 41 : i32
    %122 = vector.broadcast %c41_i32 : i32 to vector<1x256xi32>
    %123 = arith.andi %3, %122 : vector<1x256xi32>
    %c41_i32_57 = arith.constant 41 : i32
    %124 = vector.broadcast %c41_i32_57 : i32 to vector<1x256xi32>
    %125 = arith.cmpi eq, %123, %124 : vector<1x256xi32>
    %c0_58 = arith.constant 0 : index
    %c119 = arith.constant 119 : index
    %126 = vector.load %arg5[%c0_58, %c119] : memref<8x512xbf16, #tpu.memory_space<vmem>>, vector<8x256xbf16>
    %cst_59 = arith.constant 0.000000e+00 : bf16
    %127 = vector.broadcast %cst_59 : bf16 to vector<8x256xbf16>
    %128 = vector.shape_cast %125 : vector<1x256xi1> to vector<1x256xi1>
    %129 = vector.broadcast %128 : vector<1x256xi1> to vector<8x256xi1>
    %130 = arith.select %129, %126, %127 : vector<8x256xi1>, vector<8x256xbf16>
    %c9 = arith.constant 9 : index
    %c0_60 = arith.constant 0 : index
    %c0_61 = arith.constant 0 : index
    %131 = vector.load %arg1[%c9, %c0_60, %c0_61] : memref<27x4x8xbf16, #tpu.memory_space<vmem>>, vector<1x4x8xbf16>
    %132 = vector.shape_cast %131 : vector<1x4x8xbf16> to vector<4x8xbf16>
    %cst_62 = arith.constant dense<0.000000e+00> : vector<4x256xf32>
    %133 = tpu.matmul %132, %130, %cst_62 {dimension_numbers = #tpu.dot_dimension_numbers<[1], [0], [0], [1], [0, 0, 1, 1], [], []>} : vector<4x8xbf16>, vector<8x256xbf16>, vector<4x256xf32> -> vector<4x256xf32>
    %134 = arith.addf %121, %133 : vector<4x256xf32>
    %c9_i32 = arith.constant 9 : i32
    %135 = vector.broadcast %c9_i32 : i32 to vector<1x256xi32>
    %136 = arith.andi %3, %135 : vector<1x256xi32>
    %c9_i32_63 = arith.constant 9 : i32
    %137 = vector.broadcast %c9_i32_63 : i32 to vector<1x256xi32>
    %138 = arith.cmpi eq, %136, %137 : vector<1x256xi32>
    %c0_64 = arith.constant 0 : index
    %c120 = arith.constant 120 : index
    %139 = vector.load %arg5[%c0_64, %c120] : memref<8x512xbf16, #tpu.memory_space<vmem>>, vector<8x256xbf16>
    %cst_65 = arith.constant 0.000000e+00 : bf16
    %140 = vector.broadcast %cst_65 : bf16 to vector<8x256xbf16>
    %141 = vector.shape_cast %138 : vector<1x256xi1> to vector<1x256xi1>
    %142 = vector.broadcast %141 : vector<1x256xi1> to vector<8x256xi1>
    %143 = arith.select %142, %139, %140 : vector<8x256xi1>, vector<8x256xbf16>
    %c10 = arith.constant 10 : index
    %c0_66 = arith.constant 0 : index
    %c0_67 = arith.constant 0 : index
    %144 = vector.load %arg1[%c10, %c0_66, %c0_67] : memref<27x4x8xbf16, #tpu.memory_space<vmem>>, vector<1x4x8xbf16>
    %145 = vector.shape_cast %144 : vector<1x4x8xbf16> to vector<4x8xbf16>
    %cst_68 = arith.constant dense<0.000000e+00> : vector<4x256xf32>
    %146 = tpu.matmul %145, %143, %cst_68 {dimension_numbers = #tpu.dot_dimension_numbers<[1], [0], [0], [1], [0, 0, 1, 1], [], []>} : vector<4x8xbf16>, vector<8x256xbf16>, vector<4x256xf32> -> vector<4x256xf32>
    %147 = arith.addf %134, %146 : vector<4x256xf32>
    %c73_i32 = arith.constant 73 : i32
    %148 = vector.broadcast %c73_i32 : i32 to vector<1x256xi32>
    %149 = arith.andi %3, %148 : vector<1x256xi32>
    %c73_i32_69 = arith.constant 73 : i32
    %150 = vector.broadcast %c73_i32_69 : i32 to vector<1x256xi32>
    %151 = arith.cmpi eq, %149, %150 : vector<1x256xi32>
    %c0_70 = arith.constant 0 : index
    %c121 = arith.constant 121 : index
    %152 = vector.load %arg5[%c0_70, %c121] : memref<8x512xbf16, #tpu.memory_space<vmem>>, vector<8x256xbf16>
    %cst_71 = arith.constant 0.000000e+00 : bf16
    %153 = vector.broadcast %cst_71 : bf16 to vector<8x256xbf16>
    %154 = vector.shape_cast %151 : vector<1x256xi1> to vector<1x256xi1>
    %155 = vector.broadcast %154 : vector<1x256xi1> to vector<8x256xi1>
    %156 = arith.select %155, %152, %153 : vector<8x256xi1>, vector<8x256xbf16>
    %c11 = arith.constant 11 : index
    %c0_72 = arith.constant 0 : index
    %c0_73 = arith.constant 0 : index
    %157 = vector.load %arg1[%c11, %c0_72, %c0_73] : memref<27x4x8xbf16, #tpu.memory_space<vmem>>, vector<1x4x8xbf16>
    %158 = vector.shape_cast %157 : vector<1x4x8xbf16> to vector<4x8xbf16>
    %cst_74 = arith.constant dense<0.000000e+00> : vector<4x256xf32>
    %159 = tpu.matmul %158, %156, %cst_74 {dimension_numbers = #tpu.dot_dimension_numbers<[1], [0], [0], [1], [0, 0, 1, 1], [], []>} : vector<4x8xbf16>, vector<8x256xbf16>, vector<4x256xf32> -> vector<4x256xf32>
    %160 = arith.addf %147, %159 : vector<4x256xf32>
    %c33_i32 = arith.constant 33 : i32
    %161 = vector.broadcast %c33_i32 : i32 to vector<1x256xi32>
    %162 = arith.andi %3, %161 : vector<1x256xi32>
    %c33_i32_75 = arith.constant 33 : i32
    %163 = vector.broadcast %c33_i32_75 : i32 to vector<1x256xi32>
    %164 = arith.cmpi eq, %162, %163 : vector<1x256xi32>
    %c0_76 = arith.constant 0 : index
    %c127 = arith.constant 127 : index
    %165 = vector.load %arg5[%c0_76, %c127] : memref<8x512xbf16, #tpu.memory_space<vmem>>, vector<8x256xbf16>
    %cst_77 = arith.constant 0.000000e+00 : bf16
    %166 = vector.broadcast %cst_77 : bf16 to vector<8x256xbf16>
    %167 = vector.shape_cast %164 : vector<1x256xi1> to vector<1x256xi1>
    %168 = vector.broadcast %167 : vector<1x256xi1> to vector<8x256xi1>
    %169 = arith.select %168, %165, %166 : vector<8x256xi1>, vector<8x256xbf16>
    %c12 = arith.constant 12 : index
    %c0_78 = arith.constant 0 : index
    %c0_79 = arith.constant 0 : index
    %170 = vector.load %arg1[%c12, %c0_78, %c0_79] : memref<27x4x8xbf16, #tpu.memory_space<vmem>>, vector<1x4x8xbf16>
    %171 = vector.shape_cast %170 : vector<1x4x8xbf16> to vector<4x8xbf16>
    %cst_80 = arith.constant dense<0.000000e+00> : vector<4x256xf32>
    %172 = tpu.matmul %171, %169, %cst_80 {dimension_numbers = #tpu.dot_dimension_numbers<[1], [0], [0], [1], [0, 0, 1, 1], [], []>} : vector<4x8xbf16>, vector<8x256xbf16>, vector<4x256xf32> -> vector<4x256xf32>
    %173 = arith.addf %160, %172 : vector<4x256xf32>
    %c1_i32 = arith.constant 1 : i32
    %174 = vector.broadcast %c1_i32 : i32 to vector<1x256xi32>
    %175 = arith.andi %3, %174 : vector<1x256xi32>
    %c1_i32_81 = arith.constant 1 : i32
    %176 = vector.broadcast %c1_i32_81 : i32 to vector<1x256xi32>
    %177 = arith.cmpi eq, %175, %176 : vector<1x256xi32>
    %c0_82 = arith.constant 0 : index
    %c128 = arith.constant 128 : index
    %178 = vector.load %arg5[%c0_82, %c128] : memref<8x512xbf16, #tpu.memory_space<vmem>>, vector<8x256xbf16>
    %cst_83 = arith.constant 0.000000e+00 : bf16
    %179 = vector.broadcast %cst_83 : bf16 to vector<8x256xbf16>
    %180 = vector.shape_cast %177 : vector<1x256xi1> to vector<1x256xi1>
    %181 = vector.broadcast %180 : vector<1x256xi1> to vector<8x256xi1>
    %182 = arith.select %181, %178, %179 : vector<8x256xi1>, vector<8x256xbf16>
    %c13 = arith.constant 13 : index
    %c0_84 = arith.constant 0 : index
    %c0_85 = arith.constant 0 : index
    %183 = vector.load %arg1[%c13, %c0_84, %c0_85] : memref<27x4x8xbf16, #tpu.memory_space<vmem>>, vector<1x4x8xbf16>
    %184 = vector.shape_cast %183 : vector<1x4x8xbf16> to vector<4x8xbf16>
    %cst_86 = arith.constant dense<0.000000e+00> : vector<4x256xf32>
    %185 = tpu.matmul %184, %182, %cst_86 {dimension_numbers = #tpu.dot_dimension_numbers<[1], [0], [0], [1], [0, 0, 1, 1], [], []>} : vector<4x8xbf16>, vector<8x256xbf16>, vector<4x256xf32> -> vector<4x256xf32>
    %186 = arith.addf %173, %185 : vector<4x256xf32>
    %c65_i32 = arith.constant 65 : i32
    %187 = vector.broadcast %c65_i32 : i32 to vector<1x256xi32>
    %188 = arith.andi %3, %187 : vector<1x256xi32>
    %c65_i32_87 = arith.constant 65 : i32
    %189 = vector.broadcast %c65_i32_87 : i32 to vector<1x256xi32>
    %190 = arith.cmpi eq, %188, %189 : vector<1x256xi32>
    %c0_88 = arith.constant 0 : index
    %c129 = arith.constant 129 : index
    %191 = vector.load %arg5[%c0_88, %c129] : memref<8x512xbf16, #tpu.memory_space<vmem>>, vector<8x256xbf16>
    %cst_89 = arith.constant 0.000000e+00 : bf16
    %192 = vector.broadcast %cst_89 : bf16 to vector<8x256xbf16>
    %193 = vector.shape_cast %190 : vector<1x256xi1> to vector<1x256xi1>
    %194 = vector.broadcast %193 : vector<1x256xi1> to vector<8x256xi1>
    %195 = arith.select %194, %191, %192 : vector<8x256xi1>, vector<8x256xbf16>
    %c14 = arith.constant 14 : index
    %c0_90 = arith.constant 0 : index
    %c0_91 = arith.constant 0 : index
    %196 = vector.load %arg1[%c14, %c0_90, %c0_91] : memref<27x4x8xbf16, #tpu.memory_space<vmem>>, vector<1x4x8xbf16>
    %197 = vector.shape_cast %196 : vector<1x4x8xbf16> to vector<4x8xbf16>
    %cst_92 = arith.constant dense<0.000000e+00> : vector<4x256xf32>
    %198 = tpu.matmul %197, %195, %cst_92 {dimension_numbers = #tpu.dot_dimension_numbers<[1], [0], [0], [1], [0, 0, 1, 1], [], []>} : vector<4x8xbf16>, vector<8x256xbf16>, vector<4x256xf32> -> vector<4x256xf32>
    %199 = arith.addf %186, %198 : vector<4x256xf32>
    %c49_i32 = arith.constant 49 : i32
    %200 = vector.broadcast %c49_i32 : i32 to vector<1x256xi32>
    %201 = arith.andi %3, %200 : vector<1x256xi32>
    %c49_i32_93 = arith.constant 49 : i32
    %202 = vector.broadcast %c49_i32_93 : i32 to vector<1x256xi32>
    %203 = arith.cmpi eq, %201, %202 : vector<1x256xi32>
    %c0_94 = arith.constant 0 : index
    %c135 = arith.constant 135 : index
    %204 = vector.load %arg5[%c0_94, %c135] : memref<8x512xbf16, #tpu.memory_space<vmem>>, vector<8x256xbf16>
    %cst_95 = arith.constant 0.000000e+00 : bf16
    %205 = vector.broadcast %cst_95 : bf16 to vector<8x256xbf16>
    %206 = vector.shape_cast %203 : vector<1x256xi1> to vector<1x256xi1>
    %207 = vector.broadcast %206 : vector<1x256xi1> to vector<8x256xi1>
    %208 = arith.select %207, %204, %205 : vector<8x256xi1>, vector<8x256xbf16>
    %c15 = arith.constant 15 : index
    %c0_96 = arith.constant 0 : index
    %c0_97 = arith.constant 0 : index
    %209 = vector.load %arg1[%c15, %c0_96, %c0_97] : memref<27x4x8xbf16, #tpu.memory_space<vmem>>, vector<1x4x8xbf16>
    %210 = vector.shape_cast %209 : vector<1x4x8xbf16> to vector<4x8xbf16>
    %cst_98 = arith.constant dense<0.000000e+00> : vector<4x256xf32>
    %211 = tpu.matmul %210, %208, %cst_98 {dimension_numbers = #tpu.dot_dimension_numbers<[1], [0], [0], [1], [0, 0, 1, 1], [], []>} : vector<4x8xbf16>, vector<8x256xbf16>, vector<4x256xf32> -> vector<4x256xf32>
    %212 = arith.addf %199, %211 : vector<4x256xf32>
    %c17_i32 = arith.constant 17 : i32
    %213 = vector.broadcast %c17_i32 : i32 to vector<1x256xi32>
    %214 = arith.andi %3, %213 : vector<1x256xi32>
    %c17_i32_99 = arith.constant 17 : i32
    %215 = vector.broadcast %c17_i32_99 : i32 to vector<1x256xi32>
    %216 = arith.cmpi eq, %214, %215 : vector<1x256xi32>
    %c0_100 = arith.constant 0 : index
    %c136 = arith.constant 136 : index
    %217 = vector.load %arg5[%c0_100, %c136] : memref<8x512xbf16, #tpu.memory_space<vmem>>, vector<8x256xbf16>
    %cst_101 = arith.constant 0.000000e+00 : bf16
    %218 = vector.broadcast %cst_101 : bf16 to vector<8x256xbf16>
    %219 = vector.shape_cast %216 : vector<1x256xi1> to vector<1x256xi1>
    %220 = vector.broadcast %219 : vector<1x256xi1> to vector<8x256xi1>
    %221 = arith.select %220, %217, %218 : vector<8x256xi1>, vector<8x256xbf16>
    %c16 = arith.constant 16 : index
    %c0_102 = arith.constant 0 : index
    %c0_103 = arith.constant 0 : index
    %222 = vector.load %arg1[%c16, %c0_102, %c0_103] : memref<27x4x8xbf16, #tpu.memory_space<vmem>>, vector<1x4x8xbf16>
    %223 = vector.shape_cast %222 : vector<1x4x8xbf16> to vector<4x8xbf16>
    %cst_104 = arith.constant dense<0.000000e+00> : vector<4x256xf32>
    %224 = tpu.matmul %223, %221, %cst_104 {dimension_numbers = #tpu.dot_dimension_numbers<[1], [0], [0], [1], [0, 0, 1, 1], [], []>} : vector<4x8xbf16>, vector<8x256xbf16>, vector<4x256xf32> -> vector<4x256xf32>
    %225 = arith.addf %212, %224 : vector<4x256xf32>
    %c81_i32 = arith.constant 81 : i32
    %226 = vector.broadcast %c81_i32 : i32 to vector<1x256xi32>
    %227 = arith.andi %3, %226 : vector<1x256xi32>
    %c81_i32_105 = arith.constant 81 : i32
    %228 = vector.broadcast %c81_i32_105 : i32 to vector<1x256xi32>
    %229 = arith.cmpi eq, %227, %228 : vector<1x256xi32>
    %c0_106 = arith.constant 0 : index
    %c137 = arith.constant 137 : index
    %230 = vector.load %arg5[%c0_106, %c137] : memref<8x512xbf16, #tpu.memory_space<vmem>>, vector<8x256xbf16>
    %cst_107 = arith.constant 0.000000e+00 : bf16
    %231 = vector.broadcast %cst_107 : bf16 to vector<8x256xbf16>
    %232 = vector.shape_cast %229 : vector<1x256xi1> to vector<1x256xi1>
    %233 = vector.broadcast %232 : vector<1x256xi1> to vector<8x256xi1>
    %234 = arith.select %233, %230, %231 : vector<8x256xi1>, vector<8x256xbf16>
    %c17 = arith.constant 17 : index
    %c0_108 = arith.constant 0 : index
    %c0_109 = arith.constant 0 : index
    %235 = vector.load %arg1[%c17, %c0_108, %c0_109] : memref<27x4x8xbf16, #tpu.memory_space<vmem>>, vector<1x4x8xbf16>
    %236 = vector.shape_cast %235 : vector<1x4x8xbf16> to vector<4x8xbf16>
    %cst_110 = arith.constant dense<0.000000e+00> : vector<4x256xf32>
    %237 = tpu.matmul %236, %234, %cst_110 {dimension_numbers = #tpu.dot_dimension_numbers<[1], [0], [0], [1], [0, 0, 1, 1], [], []>} : vector<4x8xbf16>, vector<8x256xbf16>, vector<4x256xf32> -> vector<4x256xf32>
    %238 = arith.addf %225, %237 : vector<4x256xf32>
    %c45_i32 = arith.constant 45 : i32
    %239 = vector.broadcast %c45_i32 : i32 to vector<1x256xi32>
    %240 = arith.andi %3, %239 : vector<1x256xi32>
    %c45_i32_111 = arith.constant 45 : i32
    %241 = vector.broadcast %c45_i32_111 : i32 to vector<1x256xi32>
    %242 = arith.cmpi eq, %240, %241 : vector<1x256xi32>
    %c0_112 = arith.constant 0 : index
    %c183 = arith.constant 183 : index
    %243 = vector.load %arg5[%c0_112, %c183] : memref<8x512xbf16, #tpu.memory_space<vmem>>, vector<8x256xbf16>
    %cst_113 = arith.constant 0.000000e+00 : bf16
    %244 = vector.broadcast %cst_113 : bf16 to vector<8x256xbf16>
    %245 = vector.shape_cast %242 : vector<1x256xi1> to vector<1x256xi1>
    %246 = vector.broadcast %245 : vector<1x256xi1> to vector<8x256xi1>
    %247 = arith.select %246, %243, %244 : vector<8x256xi1>, vector<8x256xbf16>
    %c18 = arith.constant 18 : index
    %c0_114 = arith.constant 0 : index
    %c0_115 = arith.constant 0 : index
    %248 = vector.load %arg1[%c18, %c0_114, %c0_115] : memref<27x4x8xbf16, #tpu.memory_space<vmem>>, vector<1x4x8xbf16>
    %249 = vector.shape_cast %248 : vector<1x4x8xbf16> to vector<4x8xbf16>
    %cst_116 = arith.constant dense<0.000000e+00> : vector<4x256xf32>
    %250 = tpu.matmul %249, %247, %cst_116 {dimension_numbers = #tpu.dot_dimension_numbers<[1], [0], [0], [1], [0, 0, 1, 1], [], []>} : vector<4x8xbf16>, vector<8x256xbf16>, vector<4x256xf32> -> vector<4x256xf32>
    %251 = arith.addf %238, %250 : vector<4x256xf32>
    %c13_i32 = arith.constant 13 : i32
    %252 = vector.broadcast %c13_i32 : i32 to vector<1x256xi32>
    %253 = arith.andi %3, %252 : vector<1x256xi32>
    %c13_i32_117 = arith.constant 13 : i32
    %254 = vector.broadcast %c13_i32_117 : i32 to vector<1x256xi32>
    %255 = arith.cmpi eq, %253, %254 : vector<1x256xi32>
    %c0_118 = arith.constant 0 : index
    %c184 = arith.constant 184 : index
    %256 = vector.load %arg5[%c0_118, %c184] : memref<8x512xbf16, #tpu.memory_space<vmem>>, vector<8x256xbf16>
    %cst_119 = arith.constant 0.000000e+00 : bf16
    %257 = vector.broadcast %cst_119 : bf16 to vector<8x256xbf16>
    %258 = vector.shape_cast %255 : vector<1x256xi1> to vector<1x256xi1>
    %259 = vector.broadcast %258 : vector<1x256xi1> to vector<8x256xi1>
    %260 = arith.select %259, %256, %257 : vector<8x256xi1>, vector<8x256xbf16>
    %c19 = arith.constant 19 : index
    %c0_120 = arith.constant 0 : index
    %c0_121 = arith.constant 0 : index
    %261 = vector.load %arg1[%c19, %c0_120, %c0_121] : memref<27x4x8xbf16, #tpu.memory_space<vmem>>, vector<1x4x8xbf16>
    %262 = vector.shape_cast %261 : vector<1x4x8xbf16> to vector<4x8xbf16>
    %cst_122 = arith.constant dense<0.000000e+00> : vector<4x256xf32>
    %263 = tpu.matmul %262, %260, %cst_122 {dimension_numbers = #tpu.dot_dimension_numbers<[1], [0], [0], [1], [0, 0, 1, 1], [], []>} : vector<4x8xbf16>, vector<8x256xbf16>, vector<4x256xf32> -> vector<4x256xf32>
    %264 = arith.addf %251, %263 : vector<4x256xf32>
    %c77_i32 = arith.constant 77 : i32
    %265 = vector.broadcast %c77_i32 : i32 to vector<1x256xi32>
    %266 = arith.andi %3, %265 : vector<1x256xi32>
    %c77_i32_123 = arith.constant 77 : i32
    %267 = vector.broadcast %c77_i32_123 : i32 to vector<1x256xi32>
    %268 = arith.cmpi eq, %266, %267 : vector<1x256xi32>
    %c0_124 = arith.constant 0 : index
    %c185 = arith.constant 185 : index
    %269 = vector.load %arg5[%c0_124, %c185] : memref<8x512xbf16, #tpu.memory_space<vmem>>, vector<8x256xbf16>
    %cst_125 = arith.constant 0.000000e+00 : bf16
    %270 = vector.broadcast %cst_125 : bf16 to vector<8x256xbf16>
    %271 = vector.shape_cast %268 : vector<1x256xi1> to vector<1x256xi1>
    %272 = vector.broadcast %271 : vector<1x256xi1> to vector<8x256xi1>
    %273 = arith.select %272, %269, %270 : vector<8x256xi1>, vector<8x256xbf16>
    %c20 = arith.constant 20 : index
    %c0_126 = arith.constant 0 : index
    %c0_127 = arith.constant 0 : index
    %274 = vector.load %arg1[%c20, %c0_126, %c0_127] : memref<27x4x8xbf16, #tpu.memory_space<vmem>>, vector<1x4x8xbf16>
    %275 = vector.shape_cast %274 : vector<1x4x8xbf16> to vector<4x8xbf16>
    %cst_128 = arith.constant dense<0.000000e+00> : vector<4x256xf32>
    %276 = tpu.matmul %275, %273, %cst_128 {dimension_numbers = #tpu.dot_dimension_numbers<[1], [0], [0], [1], [0, 0, 1, 1], [], []>} : vector<4x8xbf16>, vector<8x256xbf16>, vector<4x256xf32> -> vector<4x256xf32>
    %277 = arith.addf %264, %276 : vector<4x256xf32>
    %c37_i32 = arith.constant 37 : i32
    %278 = vector.broadcast %c37_i32 : i32 to vector<1x256xi32>
    %279 = arith.andi %3, %278 : vector<1x256xi32>
    %c37_i32_129 = arith.constant 37 : i32
    %280 = vector.broadcast %c37_i32_129 : i32 to vector<1x256xi32>
    %281 = arith.cmpi eq, %279, %280 : vector<1x256xi32>
    %c0_130 = arith.constant 0 : index
    %c191 = arith.constant 191 : index
    %282 = vector.load %arg5[%c0_130, %c191] : memref<8x512xbf16, #tpu.memory_space<vmem>>, vector<8x256xbf16>
    %cst_131 = arith.constant 0.000000e+00 : bf16
    %283 = vector.broadcast %cst_131 : bf16 to vector<8x256xbf16>
    %284 = vector.shape_cast %281 : vector<1x256xi1> to vector<1x256xi1>
    %285 = vector.broadcast %284 : vector<1x256xi1> to vector<8x256xi1>
    %286 = arith.select %285, %282, %283 : vector<8x256xi1>, vector<8x256xbf16>
    %c21 = arith.constant 21 : index
    %c0_132 = arith.constant 0 : index
    %c0_133 = arith.constant 0 : index
    %287 = vector.load %arg1[%c21, %c0_132, %c0_133] : memref<27x4x8xbf16, #tpu.memory_space<vmem>>, vector<1x4x8xbf16>
    %288 = vector.shape_cast %287 : vector<1x4x8xbf16> to vector<4x8xbf16>
    %cst_134 = arith.constant dense<0.000000e+00> : vector<4x256xf32>
    %289 = tpu.matmul %288, %286, %cst_134 {dimension_numbers = #tpu.dot_dimension_numbers<[1], [0], [0], [1], [0, 0, 1, 1], [], []>} : vector<4x8xbf16>, vector<8x256xbf16>, vector<4x256xf32> -> vector<4x256xf32>
    %290 = arith.addf %277, %289 : vector<4x256xf32>
    %c5_i32 = arith.constant 5 : i32
    %291 = vector.broadcast %c5_i32 : i32 to vector<1x256xi32>
    %292 = arith.andi %3, %291 : vector<1x256xi32>
    %c5_i32_135 = arith.constant 5 : i32
    %293 = vector.broadcast %c5_i32_135 : i32 to vector<1x256xi32>
    %294 = arith.cmpi eq, %292, %293 : vector<1x256xi32>
    %c0_136 = arith.constant 0 : index
    %c192 = arith.constant 192 : index
    %295 = vector.load %arg5[%c0_136, %c192] : memref<8x512xbf16, #tpu.memory_space<vmem>>, vector<8x256xbf16>
    %cst_137 = arith.constant 0.000000e+00 : bf16
    %296 = vector.broadcast %cst_137 : bf16 to vector<8x256xbf16>
    %297 = vector.shape_cast %294 : vector<1x256xi1> to vector<1x256xi1>
    %298 = vector.broadcast %297 : vector<1x256xi1> to vector<8x256xi1>
    %299 = arith.select %298, %295, %296 : vector<8x256xi1>, vector<8x256xbf16>
    %c22 = arith.constant 22 : index
    %c0_138 = arith.constant 0 : index
    %c0_139 = arith.constant 0 : index
    %300 = vector.load %arg1[%c22, %c0_138, %c0_139] : memref<27x4x8xbf16, #tpu.memory_space<vmem>>, vector<1x4x8xbf16>
    %301 = vector.shape_cast %300 : vector<1x4x8xbf16> to vector<4x8xbf16>
    %cst_140 = arith.constant dense<0.000000e+00> : vector<4x256xf32>
    %302 = tpu.matmul %301, %299, %cst_140 {dimension_numbers = #tpu.dot_dimension_numbers<[1], [0], [0], [1], [0, 0, 1, 1], [], []>} : vector<4x8xbf16>, vector<8x256xbf16>, vector<4x256xf32> -> vector<4x256xf32>
    %303 = arith.addf %290, %302 : vector<4x256xf32>
    %c69_i32 = arith.constant 69 : i32
    %304 = vector.broadcast %c69_i32 : i32 to vector<1x256xi32>
    %305 = arith.andi %3, %304 : vector<1x256xi32>
    %c69_i32_141 = arith.constant 69 : i32
    %306 = vector.broadcast %c69_i32_141 : i32 to vector<1x256xi32>
    %307 = arith.cmpi eq, %305, %306 : vector<1x256xi32>
    %c0_142 = arith.constant 0 : index
    %c193 = arith.constant 193 : index
    %308 = vector.load %arg5[%c0_142, %c193] : memref<8x512xbf16, #tpu.memory_space<vmem>>, vector<8x256xbf16>
    %cst_143 = arith.constant 0.000000e+00 : bf16
    %309 = vector.broadcast %cst_143 : bf16 to vector<8x256xbf16>
    %310 = vector.shape_cast %307 : vector<1x256xi1> to vector<1x256xi1>
    %311 = vector.broadcast %310 : vector<1x256xi1> to vector<8x256xi1>
    %312 = arith.select %311, %308, %309 : vector<8x256xi1>, vector<8x256xbf16>
    %c23 = arith.constant 23 : index
    %c0_144 = arith.constant 0 : index
    %c0_145 = arith.constant 0 : index
    %313 = vector.load %arg1[%c23, %c0_144, %c0_145] : memref<27x4x8xbf16, #tpu.memory_space<vmem>>, vector<1x4x8xbf16>
    %314 = vector.shape_cast %313 : vector<1x4x8xbf16> to vector<4x8xbf16>
    %cst_146 = arith.constant dense<0.000000e+00> : vector<4x256xf32>
    %315 = tpu.matmul %314, %312, %cst_146 {dimension_numbers = #tpu.dot_dimension_numbers<[1], [0], [0], [1], [0, 0, 1, 1], [], []>} : vector<4x8xbf16>, vector<8x256xbf16>, vector<4x256xf32> -> vector<4x256xf32>
    %316 = arith.addf %303, %315 : vector<4x256xf32>
    %c53_i32 = arith.constant 53 : i32
    %317 = vector.broadcast %c53_i32 : i32 to vector<1x256xi32>
    %318 = arith.andi %3, %317 : vector<1x256xi32>
    %c53_i32_147 = arith.constant 53 : i32
    %319 = vector.broadcast %c53_i32_147 : i32 to vector<1x256xi32>
    %320 = arith.cmpi eq, %318, %319 : vector<1x256xi32>
    %c0_148 = arith.constant 0 : index
    %c199 = arith.constant 199 : index
    %321 = vector.load %arg5[%c0_148, %c199] : memref<8x512xbf16, #tpu.memory_space<vmem>>, vector<8x256xbf16>
    %cst_149 = arith.constant 0.000000e+00 : bf16
    %322 = vector.broadcast %cst_149 : bf16 to vector<8x256xbf16>
    %323 = vector.shape_cast %320 : vector<1x256xi1> to vector<1x256xi1>
    %324 = vector.broadcast %323 : vector<1x256xi1> to vector<8x256xi1>
    %325 = arith.select %324, %321, %322 : vector<8x256xi1>, vector<8x256xbf16>
    %c24 = arith.constant 24 : index
    %c0_150 = arith.constant 0 : index
    %c0_151 = arith.constant 0 : index
    %326 = vector.load %arg1[%c24, %c0_150, %c0_151] : memref<27x4x8xbf16, #tpu.memory_space<vmem>>, vector<1x4x8xbf16>
    %327 = vector.shape_cast %326 : vector<1x4x8xbf16> to vector<4x8xbf16>
    %cst_152 = arith.constant dense<0.000000e+00> : vector<4x256xf32>
    %328 = tpu.matmul %327, %325, %cst_152 {dimension_numbers = #tpu.dot_dimension_numbers<[1], [0], [0], [1], [0, 0, 1, 1], [], []>} : vector<4x8xbf16>, vector<8x256xbf16>, vector<4x256xf32> -> vector<4x256xf32>
    %329 = arith.addf %316, %328 : vector<4x256xf32>
    %c21_i32 = arith.constant 21 : i32
    %330 = vector.broadcast %c21_i32 : i32 to vector<1x256xi32>
    %331 = arith.andi %3, %330 : vector<1x256xi32>
    %c21_i32_153 = arith.constant 21 : i32
    %332 = vector.broadcast %c21_i32_153 : i32 to vector<1x256xi32>
    %333 = arith.cmpi eq, %331, %332 : vector<1x256xi32>
    %c0_154 = arith.constant 0 : index
    %c200 = arith.constant 200 : index
    %334 = vector.load %arg5[%c0_154, %c200] : memref<8x512xbf16, #tpu.memory_space<vmem>>, vector<8x256xbf16>
    %cst_155 = arith.constant 0.000000e+00 : bf16
    %335 = vector.broadcast %cst_155 : bf16 to vector<8x256xbf16>
    %336 = vector.shape_cast %333 : vector<1x256xi1> to vector<1x256xi1>
    %337 = vector.broadcast %336 : vector<1x256xi1> to vector<8x256xi1>
    %338 = arith.select %337, %334, %335 : vector<8x256xi1>, vector<8x256xbf16>
    %c25 = arith.constant 25 : index
    %c0_156 = arith.constant 0 : index
    %c0_157 = arith.constant 0 : index
    %339 = vector.load %arg1[%c25, %c0_156, %c0_157] : memref<27x4x8xbf16, #tpu.memory_space<vmem>>, vector<1x4x8xbf16>
    %340 = vector.shape_cast %339 : vector<1x4x8xbf16> to vector<4x8xbf16>
    %cst_158 = arith.constant dense<0.000000e+00> : vector<4x256xf32>
    %341 = tpu.matmul %340, %338, %cst_158 {dimension_numbers = #tpu.dot_dimension_numbers<[1], [0], [0], [1], [0, 0, 1, 1], [], []>} : vector<4x8xbf16>, vector<8x256xbf16>, vector<4x256xf32> -> vector<4x256xf32>
    %342 = arith.addf %329, %341 : vector<4x256xf32>
    %c85_i32 = arith.constant 85 : i32
    %343 = vector.broadcast %c85_i32 : i32 to vector<1x256xi32>
    %344 = arith.andi %3, %343 : vector<1x256xi32>
    %c85_i32_159 = arith.constant 85 : i32
    %345 = vector.broadcast %c85_i32_159 : i32 to vector<1x256xi32>
    %346 = arith.cmpi eq, %344, %345 : vector<1x256xi32>
    %c0_160 = arith.constant 0 : index
    %c201 = arith.constant 201 : index
    %347 = vector.load %arg5[%c0_160, %c201] : memref<8x512xbf16, #tpu.memory_space<vmem>>, vector<8x256xbf16>
    %cst_161 = arith.constant 0.000000e+00 : bf16
    %348 = vector.broadcast %cst_161 : bf16 to vector<8x256xbf16>
    %349 = vector.shape_cast %346 : vector<1x256xi1> to vector<1x256xi1>
    %350 = vector.broadcast %349 : vector<1x256xi1> to vector<8x256xi1>
    %351 = arith.select %350, %347, %348 : vector<8x256xi1>, vector<8x256xbf16>
    %c26 = arith.constant 26 : index
    %c0_162 = arith.constant 0 : index
    %c0_163 = arith.constant 0 : index
    %352 = vector.load %arg1[%c26, %c0_162, %c0_163] : memref<27x4x8xbf16, #tpu.memory_space<vmem>>, vector<1x4x8xbf16>
    %353 = vector.shape_cast %352 : vector<1x4x8xbf16> to vector<4x8xbf16>
    %cst_164 = arith.constant dense<0.000000e+00> : vector<4x256xf32>
    %354 = tpu.matmul %353, %351, %cst_164 {dimension_numbers = #tpu.dot_dimension_numbers<[1], [0], [0], [1], [0, 0, 1, 1], [], []>} : vector<4x8xbf16>, vector<8x256xbf16>, vector<4x256xf32> -> vector<4x256xf32>
    %355 = arith.addf %342, %354 : vector<4x256xf32>
    %cst_165 = arith.constant dense<0.000000e+00> : vector<4xf32>
    %356 = vector.multi_reduction <add>, %355, %cst_165 [1] : vector<4x256xf32> to vector<4xf32>
    %357 = vector.shape_cast %356 : vector<4xf32> to vector<4x1xf32>
    %358 = arith.mulf %355, %355 : vector<4x256xf32>
    %cst_166 = arith.constant dense<0.000000e+00> : vector<4xf32>
    %359 = vector.multi_reduction <add>, %358, %cst_166 [1] : vector<4x256xf32> to vector<4xf32>
    %360 = vector.shape_cast %359 : vector<4xf32> to vector<4x1xf32>
    %361 = tpu.concatenate %357, %360 in 1 : vector<4x1xf32>, vector<4x1xf32> -> vector<4x2xf32>
    %c0_167 = arith.constant 0 : index
    %c0_168 = arith.constant 0 : index
    %c0_169 = arith.constant 0 : index
    %362 = vector.load %arg4[%c0_167, %c0_168, %c0_169] : memref<1x4x2xf32, #tpu.memory_space<vmem>>, vector<1x4x2xf32>
    %363 = vector.shape_cast %362 : vector<1x4x2xf32> to vector<4x2xf32>
    %364 = vector.shape_cast %361 : vector<4x2xf32> to vector<1x4x2xf32>
    tpu.vector_store %arg4[%c0_167, %c0_168, %c0_169], %364 {strides = array<i32>} : memref<1x4x2xf32, #tpu.memory_space<vmem>>, vector<1x4x2xf32>,
    return
  }
  func.func @transform_0(%arg0: i32) -> (i32, i32, i32) {
    %c0_i32 = arith.constant 0 : i32
    %c0_i32_0 = arith.constant 0 : i32
    %c0_i32_1 = arith.constant 0 : i32
    %c0_i32_2 = arith.constant 0 : i32
    return %c0_i32, %c0_i32_0, %c0_i32_1 : i32, i32, i32
  }
  func.func @transform_1(%arg0: i32) -> (i32, i32) {
    %c0_i32 = arith.constant 0 : i32
    %c0_i32_0 = arith.constant 0 : i32
    %c0_i32_1 = arith.constant 0 : i32
    return %c0_i32, %c0_i32_0 : i32, i32
  }
  func.func @transform_2(%arg0: i32) -> (i32, i32) {
    %c0_i32 = arith.constant 0 : i32
    %c0_i32_0 = arith.constant 0 : i32
    return %c0_i32, %arg0 : i32, i32
  }
  func.func @transform_3(%arg0: i32) -> (i32, i32, i32) {
    %c0_i32 = arith.constant 0 : i32
    %c0_i32_0 = arith.constant 0 : i32
    %c0_i32_1 = arith.constant 0 : i32
    return %arg0, %c0_i32, %c0_i32_0 : i32, i32, i32
  }
}

module attributes {stable_mosaic.version = 11 : i64} {
  func.func @_conv_bn_act_kernel(%arg0: i32, %arg1: memref<27x4x8xbf16, #tpu.memory_space<vmem>>, %arg2: memref<8x1280xbf16, #tpu.memory_space<vmem>>, %arg3: memref<1x256xi32, #tpu.memory_space<vmem>>, %arg4: memref<4x1xf32, #tpu.memory_space<vmem>>, %arg5: memref<4x1xf32, #tpu.memory_space<vmem>>, %arg6: memref<4x256xbf16, #tpu.memory_space<vmem>>, %arg7: memref<8x512xbf16, #tpu.memory_space<vmem>>, %arg8: memref<!tpu.dma_semaphore, #tpu.memory_space<semaphore_mem>>) attributes {dimension_semantics = [#tpu.dimension_semantics<parallel>], iteration_bounds = array<i64: 4>, scalar_prefetch = 0 : i64, scratch_operands = 2 : i64, tpu.core_type = #tpu.core_type<tc>, window_params = [{pipeline_mode = #tpu.pipeline_mode<synchronous>, transform_indices = @transform_0, window_bounds = array<i64: 27, 4, 8>}, {pipeline_mode = #tpu.pipeline_mode<synchronous>, transform_indices = @transform_1, window_bounds = array<i64: 8, 1280>}, {transform_indices = @transform_2, window_bounds = array<i64: 1, 256>}, {pipeline_mode = #tpu.pipeline_mode<synchronous>, transform_indices = @transform_3, window_bounds = array<i64: 4, 1>}, {pipeline_mode = #tpu.pipeline_mode<synchronous>, transform_indices = @transform_4, window_bounds = array<i64: 4, 1>}, {transform_indices = @transform_5, window_bounds = array<i64: 4, 256>}]} {
    %c256_i32 = arith.constant 256 : i32
    %0 = arith.muli %arg0, %c256_i32 : i32
    %c0_i32 = arith.constant 0 : i32
    %1 = tpu.memref_slice %arg2[%c0_i32, %0] : memref<8x1280xbf16, #tpu.memory_space<vmem>> -> memref<8x512xbf16, #tpu.memory_space<vmem>>
    tpu.enqueue_dma source(%1 : memref<8x512xbf16, #tpu.memory_space<vmem>>) target(%arg7 : memref<8x512xbf16, #tpu.memory_space<vmem>>) target_semaphore(%arg8 : memref<!tpu.dma_semaphore, #tpu.memory_space<semaphore_mem>>)
    %c0_i32_0 = arith.constant 0 : i32
    %2 = tpu.memref_slice %arg2[%c0_i32_0, %0] : memref<8x1280xbf16, #tpu.memory_space<vmem>> -> memref<8x512xbf16, #tpu.memory_space<vmem>>
    tpu.wait_dma2 semaphore(%arg8 : memref<!tpu.dma_semaphore, #tpu.memory_space<semaphore_mem>>) src(%2 : memref<8x512xbf16, #tpu.memory_space<vmem>>) dst(%arg7 : memref<8x512xbf16, #tpu.memory_space<vmem>>)
    %c0 = arith.constant 0 : index
    %c0_1 = arith.constant 0 : index
    %3 = vector.load %arg3[%c0, %c0_1] : memref<1x256xi32, #tpu.memory_space<vmem>>, vector<1x256xi32>
    %cst = arith.constant 0.000000e+00 : f32
    %4 = vector.broadcast %cst : f32 to vector<4x256xf32>
    %c43_i32 = arith.constant 43 : i32
    %5 = vector.broadcast %c43_i32 : i32 to vector<1x256xi32>
    %6 = arith.andi %3, %5 : vector<1x256xi32>
    %c43_i32_2 = arith.constant 43 : i32
    %7 = vector.broadcast %c43_i32_2 : i32 to vector<1x256xi32>
    %8 = arith.cmpi eq, %6, %7 : vector<1x256xi32>
    %c0_3 = arith.constant 0 : index
    %c55 = arith.constant 55 : index
    %9 = vector.load %arg7[%c0_3, %c55] : memref<8x512xbf16, #tpu.memory_space<vmem>>, vector<8x256xbf16>
    %cst_4 = arith.constant 0.000000e+00 : bf16
    %10 = vector.broadcast %cst_4 : bf16 to vector<8x256xbf16>
    %11 = vector.shape_cast %8 : vector<1x256xi1> to vector<1x256xi1>
    %12 = vector.broadcast %11 : vector<1x256xi1> to vector<8x256xi1>
    %13 = arith.select %12, %9, %10 : vector<8x256xi1>, vector<8x256xbf16>
    %c0_5 = arith.constant 0 : index
    %c0_6 = arith.constant 0 : index
    %c0_7 = arith.constant 0 : index
    %14 = vector.load %arg1[%c0_5, %c0_6, %c0_7] : memref<27x4x8xbf16, #tpu.memory_space<vmem>>, vector<1x4x8xbf16>
    %15 = vector.shape_cast %14 : vector<1x4x8xbf16> to vector<4x8xbf16>
    %cst_8 = arith.constant dense<0.000000e+00> : vector<4x256xf32>
    %16 = tpu.matmul %15, %13, %cst_8 {dimension_numbers = #tpu.dot_dimension_numbers<[1], [0], [0], [1], [0, 0, 1, 1], [], []>} : vector<4x8xbf16>, vector<8x256xbf16>, vector<4x256xf32> -> vector<4x256xf32>
    %17 = arith.addf %4, %16 : vector<4x256xf32>
    %c11_i32 = arith.constant 11 : i32
    %18 = vector.broadcast %c11_i32 : i32 to vector<1x256xi32>
    %19 = arith.andi %3, %18 : vector<1x256xi32>
    %c11_i32_9 = arith.constant 11 : i32
    %20 = vector.broadcast %c11_i32_9 : i32 to vector<1x256xi32>
    %21 = arith.cmpi eq, %19, %20 : vector<1x256xi32>
    %c0_10 = arith.constant 0 : index
    %c56 = arith.constant 56 : index
    %22 = vector.load %arg7[%c0_10, %c56] : memref<8x512xbf16, #tpu.memory_space<vmem>>, vector<8x256xbf16>
    %cst_11 = arith.constant 0.000000e+00 : bf16
    %23 = vector.broadcast %cst_11 : bf16 to vector<8x256xbf16>
    %24 = vector.shape_cast %21 : vector<1x256xi1> to vector<1x256xi1>
    %25 = vector.broadcast %24 : vector<1x256xi1> to vector<8x256xi1>
    %26 = arith.select %25, %22, %23 : vector<8x256xi1>, vector<8x256xbf16>
    %c1 = arith.constant 1 : index
    %c0_12 = arith.constant 0 : index
    %c0_13 = arith.constant 0 : index
    %27 = vector.load %arg1[%c1, %c0_12, %c0_13] : memref<27x4x8xbf16, #tpu.memory_space<vmem>>, vector<1x4x8xbf16>
    %28 = vector.shape_cast %27 : vector<1x4x8xbf16> to vector<4x8xbf16>
    %cst_14 = arith.constant dense<0.000000e+00> : vector<4x256xf32>
    %29 = tpu.matmul %28, %26, %cst_14 {dimension_numbers = #tpu.dot_dimension_numbers<[1], [0], [0], [1], [0, 0, 1, 1], [], []>} : vector<4x8xbf16>, vector<8x256xbf16>, vector<4x256xf32> -> vector<4x256xf32>
    %30 = arith.addf %17, %29 : vector<4x256xf32>
    %c75_i32 = arith.constant 75 : i32
    %31 = vector.broadcast %c75_i32 : i32 to vector<1x256xi32>
    %32 = arith.andi %3, %31 : vector<1x256xi32>
    %c75_i32_15 = arith.constant 75 : i32
    %33 = vector.broadcast %c75_i32_15 : i32 to vector<1x256xi32>
    %34 = arith.cmpi eq, %32, %33 : vector<1x256xi32>
    %c0_16 = arith.constant 0 : index
    %c57 = arith.constant 57 : index
    %35 = vector.load %arg7[%c0_16, %c57] : memref<8x512xbf16, #tpu.memory_space<vmem>>, vector<8x256xbf16>
    %cst_17 = arith.constant 0.000000e+00 : bf16
    %36 = vector.broadcast %cst_17 : bf16 to vector<8x256xbf16>
    %37 = vector.shape_cast %34 : vector<1x256xi1> to vector<1x256xi1>
    %38 = vector.broadcast %37 : vector<1x256xi1> to vector<8x256xi1>
    %39 = arith.select %38, %35, %36 : vector<8x256xi1>, vector<8x256xbf16>
    %c2 = arith.constant 2 : index
    %c0_18 = arith.constant 0 : index
    %c0_19 = arith.constant 0 : index
    %40 = vector.load %arg1[%c2, %c0_18, %c0_19] : memref<27x4x8xbf16, #tpu.memory_space<vmem>>, vector<1x4x8xbf16>
    %41 = vector.shape_cast %40 : vector<1x4x8xbf16> to vector<4x8xbf16>
    %cst_20 = arith.constant dense<0.000000e+00> : vector<4x256xf32>
    %42 = tpu.matmul %41, %39, %cst_20 {dimension_numbers = #tpu.dot_dimension_numbers<[1], [0], [0], [1], [0, 0, 1, 1], [], []>} : vector<4x8xbf16>, vector<8x256xbf16>, vector<4x256xf32> -> vector<4x256xf32>
    %43 = arith.addf %30, %42 : vector<4x256xf32>
    %c35_i32 = arith.constant 35 : i32
    %44 = vector.broadcast %c35_i32 : i32 to vector<1x256xi32>
    %45 = arith.andi %3, %44 : vector<1x256xi32>
    %c35_i32_21 = arith.constant 35 : i32
    %46 = vector.broadcast %c35_i32_21 : i32 to vector<1x256xi32>
    %47 = arith.cmpi eq, %45, %46 : vector<1x256xi32>
    %c0_22 = arith.constant 0 : index
    %c63 = arith.constant 63 : index
    %48 = vector.load %arg7[%c0_22, %c63] : memref<8x512xbf16, #tpu.memory_space<vmem>>, vector<8x256xbf16>
    %cst_23 = arith.constant 0.000000e+00 : bf16
    %49 = vector.broadcast %cst_23 : bf16 to vector<8x256xbf16>
    %50 = vector.shape_cast %47 : vector<1x256xi1> to vector<1x256xi1>
    %51 = vector.broadcast %50 : vector<1x256xi1> to vector<8x256xi1>
    %52 = arith.select %51, %48, %49 : vector<8x256xi1>, vector<8x256xbf16>
    %c3 = arith.constant 3 : index
    %c0_24 = arith.constant 0 : index
    %c0_25 = arith.constant 0 : index
    %53 = vector.load %arg1[%c3, %c0_24, %c0_25] : memref<27x4x8xbf16, #tpu.memory_space<vmem>>, vector<1x4x8xbf16>
    %54 = vector.shape_cast %53 : vector<1x4x8xbf16> to vector<4x8xbf16>
    %cst_26 = arith.constant dense<0.000000e+00> : vector<4x256xf32>
    %55 = tpu.matmul %54, %52, %cst_26 {dimension_numbers = #tpu.dot_dimension_numbers<[1], [0], [0], [1], [0, 0, 1, 1], [], []>} : vector<4x8xbf16>, vector<8x256xbf16>, vector<4x256xf32> -> vector<4x256xf32>
    %56 = arith.addf %43, %55 : vector<4x256xf32>
    %c3_i32 = arith.constant 3 : i32
    %57 = vector.broadcast %c3_i32 : i32 to vector<1x256xi32>
    %58 = arith.andi %3, %57 : vector<1x256xi32>
    %c3_i32_27 = arith.constant 3 : i32
    %59 = vector.broadcast %c3_i32_27 : i32 to vector<1x256xi32>
    %60 = arith.cmpi eq, %58, %59 : vector<1x256xi32>
    %c0_28 = arith.constant 0 : index
    %c64 = arith.constant 64 : index
    %61 = vector.load %arg7[%c0_28, %c64] : memref<8x512xbf16, #tpu.memory_space<vmem>>, vector<8x256xbf16>
    %cst_29 = arith.constant 0.000000e+00 : bf16
    %62 = vector.broadcast %cst_29 : bf16 to vector<8x256xbf16>
    %63 = vector.shape_cast %60 : vector<1x256xi1> to vector<1x256xi1>
    %64 = vector.broadcast %63 : vector<1x256xi1> to vector<8x256xi1>
    %65 = arith.select %64, %61, %62 : vector<8x256xi1>, vector<8x256xbf16>
    %c4 = arith.constant 4 : index
    %c0_30 = arith.constant 0 : index
    %c0_31 = arith.constant 0 : index
    %66 = vector.load %arg1[%c4, %c0_30, %c0_31] : memref<27x4x8xbf16, #tpu.memory_space<vmem>>, vector<1x4x8xbf16>
    %67 = vector.shape_cast %66 : vector<1x4x8xbf16> to vector<4x8xbf16>
    %cst_32 = arith.constant dense<0.000000e+00> : vector<4x256xf32>
    %68 = tpu.matmul %67, %65, %cst_32 {dimension_numbers = #tpu.dot_dimension_numbers<[1], [0], [0], [1], [0, 0, 1, 1], [], []>} : vector<4x8xbf16>, vector<8x256xbf16>, vector<4x256xf32> -> vector<4x256xf32>
    %69 = arith.addf %56, %68 : vector<4x256xf32>
    %c67_i32 = arith.constant 67 : i32
    %70 = vector.broadcast %c67_i32 : i32 to vector<1x256xi32>
    %71 = arith.andi %3, %70 : vector<1x256xi32>
    %c67_i32_33 = arith.constant 67 : i32
    %72 = vector.broadcast %c67_i32_33 : i32 to vector<1x256xi32>
    %73 = arith.cmpi eq, %71, %72 : vector<1x256xi32>
    %c0_34 = arith.constant 0 : index
    %c65 = arith.constant 65 : index
    %74 = vector.load %arg7[%c0_34, %c65] : memref<8x512xbf16, #tpu.memory_space<vmem>>, vector<8x256xbf16>
    %cst_35 = arith.constant 0.000000e+00 : bf16
    %75 = vector.broadcast %cst_35 : bf16 to vector<8x256xbf16>
    %76 = vector.shape_cast %73 : vector<1x256xi1> to vector<1x256xi1>
    %77 = vector.broadcast %76 : vector<1x256xi1> to vector<8x256xi1>
    %78 = arith.select %77, %74, %75 : vector<8x256xi1>, vector<8x256xbf16>
    %c5 = arith.constant 5 : index
    %c0_36 = arith.constant 0 : index
    %c0_37 = arith.constant 0 : index
    %79 = vector.load %arg1[%c5, %c0_36, %c0_37] : memref<27x4x8xbf16, #tpu.memory_space<vmem>>, vector<1x4x8xbf16>
    %80 = vector.shape_cast %79 : vector<1x4x8xbf16> to vector<4x8xbf16>
    %cst_38 = arith.constant dense<0.000000e+00> : vector<4x256xf32>
    %81 = tpu.matmul %80, %78, %cst_38 {dimension_numbers = #tpu.dot_dimension_numbers<[1], [0], [0], [1], [0, 0, 1, 1], [], []>} : vector<4x8xbf16>, vector<8x256xbf16>, vector<4x256xf32> -> vector<4x256xf32>
    %82 = arith.addf %69, %81 : vector<4x256xf32>
    %c51_i32 = arith.constant 51 : i32
    %83 = vector.broadcast %c51_i32 : i32 to vector<1x256xi32>
    %84 = arith.andi %3, %83 : vector<1x256xi32>
    %c51_i32_39 = arith.constant 51 : i32
    %85 = vector.broadcast %c51_i32_39 : i32 to vector<1x256xi32>
    %86 = arith.cmpi eq, %84, %85 : vector<1x256xi32>
    %c0_40 = arith.constant 0 : index
    %c71 = arith.constant 71 : index
    %87 = vector.load %arg7[%c0_40, %c71] : memref<8x512xbf16, #tpu.memory_space<vmem>>, vector<8x256xbf16>
    %cst_41 = arith.constant 0.000000e+00 : bf16
    %88 = vector.broadcast %cst_41 : bf16 to vector<8x256xbf16>
    %89 = vector.shape_cast %86 : vector<1x256xi1> to vector<1x256xi1>
    %90 = vector.broadcast %89 : vector<1x256xi1> to vector<8x256xi1>
    %91 = arith.select %90, %87, %88 : vector<8x256xi1>, vector<8x256xbf16>
    %c6 = arith.constant 6 : index
    %c0_42 = arith.constant 0 : index
    %c0_43 = arith.constant 0 : index
    %92 = vector.load %arg1[%c6, %c0_42, %c0_43] : memref<27x4x8xbf16, #tpu.memory_space<vmem>>, vector<1x4x8xbf16>
    %93 = vector.shape_cast %92 : vector<1x4x8xbf16> to vector<4x8xbf16>
    %cst_44 = arith.constant dense<0.000000e+00> : vector<4x256xf32>
    %94 = tpu.matmul %93, %91, %cst_44 {dimension_numbers = #tpu.dot_dimension_numbers<[1], [0], [0], [1], [0, 0, 1, 1], [], []>} : vector<4x8xbf16>, vector<8x256xbf16>, vector<4x256xf32> -> vector<4x256xf32>
    %95 = arith.addf %82, %94 : vector<4x256xf32>
    %c19_i32 = arith.constant 19 : i32
    %96 = vector.broadcast %c19_i32 : i32 to vector<1x256xi32>
    %97 = arith.andi %3, %96 : vector<1x256xi32>
    %c19_i32_45 = arith.constant 19 : i32
    %98 = vector.broadcast %c19_i32_45 : i32 to vector<1x256xi32>
    %99 = arith.cmpi eq, %97, %98 : vector<1x256xi32>
    %c0_46 = arith.constant 0 : index
    %c72 = arith.constant 72 : index
    %100 = vector.load %arg7[%c0_46, %c72] : memref<8x512xbf16, #tpu.memory_space<vmem>>, vector<8x256xbf16>
    %cst_47 = arith.constant 0.000000e+00 : bf16
    %101 = vector.broadcast %cst_47 : bf16 to vector<8x256xbf16>
    %102 = vector.shape_cast %99 : vector<1x256xi1> to vector<1x256xi1>
    %103 = vector.broadcast %102 : vector<1x256xi1> to vector<8x256xi1>
    %104 = arith.select %103, %100, %101 : vector<8x256xi1>, vector<8x256xbf16>
    %c7 = arith.constant 7 : index
    %c0_48 = arith.constant 0 : index
    %c0_49 = arith.constant 0 : index
    %105 = vector.load %arg1[%c7, %c0_48, %c0_49] : memref<27x4x8xbf16, #tpu.memory_space<vmem>>, vector<1x4x8xbf16>
    %106 = vector.shape_cast %105 : vector<1x4x8xbf16> to vector<4x8xbf16>
    %cst_50 = arith.constant dense<0.000000e+00> : vector<4x256xf32>
    %107 = tpu.matmul %106, %104, %cst_50 {dimension_numbers = #tpu.dot_dimension_numbers<[1], [0], [0], [1], [0, 0, 1, 1], [], []>} : vector<4x8xbf16>, vector<8x256xbf16>, vector<4x256xf32> -> vector<4x256xf32>
    %108 = arith.addf %95, %107 : vector<4x256xf32>
    %c83_i32 = arith.constant 83 : i32
    %109 = vector.broadcast %c83_i32 : i32 to vector<1x256xi32>
    %110 = arith.andi %3, %109 : vector<1x256xi32>
    %c83_i32_51 = arith.constant 83 : i32
    %111 = vector.broadcast %c83_i32_51 : i32 to vector<1x256xi32>
    %112 = arith.cmpi eq, %110, %111 : vector<1x256xi32>
    %c0_52 = arith.constant 0 : index
    %c73 = arith.constant 73 : index
    %113 = vector.load %arg7[%c0_52, %c73] : memref<8x512xbf16, #tpu.memory_space<vmem>>, vector<8x256xbf16>
    %cst_53 = arith.constant 0.000000e+00 : bf16
    %114 = vector.broadcast %cst_53 : bf16 to vector<8x256xbf16>
    %115 = vector.shape_cast %112 : vector<1x256xi1> to vector<1x256xi1>
    %116 = vector.broadcast %115 : vector<1x256xi1> to vector<8x256xi1>
    %117 = arith.select %116, %113, %114 : vector<8x256xi1>, vector<8x256xbf16>
    %c8 = arith.constant 8 : index
    %c0_54 = arith.constant 0 : index
    %c0_55 = arith.constant 0 : index
    %118 = vector.load %arg1[%c8, %c0_54, %c0_55] : memref<27x4x8xbf16, #tpu.memory_space<vmem>>, vector<1x4x8xbf16>
    %119 = vector.shape_cast %118 : vector<1x4x8xbf16> to vector<4x8xbf16>
    %cst_56 = arith.constant dense<0.000000e+00> : vector<4x256xf32>
    %120 = tpu.matmul %119, %117, %cst_56 {dimension_numbers = #tpu.dot_dimension_numbers<[1], [0], [0], [1], [0, 0, 1, 1], [], []>} : vector<4x8xbf16>, vector<8x256xbf16>, vector<4x256xf32> -> vector<4x256xf32>
    %121 = arith.addf %108, %120 : vector<4x256xf32>
    %c41_i32 = arith.constant 41 : i32
    %122 = vector.broadcast %c41_i32 : i32 to vector<1x256xi32>
    %123 = arith.andi %3, %122 : vector<1x256xi32>
    %c41_i32_57 = arith.constant 41 : i32
    %124 = vector.broadcast %c41_i32_57 : i32 to vector<1x256xi32>
    %125 = arith.cmpi eq, %123, %124 : vector<1x256xi32>
    %c0_58 = arith.constant 0 : index
    %c119 = arith.constant 119 : index
    %126 = vector.load %arg7[%c0_58, %c119] : memref<8x512xbf16, #tpu.memory_space<vmem>>, vector<8x256xbf16>
    %cst_59 = arith.constant 0.000000e+00 : bf16
    %127 = vector.broadcast %cst_59 : bf16 to vector<8x256xbf16>
    %128 = vector.shape_cast %125 : vector<1x256xi1> to vector<1x256xi1>
    %129 = vector.broadcast %128 : vector<1x256xi1> to vector<8x256xi1>
    %130 = arith.select %129, %126, %127 : vector<8x256xi1>, vector<8x256xbf16>
    %c9 = arith.constant 9 : index
    %c0_60 = arith.constant 0 : index
    %c0_61 = arith.constant 0 : index
    %131 = vector.load %arg1[%c9, %c0_60, %c0_61] : memref<27x4x8xbf16, #tpu.memory_space<vmem>>, vector<1x4x8xbf16>
    %132 = vector.shape_cast %131 : vector<1x4x8xbf16> to vector<4x8xbf16>
    %cst_62 = arith.constant dense<0.000000e+00> : vector<4x256xf32>
    %133 = tpu.matmul %132, %130, %cst_62 {dimension_numbers = #tpu.dot_dimension_numbers<[1], [0], [0], [1], [0, 0, 1, 1], [], []>} : vector<4x8xbf16>, vector<8x256xbf16>, vector<4x256xf32> -> vector<4x256xf32>
    %134 = arith.addf %121, %133 : vector<4x256xf32>
    %c9_i32 = arith.constant 9 : i32
    %135 = vector.broadcast %c9_i32 : i32 to vector<1x256xi32>
    %136 = arith.andi %3, %135 : vector<1x256xi32>
    %c9_i32_63 = arith.constant 9 : i32
    %137 = vector.broadcast %c9_i32_63 : i32 to vector<1x256xi32>
    %138 = arith.cmpi eq, %136, %137 : vector<1x256xi32>
    %c0_64 = arith.constant 0 : index
    %c120 = arith.constant 120 : index
    %139 = vector.load %arg7[%c0_64, %c120] : memref<8x512xbf16, #tpu.memory_space<vmem>>, vector<8x256xbf16>
    %cst_65 = arith.constant 0.000000e+00 : bf16
    %140 = vector.broadcast %cst_65 : bf16 to vector<8x256xbf16>
    %141 = vector.shape_cast %138 : vector<1x256xi1> to vector<1x256xi1>
    %142 = vector.broadcast %141 : vector<1x256xi1> to vector<8x256xi1>
    %143 = arith.select %142, %139, %140 : vector<8x256xi1>, vector<8x256xbf16>
    %c10 = arith.constant 10 : index
    %c0_66 = arith.constant 0 : index
    %c0_67 = arith.constant 0 : index
    %144 = vector.load %arg1[%c10, %c0_66, %c0_67] : memref<27x4x8xbf16, #tpu.memory_space<vmem>>, vector<1x4x8xbf16>
    %145 = vector.shape_cast %144 : vector<1x4x8xbf16> to vector<4x8xbf16>
    %cst_68 = arith.constant dense<0.000000e+00> : vector<4x256xf32>
    %146 = tpu.matmul %145, %143, %cst_68 {dimension_numbers = #tpu.dot_dimension_numbers<[1], [0], [0], [1], [0, 0, 1, 1], [], []>} : vector<4x8xbf16>, vector<8x256xbf16>, vector<4x256xf32> -> vector<4x256xf32>
    %147 = arith.addf %134, %146 : vector<4x256xf32>
    %c73_i32 = arith.constant 73 : i32
    %148 = vector.broadcast %c73_i32 : i32 to vector<1x256xi32>
    %149 = arith.andi %3, %148 : vector<1x256xi32>
    %c73_i32_69 = arith.constant 73 : i32
    %150 = vector.broadcast %c73_i32_69 : i32 to vector<1x256xi32>
    %151 = arith.cmpi eq, %149, %150 : vector<1x256xi32>
    %c0_70 = arith.constant 0 : index
    %c121 = arith.constant 121 : index
    %152 = vector.load %arg7[%c0_70, %c121] : memref<8x512xbf16, #tpu.memory_space<vmem>>, vector<8x256xbf16>
    %cst_71 = arith.constant 0.000000e+00 : bf16
    %153 = vector.broadcast %cst_71 : bf16 to vector<8x256xbf16>
    %154 = vector.shape_cast %151 : vector<1x256xi1> to vector<1x256xi1>
    %155 = vector.broadcast %154 : vector<1x256xi1> to vector<8x256xi1>
    %156 = arith.select %155, %152, %153 : vector<8x256xi1>, vector<8x256xbf16>
    %c11 = arith.constant 11 : index
    %c0_72 = arith.constant 0 : index
    %c0_73 = arith.constant 0 : index
    %157 = vector.load %arg1[%c11, %c0_72, %c0_73] : memref<27x4x8xbf16, #tpu.memory_space<vmem>>, vector<1x4x8xbf16>
    %158 = vector.shape_cast %157 : vector<1x4x8xbf16> to vector<4x8xbf16>
    %cst_74 = arith.constant dense<0.000000e+00> : vector<4x256xf32>
    %159 = tpu.matmul %158, %156, %cst_74 {dimension_numbers = #tpu.dot_dimension_numbers<[1], [0], [0], [1], [0, 0, 1, 1], [], []>} : vector<4x8xbf16>, vector<8x256xbf16>, vector<4x256xf32> -> vector<4x256xf32>
    %160 = arith.addf %147, %159 : vector<4x256xf32>
    %c33_i32 = arith.constant 33 : i32
    %161 = vector.broadcast %c33_i32 : i32 to vector<1x256xi32>
    %162 = arith.andi %3, %161 : vector<1x256xi32>
    %c33_i32_75 = arith.constant 33 : i32
    %163 = vector.broadcast %c33_i32_75 : i32 to vector<1x256xi32>
    %164 = arith.cmpi eq, %162, %163 : vector<1x256xi32>
    %c0_76 = arith.constant 0 : index
    %c127 = arith.constant 127 : index
    %165 = vector.load %arg7[%c0_76, %c127] : memref<8x512xbf16, #tpu.memory_space<vmem>>, vector<8x256xbf16>
    %cst_77 = arith.constant 0.000000e+00 : bf16
    %166 = vector.broadcast %cst_77 : bf16 to vector<8x256xbf16>
    %167 = vector.shape_cast %164 : vector<1x256xi1> to vector<1x256xi1>
    %168 = vector.broadcast %167 : vector<1x256xi1> to vector<8x256xi1>
    %169 = arith.select %168, %165, %166 : vector<8x256xi1>, vector<8x256xbf16>
    %c12 = arith.constant 12 : index
    %c0_78 = arith.constant 0 : index
    %c0_79 = arith.constant 0 : index
    %170 = vector.load %arg1[%c12, %c0_78, %c0_79] : memref<27x4x8xbf16, #tpu.memory_space<vmem>>, vector<1x4x8xbf16>
    %171 = vector.shape_cast %170 : vector<1x4x8xbf16> to vector<4x8xbf16>
    %cst_80 = arith.constant dense<0.000000e+00> : vector<4x256xf32>
    %172 = tpu.matmul %171, %169, %cst_80 {dimension_numbers = #tpu.dot_dimension_numbers<[1], [0], [0], [1], [0, 0, 1, 1], [], []>} : vector<4x8xbf16>, vector<8x256xbf16>, vector<4x256xf32> -> vector<4x256xf32>
    %173 = arith.addf %160, %172 : vector<4x256xf32>
    %c1_i32 = arith.constant 1 : i32
    %174 = vector.broadcast %c1_i32 : i32 to vector<1x256xi32>
    %175 = arith.andi %3, %174 : vector<1x256xi32>
    %c1_i32_81 = arith.constant 1 : i32
    %176 = vector.broadcast %c1_i32_81 : i32 to vector<1x256xi32>
    %177 = arith.cmpi eq, %175, %176 : vector<1x256xi32>
    %c0_82 = arith.constant 0 : index
    %c128 = arith.constant 128 : index
    %178 = vector.load %arg7[%c0_82, %c128] : memref<8x512xbf16, #tpu.memory_space<vmem>>, vector<8x256xbf16>
    %cst_83 = arith.constant 0.000000e+00 : bf16
    %179 = vector.broadcast %cst_83 : bf16 to vector<8x256xbf16>
    %180 = vector.shape_cast %177 : vector<1x256xi1> to vector<1x256xi1>
    %181 = vector.broadcast %180 : vector<1x256xi1> to vector<8x256xi1>
    %182 = arith.select %181, %178, %179 : vector<8x256xi1>, vector<8x256xbf16>
    %c13 = arith.constant 13 : index
    %c0_84 = arith.constant 0 : index
    %c0_85 = arith.constant 0 : index
    %183 = vector.load %arg1[%c13, %c0_84, %c0_85] : memref<27x4x8xbf16, #tpu.memory_space<vmem>>, vector<1x4x8xbf16>
    %184 = vector.shape_cast %183 : vector<1x4x8xbf16> to vector<4x8xbf16>
    %cst_86 = arith.constant dense<0.000000e+00> : vector<4x256xf32>
    %185 = tpu.matmul %184, %182, %cst_86 {dimension_numbers = #tpu.dot_dimension_numbers<[1], [0], [0], [1], [0, 0, 1, 1], [], []>} : vector<4x8xbf16>, vector<8x256xbf16>, vector<4x256xf32> -> vector<4x256xf32>
    %186 = arith.addf %173, %185 : vector<4x256xf32>
    %c65_i32 = arith.constant 65 : i32
    %187 = vector.broadcast %c65_i32 : i32 to vector<1x256xi32>
    %188 = arith.andi %3, %187 : vector<1x256xi32>
    %c65_i32_87 = arith.constant 65 : i32
    %189 = vector.broadcast %c65_i32_87 : i32 to vector<1x256xi32>
    %190 = arith.cmpi eq, %188, %189 : vector<1x256xi32>
    %c0_88 = arith.constant 0 : index
    %c129 = arith.constant 129 : index
    %191 = vector.load %arg7[%c0_88, %c129] : memref<8x512xbf16, #tpu.memory_space<vmem>>, vector<8x256xbf16>
    %cst_89 = arith.constant 0.000000e+00 : bf16
    %192 = vector.broadcast %cst_89 : bf16 to vector<8x256xbf16>
    %193 = vector.shape_cast %190 : vector<1x256xi1> to vector<1x256xi1>
    %194 = vector.broadcast %193 : vector<1x256xi1> to vector<8x256xi1>
    %195 = arith.select %194, %191, %192 : vector<8x256xi1>, vector<8x256xbf16>
    %c14 = arith.constant 14 : index
    %c0_90 = arith.constant 0 : index
    %c0_91 = arith.constant 0 : index
    %196 = vector.load %arg1[%c14, %c0_90, %c0_91] : memref<27x4x8xbf16, #tpu.memory_space<vmem>>, vector<1x4x8xbf16>
    %197 = vector.shape_cast %196 : vector<1x4x8xbf16> to vector<4x8xbf16>
    %cst_92 = arith.constant dense<0.000000e+00> : vector<4x256xf32>
    %198 = tpu.matmul %197, %195, %cst_92 {dimension_numbers = #tpu.dot_dimension_numbers<[1], [0], [0], [1], [0, 0, 1, 1], [], []>} : vector<4x8xbf16>, vector<8x256xbf16>, vector<4x256xf32> -> vector<4x256xf32>
    %199 = arith.addf %186, %198 : vector<4x256xf32>
    %c49_i32 = arith.constant 49 : i32
    %200 = vector.broadcast %c49_i32 : i32 to vector<1x256xi32>
    %201 = arith.andi %3, %200 : vector<1x256xi32>
    %c49_i32_93 = arith.constant 49 : i32
    %202 = vector.broadcast %c49_i32_93 : i32 to vector<1x256xi32>
    %203 = arith.cmpi eq, %201, %202 : vector<1x256xi32>
    %c0_94 = arith.constant 0 : index
    %c135 = arith.constant 135 : index
    %204 = vector.load %arg7[%c0_94, %c135] : memref<8x512xbf16, #tpu.memory_space<vmem>>, vector<8x256xbf16>
    %cst_95 = arith.constant 0.000000e+00 : bf16
    %205 = vector.broadcast %cst_95 : bf16 to vector<8x256xbf16>
    %206 = vector.shape_cast %203 : vector<1x256xi1> to vector<1x256xi1>
    %207 = vector.broadcast %206 : vector<1x256xi1> to vector<8x256xi1>
    %208 = arith.select %207, %204, %205 : vector<8x256xi1>, vector<8x256xbf16>
    %c15 = arith.constant 15 : index
    %c0_96 = arith.constant 0 : index
    %c0_97 = arith.constant 0 : index
    %209 = vector.load %arg1[%c15, %c0_96, %c0_97] : memref<27x4x8xbf16, #tpu.memory_space<vmem>>, vector<1x4x8xbf16>
    %210 = vector.shape_cast %209 : vector<1x4x8xbf16> to vector<4x8xbf16>
    %cst_98 = arith.constant dense<0.000000e+00> : vector<4x256xf32>
    %211 = tpu.matmul %210, %208, %cst_98 {dimension_numbers = #tpu.dot_dimension_numbers<[1], [0], [0], [1], [0, 0, 1, 1], [], []>} : vector<4x8xbf16>, vector<8x256xbf16>, vector<4x256xf32> -> vector<4x256xf32>
    %212 = arith.addf %199, %211 : vector<4x256xf32>
    %c17_i32 = arith.constant 17 : i32
    %213 = vector.broadcast %c17_i32 : i32 to vector<1x256xi32>
    %214 = arith.andi %3, %213 : vector<1x256xi32>
    %c17_i32_99 = arith.constant 17 : i32
    %215 = vector.broadcast %c17_i32_99 : i32 to vector<1x256xi32>
    %216 = arith.cmpi eq, %214, %215 : vector<1x256xi32>
    %c0_100 = arith.constant 0 : index
    %c136 = arith.constant 136 : index
    %217 = vector.load %arg7[%c0_100, %c136] : memref<8x512xbf16, #tpu.memory_space<vmem>>, vector<8x256xbf16>
    %cst_101 = arith.constant 0.000000e+00 : bf16
    %218 = vector.broadcast %cst_101 : bf16 to vector<8x256xbf16>
    %219 = vector.shape_cast %216 : vector<1x256xi1> to vector<1x256xi1>
    %220 = vector.broadcast %219 : vector<1x256xi1> to vector<8x256xi1>
    %221 = arith.select %220, %217, %218 : vector<8x256xi1>, vector<8x256xbf16>
    %c16 = arith.constant 16 : index
    %c0_102 = arith.constant 0 : index
    %c0_103 = arith.constant 0 : index
    %222 = vector.load %arg1[%c16, %c0_102, %c0_103] : memref<27x4x8xbf16, #tpu.memory_space<vmem>>, vector<1x4x8xbf16>
    %223 = vector.shape_cast %222 : vector<1x4x8xbf16> to vector<4x8xbf16>
    %cst_104 = arith.constant dense<0.000000e+00> : vector<4x256xf32>
    %224 = tpu.matmul %223, %221, %cst_104 {dimension_numbers = #tpu.dot_dimension_numbers<[1], [0], [0], [1], [0, 0, 1, 1], [], []>} : vector<4x8xbf16>, vector<8x256xbf16>, vector<4x256xf32> -> vector<4x256xf32>
    %225 = arith.addf %212, %224 : vector<4x256xf32>
    %c81_i32 = arith.constant 81 : i32
    %226 = vector.broadcast %c81_i32 : i32 to vector<1x256xi32>
    %227 = arith.andi %3, %226 : vector<1x256xi32>
    %c81_i32_105 = arith.constant 81 : i32
    %228 = vector.broadcast %c81_i32_105 : i32 to vector<1x256xi32>
    %229 = arith.cmpi eq, %227, %228 : vector<1x256xi32>
    %c0_106 = arith.constant 0 : index
    %c137 = arith.constant 137 : index
    %230 = vector.load %arg7[%c0_106, %c137] : memref<8x512xbf16, #tpu.memory_space<vmem>>, vector<8x256xbf16>
    %cst_107 = arith.constant 0.000000e+00 : bf16
    %231 = vector.broadcast %cst_107 : bf16 to vector<8x256xbf16>
    %232 = vector.shape_cast %229 : vector<1x256xi1> to vector<1x256xi1>
    %233 = vector.broadcast %232 : vector<1x256xi1> to vector<8x256xi1>
    %234 = arith.select %233, %230, %231 : vector<8x256xi1>, vector<8x256xbf16>
    %c17 = arith.constant 17 : index
    %c0_108 = arith.constant 0 : index
    %c0_109 = arith.constant 0 : index
    %235 = vector.load %arg1[%c17, %c0_108, %c0_109] : memref<27x4x8xbf16, #tpu.memory_space<vmem>>, vector<1x4x8xbf16>
    %236 = vector.shape_cast %235 : vector<1x4x8xbf16> to vector<4x8xbf16>
    %cst_110 = arith.constant dense<0.000000e+00> : vector<4x256xf32>
    %237 = tpu.matmul %236, %234, %cst_110 {dimension_numbers = #tpu.dot_dimension_numbers<[1], [0], [0], [1], [0, 0, 1, 1], [], []>} : vector<4x8xbf16>, vector<8x256xbf16>, vector<4x256xf32> -> vector<4x256xf32>
    %238 = arith.addf %225, %237 : vector<4x256xf32>
    %c45_i32 = arith.constant 45 : i32
    %239 = vector.broadcast %c45_i32 : i32 to vector<1x256xi32>
    %240 = arith.andi %3, %239 : vector<1x256xi32>
    %c45_i32_111 = arith.constant 45 : i32
    %241 = vector.broadcast %c45_i32_111 : i32 to vector<1x256xi32>
    %242 = arith.cmpi eq, %240, %241 : vector<1x256xi32>
    %c0_112 = arith.constant 0 : index
    %c183 = arith.constant 183 : index
    %243 = vector.load %arg7[%c0_112, %c183] : memref<8x512xbf16, #tpu.memory_space<vmem>>, vector<8x256xbf16>
    %cst_113 = arith.constant 0.000000e+00 : bf16
    %244 = vector.broadcast %cst_113 : bf16 to vector<8x256xbf16>
    %245 = vector.shape_cast %242 : vector<1x256xi1> to vector<1x256xi1>
    %246 = vector.broadcast %245 : vector<1x256xi1> to vector<8x256xi1>
    %247 = arith.select %246, %243, %244 : vector<8x256xi1>, vector<8x256xbf16>
    %c18 = arith.constant 18 : index
    %c0_114 = arith.constant 0 : index
    %c0_115 = arith.constant 0 : index
    %248 = vector.load %arg1[%c18, %c0_114, %c0_115] : memref<27x4x8xbf16, #tpu.memory_space<vmem>>, vector<1x4x8xbf16>
    %249 = vector.shape_cast %248 : vector<1x4x8xbf16> to vector<4x8xbf16>
    %cst_116 = arith.constant dense<0.000000e+00> : vector<4x256xf32>
    %250 = tpu.matmul %249, %247, %cst_116 {dimension_numbers = #tpu.dot_dimension_numbers<[1], [0], [0], [1], [0, 0, 1, 1], [], []>} : vector<4x8xbf16>, vector<8x256xbf16>, vector<4x256xf32> -> vector<4x256xf32>
    %251 = arith.addf %238, %250 : vector<4x256xf32>
    %c13_i32 = arith.constant 13 : i32
    %252 = vector.broadcast %c13_i32 : i32 to vector<1x256xi32>
    %253 = arith.andi %3, %252 : vector<1x256xi32>
    %c13_i32_117 = arith.constant 13 : i32
    %254 = vector.broadcast %c13_i32_117 : i32 to vector<1x256xi32>
    %255 = arith.cmpi eq, %253, %254 : vector<1x256xi32>
    %c0_118 = arith.constant 0 : index
    %c184 = arith.constant 184 : index
    %256 = vector.load %arg7[%c0_118, %c184] : memref<8x512xbf16, #tpu.memory_space<vmem>>, vector<8x256xbf16>
    %cst_119 = arith.constant 0.000000e+00 : bf16
    %257 = vector.broadcast %cst_119 : bf16 to vector<8x256xbf16>
    %258 = vector.shape_cast %255 : vector<1x256xi1> to vector<1x256xi1>
    %259 = vector.broadcast %258 : vector<1x256xi1> to vector<8x256xi1>
    %260 = arith.select %259, %256, %257 : vector<8x256xi1>, vector<8x256xbf16>
    %c19 = arith.constant 19 : index
    %c0_120 = arith.constant 0 : index
    %c0_121 = arith.constant 0 : index
    %261 = vector.load %arg1[%c19, %c0_120, %c0_121] : memref<27x4x8xbf16, #tpu.memory_space<vmem>>, vector<1x4x8xbf16>
    %262 = vector.shape_cast %261 : vector<1x4x8xbf16> to vector<4x8xbf16>
    %cst_122 = arith.constant dense<0.000000e+00> : vector<4x256xf32>
    %263 = tpu.matmul %262, %260, %cst_122 {dimension_numbers = #tpu.dot_dimension_numbers<[1], [0], [0], [1], [0, 0, 1, 1], [], []>} : vector<4x8xbf16>, vector<8x256xbf16>, vector<4x256xf32> -> vector<4x256xf32>
    %264 = arith.addf %251, %263 : vector<4x256xf32>
    %c77_i32 = arith.constant 77 : i32
    %265 = vector.broadcast %c77_i32 : i32 to vector<1x256xi32>
    %266 = arith.andi %3, %265 : vector<1x256xi32>
    %c77_i32_123 = arith.constant 77 : i32
    %267 = vector.broadcast %c77_i32_123 : i32 to vector<1x256xi32>
    %268 = arith.cmpi eq, %266, %267 : vector<1x256xi32>
    %c0_124 = arith.constant 0 : index
    %c185 = arith.constant 185 : index
    %269 = vector.load %arg7[%c0_124, %c185] : memref<8x512xbf16, #tpu.memory_space<vmem>>, vector<8x256xbf16>
    %cst_125 = arith.constant 0.000000e+00 : bf16
    %270 = vector.broadcast %cst_125 : bf16 to vector<8x256xbf16>
    %271 = vector.shape_cast %268 : vector<1x256xi1> to vector<1x256xi1>
    %272 = vector.broadcast %271 : vector<1x256xi1> to vector<8x256xi1>
    %273 = arith.select %272, %269, %270 : vector<8x256xi1>, vector<8x256xbf16>
    %c20 = arith.constant 20 : index
    %c0_126 = arith.constant 0 : index
    %c0_127 = arith.constant 0 : index
    %274 = vector.load %arg1[%c20, %c0_126, %c0_127] : memref<27x4x8xbf16, #tpu.memory_space<vmem>>, vector<1x4x8xbf16>
    %275 = vector.shape_cast %274 : vector<1x4x8xbf16> to vector<4x8xbf16>
    %cst_128 = arith.constant dense<0.000000e+00> : vector<4x256xf32>
    %276 = tpu.matmul %275, %273, %cst_128 {dimension_numbers = #tpu.dot_dimension_numbers<[1], [0], [0], [1], [0, 0, 1, 1], [], []>} : vector<4x8xbf16>, vector<8x256xbf16>, vector<4x256xf32> -> vector<4x256xf32>
    %277 = arith.addf %264, %276 : vector<4x256xf32>
    %c37_i32 = arith.constant 37 : i32
    %278 = vector.broadcast %c37_i32 : i32 to vector<1x256xi32>
    %279 = arith.andi %3, %278 : vector<1x256xi32>
    %c37_i32_129 = arith.constant 37 : i32
    %280 = vector.broadcast %c37_i32_129 : i32 to vector<1x256xi32>
    %281 = arith.cmpi eq, %279, %280 : vector<1x256xi32>
    %c0_130 = arith.constant 0 : index
    %c191 = arith.constant 191 : index
    %282 = vector.load %arg7[%c0_130, %c191] : memref<8x512xbf16, #tpu.memory_space<vmem>>, vector<8x256xbf16>
    %cst_131 = arith.constant 0.000000e+00 : bf16
    %283 = vector.broadcast %cst_131 : bf16 to vector<8x256xbf16>
    %284 = vector.shape_cast %281 : vector<1x256xi1> to vector<1x256xi1>
    %285 = vector.broadcast %284 : vector<1x256xi1> to vector<8x256xi1>
    %286 = arith.select %285, %282, %283 : vector<8x256xi1>, vector<8x256xbf16>
    %c21 = arith.constant 21 : index
    %c0_132 = arith.constant 0 : index
    %c0_133 = arith.constant 0 : index
    %287 = vector.load %arg1[%c21, %c0_132, %c0_133] : memref<27x4x8xbf16, #tpu.memory_space<vmem>>, vector<1x4x8xbf16>
    %288 = vector.shape_cast %287 : vector<1x4x8xbf16> to vector<4x8xbf16>
    %cst_134 = arith.constant dense<0.000000e+00> : vector<4x256xf32>
    %289 = tpu.matmul %288, %286, %cst_134 {dimension_numbers = #tpu.dot_dimension_numbers<[1], [0], [0], [1], [0, 0, 1, 1], [], []>} : vector<4x8xbf16>, vector<8x256xbf16>, vector<4x256xf32> -> vector<4x256xf32>
    %290 = arith.addf %277, %289 : vector<4x256xf32>
    %c5_i32 = arith.constant 5 : i32
    %291 = vector.broadcast %c5_i32 : i32 to vector<1x256xi32>
    %292 = arith.andi %3, %291 : vector<1x256xi32>
    %c5_i32_135 = arith.constant 5 : i32
    %293 = vector.broadcast %c5_i32_135 : i32 to vector<1x256xi32>
    %294 = arith.cmpi eq, %292, %293 : vector<1x256xi32>
    %c0_136 = arith.constant 0 : index
    %c192 = arith.constant 192 : index
    %295 = vector.load %arg7[%c0_136, %c192] : memref<8x512xbf16, #tpu.memory_space<vmem>>, vector<8x256xbf16>
    %cst_137 = arith.constant 0.000000e+00 : bf16
    %296 = vector.broadcast %cst_137 : bf16 to vector<8x256xbf16>
    %297 = vector.shape_cast %294 : vector<1x256xi1> to vector<1x256xi1>
    %298 = vector.broadcast %297 : vector<1x256xi1> to vector<8x256xi1>
    %299 = arith.select %298, %295, %296 : vector<8x256xi1>, vector<8x256xbf16>
    %c22 = arith.constant 22 : index
    %c0_138 = arith.constant 0 : index
    %c0_139 = arith.constant 0 : index
    %300 = vector.load %arg1[%c22, %c0_138, %c0_139] : memref<27x4x8xbf16, #tpu.memory_space<vmem>>, vector<1x4x8xbf16>
    %301 = vector.shape_cast %300 : vector<1x4x8xbf16> to vector<4x8xbf16>
    %cst_140 = arith.constant dense<0.000000e+00> : vector<4x256xf32>
    %302 = tpu.matmul %301, %299, %cst_140 {dimension_numbers = #tpu.dot_dimension_numbers<[1], [0], [0], [1], [0, 0, 1, 1], [], []>} : vector<4x8xbf16>, vector<8x256xbf16>, vector<4x256xf32> -> vector<4x256xf32>
    %303 = arith.addf %290, %302 : vector<4x256xf32>
    %c69_i32 = arith.constant 69 : i32
    %304 = vector.broadcast %c69_i32 : i32 to vector<1x256xi32>
    %305 = arith.andi %3, %304 : vector<1x256xi32>
    %c69_i32_141 = arith.constant 69 : i32
    %306 = vector.broadcast %c69_i32_141 : i32 to vector<1x256xi32>
    %307 = arith.cmpi eq, %305, %306 : vector<1x256xi32>
    %c0_142 = arith.constant 0 : index
    %c193 = arith.constant 193 : index
    %308 = vector.load %arg7[%c0_142, %c193] : memref<8x512xbf16, #tpu.memory_space<vmem>>, vector<8x256xbf16>
    %cst_143 = arith.constant 0.000000e+00 : bf16
    %309 = vector.broadcast %cst_143 : bf16 to vector<8x256xbf16>
    %310 = vector.shape_cast %307 : vector<1x256xi1> to vector<1x256xi1>
    %311 = vector.broadcast %310 : vector<1x256xi1> to vector<8x256xi1>
    %312 = arith.select %311, %308, %309 : vector<8x256xi1>, vector<8x256xbf16>
    %c23 = arith.constant 23 : index
    %c0_144 = arith.constant 0 : index
    %c0_145 = arith.constant 0 : index
    %313 = vector.load %arg1[%c23, %c0_144, %c0_145] : memref<27x4x8xbf16, #tpu.memory_space<vmem>>, vector<1x4x8xbf16>
    %314 = vector.shape_cast %313 : vector<1x4x8xbf16> to vector<4x8xbf16>
    %cst_146 = arith.constant dense<0.000000e+00> : vector<4x256xf32>
    %315 = tpu.matmul %314, %312, %cst_146 {dimension_numbers = #tpu.dot_dimension_numbers<[1], [0], [0], [1], [0, 0, 1, 1], [], []>} : vector<4x8xbf16>, vector<8x256xbf16>, vector<4x256xf32> -> vector<4x256xf32>
    %316 = arith.addf %303, %315 : vector<4x256xf32>
    %c53_i32 = arith.constant 53 : i32
    %317 = vector.broadcast %c53_i32 : i32 to vector<1x256xi32>
    %318 = arith.andi %3, %317 : vector<1x256xi32>
    %c53_i32_147 = arith.constant 53 : i32
    %319 = vector.broadcast %c53_i32_147 : i32 to vector<1x256xi32>
    %320 = arith.cmpi eq, %318, %319 : vector<1x256xi32>
    %c0_148 = arith.constant 0 : index
    %c199 = arith.constant 199 : index
    %321 = vector.load %arg7[%c0_148, %c199] : memref<8x512xbf16, #tpu.memory_space<vmem>>, vector<8x256xbf16>
    %cst_149 = arith.constant 0.000000e+00 : bf16
    %322 = vector.broadcast %cst_149 : bf16 to vector<8x256xbf16>
    %323 = vector.shape_cast %320 : vector<1x256xi1> to vector<1x256xi1>
    %324 = vector.broadcast %323 : vector<1x256xi1> to vector<8x256xi1>
    %325 = arith.select %324, %321, %322 : vector<8x256xi1>, vector<8x256xbf16>
    %c24 = arith.constant 24 : index
    %c0_150 = arith.constant 0 : index
    %c0_151 = arith.constant 0 : index
    %326 = vector.load %arg1[%c24, %c0_150, %c0_151] : memref<27x4x8xbf16, #tpu.memory_space<vmem>>, vector<1x4x8xbf16>
    %327 = vector.shape_cast %326 : vector<1x4x8xbf16> to vector<4x8xbf16>
    %cst_152 = arith.constant dense<0.000000e+00> : vector<4x256xf32>
    %328 = tpu.matmul %327, %325, %cst_152 {dimension_numbers = #tpu.dot_dimension_numbers<[1], [0], [0], [1], [0, 0, 1, 1], [], []>} : vector<4x8xbf16>, vector<8x256xbf16>, vector<4x256xf32> -> vector<4x256xf32>
    %329 = arith.addf %316, %328 : vector<4x256xf32>
    %c21_i32 = arith.constant 21 : i32
    %330 = vector.broadcast %c21_i32 : i32 to vector<1x256xi32>
    %331 = arith.andi %3, %330 : vector<1x256xi32>
    %c21_i32_153 = arith.constant 21 : i32
    %332 = vector.broadcast %c21_i32_153 : i32 to vector<1x256xi32>
    %333 = arith.cmpi eq, %331, %332 : vector<1x256xi32>
    %c0_154 = arith.constant 0 : index
    %c200 = arith.constant 200 : index
    %334 = vector.load %arg7[%c0_154, %c200] : memref<8x512xbf16, #tpu.memory_space<vmem>>, vector<8x256xbf16>
    %cst_155 = arith.constant 0.000000e+00 : bf16
    %335 = vector.broadcast %cst_155 : bf16 to vector<8x256xbf16>
    %336 = vector.shape_cast %333 : vector<1x256xi1> to vector<1x256xi1>
    %337 = vector.broadcast %336 : vector<1x256xi1> to vector<8x256xi1>
    %338 = arith.select %337, %334, %335 : vector<8x256xi1>, vector<8x256xbf16>
    %c25 = arith.constant 25 : index
    %c0_156 = arith.constant 0 : index
    %c0_157 = arith.constant 0 : index
    %339 = vector.load %arg1[%c25, %c0_156, %c0_157] : memref<27x4x8xbf16, #tpu.memory_space<vmem>>, vector<1x4x8xbf16>
    %340 = vector.shape_cast %339 : vector<1x4x8xbf16> to vector<4x8xbf16>
    %cst_158 = arith.constant dense<0.000000e+00> : vector<4x256xf32>
    %341 = tpu.matmul %340, %338, %cst_158 {dimension_numbers = #tpu.dot_dimension_numbers<[1], [0], [0], [1], [0, 0, 1, 1], [], []>} : vector<4x8xbf16>, vector<8x256xbf16>, vector<4x256xf32> -> vector<4x256xf32>
    %342 = arith.addf %329, %341 : vector<4x256xf32>
    %c85_i32 = arith.constant 85 : i32
    %343 = vector.broadcast %c85_i32 : i32 to vector<1x256xi32>
    %344 = arith.andi %3, %343 : vector<1x256xi32>
    %c85_i32_159 = arith.constant 85 : i32
    %345 = vector.broadcast %c85_i32_159 : i32 to vector<1x256xi32>
    %346 = arith.cmpi eq, %344, %345 : vector<1x256xi32>
    %c0_160 = arith.constant 0 : index
    %c201 = arith.constant 201 : index
    %347 = vector.load %arg7[%c0_160, %c201] : memref<8x512xbf16, #tpu.memory_space<vmem>>, vector<8x256xbf16>
    %cst_161 = arith.constant 0.000000e+00 : bf16
    %348 = vector.broadcast %cst_161 : bf16 to vector<8x256xbf16>
    %349 = vector.shape_cast %346 : vector<1x256xi1> to vector<1x256xi1>
    %350 = vector.broadcast %349 : vector<1x256xi1> to vector<8x256xi1>
    %351 = arith.select %350, %347, %348 : vector<8x256xi1>, vector<8x256xbf16>
    %c26 = arith.constant 26 : index
    %c0_162 = arith.constant 0 : index
    %c0_163 = arith.constant 0 : index
    %352 = vector.load %arg1[%c26, %c0_162, %c0_163] : memref<27x4x8xbf16, #tpu.memory_space<vmem>>, vector<1x4x8xbf16>
    %353 = vector.shape_cast %352 : vector<1x4x8xbf16> to vector<4x8xbf16>
    %cst_164 = arith.constant dense<0.000000e+00> : vector<4x256xf32>
    %354 = tpu.matmul %353, %351, %cst_164 {dimension_numbers = #tpu.dot_dimension_numbers<[1], [0], [0], [1], [0, 0, 1, 1], [], []>} : vector<4x8xbf16>, vector<8x256xbf16>, vector<4x256xf32> -> vector<4x256xf32>
    %355 = arith.addf %342, %354 : vector<4x256xf32>
    %c0_165 = arith.constant 0 : index
    %c0_166 = arith.constant 0 : index
    %356 = vector.load %arg4[%c0_165, %c0_166] : memref<4x1xf32, #tpu.memory_space<vmem>>, vector<4x1xf32>
    %357 = vector.broadcast %356 : vector<4x1xf32> to vector<4x256xf32>
    %358 = arith.mulf %355, %357 : vector<4x256xf32>
    %c0_167 = arith.constant 0 : index
    %c0_168 = arith.constant 0 : index
    %359 = vector.load %arg5[%c0_167, %c0_168] : memref<4x1xf32, #tpu.memory_space<vmem>>, vector<4x1xf32>
    %360 = vector.broadcast %359 : vector<4x1xf32> to vector<4x256xf32>
    %361 = arith.addf %358, %360 : vector<4x256xf32>
    %cst_169 = arith.constant 0.000000e+00 : f32
    %362 = vector.broadcast %cst_169 : f32 to vector<4x256xf32>
    %363 = arith.maximumf %361, %362 : vector<4x256xf32>
    %364 = arith.truncf %363 : vector<4x256xf32> to vector<4x256xbf16>
    %c0_170 = arith.constant 0 : index
    %c0_171 = arith.constant 0 : index
    %365 = vector.load %arg6[%c0_170, %c0_171] : memref<4x256xbf16, #tpu.memory_space<vmem>>, vector<4x256xbf16>
    tpu.vector_store %arg6[%c0_170, %c0_171], %364 {strides = array<i32>} : memref<4x256xbf16, #tpu.memory_space<vmem>>, vector<4x256xbf16>,
    return
  }
  func.func @transform_0(%arg0: i32) -> (i32, i32, i32) {
    %c0_i32 = arith.constant 0 : i32
    %c0_i32_0 = arith.constant 0 : i32
    %c0_i32_1 = arith.constant 0 : i32
    %c0_i32_2 = arith.constant 0 : i32
    return %c0_i32, %c0_i32_0, %c0_i32_1 : i32, i32, i32
  }
  func.func @transform_1(%arg0: i32) -> (i32, i32) {
    %c0_i32 = arith.constant 0 : i32
    %c0_i32_0 = arith.constant 0 : i32
    %c0_i32_1 = arith.constant 0 : i32
    return %c0_i32, %c0_i32_0 : i32, i32
  }
  func.func @transform_2(%arg0: i32) -> (i32, i32) {
    %c0_i32 = arith.constant 0 : i32
    %c0_i32_0 = arith.constant 0 : i32
    return %c0_i32, %arg0 : i32, i32
  }
  func.func @transform_3(%arg0: i32) -> (i32, i32) {
    %c0_i32 = arith.constant 0 : i32
    %c0_i32_0 = arith.constant 0 : i32
    %c0_i32_1 = arith.constant 0 : i32
    return %c0_i32, %c0_i32_0 : i32, i32
  }
  func.func @transform_4(%arg0: i32) -> (i32, i32) {
    %c0_i32 = arith.constant 0 : i32
    %c0_i32_0 = arith.constant 0 : i32
    %c0_i32_1 = arith.constant 0 : i32
    return %c0_i32, %c0_i32_0 : i32, i32
  }
  func.func @transform_5(%arg0: i32) -> (i32, i32) {
    %c0_i32 = arith.constant 0 : i32
    %c0_i32_0 = arith.constant 0 : i32
    return %c0_i32, %arg0 : i32, i32
  }
}

module attributes {stable_mosaic.version = 11 : i64} {
  func.func @_conv_bn_act_kernel(%arg0: i32, %arg1: memref<27x4x8xbf16, #tpu.memory_space<vmem>>, %arg2: memref<8x1280xbf16, #tpu.memory_space<vmem>>, %arg3: memref<1x256xi32, #tpu.memory_space<vmem>>, %arg4: memref<4x1xf32, #tpu.memory_space<vmem>>, %arg5: memref<4x1xf32, #tpu.memory_space<vmem>>, %arg6: memref<4x256xf32, #tpu.memory_space<vmem>>, %arg7: memref<4x256xf32, #tpu.memory_space<vmem>>, %arg8: memref<8x512xbf16, #tpu.memory_space<vmem>>, %arg9: memref<!tpu.dma_semaphore, #tpu.memory_space<semaphore_mem>>) attributes {dimension_semantics = [#tpu.dimension_semantics<parallel>], iteration_bounds = array<i64: 4>, scalar_prefetch = 0 : i64, scratch_operands = 2 : i64, tpu.core_type = #tpu.core_type<tc>, window_params = [{pipeline_mode = #tpu.pipeline_mode<synchronous>, transform_indices = @transform_0, window_bounds = array<i64: 27, 4, 8>}, {pipeline_mode = #tpu.pipeline_mode<synchronous>, transform_indices = @transform_1, window_bounds = array<i64: 8, 1280>}, {transform_indices = @transform_2, window_bounds = array<i64: 1, 256>}, {pipeline_mode = #tpu.pipeline_mode<synchronous>, transform_indices = @transform_3, window_bounds = array<i64: 4, 1>}, {pipeline_mode = #tpu.pipeline_mode<synchronous>, transform_indices = @transform_4, window_bounds = array<i64: 4, 1>}, {transform_indices = @transform_5, window_bounds = array<i64: 4, 256>}, {transform_indices = @transform_6, window_bounds = array<i64: 4, 256>}]} {
    %c256_i32 = arith.constant 256 : i32
    %0 = arith.muli %arg0, %c256_i32 : i32
    %c0_i32 = arith.constant 0 : i32
    %1 = tpu.memref_slice %arg2[%c0_i32, %0] : memref<8x1280xbf16, #tpu.memory_space<vmem>> -> memref<8x512xbf16, #tpu.memory_space<vmem>>
    tpu.enqueue_dma source(%1 : memref<8x512xbf16, #tpu.memory_space<vmem>>) target(%arg8 : memref<8x512xbf16, #tpu.memory_space<vmem>>) target_semaphore(%arg9 : memref<!tpu.dma_semaphore, #tpu.memory_space<semaphore_mem>>)
    %c0_i32_0 = arith.constant 0 : i32
    %2 = tpu.memref_slice %arg2[%c0_i32_0, %0] : memref<8x1280xbf16, #tpu.memory_space<vmem>> -> memref<8x512xbf16, #tpu.memory_space<vmem>>
    tpu.wait_dma2 semaphore(%arg9 : memref<!tpu.dma_semaphore, #tpu.memory_space<semaphore_mem>>) src(%2 : memref<8x512xbf16, #tpu.memory_space<vmem>>) dst(%arg8 : memref<8x512xbf16, #tpu.memory_space<vmem>>)
    %c0 = arith.constant 0 : index
    %c0_1 = arith.constant 0 : index
    %3 = vector.load %arg3[%c0, %c0_1] : memref<1x256xi32, #tpu.memory_space<vmem>>, vector<1x256xi32>
    %cst = arith.constant 0.000000e+00 : f32
    %4 = vector.broadcast %cst : f32 to vector<4x256xf32>
    %c43_i32 = arith.constant 43 : i32
    %5 = vector.broadcast %c43_i32 : i32 to vector<1x256xi32>
    %6 = arith.andi %3, %5 : vector<1x256xi32>
    %c43_i32_2 = arith.constant 43 : i32
    %7 = vector.broadcast %c43_i32_2 : i32 to vector<1x256xi32>
    %8 = arith.cmpi eq, %6, %7 : vector<1x256xi32>
    %c0_3 = arith.constant 0 : index
    %c55 = arith.constant 55 : index
    %9 = vector.load %arg8[%c0_3, %c55] : memref<8x512xbf16, #tpu.memory_space<vmem>>, vector<8x256xbf16>
    %cst_4 = arith.constant 0.000000e+00 : bf16
    %10 = vector.broadcast %cst_4 : bf16 to vector<8x256xbf16>
    %11 = vector.shape_cast %8 : vector<1x256xi1> to vector<1x256xi1>
    %12 = vector.broadcast %11 : vector<1x256xi1> to vector<8x256xi1>
    %13 = arith.select %12, %9, %10 : vector<8x256xi1>, vector<8x256xbf16>
    %c0_5 = arith.constant 0 : index
    %c0_6 = arith.constant 0 : index
    %c0_7 = arith.constant 0 : index
    %14 = vector.load %arg1[%c0_5, %c0_6, %c0_7] : memref<27x4x8xbf16, #tpu.memory_space<vmem>>, vector<1x4x8xbf16>
    %15 = vector.shape_cast %14 : vector<1x4x8xbf16> to vector<4x8xbf16>
    %cst_8 = arith.constant dense<0.000000e+00> : vector<4x256xf32>
    %16 = tpu.matmul %15, %13, %cst_8 {dimension_numbers = #tpu.dot_dimension_numbers<[1], [0], [0], [1], [0, 0, 1, 1], [], []>} : vector<4x8xbf16>, vector<8x256xbf16>, vector<4x256xf32> -> vector<4x256xf32>
    %17 = arith.addf %4, %16 : vector<4x256xf32>
    %c11_i32 = arith.constant 11 : i32
    %18 = vector.broadcast %c11_i32 : i32 to vector<1x256xi32>
    %19 = arith.andi %3, %18 : vector<1x256xi32>
    %c11_i32_9 = arith.constant 11 : i32
    %20 = vector.broadcast %c11_i32_9 : i32 to vector<1x256xi32>
    %21 = arith.cmpi eq, %19, %20 : vector<1x256xi32>
    %c0_10 = arith.constant 0 : index
    %c56 = arith.constant 56 : index
    %22 = vector.load %arg8[%c0_10, %c56] : memref<8x512xbf16, #tpu.memory_space<vmem>>, vector<8x256xbf16>
    %cst_11 = arith.constant 0.000000e+00 : bf16
    %23 = vector.broadcast %cst_11 : bf16 to vector<8x256xbf16>
    %24 = vector.shape_cast %21 : vector<1x256xi1> to vector<1x256xi1>
    %25 = vector.broadcast %24 : vector<1x256xi1> to vector<8x256xi1>
    %26 = arith.select %25, %22, %23 : vector<8x256xi1>, vector<8x256xbf16>
    %c1 = arith.constant 1 : index
    %c0_12 = arith.constant 0 : index
    %c0_13 = arith.constant 0 : index
    %27 = vector.load %arg1[%c1, %c0_12, %c0_13] : memref<27x4x8xbf16, #tpu.memory_space<vmem>>, vector<1x4x8xbf16>
    %28 = vector.shape_cast %27 : vector<1x4x8xbf16> to vector<4x8xbf16>
    %cst_14 = arith.constant dense<0.000000e+00> : vector<4x256xf32>
    %29 = tpu.matmul %28, %26, %cst_14 {dimension_numbers = #tpu.dot_dimension_numbers<[1], [0], [0], [1], [0, 0, 1, 1], [], []>} : vector<4x8xbf16>, vector<8x256xbf16>, vector<4x256xf32> -> vector<4x256xf32>
    %30 = arith.addf %17, %29 : vector<4x256xf32>
    %c75_i32 = arith.constant 75 : i32
    %31 = vector.broadcast %c75_i32 : i32 to vector<1x256xi32>
    %32 = arith.andi %3, %31 : vector<1x256xi32>
    %c75_i32_15 = arith.constant 75 : i32
    %33 = vector.broadcast %c75_i32_15 : i32 to vector<1x256xi32>
    %34 = arith.cmpi eq, %32, %33 : vector<1x256xi32>
    %c0_16 = arith.constant 0 : index
    %c57 = arith.constant 57 : index
    %35 = vector.load %arg8[%c0_16, %c57] : memref<8x512xbf16, #tpu.memory_space<vmem>>, vector<8x256xbf16>
    %cst_17 = arith.constant 0.000000e+00 : bf16
    %36 = vector.broadcast %cst_17 : bf16 to vector<8x256xbf16>
    %37 = vector.shape_cast %34 : vector<1x256xi1> to vector<1x256xi1>
    %38 = vector.broadcast %37 : vector<1x256xi1> to vector<8x256xi1>
    %39 = arith.select %38, %35, %36 : vector<8x256xi1>, vector<8x256xbf16>
    %c2 = arith.constant 2 : index
    %c0_18 = arith.constant 0 : index
    %c0_19 = arith.constant 0 : index
    %40 = vector.load %arg1[%c2, %c0_18, %c0_19] : memref<27x4x8xbf16, #tpu.memory_space<vmem>>, vector<1x4x8xbf16>
    %41 = vector.shape_cast %40 : vector<1x4x8xbf16> to vector<4x8xbf16>
    %cst_20 = arith.constant dense<0.000000e+00> : vector<4x256xf32>
    %42 = tpu.matmul %41, %39, %cst_20 {dimension_numbers = #tpu.dot_dimension_numbers<[1], [0], [0], [1], [0, 0, 1, 1], [], []>} : vector<4x8xbf16>, vector<8x256xbf16>, vector<4x256xf32> -> vector<4x256xf32>
    %43 = arith.addf %30, %42 : vector<4x256xf32>
    %c35_i32 = arith.constant 35 : i32
    %44 = vector.broadcast %c35_i32 : i32 to vector<1x256xi32>
    %45 = arith.andi %3, %44 : vector<1x256xi32>
    %c35_i32_21 = arith.constant 35 : i32
    %46 = vector.broadcast %c35_i32_21 : i32 to vector<1x256xi32>
    %47 = arith.cmpi eq, %45, %46 : vector<1x256xi32>
    %c0_22 = arith.constant 0 : index
    %c63 = arith.constant 63 : index
    %48 = vector.load %arg8[%c0_22, %c63] : memref<8x512xbf16, #tpu.memory_space<vmem>>, vector<8x256xbf16>
    %cst_23 = arith.constant 0.000000e+00 : bf16
    %49 = vector.broadcast %cst_23 : bf16 to vector<8x256xbf16>
    %50 = vector.shape_cast %47 : vector<1x256xi1> to vector<1x256xi1>
    %51 = vector.broadcast %50 : vector<1x256xi1> to vector<8x256xi1>
    %52 = arith.select %51, %48, %49 : vector<8x256xi1>, vector<8x256xbf16>
    %c3 = arith.constant 3 : index
    %c0_24 = arith.constant 0 : index
    %c0_25 = arith.constant 0 : index
    %53 = vector.load %arg1[%c3, %c0_24, %c0_25] : memref<27x4x8xbf16, #tpu.memory_space<vmem>>, vector<1x4x8xbf16>
    %54 = vector.shape_cast %53 : vector<1x4x8xbf16> to vector<4x8xbf16>
    %cst_26 = arith.constant dense<0.000000e+00> : vector<4x256xf32>
    %55 = tpu.matmul %54, %52, %cst_26 {dimension_numbers = #tpu.dot_dimension_numbers<[1], [0], [0], [1], [0, 0, 1, 1], [], []>} : vector<4x8xbf16>, vector<8x256xbf16>, vector<4x256xf32> -> vector<4x256xf32>
    %56 = arith.addf %43, %55 : vector<4x256xf32>
    %c3_i32 = arith.constant 3 : i32
    %57 = vector.broadcast %c3_i32 : i32 to vector<1x256xi32>
    %58 = arith.andi %3, %57 : vector<1x256xi32>
    %c3_i32_27 = arith.constant 3 : i32
    %59 = vector.broadcast %c3_i32_27 : i32 to vector<1x256xi32>
    %60 = arith.cmpi eq, %58, %59 : vector<1x256xi32>
    %c0_28 = arith.constant 0 : index
    %c64 = arith.constant 64 : index
    %61 = vector.load %arg8[%c0_28, %c64] : memref<8x512xbf16, #tpu.memory_space<vmem>>, vector<8x256xbf16>
    %cst_29 = arith.constant 0.000000e+00 : bf16
    %62 = vector.broadcast %cst_29 : bf16 to vector<8x256xbf16>
    %63 = vector.shape_cast %60 : vector<1x256xi1> to vector<1x256xi1>
    %64 = vector.broadcast %63 : vector<1x256xi1> to vector<8x256xi1>
    %65 = arith.select %64, %61, %62 : vector<8x256xi1>, vector<8x256xbf16>
    %c4 = arith.constant 4 : index
    %c0_30 = arith.constant 0 : index
    %c0_31 = arith.constant 0 : index
    %66 = vector.load %arg1[%c4, %c0_30, %c0_31] : memref<27x4x8xbf16, #tpu.memory_space<vmem>>, vector<1x4x8xbf16>
    %67 = vector.shape_cast %66 : vector<1x4x8xbf16> to vector<4x8xbf16>
    %cst_32 = arith.constant dense<0.000000e+00> : vector<4x256xf32>
    %68 = tpu.matmul %67, %65, %cst_32 {dimension_numbers = #tpu.dot_dimension_numbers<[1], [0], [0], [1], [0, 0, 1, 1], [], []>} : vector<4x8xbf16>, vector<8x256xbf16>, vector<4x256xf32> -> vector<4x256xf32>
    %69 = arith.addf %56, %68 : vector<4x256xf32>
    %c67_i32 = arith.constant 67 : i32
    %70 = vector.broadcast %c67_i32 : i32 to vector<1x256xi32>
    %71 = arith.andi %3, %70 : vector<1x256xi32>
    %c67_i32_33 = arith.constant 67 : i32
    %72 = vector.broadcast %c67_i32_33 : i32 to vector<1x256xi32>
    %73 = arith.cmpi eq, %71, %72 : vector<1x256xi32>
    %c0_34 = arith.constant 0 : index
    %c65 = arith.constant 65 : index
    %74 = vector.load %arg8[%c0_34, %c65] : memref<8x512xbf16, #tpu.memory_space<vmem>>, vector<8x256xbf16>
    %cst_35 = arith.constant 0.000000e+00 : bf16
    %75 = vector.broadcast %cst_35 : bf16 to vector<8x256xbf16>
    %76 = vector.shape_cast %73 : vector<1x256xi1> to vector<1x256xi1>
    %77 = vector.broadcast %76 : vector<1x256xi1> to vector<8x256xi1>
    %78 = arith.select %77, %74, %75 : vector<8x256xi1>, vector<8x256xbf16>
    %c5 = arith.constant 5 : index
    %c0_36 = arith.constant 0 : index
    %c0_37 = arith.constant 0 : index
    %79 = vector.load %arg1[%c5, %c0_36, %c0_37] : memref<27x4x8xbf16, #tpu.memory_space<vmem>>, vector<1x4x8xbf16>
    %80 = vector.shape_cast %79 : vector<1x4x8xbf16> to vector<4x8xbf16>
    %cst_38 = arith.constant dense<0.000000e+00> : vector<4x256xf32>
    %81 = tpu.matmul %80, %78, %cst_38 {dimension_numbers = #tpu.dot_dimension_numbers<[1], [0], [0], [1], [0, 0, 1, 1], [], []>} : vector<4x8xbf16>, vector<8x256xbf16>, vector<4x256xf32> -> vector<4x256xf32>
    %82 = arith.addf %69, %81 : vector<4x256xf32>
    %c51_i32 = arith.constant 51 : i32
    %83 = vector.broadcast %c51_i32 : i32 to vector<1x256xi32>
    %84 = arith.andi %3, %83 : vector<1x256xi32>
    %c51_i32_39 = arith.constant 51 : i32
    %85 = vector.broadcast %c51_i32_39 : i32 to vector<1x256xi32>
    %86 = arith.cmpi eq, %84, %85 : vector<1x256xi32>
    %c0_40 = arith.constant 0 : index
    %c71 = arith.constant 71 : index
    %87 = vector.load %arg8[%c0_40, %c71] : memref<8x512xbf16, #tpu.memory_space<vmem>>, vector<8x256xbf16>
    %cst_41 = arith.constant 0.000000e+00 : bf16
    %88 = vector.broadcast %cst_41 : bf16 to vector<8x256xbf16>
    %89 = vector.shape_cast %86 : vector<1x256xi1> to vector<1x256xi1>
    %90 = vector.broadcast %89 : vector<1x256xi1> to vector<8x256xi1>
    %91 = arith.select %90, %87, %88 : vector<8x256xi1>, vector<8x256xbf16>
    %c6 = arith.constant 6 : index
    %c0_42 = arith.constant 0 : index
    %c0_43 = arith.constant 0 : index
    %92 = vector.load %arg1[%c6, %c0_42, %c0_43] : memref<27x4x8xbf16, #tpu.memory_space<vmem>>, vector<1x4x8xbf16>
    %93 = vector.shape_cast %92 : vector<1x4x8xbf16> to vector<4x8xbf16>
    %cst_44 = arith.constant dense<0.000000e+00> : vector<4x256xf32>
    %94 = tpu.matmul %93, %91, %cst_44 {dimension_numbers = #tpu.dot_dimension_numbers<[1], [0], [0], [1], [0, 0, 1, 1], [], []>} : vector<4x8xbf16>, vector<8x256xbf16>, vector<4x256xf32> -> vector<4x256xf32>
    %95 = arith.addf %82, %94 : vector<4x256xf32>
    %c19_i32 = arith.constant 19 : i32
    %96 = vector.broadcast %c19_i32 : i32 to vector<1x256xi32>
    %97 = arith.andi %3, %96 : vector<1x256xi32>
    %c19_i32_45 = arith.constant 19 : i32
    %98 = vector.broadcast %c19_i32_45 : i32 to vector<1x256xi32>
    %99 = arith.cmpi eq, %97, %98 : vector<1x256xi32>
    %c0_46 = arith.constant 0 : index
    %c72 = arith.constant 72 : index
    %100 = vector.load %arg8[%c0_46, %c72] : memref<8x512xbf16, #tpu.memory_space<vmem>>, vector<8x256xbf16>
    %cst_47 = arith.constant 0.000000e+00 : bf16
    %101 = vector.broadcast %cst_47 : bf16 to vector<8x256xbf16>
    %102 = vector.shape_cast %99 : vector<1x256xi1> to vector<1x256xi1>
    %103 = vector.broadcast %102 : vector<1x256xi1> to vector<8x256xi1>
    %104 = arith.select %103, %100, %101 : vector<8x256xi1>, vector<8x256xbf16>
    %c7 = arith.constant 7 : index
    %c0_48 = arith.constant 0 : index
    %c0_49 = arith.constant 0 : index
    %105 = vector.load %arg1[%c7, %c0_48, %c0_49] : memref<27x4x8xbf16, #tpu.memory_space<vmem>>, vector<1x4x8xbf16>
    %106 = vector.shape_cast %105 : vector<1x4x8xbf16> to vector<4x8xbf16>
    %cst_50 = arith.constant dense<0.000000e+00> : vector<4x256xf32>
    %107 = tpu.matmul %106, %104, %cst_50 {dimension_numbers = #tpu.dot_dimension_numbers<[1], [0], [0], [1], [0, 0, 1, 1], [], []>} : vector<4x8xbf16>, vector<8x256xbf16>, vector<4x256xf32> -> vector<4x256xf32>
    %108 = arith.addf %95, %107 : vector<4x256xf32>
    %c83_i32 = arith.constant 83 : i32
    %109 = vector.broadcast %c83_i32 : i32 to vector<1x256xi32>
    %110 = arith.andi %3, %109 : vector<1x256xi32>
    %c83_i32_51 = arith.constant 83 : i32
    %111 = vector.broadcast %c83_i32_51 : i32 to vector<1x256xi32>
    %112 = arith.cmpi eq, %110, %111 : vector<1x256xi32>
    %c0_52 = arith.constant 0 : index
    %c73 = arith.constant 73 : index
    %113 = vector.load %arg8[%c0_52, %c73] : memref<8x512xbf16, #tpu.memory_space<vmem>>, vector<8x256xbf16>
    %cst_53 = arith.constant 0.000000e+00 : bf16
    %114 = vector.broadcast %cst_53 : bf16 to vector<8x256xbf16>
    %115 = vector.shape_cast %112 : vector<1x256xi1> to vector<1x256xi1>
    %116 = vector.broadcast %115 : vector<1x256xi1> to vector<8x256xi1>
    %117 = arith.select %116, %113, %114 : vector<8x256xi1>, vector<8x256xbf16>
    %c8 = arith.constant 8 : index
    %c0_54 = arith.constant 0 : index
    %c0_55 = arith.constant 0 : index
    %118 = vector.load %arg1[%c8, %c0_54, %c0_55] : memref<27x4x8xbf16, #tpu.memory_space<vmem>>, vector<1x4x8xbf16>
    %119 = vector.shape_cast %118 : vector<1x4x8xbf16> to vector<4x8xbf16>
    %cst_56 = arith.constant dense<0.000000e+00> : vector<4x256xf32>
    %120 = tpu.matmul %119, %117, %cst_56 {dimension_numbers = #tpu.dot_dimension_numbers<[1], [0], [0], [1], [0, 0, 1, 1], [], []>} : vector<4x8xbf16>, vector<8x256xbf16>, vector<4x256xf32> -> vector<4x256xf32>
    %121 = arith.addf %108, %120 : vector<4x256xf32>
    %c41_i32 = arith.constant 41 : i32
    %122 = vector.broadcast %c41_i32 : i32 to vector<1x256xi32>
    %123 = arith.andi %3, %122 : vector<1x256xi32>
    %c41_i32_57 = arith.constant 41 : i32
    %124 = vector.broadcast %c41_i32_57 : i32 to vector<1x256xi32>
    %125 = arith.cmpi eq, %123, %124 : vector<1x256xi32>
    %c0_58 = arith.constant 0 : index
    %c119 = arith.constant 119 : index
    %126 = vector.load %arg8[%c0_58, %c119] : memref<8x512xbf16, #tpu.memory_space<vmem>>, vector<8x256xbf16>
    %cst_59 = arith.constant 0.000000e+00 : bf16
    %127 = vector.broadcast %cst_59 : bf16 to vector<8x256xbf16>
    %128 = vector.shape_cast %125 : vector<1x256xi1> to vector<1x256xi1>
    %129 = vector.broadcast %128 : vector<1x256xi1> to vector<8x256xi1>
    %130 = arith.select %129, %126, %127 : vector<8x256xi1>, vector<8x256xbf16>
    %c9 = arith.constant 9 : index
    %c0_60 = arith.constant 0 : index
    %c0_61 = arith.constant 0 : index
    %131 = vector.load %arg1[%c9, %c0_60, %c0_61] : memref<27x4x8xbf16, #tpu.memory_space<vmem>>, vector<1x4x8xbf16>
    %132 = vector.shape_cast %131 : vector<1x4x8xbf16> to vector<4x8xbf16>
    %cst_62 = arith.constant dense<0.000000e+00> : vector<4x256xf32>
    %133 = tpu.matmul %132, %130, %cst_62 {dimension_numbers = #tpu.dot_dimension_numbers<[1], [0], [0], [1], [0, 0, 1, 1], [], []>} : vector<4x8xbf16>, vector<8x256xbf16>, vector<4x256xf32> -> vector<4x256xf32>
    %134 = arith.addf %121, %133 : vector<4x256xf32>
    %c9_i32 = arith.constant 9 : i32
    %135 = vector.broadcast %c9_i32 : i32 to vector<1x256xi32>
    %136 = arith.andi %3, %135 : vector<1x256xi32>
    %c9_i32_63 = arith.constant 9 : i32
    %137 = vector.broadcast %c9_i32_63 : i32 to vector<1x256xi32>
    %138 = arith.cmpi eq, %136, %137 : vector<1x256xi32>
    %c0_64 = arith.constant 0 : index
    %c120 = arith.constant 120 : index
    %139 = vector.load %arg8[%c0_64, %c120] : memref<8x512xbf16, #tpu.memory_space<vmem>>, vector<8x256xbf16>
    %cst_65 = arith.constant 0.000000e+00 : bf16
    %140 = vector.broadcast %cst_65 : bf16 to vector<8x256xbf16>
    %141 = vector.shape_cast %138 : vector<1x256xi1> to vector<1x256xi1>
    %142 = vector.broadcast %141 : vector<1x256xi1> to vector<8x256xi1>
    %143 = arith.select %142, %139, %140 : vector<8x256xi1>, vector<8x256xbf16>
    %c10 = arith.constant 10 : index
    %c0_66 = arith.constant 0 : index
    %c0_67 = arith.constant 0 : index
    %144 = vector.load %arg1[%c10, %c0_66, %c0_67] : memref<27x4x8xbf16, #tpu.memory_space<vmem>>, vector<1x4x8xbf16>
    %145 = vector.shape_cast %144 : vector<1x4x8xbf16> to vector<4x8xbf16>
    %cst_68 = arith.constant dense<0.000000e+00> : vector<4x256xf32>
    %146 = tpu.matmul %145, %143, %cst_68 {dimension_numbers = #tpu.dot_dimension_numbers<[1], [0], [0], [1], [0, 0, 1, 1], [], []>} : vector<4x8xbf16>, vector<8x256xbf16>, vector<4x256xf32> -> vector<4x256xf32>
    %147 = arith.addf %134, %146 : vector<4x256xf32>
    %c73_i32 = arith.constant 73 : i32
    %148 = vector.broadcast %c73_i32 : i32 to vector<1x256xi32>
    %149 = arith.andi %3, %148 : vector<1x256xi32>
    %c73_i32_69 = arith.constant 73 : i32
    %150 = vector.broadcast %c73_i32_69 : i32 to vector<1x256xi32>
    %151 = arith.cmpi eq, %149, %150 : vector<1x256xi32>
    %c0_70 = arith.constant 0 : index
    %c121 = arith.constant 121 : index
    %152 = vector.load %arg8[%c0_70, %c121] : memref<8x512xbf16, #tpu.memory_space<vmem>>, vector<8x256xbf16>
    %cst_71 = arith.constant 0.000000e+00 : bf16
    %153 = vector.broadcast %cst_71 : bf16 to vector<8x256xbf16>
    %154 = vector.shape_cast %151 : vector<1x256xi1> to vector<1x256xi1>
    %155 = vector.broadcast %154 : vector<1x256xi1> to vector<8x256xi1>
    %156 = arith.select %155, %152, %153 : vector<8x256xi1>, vector<8x256xbf16>
    %c11 = arith.constant 11 : index
    %c0_72 = arith.constant 0 : index
    %c0_73 = arith.constant 0 : index
    %157 = vector.load %arg1[%c11, %c0_72, %c0_73] : memref<27x4x8xbf16, #tpu.memory_space<vmem>>, vector<1x4x8xbf16>
    %158 = vector.shape_cast %157 : vector<1x4x8xbf16> to vector<4x8xbf16>
    %cst_74 = arith.constant dense<0.000000e+00> : vector<4x256xf32>
    %159 = tpu.matmul %158, %156, %cst_74 {dimension_numbers = #tpu.dot_dimension_numbers<[1], [0], [0], [1], [0, 0, 1, 1], [], []>} : vector<4x8xbf16>, vector<8x256xbf16>, vector<4x256xf32> -> vector<4x256xf32>
    %160 = arith.addf %147, %159 : vector<4x256xf32>
    %c33_i32 = arith.constant 33 : i32
    %161 = vector.broadcast %c33_i32 : i32 to vector<1x256xi32>
    %162 = arith.andi %3, %161 : vector<1x256xi32>
    %c33_i32_75 = arith.constant 33 : i32
    %163 = vector.broadcast %c33_i32_75 : i32 to vector<1x256xi32>
    %164 = arith.cmpi eq, %162, %163 : vector<1x256xi32>
    %c0_76 = arith.constant 0 : index
    %c127 = arith.constant 127 : index
    %165 = vector.load %arg8[%c0_76, %c127] : memref<8x512xbf16, #tpu.memory_space<vmem>>, vector<8x256xbf16>
    %cst_77 = arith.constant 0.000000e+00 : bf16
    %166 = vector.broadcast %cst_77 : bf16 to vector<8x256xbf16>
    %167 = vector.shape_cast %164 : vector<1x256xi1> to vector<1x256xi1>
    %168 = vector.broadcast %167 : vector<1x256xi1> to vector<8x256xi1>
    %169 = arith.select %168, %165, %166 : vector<8x256xi1>, vector<8x256xbf16>
    %c12 = arith.constant 12 : index
    %c0_78 = arith.constant 0 : index
    %c0_79 = arith.constant 0 : index
    %170 = vector.load %arg1[%c12, %c0_78, %c0_79] : memref<27x4x8xbf16, #tpu.memory_space<vmem>>, vector<1x4x8xbf16>
    %171 = vector.shape_cast %170 : vector<1x4x8xbf16> to vector<4x8xbf16>
    %cst_80 = arith.constant dense<0.000000e+00> : vector<4x256xf32>
    %172 = tpu.matmul %171, %169, %cst_80 {dimension_numbers = #tpu.dot_dimension_numbers<[1], [0], [0], [1], [0, 0, 1, 1], [], []>} : vector<4x8xbf16>, vector<8x256xbf16>, vector<4x256xf32> -> vector<4x256xf32>
    %173 = arith.addf %160, %172 : vector<4x256xf32>
    %c1_i32 = arith.constant 1 : i32
    %174 = vector.broadcast %c1_i32 : i32 to vector<1x256xi32>
    %175 = arith.andi %3, %174 : vector<1x256xi32>
    %c1_i32_81 = arith.constant 1 : i32
    %176 = vector.broadcast %c1_i32_81 : i32 to vector<1x256xi32>
    %177 = arith.cmpi eq, %175, %176 : vector<1x256xi32>
    %c0_82 = arith.constant 0 : index
    %c128 = arith.constant 128 : index
    %178 = vector.load %arg8[%c0_82, %c128] : memref<8x512xbf16, #tpu.memory_space<vmem>>, vector<8x256xbf16>
    %cst_83 = arith.constant 0.000000e+00 : bf16
    %179 = vector.broadcast %cst_83 : bf16 to vector<8x256xbf16>
    %180 = vector.shape_cast %177 : vector<1x256xi1> to vector<1x256xi1>
    %181 = vector.broadcast %180 : vector<1x256xi1> to vector<8x256xi1>
    %182 = arith.select %181, %178, %179 : vector<8x256xi1>, vector<8x256xbf16>
    %c13 = arith.constant 13 : index
    %c0_84 = arith.constant 0 : index
    %c0_85 = arith.constant 0 : index
    %183 = vector.load %arg1[%c13, %c0_84, %c0_85] : memref<27x4x8xbf16, #tpu.memory_space<vmem>>, vector<1x4x8xbf16>
    %184 = vector.shape_cast %183 : vector<1x4x8xbf16> to vector<4x8xbf16>
    %cst_86 = arith.constant dense<0.000000e+00> : vector<4x256xf32>
    %185 = tpu.matmul %184, %182, %cst_86 {dimension_numbers = #tpu.dot_dimension_numbers<[1], [0], [0], [1], [0, 0, 1, 1], [], []>} : vector<4x8xbf16>, vector<8x256xbf16>, vector<4x256xf32> -> vector<4x256xf32>
    %186 = arith.addf %173, %185 : vector<4x256xf32>
    %c65_i32 = arith.constant 65 : i32
    %187 = vector.broadcast %c65_i32 : i32 to vector<1x256xi32>
    %188 = arith.andi %3, %187 : vector<1x256xi32>
    %c65_i32_87 = arith.constant 65 : i32
    %189 = vector.broadcast %c65_i32_87 : i32 to vector<1x256xi32>
    %190 = arith.cmpi eq, %188, %189 : vector<1x256xi32>
    %c0_88 = arith.constant 0 : index
    %c129 = arith.constant 129 : index
    %191 = vector.load %arg8[%c0_88, %c129] : memref<8x512xbf16, #tpu.memory_space<vmem>>, vector<8x256xbf16>
    %cst_89 = arith.constant 0.000000e+00 : bf16
    %192 = vector.broadcast %cst_89 : bf16 to vector<8x256xbf16>
    %193 = vector.shape_cast %190 : vector<1x256xi1> to vector<1x256xi1>
    %194 = vector.broadcast %193 : vector<1x256xi1> to vector<8x256xi1>
    %195 = arith.select %194, %191, %192 : vector<8x256xi1>, vector<8x256xbf16>
    %c14 = arith.constant 14 : index
    %c0_90 = arith.constant 0 : index
    %c0_91 = arith.constant 0 : index
    %196 = vector.load %arg1[%c14, %c0_90, %c0_91] : memref<27x4x8xbf16, #tpu.memory_space<vmem>>, vector<1x4x8xbf16>
    %197 = vector.shape_cast %196 : vector<1x4x8xbf16> to vector<4x8xbf16>
    %cst_92 = arith.constant dense<0.000000e+00> : vector<4x256xf32>
    %198 = tpu.matmul %197, %195, %cst_92 {dimension_numbers = #tpu.dot_dimension_numbers<[1], [0], [0], [1], [0, 0, 1, 1], [], []>} : vector<4x8xbf16>, vector<8x256xbf16>, vector<4x256xf32> -> vector<4x256xf32>
    %199 = arith.addf %186, %198 : vector<4x256xf32>
    %c49_i32 = arith.constant 49 : i32
    %200 = vector.broadcast %c49_i32 : i32 to vector<1x256xi32>
    %201 = arith.andi %3, %200 : vector<1x256xi32>
    %c49_i32_93 = arith.constant 49 : i32
    %202 = vector.broadcast %c49_i32_93 : i32 to vector<1x256xi32>
    %203 = arith.cmpi eq, %201, %202 : vector<1x256xi32>
    %c0_94 = arith.constant 0 : index
    %c135 = arith.constant 135 : index
    %204 = vector.load %arg8[%c0_94, %c135] : memref<8x512xbf16, #tpu.memory_space<vmem>>, vector<8x256xbf16>
    %cst_95 = arith.constant 0.000000e+00 : bf16
    %205 = vector.broadcast %cst_95 : bf16 to vector<8x256xbf16>
    %206 = vector.shape_cast %203 : vector<1x256xi1> to vector<1x256xi1>
    %207 = vector.broadcast %206 : vector<1x256xi1> to vector<8x256xi1>
    %208 = arith.select %207, %204, %205 : vector<8x256xi1>, vector<8x256xbf16>
    %c15 = arith.constant 15 : index
    %c0_96 = arith.constant 0 : index
    %c0_97 = arith.constant 0 : index
    %209 = vector.load %arg1[%c15, %c0_96, %c0_97] : memref<27x4x8xbf16, #tpu.memory_space<vmem>>, vector<1x4x8xbf16>
    %210 = vector.shape_cast %209 : vector<1x4x8xbf16> to vector<4x8xbf16>
    %cst_98 = arith.constant dense<0.000000e+00> : vector<4x256xf32>
    %211 = tpu.matmul %210, %208, %cst_98 {dimension_numbers = #tpu.dot_dimension_numbers<[1], [0], [0], [1], [0, 0, 1, 1], [], []>} : vector<4x8xbf16>, vector<8x256xbf16>, vector<4x256xf32> -> vector<4x256xf32>
    %212 = arith.addf %199, %211 : vector<4x256xf32>
    %c17_i32 = arith.constant 17 : i32
    %213 = vector.broadcast %c17_i32 : i32 to vector<1x256xi32>
    %214 = arith.andi %3, %213 : vector<1x256xi32>
    %c17_i32_99 = arith.constant 17 : i32
    %215 = vector.broadcast %c17_i32_99 : i32 to vector<1x256xi32>
    %216 = arith.cmpi eq, %214, %215 : vector<1x256xi32>
    %c0_100 = arith.constant 0 : index
    %c136 = arith.constant 136 : index
    %217 = vector.load %arg8[%c0_100, %c136] : memref<8x512xbf16, #tpu.memory_space<vmem>>, vector<8x256xbf16>
    %cst_101 = arith.constant 0.000000e+00 : bf16
    %218 = vector.broadcast %cst_101 : bf16 to vector<8x256xbf16>
    %219 = vector.shape_cast %216 : vector<1x256xi1> to vector<1x256xi1>
    %220 = vector.broadcast %219 : vector<1x256xi1> to vector<8x256xi1>
    %221 = arith.select %220, %217, %218 : vector<8x256xi1>, vector<8x256xbf16>
    %c16 = arith.constant 16 : index
    %c0_102 = arith.constant 0 : index
    %c0_103 = arith.constant 0 : index
    %222 = vector.load %arg1[%c16, %c0_102, %c0_103] : memref<27x4x8xbf16, #tpu.memory_space<vmem>>, vector<1x4x8xbf16>
    %223 = vector.shape_cast %222 : vector<1x4x8xbf16> to vector<4x8xbf16>
    %cst_104 = arith.constant dense<0.000000e+00> : vector<4x256xf32>
    %224 = tpu.matmul %223, %221, %cst_104 {dimension_numbers = #tpu.dot_dimension_numbers<[1], [0], [0], [1], [0, 0, 1, 1], [], []>} : vector<4x8xbf16>, vector<8x256xbf16>, vector<4x256xf32> -> vector<4x256xf32>
    %225 = arith.addf %212, %224 : vector<4x256xf32>
    %c81_i32 = arith.constant 81 : i32
    %226 = vector.broadcast %c81_i32 : i32 to vector<1x256xi32>
    %227 = arith.andi %3, %226 : vector<1x256xi32>
    %c81_i32_105 = arith.constant 81 : i32
    %228 = vector.broadcast %c81_i32_105 : i32 to vector<1x256xi32>
    %229 = arith.cmpi eq, %227, %228 : vector<1x256xi32>
    %c0_106 = arith.constant 0 : index
    %c137 = arith.constant 137 : index
    %230 = vector.load %arg8[%c0_106, %c137] : memref<8x512xbf16, #tpu.memory_space<vmem>>, vector<8x256xbf16>
    %cst_107 = arith.constant 0.000000e+00 : bf16
    %231 = vector.broadcast %cst_107 : bf16 to vector<8x256xbf16>
    %232 = vector.shape_cast %229 : vector<1x256xi1> to vector<1x256xi1>
    %233 = vector.broadcast %232 : vector<1x256xi1> to vector<8x256xi1>
    %234 = arith.select %233, %230, %231 : vector<8x256xi1>, vector<8x256xbf16>
    %c17 = arith.constant 17 : index
    %c0_108 = arith.constant 0 : index
    %c0_109 = arith.constant 0 : index
    %235 = vector.load %arg1[%c17, %c0_108, %c0_109] : memref<27x4x8xbf16, #tpu.memory_space<vmem>>, vector<1x4x8xbf16>
    %236 = vector.shape_cast %235 : vector<1x4x8xbf16> to vector<4x8xbf16>
    %cst_110 = arith.constant dense<0.000000e+00> : vector<4x256xf32>
    %237 = tpu.matmul %236, %234, %cst_110 {dimension_numbers = #tpu.dot_dimension_numbers<[1], [0], [0], [1], [0, 0, 1, 1], [], []>} : vector<4x8xbf16>, vector<8x256xbf16>, vector<4x256xf32> -> vector<4x256xf32>
    %238 = arith.addf %225, %237 : vector<4x256xf32>
    %c45_i32 = arith.constant 45 : i32
    %239 = vector.broadcast %c45_i32 : i32 to vector<1x256xi32>
    %240 = arith.andi %3, %239 : vector<1x256xi32>
    %c45_i32_111 = arith.constant 45 : i32
    %241 = vector.broadcast %c45_i32_111 : i32 to vector<1x256xi32>
    %242 = arith.cmpi eq, %240, %241 : vector<1x256xi32>
    %c0_112 = arith.constant 0 : index
    %c183 = arith.constant 183 : index
    %243 = vector.load %arg8[%c0_112, %c183] : memref<8x512xbf16, #tpu.memory_space<vmem>>, vector<8x256xbf16>
    %cst_113 = arith.constant 0.000000e+00 : bf16
    %244 = vector.broadcast %cst_113 : bf16 to vector<8x256xbf16>
    %245 = vector.shape_cast %242 : vector<1x256xi1> to vector<1x256xi1>
    %246 = vector.broadcast %245 : vector<1x256xi1> to vector<8x256xi1>
    %247 = arith.select %246, %243, %244 : vector<8x256xi1>, vector<8x256xbf16>
    %c18 = arith.constant 18 : index
    %c0_114 = arith.constant 0 : index
    %c0_115 = arith.constant 0 : index
    %248 = vector.load %arg1[%c18, %c0_114, %c0_115] : memref<27x4x8xbf16, #tpu.memory_space<vmem>>, vector<1x4x8xbf16>
    %249 = vector.shape_cast %248 : vector<1x4x8xbf16> to vector<4x8xbf16>
    %cst_116 = arith.constant dense<0.000000e+00> : vector<4x256xf32>
    %250 = tpu.matmul %249, %247, %cst_116 {dimension_numbers = #tpu.dot_dimension_numbers<[1], [0], [0], [1], [0, 0, 1, 1], [], []>} : vector<4x8xbf16>, vector<8x256xbf16>, vector<4x256xf32> -> vector<4x256xf32>
    %251 = arith.addf %238, %250 : vector<4x256xf32>
    %c13_i32 = arith.constant 13 : i32
    %252 = vector.broadcast %c13_i32 : i32 to vector<1x256xi32>
    %253 = arith.andi %3, %252 : vector<1x256xi32>
    %c13_i32_117 = arith.constant 13 : i32
    %254 = vector.broadcast %c13_i32_117 : i32 to vector<1x256xi32>
    %255 = arith.cmpi eq, %253, %254 : vector<1x256xi32>
    %c0_118 = arith.constant 0 : index
    %c184 = arith.constant 184 : index
    %256 = vector.load %arg8[%c0_118, %c184] : memref<8x512xbf16, #tpu.memory_space<vmem>>, vector<8x256xbf16>
    %cst_119 = arith.constant 0.000000e+00 : bf16
    %257 = vector.broadcast %cst_119 : bf16 to vector<8x256xbf16>
    %258 = vector.shape_cast %255 : vector<1x256xi1> to vector<1x256xi1>
    %259 = vector.broadcast %258 : vector<1x256xi1> to vector<8x256xi1>
    %260 = arith.select %259, %256, %257 : vector<8x256xi1>, vector<8x256xbf16>
    %c19 = arith.constant 19 : index
    %c0_120 = arith.constant 0 : index
    %c0_121 = arith.constant 0 : index
    %261 = vector.load %arg1[%c19, %c0_120, %c0_121] : memref<27x4x8xbf16, #tpu.memory_space<vmem>>, vector<1x4x8xbf16>
    %262 = vector.shape_cast %261 : vector<1x4x8xbf16> to vector<4x8xbf16>
    %cst_122 = arith.constant dense<0.000000e+00> : vector<4x256xf32>
    %263 = tpu.matmul %262, %260, %cst_122 {dimension_numbers = #tpu.dot_dimension_numbers<[1], [0], [0], [1], [0, 0, 1, 1], [], []>} : vector<4x8xbf16>, vector<8x256xbf16>, vector<4x256xf32> -> vector<4x256xf32>
    %264 = arith.addf %251, %263 : vector<4x256xf32>
    %c77_i32 = arith.constant 77 : i32
    %265 = vector.broadcast %c77_i32 : i32 to vector<1x256xi32>
    %266 = arith.andi %3, %265 : vector<1x256xi32>
    %c77_i32_123 = arith.constant 77 : i32
    %267 = vector.broadcast %c77_i32_123 : i32 to vector<1x256xi32>
    %268 = arith.cmpi eq, %266, %267 : vector<1x256xi32>
    %c0_124 = arith.constant 0 : index
    %c185 = arith.constant 185 : index
    %269 = vector.load %arg8[%c0_124, %c185] : memref<8x512xbf16, #tpu.memory_space<vmem>>, vector<8x256xbf16>
    %cst_125 = arith.constant 0.000000e+00 : bf16
    %270 = vector.broadcast %cst_125 : bf16 to vector<8x256xbf16>
    %271 = vector.shape_cast %268 : vector<1x256xi1> to vector<1x256xi1>
    %272 = vector.broadcast %271 : vector<1x256xi1> to vector<8x256xi1>
    %273 = arith.select %272, %269, %270 : vector<8x256xi1>, vector<8x256xbf16>
    %c20 = arith.constant 20 : index
    %c0_126 = arith.constant 0 : index
    %c0_127 = arith.constant 0 : index
    %274 = vector.load %arg1[%c20, %c0_126, %c0_127] : memref<27x4x8xbf16, #tpu.memory_space<vmem>>, vector<1x4x8xbf16>
    %275 = vector.shape_cast %274 : vector<1x4x8xbf16> to vector<4x8xbf16>
    %cst_128 = arith.constant dense<0.000000e+00> : vector<4x256xf32>
    %276 = tpu.matmul %275, %273, %cst_128 {dimension_numbers = #tpu.dot_dimension_numbers<[1], [0], [0], [1], [0, 0, 1, 1], [], []>} : vector<4x8xbf16>, vector<8x256xbf16>, vector<4x256xf32> -> vector<4x256xf32>
    %277 = arith.addf %264, %276 : vector<4x256xf32>
    %c37_i32 = arith.constant 37 : i32
    %278 = vector.broadcast %c37_i32 : i32 to vector<1x256xi32>
    %279 = arith.andi %3, %278 : vector<1x256xi32>
    %c37_i32_129 = arith.constant 37 : i32
    %280 = vector.broadcast %c37_i32_129 : i32 to vector<1x256xi32>
    %281 = arith.cmpi eq, %279, %280 : vector<1x256xi32>
    %c0_130 = arith.constant 0 : index
    %c191 = arith.constant 191 : index
    %282 = vector.load %arg8[%c0_130, %c191] : memref<8x512xbf16, #tpu.memory_space<vmem>>, vector<8x256xbf16>
    %cst_131 = arith.constant 0.000000e+00 : bf16
    %283 = vector.broadcast %cst_131 : bf16 to vector<8x256xbf16>
    %284 = vector.shape_cast %281 : vector<1x256xi1> to vector<1x256xi1>
    %285 = vector.broadcast %284 : vector<1x256xi1> to vector<8x256xi1>
    %286 = arith.select %285, %282, %283 : vector<8x256xi1>, vector<8x256xbf16>
    %c21 = arith.constant 21 : index
    %c0_132 = arith.constant 0 : index
    %c0_133 = arith.constant 0 : index
    %287 = vector.load %arg1[%c21, %c0_132, %c0_133] : memref<27x4x8xbf16, #tpu.memory_space<vmem>>, vector<1x4x8xbf16>
    %288 = vector.shape_cast %287 : vector<1x4x8xbf16> to vector<4x8xbf16>
    %cst_134 = arith.constant dense<0.000000e+00> : vector<4x256xf32>
    %289 = tpu.matmul %288, %286, %cst_134 {dimension_numbers = #tpu.dot_dimension_numbers<[1], [0], [0], [1], [0, 0, 1, 1], [], []>} : vector<4x8xbf16>, vector<8x256xbf16>, vector<4x256xf32> -> vector<4x256xf32>
    %290 = arith.addf %277, %289 : vector<4x256xf32>
    %c5_i32 = arith.constant 5 : i32
    %291 = vector.broadcast %c5_i32 : i32 to vector<1x256xi32>
    %292 = arith.andi %3, %291 : vector<1x256xi32>
    %c5_i32_135 = arith.constant 5 : i32
    %293 = vector.broadcast %c5_i32_135 : i32 to vector<1x256xi32>
    %294 = arith.cmpi eq, %292, %293 : vector<1x256xi32>
    %c0_136 = arith.constant 0 : index
    %c192 = arith.constant 192 : index
    %295 = vector.load %arg8[%c0_136, %c192] : memref<8x512xbf16, #tpu.memory_space<vmem>>, vector<8x256xbf16>
    %cst_137 = arith.constant 0.000000e+00 : bf16
    %296 = vector.broadcast %cst_137 : bf16 to vector<8x256xbf16>
    %297 = vector.shape_cast %294 : vector<1x256xi1> to vector<1x256xi1>
    %298 = vector.broadcast %297 : vector<1x256xi1> to vector<8x256xi1>
    %299 = arith.select %298, %295, %296 : vector<8x256xi1>, vector<8x256xbf16>
    %c22 = arith.constant 22 : index
    %c0_138 = arith.constant 0 : index
    %c0_139 = arith.constant 0 : index
    %300 = vector.load %arg1[%c22, %c0_138, %c0_139] : memref<27x4x8xbf16, #tpu.memory_space<vmem>>, vector<1x4x8xbf16>
    %301 = vector.shape_cast %300 : vector<1x4x8xbf16> to vector<4x8xbf16>
    %cst_140 = arith.constant dense<0.000000e+00> : vector<4x256xf32>
    %302 = tpu.matmul %301, %299, %cst_140 {dimension_numbers = #tpu.dot_dimension_numbers<[1], [0], [0], [1], [0, 0, 1, 1], [], []>} : vector<4x8xbf16>, vector<8x256xbf16>, vector<4x256xf32> -> vector<4x256xf32>
    %303 = arith.addf %290, %302 : vector<4x256xf32>
    %c69_i32 = arith.constant 69 : i32
    %304 = vector.broadcast %c69_i32 : i32 to vector<1x256xi32>
    %305 = arith.andi %3, %304 : vector<1x256xi32>
    %c69_i32_141 = arith.constant 69 : i32
    %306 = vector.broadcast %c69_i32_141 : i32 to vector<1x256xi32>
    %307 = arith.cmpi eq, %305, %306 : vector<1x256xi32>
    %c0_142 = arith.constant 0 : index
    %c193 = arith.constant 193 : index
    %308 = vector.load %arg8[%c0_142, %c193] : memref<8x512xbf16, #tpu.memory_space<vmem>>, vector<8x256xbf16>
    %cst_143 = arith.constant 0.000000e+00 : bf16
    %309 = vector.broadcast %cst_143 : bf16 to vector<8x256xbf16>
    %310 = vector.shape_cast %307 : vector<1x256xi1> to vector<1x256xi1>
    %311 = vector.broadcast %310 : vector<1x256xi1> to vector<8x256xi1>
    %312 = arith.select %311, %308, %309 : vector<8x256xi1>, vector<8x256xbf16>
    %c23 = arith.constant 23 : index
    %c0_144 = arith.constant 0 : index
    %c0_145 = arith.constant 0 : index
    %313 = vector.load %arg1[%c23, %c0_144, %c0_145] : memref<27x4x8xbf16, #tpu.memory_space<vmem>>, vector<1x4x8xbf16>
    %314 = vector.shape_cast %313 : vector<1x4x8xbf16> to vector<4x8xbf16>
    %cst_146 = arith.constant dense<0.000000e+00> : vector<4x256xf32>
    %315 = tpu.matmul %314, %312, %cst_146 {dimension_numbers = #tpu.dot_dimension_numbers<[1], [0], [0], [1], [0, 0, 1, 1], [], []>} : vector<4x8xbf16>, vector<8x256xbf16>, vector<4x256xf32> -> vector<4x256xf32>
    %316 = arith.addf %303, %315 : vector<4x256xf32>
    %c53_i32 = arith.constant 53 : i32
    %317 = vector.broadcast %c53_i32 : i32 to vector<1x256xi32>
    %318 = arith.andi %3, %317 : vector<1x256xi32>
    %c53_i32_147 = arith.constant 53 : i32
    %319 = vector.broadcast %c53_i32_147 : i32 to vector<1x256xi32>
    %320 = arith.cmpi eq, %318, %319 : vector<1x256xi32>
    %c0_148 = arith.constant 0 : index
    %c199 = arith.constant 199 : index
    %321 = vector.load %arg8[%c0_148, %c199] : memref<8x512xbf16, #tpu.memory_space<vmem>>, vector<8x256xbf16>
    %cst_149 = arith.constant 0.000000e+00 : bf16
    %322 = vector.broadcast %cst_149 : bf16 to vector<8x256xbf16>
    %323 = vector.shape_cast %320 : vector<1x256xi1> to vector<1x256xi1>
    %324 = vector.broadcast %323 : vector<1x256xi1> to vector<8x256xi1>
    %325 = arith.select %324, %321, %322 : vector<8x256xi1>, vector<8x256xbf16>
    %c24 = arith.constant 24 : index
    %c0_150 = arith.constant 0 : index
    %c0_151 = arith.constant 0 : index
    %326 = vector.load %arg1[%c24, %c0_150, %c0_151] : memref<27x4x8xbf16, #tpu.memory_space<vmem>>, vector<1x4x8xbf16>
    %327 = vector.shape_cast %326 : vector<1x4x8xbf16> to vector<4x8xbf16>
    %cst_152 = arith.constant dense<0.000000e+00> : vector<4x256xf32>
    %328 = tpu.matmul %327, %325, %cst_152 {dimension_numbers = #tpu.dot_dimension_numbers<[1], [0], [0], [1], [0, 0, 1, 1], [], []>} : vector<4x8xbf16>, vector<8x256xbf16>, vector<4x256xf32> -> vector<4x256xf32>
    %329 = arith.addf %316, %328 : vector<4x256xf32>
    %c21_i32 = arith.constant 21 : i32
    %330 = vector.broadcast %c21_i32 : i32 to vector<1x256xi32>
    %331 = arith.andi %3, %330 : vector<1x256xi32>
    %c21_i32_153 = arith.constant 21 : i32
    %332 = vector.broadcast %c21_i32_153 : i32 to vector<1x256xi32>
    %333 = arith.cmpi eq, %331, %332 : vector<1x256xi32>
    %c0_154 = arith.constant 0 : index
    %c200 = arith.constant 200 : index
    %334 = vector.load %arg8[%c0_154, %c200] : memref<8x512xbf16, #tpu.memory_space<vmem>>, vector<8x256xbf16>
    %cst_155 = arith.constant 0.000000e+00 : bf16
    %335 = vector.broadcast %cst_155 : bf16 to vector<8x256xbf16>
    %336 = vector.shape_cast %333 : vector<1x256xi1> to vector<1x256xi1>
    %337 = vector.broadcast %336 : vector<1x256xi1> to vector<8x256xi1>
    %338 = arith.select %337, %334, %335 : vector<8x256xi1>, vector<8x256xbf16>
    %c25 = arith.constant 25 : index
    %c0_156 = arith.constant 0 : index
    %c0_157 = arith.constant 0 : index
    %339 = vector.load %arg1[%c25, %c0_156, %c0_157] : memref<27x4x8xbf16, #tpu.memory_space<vmem>>, vector<1x4x8xbf16>
    %340 = vector.shape_cast %339 : vector<1x4x8xbf16> to vector<4x8xbf16>
    %cst_158 = arith.constant dense<0.000000e+00> : vector<4x256xf32>
    %341 = tpu.matmul %340, %338, %cst_158 {dimension_numbers = #tpu.dot_dimension_numbers<[1], [0], [0], [1], [0, 0, 1, 1], [], []>} : vector<4x8xbf16>, vector<8x256xbf16>, vector<4x256xf32> -> vector<4x256xf32>
    %342 = arith.addf %329, %341 : vector<4x256xf32>
    %c85_i32 = arith.constant 85 : i32
    %343 = vector.broadcast %c85_i32 : i32 to vector<1x256xi32>
    %344 = arith.andi %3, %343 : vector<1x256xi32>
    %c85_i32_159 = arith.constant 85 : i32
    %345 = vector.broadcast %c85_i32_159 : i32 to vector<1x256xi32>
    %346 = arith.cmpi eq, %344, %345 : vector<1x256xi32>
    %c0_160 = arith.constant 0 : index
    %c201 = arith.constant 201 : index
    %347 = vector.load %arg8[%c0_160, %c201] : memref<8x512xbf16, #tpu.memory_space<vmem>>, vector<8x256xbf16>
    %cst_161 = arith.constant 0.000000e+00 : bf16
    %348 = vector.broadcast %cst_161 : bf16 to vector<8x256xbf16>
    %349 = vector.shape_cast %346 : vector<1x256xi1> to vector<1x256xi1>
    %350 = vector.broadcast %349 : vector<1x256xi1> to vector<8x256xi1>
    %351 = arith.select %350, %347, %348 : vector<8x256xi1>, vector<8x256xbf16>
    %c26 = arith.constant 26 : index
    %c0_162 = arith.constant 0 : index
    %c0_163 = arith.constant 0 : index
    %352 = vector.load %arg1[%c26, %c0_162, %c0_163] : memref<27x4x8xbf16, #tpu.memory_space<vmem>>, vector<1x4x8xbf16>
    %353 = vector.shape_cast %352 : vector<1x4x8xbf16> to vector<4x8xbf16>
    %cst_164 = arith.constant dense<0.000000e+00> : vector<4x256xf32>
    %354 = tpu.matmul %353, %351, %cst_164 {dimension_numbers = #tpu.dot_dimension_numbers<[1], [0], [0], [1], [0, 0, 1, 1], [], []>} : vector<4x8xbf16>, vector<8x256xbf16>, vector<4x256xf32> -> vector<4x256xf32>
    %355 = arith.addf %342, %354 : vector<4x256xf32>
    %c0_165 = arith.constant 0 : index
    %c0_166 = arith.constant 0 : index
    %356 = vector.load %arg4[%c0_165, %c0_166] : memref<4x1xf32, #tpu.memory_space<vmem>>, vector<4x1xf32>
    %357 = vector.broadcast %356 : vector<4x1xf32> to vector<4x256xf32>
    %358 = arith.mulf %355, %357 : vector<4x256xf32>
    %c0_167 = arith.constant 0 : index
    %c0_168 = arith.constant 0 : index
    %359 = vector.load %arg5[%c0_167, %c0_168] : memref<4x1xf32, #tpu.memory_space<vmem>>, vector<4x1xf32>
    %360 = vector.broadcast %359 : vector<4x1xf32> to vector<4x256xf32>
    %361 = arith.addf %358, %360 : vector<4x256xf32>
    %c0_169 = arith.constant 0 : index
    %c0_170 = arith.constant 0 : index
    %362 = vector.load %arg6[%c0_169, %c0_170] : memref<4x256xf32, #tpu.memory_space<vmem>>, vector<4x256xf32>
    %363 = arith.addf %361, %362 : vector<4x256xf32>
    %cst_171 = arith.constant 0.000000e+00 : f32
    %364 = vector.broadcast %cst_171 : f32 to vector<4x256xf32>
    %365 = arith.maximumf %363, %364 : vector<4x256xf32>
    %c0_172 = arith.constant 0 : index
    %c0_173 = arith.constant 0 : index
    %366 = vector.load %arg7[%c0_172, %c0_173] : memref<4x256xf32, #tpu.memory_space<vmem>>, vector<4x256xf32>
    tpu.vector_store %arg7[%c0_172, %c0_173], %365 {strides = array<i32>} : memref<4x256xf32, #tpu.memory_space<vmem>>, vector<4x256xf32>,
    return
  }
  func.func @transform_0(%arg0: i32) -> (i32, i32, i32) {
    %c0_i32 = arith.constant 0 : i32
    %c0_i32_0 = arith.constant 0 : i32
    %c0_i32_1 = arith.constant 0 : i32
    %c0_i32_2 = arith.constant 0 : i32
    return %c0_i32, %c0_i32_0, %c0_i32_1 : i32, i32, i32
  }
  func.func @transform_1(%arg0: i32) -> (i32, i32) {
    %c0_i32 = arith.constant 0 : i32
    %c0_i32_0 = arith.constant 0 : i32
    %c0_i32_1 = arith.constant 0 : i32
    return %c0_i32, %c0_i32_0 : i32, i32
  }
  func.func @transform_2(%arg0: i32) -> (i32, i32) {
    %c0_i32 = arith.constant 0 : i32
    %c0_i32_0 = arith.constant 0 : i32
    return %c0_i32, %arg0 : i32, i32
  }
  func.func @transform_3(%arg0: i32) -> (i32, i32) {
    %c0_i32 = arith.constant 0 : i32
    %c0_i32_0 = arith.constant 0 : i32
    %c0_i32_1 = arith.constant 0 : i32
    return %c0_i32, %c0_i32_0 : i32, i32
  }
  func.func @transform_4(%arg0: i32) -> (i32, i32) {
    %c0_i32 = arith.constant 0 : i32
    %c0_i32_0 = arith.constant 0 : i32
    %c0_i32_1 = arith.constant 0 : i32
    return %c0_i32, %c0_i32_0 : i32, i32
  }
  func.func @transform_5(%arg0: i32) -> (i32, i32) {
    %c0_i32 = arith.constant 0 : i32
    %c0_i32_0 = arith.constant 0 : i32
    return %c0_i32, %arg0 : i32, i32
  }
  func.func @transform_6(%arg0: i32) -> (i32, i32) {
    %c0_i32 = arith.constant 0 : i32
    %c0_i32_0 = arith.constant 0 : i32
    return %c0_i32, %arg0 : i32, i32
  }
}

</mosaic_0001>

<bundles_post_ra>
// kernel: a_call__.4
= control target key start
LH: loop header
LB: loop body
LE: loop exit
PB: predicated region body
PF: predicated region fallthrough
CT: control target
= control target key end

     0   :  { %s2704_s12 = smov 0   ;;  %s4223_s0 = inlined_call_operand.vmem [shape: bf16[27,4,8], index: 0, kind: input, shape index: {}]   ;;  %s4224_s1 = inlined_call_operand.vmem [shape: bf16[8,1280], index: 1, kind: input, shape index: {}]   ;;  %s4225_s2 = inlined_call_operand.vmem [shape: s32[1,1024], index: 2, kind: input, shape index: {}]   ;;  %s4226_s3 = inlined_call_operand.vmem [shape: f32[4,4,2], index: 3, kind: output, shape index: {}]  }
   0x1 LB: > { %s2535_s13 = sadd.s32 4294967295, %s2664_s12   ;;  %p2539_p0 = scmp.ge.s32.totalorder %s2664_s12, 1  ;;  %s2664_s12 = sphi %s2704_s12, %s13_s12  }
   0x2   : > { %p137_p1 = scmp.lt.s32.totalorder %s2664_s12, 5 }
   0x4   : > { %p138_p2 = pnand %p2539_p0, %p137_p1 }
   0x5   : > { %s2540_s14 = sshll.u32 (!%p138_p2), %s2535_s13, 1  ;;  %p164_p3 = scmp.lt.s32.totalorder (!%p138_p2), %s2535_s13, 3 }
   0x6   : > { %141 = sbr.rel (%p138_p2) target bundleno = 900 (0x384), region = 32  ;;  %p160_p4 = scmp.lt.s32.totalorder (!%p138_p2), %s2540_s14, 7 }
   0x7   : > { %s2542_s15 = sshll.u32 (!%p138_p2), %s2535_s13, 8 }
   0x8   : > { %s172_s17 = sshra.s32 (!%p138_p2), %s2542_s15, 7 }
   0x9   : > { %s2543_s24 = sshll.u32 (!%p138_p2), %s172_s17, 2 }
   0xa   : > { %s175_s27 = scalar_lea.vmem (!%p138_p2), %s4224_s1, %s2543_s24 }
   0xb   : > { %s4492_s13 = smov (!%p164_p3, %s2535_s13), 3  ;;  %s4494_s14 = smov (!%p160_p4, %s2540_s14), 7  ;;  %v186_v0 = vld [vmem:[%s175_s27] sm:$0xff]  ;;  %v188_v1 = vld [vmem:[%s175_s27 + $0x8] sm:$0xff] }
   0xc   : > { %s2541_s16 = sshll.u32 %s4492_s13, 2  ;;  %s2715_s20 = scalar_lea.vmem %s4225_s2, %s4494_s14  ;;  %187 = vst [vmem:[#allocation2] sm:$0xff] %v186_v0 }
   0xd   : > { %s2720_s23 = scalar_lea.vmem %s4226_s3, %s2541_s16  ;;  %189 = vst [vmem:[#allocation2 + $0x8] sm:$0xff] %v188_v1 }
   0xe   : > { %195 = vsyncadd [#allocation3], 256 }
   0xf   : > { %2660 = dma.done.wait [#allocation3], 256 }
  0x10   : > { %2661 = vsyncadd [#allocation3], 4294967040  ;;  %v2726_v2 = vld [vmem:[%s2715_s20] sm:$0x3]  ;;  %v2666_v11 = vmov 0   ;;  %s2667_s28 = smov 57  }
  0x11   : > { %v372_v3 = vand.u32 75, %v2726_v2  ;;  %v234_v4 = vand.u32 11, %v2726_v2  ;;  %v458_v5 = vand.u32 35, %v2726_v2  ;;  %v201_v6 = vand.u32 43, %v2726_v2  ;;  %s2668_s29 = smov 56   ;;  %s2669_s30 = smov 63  }
  0x12   : > { %v713_v7 = vand.u32 51, %v2726_v2  ;;  %v797_v8 = vand.u32 19, %v2726_v2  ;;  %v544_v9 = vand.u32 3, %v2726_v2  ;;  %v629_v10 = vand.u32 67, %v2726_v2  ;;  %s2670_s4 = smov 64   ;;  %s2671_s5 = smov 55  }
  0x13   : > { %vm373_vm0 = vcmp.eq.s32.totalorder %v372_v3, 75  ;;  %vm235_vm1 = vcmp.eq.s32.totalorder %v234_v4, 11  ;;  %vm459_vm2 = vcmp.eq.s32.totalorder %v458_v5, 35  ;;  %vm202_vm3 = vcmp.eq.s32.totalorder %v201_v6, 43  ;;  %s2672_s6 = smov 72   ;;  %s2673_s7 = smov 65  }
  0x14   : > { %v374_v12 = vsel %vm373_vm0, 1, %v2666_v11  ;;  %v236_v13 = vsel %vm235_vm1, 1, %v2666_v11  ;;  %v460_v14 = vsel %vm459_vm2, 1, %v2666_v11  ;;  %v205_v15 = vsel %vm202_vm3, 1, %v2666_v11  ;;  %s2674_s8 = smov 71   ;;  %s2675_s9 = smov 73  }
  0x15   : > { %v375_v16 = vperm.slane %v374_v12, 0  ;;  %v376_v17 = vperm.slane %v374_v12, 1  ;;  %v237_v18 = vperm.slane %v236_v13, 0  ;;  %v238_v19 = vperm.slane %v236_v13, 1  ;;  %s2676_s10 = smov 120   ;;  %s2677_s11 = smov 119  }
  0x16   : > { %v461_v20 = vperm.slane %v460_v14, 0  ;;  %v462_v21 = vperm.slane %v460_v14, 1  ;;  %v206_v22 = vperm.slane %v205_v15, 0  ;;  %v207_v23 = vperm.slane %v205_v15, 1  ;;  %s2678_s13 = smov 121   ;;  %s2679_s14 = smov 127  }
  0x17   : > { %vm377_vm4 = vcmp.eq.s32.totalorder %v375_v16, 1  ;;  %vm378_vm5 = vcmp.eq.s32.totalorder %v376_v17, 1  ;;  %vm239_vm6 = vcmp.eq.s32.totalorder %v237_v18, 1  ;;  %vm240_vm7 = vcmp.eq.s32.totalorder %v238_v19, 1  ;;  %s2680_s15 = smov 7   ;;  %s2681_s16 = smov 1  }
  0x18   : > { %vm379_vm8 = vmpackc.low %vm378_vm5, %vm377_vm4  ;;  %vm2740_vm9 = vcmp.eq.s32.totalorder %v461_v20, 1  ;;  %vm2744_vm10 = vcmp.eq.s32.totalorder %v462_v21, 1  ;;  %vm2748_vm11 = vcmp.eq.s32.totalorder %v206_v22, 1  ;;  %vm2752_vm12 = vcmp.eq.s32.totalorder %v207_v23, 1  ;;  %v2924_v53 = vld [vmem:[#allocation2 + $0x8] sm:$0xf] }
  0x19   : > { %v380_v28 = vsel %vm379_vm8, 65537, %v2666_v11  ;;  %vm241_vm13 = vmpackc.low %vm240_vm7, %vm239_vm6  ;;  %vm714_vm14 = vcmp.eq.s32.totalorder %v713_v7, 51  ;;  %vm798_vm15 = vcmp.eq.s32.totalorder %v797_v8, 19  ;;  %vm545_vm0 = vcmp.eq.s32.totalorder %v544_v9, 3  ;;  %s2682_s17 = smov 9   ;;  %s2683_s18 = smov 8  }
  0x1a   : > { %381 = vrot.lane.b32.xlu1 %v380_v28, %s2667_s28  ;;  %v242_v29 = vsel %vm241_vm13, 65537, %v2666_v11  ;;  %vm465_vm1 = vmpackc.low %vm2744_vm10, %vm2740_vm9  ;;  %v715_v30 = vsel %vm714_vm14, 1, %v2666_v11  ;;  %v799_v31 = vsel %vm798_vm15, 1, %v2666_v11  ;;  %v546_v32 = vsel %vm545_vm0, 1, %v2666_v11 }
  0x1b   : > { %243 = vrot.lane.b32.xlu0 %v242_v29, %s2668_s29  ;;  %vm210_vm2 = vmpackc.low %vm2752_vm12, %vm2748_vm11  ;;  %v800_v33 = vperm.slane %v799_v31, 0  ;;  %v801_v34 = vperm.slane %v799_v31, 1  ;;  %v547_v35 = vperm.slane %v546_v32, 0  ;;  %v548_v36 = vperm.slane %v546_v32, 1 }
  0x1c   : > { %v466_v37 = vsel %vm465_vm1, 65537, %v2666_v11  ;;  %v716_v38 = vperm.slane %v715_v30, 0  ;;  %vm630_vm3 = vcmp.eq.s32.totalorder %v629_v10, 67  ;;  %v717_v39 = vperm.slane %v715_v30, 1 }
  0x1d   : > { %vm549_vm4 = vcmp.eq.s32.totalorder %v547_v35, 1  ;;  %vm550_vm5 = vcmp.eq.s32.totalorder %v548_v36, 1  ;;  %v631_v40 = vsel %vm630_vm3, 1, %v2666_v11  ;;  %v211_v41 = vsel %vm210_vm2, 65537, %v2666_v11 }
  0x1e   : > { %v632_v42 = vperm.slane %v631_v40, 0  ;;  %v633_v43 = vperm.slane %v631_v40, 1  ;;  %v965_v44 = vand.u32 41, %v2726_v2  ;;  %vm2775_vm6 = vcmp.eq.s32.totalorder %v800_v33, 1  ;;  %vm551_vm8 = vmpackc.low %vm550_vm5, %vm549_vm4 }
  0x1f   : > { %vm2779_vm7 = vcmp.eq.s32.totalorder %v801_v34, 1  ;;  %v881_v47 = vand.u32 83, %v2726_v2  ;;  %v1051_v48 = vand.u32 9, %v2726_v2  ;;  %v552_v49 = vsel %vm551_vm8, 65537, %v2666_v11 }
  0x20   : > { %vm2786_vm9 = vcmp.eq.s32.totalorder %v632_v42, 1  ;;  %vm2790_vm10 = vcmp.eq.s32.totalorder %v633_v43, 1  ;;  %vm966_vm11 = vcmp.eq.s32.totalorder %v965_v44, 41  ;;  %vm2795_vm12 = vcmp.eq.s32.totalorder %v716_v38, 1  ;;  %553 = vrot.lane.b32.xlu2 %v552_v49, %s2670_s4  ;;  %vm804_vm0 = vmpackc.low %vm2779_vm7, %vm2775_vm6 }
  0x21   : > { %vm2799_vm13 = vcmp.eq.s32.totalorder %v717_v39, 1  ;;  %vm882_vm14 = vcmp.eq.s32.totalorder %v881_v47, 83  ;;  %vm1052_vm15 = vcmp.eq.s32.totalorder %v1051_v48, 9  ;;  %v967_v54 = vsel %vm966_vm11, 1, %v2666_v11  ;;  %vm636_vm1 = vmpackc.low %vm2790_vm10, %vm2786_vm9 }
  0x22   : > { %467 = vrot.lane.b32.xlu1 %v466_v37, %s2669_s30  ;;  %v883_v55 = vsel %vm882_vm14, 1, %v2666_v11  ;;  %v1137_v56 = vand.u32 73, %v2726_v2  ;;  %v1053_v59 = vsel %vm1052_vm15, 1, %v2666_v11  ;;  %vm720_vm2 = vmpackc.low %vm2799_vm13, %vm2795_vm12  ;;  %v968_v62 = vperm.slane %v967_v54, 0 }
  0x23   : > { %212 = vrot.lane.b32.xlu0 %v211_v41, %s2671_s5  ;;  %v884_v57 = vperm.slane %v883_v55, 0  ;;  %v885_v58 = vperm.slane %v883_v55, 1  ;;  %v1054_v60 = vperm.slane %v1053_v59, 0  ;;  %v1055_v61 = vperm.slane %v1053_v59, 1 }
  0x24   : > { %v969_v63 = vperm.slane %v967_v54, 1  ;;  %v805_v0 = vsel %vm804_vm0, 65537, %v2666_v11  ;;  %v637_v1 = vsel %vm636_vm1, 65537, %v2666_v11  ;;  %vm1138_vm3 = vcmp.eq.s32.totalorder %v1137_v56, 73 }
  0x25   : > { %v1223_v3 = vand.u32 33, %v2726_v2  ;;  %v721_v4 = vsel %vm720_vm2, 65537, %v2666_v11  ;;  %vm2825_vm4 = vcmp.eq.s32.totalorder %v884_v57, 1  ;;  %vm2829_vm5 = vcmp.eq.s32.totalorder %v885_v58, 1 }
  0x26   : > { %vm2833_vm6 = vcmp.eq.s32.totalorder %v1054_v60, 1  ;;  %vm2837_vm7 = vcmp.eq.s32.totalorder %v1055_v61, 1  ;;  %vm2843_vm9 = vcmp.eq.s32.totalorder %v968_v62, 1  ;;  %vm971_vm10 = vcmp.eq.s32.totalorder %v969_v63, 1  ;;  %vm888_vm11 = vmpackc.low %vm2829_vm5, %vm2825_vm4 }
  0x27   : > { %vm1224_vm8 = vcmp.eq.s32.totalorder %v1223_v3, 33  ;;  %v1139_v10 = vsel %vm1138_vm3, 1, %v2666_v11  ;;  %vm1058_vm12 = vmpackc.low %vm2837_vm7, %vm2833_vm6  ;;  %v889_v17 = vsel %vm888_vm11, 65537, %v2666_v11  ;;  %v1449_v22 = vand.u32 49, %v2726_v2 }
  0x28   : > { %638 = vrot.lane.b32.xlu2 %v637_v1, %s2673_s7  ;;  %v1225_v12 = vsel %vm1224_vm8, 1, %v2666_v11  ;;  %vm972_vm13 = vmpackc.low %vm971_vm10, %vm2843_vm9  ;;  %v1140_v13 = vperm.slane %v1139_v10, 0  ;;  %v1141_v14 = vperm.slane %v1139_v10, 1  ;;  %v1059_v18 = vsel %vm1058_vm12, 65537, %v2666_v11 }
  0x29   : > { %v1226_v15 = vperm.slane %v1225_v12, 0  ;;  %v1227_v16 = vperm.slane %v1225_v12, 1  ;;  %v973_v19 = vsel %vm972_vm13, 65537, %v2666_v11  ;;  %v1363_v23 = vand.u32 65, %v2726_v2 }
  0x2a   : > { %806 = vrot.lane.b32.xlu1 %v805_v0, %s2672_s6  ;;  %vm1142_vm14 = vcmp.eq.s32.totalorder %v1140_v13, 1  ;;  %vm1143_vm15 = vcmp.eq.s32.totalorder %v1141_v14, 1  ;;  %vm1450_vm4 = vcmp.eq.s32.totalorder %v1449_v22, 49  ;;  %v2893_v40 = vunpack.c.l.b16 %v2666_v11 }
  0x2b   : > { %722 = vrot.lane.b32.xlu0 %v721_v4, %s2674_s8  ;;  %vm1228_vm0 = vcmp.eq.s32.totalorder %v1226_v15, 1  ;;  %vm1229_vm1 = vcmp.eq.s32.totalorder %v1227_v16, 1  ;;  %vm1144_vm2 = vmpackc.low %vm1143_vm15, %vm1142_vm14  ;;  %v1451_v24 = vsel %vm1450_vm4, 1, %v2666_v11  ;;  %vm1364_vm5 = vcmp.eq.s32.totalorder %v1363_v23, 65 }
  0x2c   : > { %vm1230_vm3 = vmpackc.low %vm1229_vm1, %vm1228_vm0  ;;  %v1145_v20 = vsel %vm1144_vm2, 65537, %v2666_v11  ;;  %v1452_v25 = vperm.slane %v1451_v24, 0  ;;  %v1453_v26 = vperm.slane %v1451_v24, 1  ;;  %v1367_v27 = vsel %vm1364_vm5, 1, %v2666_v11 }
  0x2d   : > { %v1231_v21 = vsel %vm1230_vm3, 65537, %v2666_v11  ;;  %v1368_v28 = vperm.slane %v1367_v27, 0  ;;  %v1369_v29 = vperm.slane %v1367_v27, 1  ;;  %v2896_v41 = vunpack.c.h.b16 %v2666_v11 }
  0x2e   : > { %vm1454_vm6 = vcmp.eq.s32.totalorder %v1452_v25, 1  ;;  %vm1455_vm7 = vcmp.eq.s32.totalorder %v1453_v26, 1  ;;  %vm4228_vm12 = vcmask 457728   ;;  %vm4231_vm5 = vcmask 449536  }
  0x2f   : > { %vm1456_vm8 = vmpackc.low %vm1455_vm7, %vm1454_vm6  ;;  %vm1370_vm9 = vcmp.eq.s32.totalorder %v1368_v28, 1  ;;  %vm1371_vm10 = vcmp.eq.s32.totalorder %v1369_v29, 1 }
  0x30   : > { %890 = vrot.lane.b32.xlu2 %v889_v17, %s2675_s9  ;;  %v1457_v30 = vsel %vm1456_vm8, 65537, %v2666_v11  ;;  %vm1372_vm11 = vmpackc.low %vm1371_vm10, %vm1370_vm9 }
  0x31   : > { %v1373_v31 = vsel %vm1372_vm11, 65537, %v2666_v11 }
  0x32   : > { %1060 = vrot.lane.b32.xlu1 %v1059_v18, %s2676_s10 }
  0x33   : > { %974 = vrot.lane.b32.xlu0 %v973_v19, %s2677_s11 }
  0x38   : > { %1146 = vrot.lane.b32.xlu2 %v1145_v20, %s2678_s13 }
  0x3a   : > { %1374 = vrot.lane.b32.xlu1 %v1373_v31, %s2681_s16  ;;  %v3027_v31 = vld [vmem:[#allocation2] sm:$0xff] }
  0x3b   : > { %1232 = vrot.lane.b32.xlu0 %v1231_v21, %s2679_s14 }
  0x40   : > { %1458 = vrot.lane.b32.xlu2 %v1457_v30, %s2680_s15 }
  0x7a   : > { %v2878_v32 = vpop.permute.xlu2 %553 }
  0x7b   : > { %v2901_v45 = vrot.slane %v2878_v32, 4 }
  0x7d   : > { %v565_v54 = vunpack.c.l.b16 %v2901_v45  ;;  %v566_v55 = vunpack.c.h.b16 %v2901_v45 }
  0x7f   : > { %vm2965_vm7 = vcmp.ne.s32.totalorder %v565_v54, %v2893_v40  ;;  %vm2970_vm8 = vcmp.ne.s32.totalorder %v566_v55, %v2896_v41 }
  0x82   : > { %v2880_v33 = vpop.permute.xlu2 %638 }
  0x83   : > { %v2883_v34 = vrot.slane %v2880_v33, 4 }
  0x85   : > { %v649_v38 = vunpack.c.l.b16 %v2883_v34  ;;  %v650_v39 = vunpack.c.h.b16 %v2883_v34 }
  0x87   : > { %vm2904_vm13 = vcmp.ne.s32.totalorder %v649_v38, %v2893_v40  ;;  %vm2909_vm14 = vcmp.ne.s32.totalorder %v650_v39, %v2896_v41 }
  0x88   : > { %vm655_vm3 = vmpackc.low %vm2909_vm14, %vm2904_vm13 }
  0x89   : > { %v657_v6 = vsel %vm655_vm3, %v2924_v53, 0  ;;  %vm571_vm14 = vmpackc.low %vm2970_vm8, %vm2965_vm7 }
  0x8a   : > { %v2951_v63 = vpop.permute.xlu2 %890  ;;  %v664_v17 = vunpack.c.l.b16 %v657_v6  ;;  %v573_v49 = vsel %vm571_vm14, %v2924_v53, 0 }
  0x8b   : > { %v2962_v8 = vrot.slane %v2951_v63, 4 }
  0x8c   : > { %v2885_v35 = vpop.permute.xlu1 %381  ;;  %v667_v28 = vpack.c.b16 %v664_v17, %v664_v17 }
  0x8d   : > { %v2888_v36 = vrot.slane %v2885_v35, 4  ;;  %v244_v37 = vpop.permute.xlu0 %243  ;;  %v901_v26 = vunpack.c.l.b16 %v2962_v8  ;;  %v902_v30 = vunpack.c.h.b16 %v2962_v8 }
  0x8e   : > { %v245_v42 = vrot.slane %v244_v37, 4 }
  0x8f   : > { %v393_v43 = vunpack.c.l.b16 %v2888_v36  ;;  %v394_v44 = vunpack.c.h.b16 %v2888_v36 }
  0x90   : > { %v255_v46 = vunpack.c.l.b16 %v245_v42  ;;  %v256_v47 = vunpack.c.h.b16 %v245_v42  ;;  %v247_v50 = vsel %vm4228_vm12, %v245_v42, %v244_v37 }
  0x91   : > { %vm2915_vm15 = vcmp.ne.s32.totalorder %v393_v43, %v2893_v40  ;;  %vm2920_vm0 = vcmp.ne.s32.totalorder %v394_v44, %v2896_v41  ;;  %v248_v59 = vunpack.c.l.b16 %v247_v50  ;;  %v249_v60 = vunpack.c.h.b16 %v247_v50 }
  0x92   : > { %vm2931_vm1 = vcmp.ne.s32.totalorder %v255_v46, %v2893_v40  ;;  %vm2936_vm2 = vcmp.ne.s32.totalorder %v256_v47, %v2896_v41  ;;  %vm399_vm4 = vmpackc.low %vm2920_vm0, %vm2915_vm15 }
  0x93   : > { %v401_v1 = vsel %vm399_vm4, %v2924_v53, 0  ;;  %vm261_vm6 = vmpackc.low %vm2936_vm2, %vm2931_vm1  ;;  %vm2975_vm9 = vcmp.ne.s32.totalorder %v248_v59, %v2893_v40  ;;  %vm2980_vm10 = vcmp.ne.s32.totalorder %v249_v60, %v2896_v41  ;;  %vm3051_vm4 = vcmp.ne.s32.totalorder %v901_v26, %v2893_v40 }
  0x94   : > { %v2928_v56 = vpop.permute.xlu1 %467  ;;  %v408_v5 = vunpack.c.l.b16 %v401_v1  ;;  %v263_v16 = vsel %vm261_vm6, %v2924_v53, 0  ;;  %vm254_vm15 = vmpackc.low %vm2980_vm10, %vm2975_vm9  ;;  %vm3058_vm6 = vcmp.ne.s32.totalorder %v902_v30, %v2896_v41  ;;  %v1701_v59 = vand.u32 45, %v2726_v2 }
  0x95   : > { %v2945_v61 = vrot.slane %v2928_v56, 4  ;;  %v213_v62 = vpop.permute.xlu0 %212  ;;  %v270_v19 = vunpack.c.l.b16 %v263_v16  ;;  %v3042_v48 = vsel %vm254_vm15, %v3027_v31, 0 }
  0x96   : > { %v214_v0 = vrot.slane %v213_v62, 4  ;;  %v411_v15 = vpack.c.b16 %v408_v5, %v408_v5  ;;  %v3197_v5 = vpop.permute.xlu2 %1146 }
  0x97   : > { %v479_v3 = vunpack.c.l.b16 %v2945_v61  ;;  %v480_v4 = vunpack.c.h.b16 %v2945_v61  ;;  %v273_v23 = vpack.c.b16 %v270_v19, %v270_v19 }
  0x98   : > { %v224_v7 = vunpack.c.l.b16 %v214_v0  ;;  %v225_v14 = vunpack.c.h.b16 %v214_v0  ;;  %416 = vrot.lane.b32.xlu2 %v411_v15, %s2674_s8  ;;  %v216_v20 = vsel %vm4231_vm5, %v214_v0, %v213_v62  ;;  %v580_v62 = vunpack.c.l.b16 %v573_v49 }
  0x99   : > { %vm2986_vm11 = vcmp.ne.s32.totalorder %v479_v3, %v2893_v40  ;;  %vm484_vm13 = vcmp.ne.s32.totalorder %v480_v4, %v2896_v41  ;;  %v217_v37 = vunpack.c.l.b16 %v216_v20  ;;  %v218_v38 = vunpack.c.h.b16 %v216_v20  ;;  %278 = vrot.lane.b32.xlu0 %v273_v23, %s2672_s6 }
  0x9a   : > { %vm3002_vm0 = vcmp.ne.s32.totalorder %v224_v7, %v2893_v40  ;;  %vm3007_vm1 = vcmp.ne.s32.totalorder %v225_v14, %v2896_v41  ;;  %vm485_vm2 = vmpackc.low %vm484_vm13, %vm2986_vm11  ;;  %v269_v0 = vunpack.c.h.b16 %v3042_v48  ;;  %v583_v7 = vpack.c.b16 %v580_v62, %v580_v62 }
  0x9b   : > { %v487_v29 = vsel %vm485_vm2, %v2924_v53, 0  ;;  %vm230_vm3 = vmpackc.low %vm3007_vm1, %vm3002_vm0  ;;  %vm3070_vm9 = vcmp.ne.s32.totalorder %v217_v37, %v2893_v40  ;;  %vm3075_vm10 = vcmp.ne.s32.totalorder %v218_v38, %v2896_v41  ;;  %vm4227_vm2 = vcmask 515072  }
  0x9c   : > { %v3015_v25 = vpop.permute.xlu1 %806  ;;  %v494_v39 = vunpack.c.l.b16 %v487_v29  ;;  %v232_v42 = vsel %vm230_vm3, %v2924_v53, 0  ;;  %vm907_vm11 = vmpackc.low %vm3058_vm6, %vm3051_vm4  ;;  %v272_v13 = vpack.c.b16 %v269_v0, %v269_v0  ;;  %vm4230_vm6 = vcmask 465920  }
  0x9d   : > { %v3011_v24 = vpop.permute.xlu0 %722  ;;  %v324_v46 = vunpack.c.l.b16 %v232_v42  ;;  %v3034_v47 = vrot.slane %v3015_v25, 4  ;;  %vm223_vm0 = vmpackc.low %vm3075_vm10, %vm3070_vm9  ;;  %v909_v14 = vsel %vm907_vm11, %v2924_v53, 0  ;;  %v471_v21 = vsel %vm4227_vm2, %v2945_v61, %v2928_v56 }
  0x9e   : > { %v3019_v27 = vrot.slane %v3011_v24, 4  ;;  %v497_v57 = vpack.c.b16 %v494_v39, %v494_v39  ;;  %v231_v15 = vsel %vm223_vm0, %v3027_v31, 0  ;;  %v916_v19 = vunpack.c.l.b16 %v909_v14 }
  0x9f   : > { %v327_v51 = vpack.c.b16 %v324_v46, %v324_v46  ;;  %v817_v52 = vunpack.c.l.b16 %v3034_v47  ;;  %v818_v54 = vunpack.c.h.b16 %v3034_v47  ;;  %v322_v22 = vunpack.c.l.b16 %v231_v15 }
  0xa0   : > { %v733_v43 = vunpack.c.l.b16 %v3019_v27  ;;  %v734_v44 = vunpack.c.h.b16 %v3019_v27  ;;  %672 = vrot.lane.b32.xlu2 %v667_v28, %s2669_s30  ;;  %v385_v23 = vsel %vm4230_vm6, %v2888_v36, %v2885_v35  ;;  %v472_v28 = vunpack.c.l.b16 %v471_v21 }
  0xa1   : > { %332 = vrot.lane.b32.xlu1 %v327_v51, %s2675_s9  ;;  %vm3093_vm14 = vcmp.ne.s32.totalorder %v817_v52, %v2893_v40  ;;  %vm3098_vm15 = vcmp.ne.s32.totalorder %v818_v54, %v2896_v41  ;;  %502 = vrot.lane.b32.xlu0 %v497_v57, %s2673_s7  ;;  %v473_v29 = vunpack.c.h.b16 %v471_v21  ;;  %v919_v30 = vpack.c.b16 %v916_v19, %v916_v19 }
  0xa2   : > { %vm3064_vm7 = vcmp.ne.s32.totalorder %v733_v43, %v2893_v40  ;;  %vm738_vm8 = vcmp.ne.s32.totalorder %v734_v44, %v2896_v41  ;;  %vm823_vm1 = vmpackc.low %vm3098_vm15, %vm3093_vm14  ;;  %v386_v56 = vunpack.c.l.b16 %v385_v23  ;;  %v387_v61 = vunpack.c.h.b16 %v385_v23 }
  0xa3   : > { %vm739_vm13 = vmpackc.low %vm738_vm8, %vm3064_vm7  ;;  %v825_v20 = vsel %vm823_vm1, %v2924_v53, 0  ;;  %vm4229_vm8 = vcmask 523264   ;;  %v325_v38 = vpack.c.b16 %v322_v22, %v322_v22  ;;  %vm3146_vm9 = vcmp.ne.s32.totalorder %v472_v28, %v2893_v40 }
  0xa4   : > { %v741_v6 = vsel %vm739_vm13, %v2924_v53, 0  ;;  %v832_v26 = vunpack.c.l.b16 %v825_v20  ;;  %v557_v39 = vsel %vm4229_vm8, %v2901_v45, %v2878_v32  ;;  %vm3151_vm10 = vcmp.ne.s32.totalorder %v473_v29, %v2896_v41 }
  0xa5   : > { %v3081_v1 = vpop.permute.xlu0 %974  ;;  %v748_v9 = vunpack.c.l.b16 %v741_v6  ;;  %vm3157_vm11 = vcmp.ne.s32.totalorder %v386_v56, %v2893_v40  ;;  %vm3162_vm13 = vcmp.ne.s32.totalorder %v387_v61, %v2896_v41  ;;  %v558_v45 = vunpack.c.l.b16 %v557_v39  ;;  %vm478_vm14 = vmpackc.low %vm3151_vm10, %vm3146_vm9 }
  0xa6   : > { %v3090_v3 = vrot.slane %v3081_v1, 4  ;;  %v835_v42 = vpack.c.b16 %v832_v26, %v832_v26  ;;  %v559_v46 = vunpack.c.h.b16 %v557_v39  ;;  %v268_v49 = vunpack.c.l.b16 %v3042_v48  ;;  %vm392_vm15 = vmpackc.low %vm3162_vm13, %vm3157_vm11 }
  0xa7   : > { %v751_v18 = vpack.c.b16 %v748_v9, %v748_v9  ;;  %v1533_v51 = vand.u32 17, %v2726_v2  ;;  %v323_v52 = vunpack.c.h.b16 %v231_v15  ;;  %vm3178_vm0 = vcmp.ne.s32.totalorder %v558_v45, %v2893_v40 }
  0xa8   : > { %v986_v10 = vunpack.c.l.b16 %v3090_v3  ;;  %v987_v12 = vunpack.c.h.b16 %v3090_v3  ;;  %276 = vrot.lane.b32.xlu2 %v272_v13, %s2672_s6  ;;  %vm3183_vm1 = vcmp.ne.s32.totalorder %v559_v46, %v2896_v41  ;;  %v271_v55 = vpack.c.b16 %v268_v49, %v268_v49 }
  0xa9   : > { %588 = vrot.lane.b32.xlu1 %v583_v7, %s2670_s4  ;;  %756 = vrot.lane.b32.xlu0 %v751_v18, %s2667_s28  ;;  %v486_v57 = vsel %vm478_vm14, %v3027_v31, 0  ;;  %v400_v58 = vsel %vm392_vm15, %v3027_v31, 0  ;;  %v326_v60 = vpack.c.b16 %v323_v52, %v323_v52  ;;  %v1617_v0 = vand.u32 81, %v2726_v2 }
  0xaa   : > { %vm3117_vm3 = vcmp.ne.s32.totalorder %v986_v10, %v2893_v40  ;;  %vm3122_vm4 = vcmp.ne.s32.totalorder %v987_v12, %v2896_v41  ;;  %v493_v62 = vunpack.c.h.b16 %v486_v57  ;;  %v407_v4 = vunpack.c.h.b16 %v400_v58 }
  0xab   : > { %vm992_vm7 = vmpackc.low %vm3122_vm4, %vm3117_vm3  ;;  %vm1534_vm3 = vcmp.eq.s32.totalorder %v1533_v51, 17  ;;  %vm1702_vm9 = vcmp.eq.s32.totalorder %v1701_v59, 45  ;;  %v406_v9 = vunpack.c.l.b16 %v400_v58  ;;  %v3205_v12 = vrot.slane %v3197_v5, 4 }
  0xac   : > { %v994_v37 = vsel %vm992_vm7, %v2924_v53, 0  ;;  %vm564_vm4 = vmpackc.low %vm3183_vm1, %vm3178_vm0  ;;  %v1535_v6 = vsel %vm1534_vm3, 1, %v2666_v11  ;;  %vm4237_vm7 = vcmask 580608   ;;  %v496_v10 = vpack.c.b16 %v493_v62, %v493_v62 }
  0xad   : > { %v1001_v35 = vunpack.c.l.b16 %v994_v37  ;;  %v3202_v7 = vsel %vm564_vm4, %v3027_v31, 0  ;;  %vm1618_vm10 = vcmp.eq.s32.totalorder %v1617_v0, 81  ;;  %v410_v13 = vpack.c.b16 %v407_v4, %v407_v4 }
  0xae   : > { %v1536_v2 = vperm.slane %v1535_v6, 0  ;;  %v1537_v14 = vperm.slane %v1535_v6, 1  ;;  %v578_v15 = vunpack.c.l.b16 %v3202_v7  ;;  %v1703_v16 = vsel %vm1702_vm9, 1, %v2666_v11 }
  0xaf   : > { %v1004_v50 = vpack.c.b16 %v1001_v35, %v1001_v35  ;;  %vm4236_vm11 = vcmask 531456   ;;  %v725_v17 = vsel %vm4237_vm7, %v3019_v27, %v3011_v24  ;;  %v1619_v18 = vsel %vm1618_vm10, 1, %v2666_v11 }
  0xb0   : > { %328 = vrot.lane.b32.xlu2 %v325_v38, %s2675_s9  ;;  %v409_v19 = vpack.c.b16 %v406_v9, %v406_v9  ;;  %v492_v20 = vunpack.c.l.b16 %v486_v57  ;;  %v1158_v21 = vunpack.c.l.b16 %v3205_v12  ;;  %v1159_v22 = vunpack.c.h.b16 %v3205_v12 }
  0xb1   : > { %924 = vrot.lane.b32.xlu1 %v919_v30, %s2671_s5  ;;  %840 = vrot.lane.b32.xlu0 %v835_v42, %s2668_s29  ;;  %vm3217_vm13 = vcmp.eq.s32.totalorder %v1536_v2, 1  ;;  %vm3221_vm14 = vcmp.eq.s32.totalorder %v1537_v14, 1  ;;  %v1704_v28 = vperm.slane %v1703_v16, 0  ;;  %v1705_v24 = vperm.slane %v1703_v16, 1 }
  0xb2   : > { %v581_v27 = vpack.c.b16 %v578_v15, %v578_v15  ;;  %v1620_v29 = vperm.slane %v1619_v18, 0  ;;  %v1621_v30 = vperm.slane %v1619_v18, 1  ;;  %v641_v37 = vsel %vm4236_vm11, %v2883_v34, %v2880_v33  ;;  %vm1540_vm15 = vmpackc.low %vm3221_vm14, %vm3217_vm13 }
  0xb3   : > { %v726_v56 = vunpack.c.l.b16 %v725_v17  ;;  %v727_v61 = vunpack.c.h.b16 %v725_v17  ;;  %vm3234_vm0 = vcmp.ne.s32.totalorder %v1158_v21, %v2893_v40  ;;  %vm3239_vm1 = vcmp.ne.s32.totalorder %v1159_v22, %v2896_v41 }
  0xb4   : > { %vm4235_vm3 = vcmask 588800   ;;  %v495_v42 = vpack.c.b16 %v492_v20, %v492_v20  ;;  %vm3243_vm4 = vcmp.eq.s32.totalorder %v1704_v28, 1  ;;  %vm3247_vm9 = vcmp.eq.s32.totalorder %v1705_v24, 1  ;;  %vm1164_vm12 = vmpackc.low %vm3239_vm1, %vm3234_vm0 }
  0xb5   : > { %v642_v35 = vunpack.c.l.b16 %v641_v37  ;;  %v643_v36 = vunpack.c.h.b16 %v641_v37  ;;  %vm3252_vm10 = vcmp.eq.s32.totalorder %v1620_v29, 1  ;;  %vm3256_vm13 = vcmp.eq.s32.totalorder %v1621_v30, 1  ;;  %vm1708_vm8 = vmpackc.low %vm3247_vm9, %vm3243_vm4 }
  0xb6   : > { %vm3261_vm14 = vcmp.ne.s32.totalorder %v726_v56, %v2893_v40  ;;  %vm3266_vm2 = vcmp.ne.s32.totalorder %v727_v61, %v2896_v41  ;;  %v1541_v46 = vsel %vm1540_vm15, 65537, %v2666_v11  ;;  %v809_v49 = vsel %vm4235_vm3, %v3034_v47, %v3015_v25  ;;  %vm1624_vm15 = vmpackc.low %vm3256_vm13, %vm3252_vm10 }
  0xb7   : > { %vm3290_vm6 = vcmp.ne.s32.totalorder %v642_v35, %v2893_v40  ;;  %vm3295_vm5 = vcmp.ne.s32.totalorder %v643_v36, %v2896_v41  ;;  %vm732_vm4 = vmpackc.low %vm3266_vm2, %vm3261_vm14  ;;  %v810_v47 = vunpack.c.l.b16 %v809_v49  ;;  %v811_v52 = vunpack.c.h.b16 %v809_v49 }
  0xb8   : > { %1009 = vrot.lane.b32.xlu2 %v1004_v50, %s2682_s17  ;;  %v3283_v50 = vpop.permute.xlu1 %1060  ;;  %v1709_v54 = vsel %vm1708_vm8, 65537, %v2666_v11  ;;  %v579_v57 = vunpack.c.h.b16 %v3202_v7  ;;  %v1166_v58 = vsel %vm1164_vm12, %v2924_v53, 0  ;;  %vm4234_vm2 = vcmask 596992   ;;  %vm648_vm8 = vmpackc.low %vm3295_vm5, %vm3290_vm6 }
  0xb9   : > { %274 = vrot.lane.b32.xlu1 %v271_v55, %s2672_s6  ;;  %330 = vrot.lane.b32.xlu0 %v326_v60, %s2675_s9  ;;  %v1062_v48 = vrot.slane %v3283_v50, 4  ;;  %v1625_v55 = vsel %vm1624_vm15, 65537, %v2666_v11  ;;  %v3315_v62 = vsel %vm732_vm4, %v3027_v31, 0  ;;  %vm3323_vm9 = vcmp.ne.s32.totalorder %v810_v47, %v2893_v40  ;;  %v3425_v47 = vpop.permute.xlu2 %1458 }
  0xba   : > { %vm3328_vm12 = vcmp.ne.s32.totalorder %v811_v52, %v2896_v41  ;;  %v1173_v6 = vunpack.c.l.b16 %v1166_v58  ;;  %v893_v7 = vsel %vm4234_vm2, %v2962_v8, %v2951_v63  ;;  %v582_v9 = vpack.c.b16 %v579_v57, %v579_v57  ;;  %v3353_v63 = vpop.permute.xlu0 %1232 }
  0xbb   : > { %v1072_v59 = vunpack.c.l.b16 %v1062_v48  ;;  %v1073_v60 = vunpack.c.h.b16 %v1062_v48  ;;  %vm816_vm0 = vmpackc.low %vm3328_vm12, %vm3323_vm9  ;;  %v894_v8 = vunpack.c.l.b16 %v893_v7  ;;  %v895_v15 = vunpack.c.h.b16 %v893_v7 }
  0xbc   : > { %v1176_v16 = vpack.c.b16 %v1173_v6, %v1173_v6  ;;  %v1234_v20 = vrot.slane %v3353_v63, 4  ;;  %vm4232_vm14 = vcmask 973824   ;;  %vm4233_vm4 = vcmask 982016  }
  0xbd   : > { %vm3339_vm5 = vcmp.ne.s32.totalorder %v1072_v59, %v2893_v40  ;;  %vm3344_vm6 = vcmp.ne.s32.totalorder %v1073_v60, %v2896_v41  ;;  %vm3365_vm10 = vcmp.ne.s32.totalorder %v894_v8, %v2893_v40  ;;  %vm3370_vm13 = vcmp.ne.s32.totalorder %v895_v15, %v2896_v41 }
  0xbe   : > { %vm1078_vm1 = vmpackc.low %vm3344_vm6, %vm3339_vm5  ;;  %v1245_v29 = vunpack.c.h.b16 %v1234_v20  ;;  %v978_v37 = vsel %vm4232_vm14, %v3090_v3, %v3081_v1  ;;  %v1064_v3 = vsel %vm4233_vm4, %v1062_v48, %v3283_v50  ;;  %vm1149_vm5 = vcmask 990208  }
  0xbf   : > { %v1080_v23 = vsel %vm1078_vm1, %v2924_v53, 0  ;;  %vm900_vm15 = vmpackc.low %vm3370_vm13, %vm3365_vm10  ;;  %v979_v33 = vunpack.c.l.b16 %v978_v37  ;;  %v980_v1 = vunpack.c.h.b16 %v978_v37  ;;  %v746_v36 = vunpack.c.l.b16 %v3315_v62 }
  0xc0   : > { %500 = vrot.lane.b32.xlu2 %v496_v10, %s2673_s7  ;;  %v747_v10 = vunpack.c.h.b16 %v3315_v62  ;;  %v1087_v30 = vunpack.c.l.b16 %v1080_v23  ;;  %v908_v38 = vsel %vm900_vm15, %v3027_v31, 0  ;;  %vm3392_vm9 = vcmp.ne.s32.totalorder %v1245_v29, %v2896_v41 }
  0xc1   : > { %414 = vrot.lane.b32.xlu1 %v410_v13, %s2674_s8  ;;  %412 = vrot.lane.b32.xlu0 %v409_v19, %s2674_s8  ;;  %v656_v13 = vsel %vm648_vm8, %v3027_v31, 0  ;;  %v3360_v19 = vsel %vm816_vm0, %v3027_v31, 0  ;;  %v914_v35 = vunpack.c.l.b16 %v908_v38  ;;  %vm3406_vm6 = vcmp.ne.s32.totalorder %v979_v33, %v2893_v40 }
  0xc2   : > { %v662_v17 = vunpack.c.l.b16 %v656_v13  ;;  %v750_v18 = vpack.c.b16 %v747_v10, %v747_v10  ;;  %v831_v28 = vunpack.c.h.b16 %v3360_v19  ;;  %v663_v24 = vunpack.c.h.b16 %v656_v13 }
  0xc3   : > { %v1090_v34 = vpack.c.b16 %v1087_v30, %v1087_v30  ;;  %vm3412_vm0 = vcmp.ne.s32.totalorder %v980_v1, %v2896_v41  ;;  %v1065_v32 = vunpack.c.l.b16 %v1064_v3  ;;  %v1066_v45 = vunpack.c.h.b16 %v1064_v3 }
  0xc4   : > { %v665_v26 = vpack.c.b16 %v662_v17, %v662_v17  ;;  %v834_v56 = vpack.c.b16 %v831_v28, %v831_v28  ;;  %v666_v61 = vpack.c.b16 %v663_v24, %v663_v24  ;;  %v1150_v49 = vsel %vm1149_vm5, %v3205_v12, %v3197_v5  ;;  %vm985_vm1 = vmpackc.low %vm3412_vm0, %vm3406_vm6  ;;  %v3473_v17 = vld [vmem:[%s2715_s20] sm:$0x3] }
  0xc5   : > { %v915_v50 = vunpack.c.h.b16 %v908_v38  ;;  %v917_v51 = vpack.c.b16 %v914_v35, %v914_v35  ;;  %v749_v25 = vpack.c.b16 %v746_v36, %v746_v36  ;;  %v1152_v48 = vunpack.c.h.b16 %v1150_v49 }
  0xc6   : > { %vm3428_vm10 = vcmp.ne.s32.totalorder %v1065_v32, %v2893_v40  ;;  %vm1070_vm13 = vcmp.ne.s32.totalorder %v1066_v45, %v2896_v41  ;;  %vm1235_vm15 = vcmask 1039360   ;;  %v830_v12 = vunpack.c.l.b16 %v3360_v19  ;;  %v3514_v32 = vld [vmem:[#allocation2 + $0x4] sm:$0xff] }
  0xc7   : > { %v918_v5 = vpack.c.b16 %v915_v50, %v915_v50  ;;  %v1236_v60 = vsel %vm1235_vm15, %v1234_v20, %v3353_v63  ;;  %v1869_v23 = vand.u32 77, %v3473_v17 }
  0xc8   : > { %584 = vrot.lane.b32.xlu2 %v581_v27, %s2670_s4  ;;  %v1244_v27 = vunpack.c.l.b16 %v1234_v20  ;;  %v833_v0 = vpack.c.b16 %v830_v12, %v830_v12  ;;  %v1237_v6 = vunpack.c.l.b16 %v1236_v60  ;;  %v1238_v7 = vunpack.c.h.b16 %v1236_v60 }
  0xc9   : > { %498 = vrot.lane.b32.xlu1 %v495_v42, %s2673_s7  ;;  %1542 = vrot.lane.b32.xlu0 %v1541_v46, %s2683_s18 }
  0xca   : > { %vm3387_vm8 = vcmp.ne.s32.totalorder %v1244_v27, %v2893_v40  ;;  %vm3463_vm0 = vcmp.ne.s32.totalorder %v1237_v6, %v2893_v40 }
  0xcb   : > { %vm1250_vm12 = vmpackc.low %vm3392_vm9, %vm3387_vm8 }
  0xcc   : > { %v1252_v46 = vsel %vm1250_vm12, %v2924_v53, 0  ;;  %vm1071_vm8 = vmpackc.low %vm1070_vm13, %vm3428_vm10  ;;  %vm3445_vm12 = vcmp.ne.s32.totalorder %v1152_v48, %v2896_v41  ;;  %vm1269_vm10 = vcmask 7168  }
  0xcd   : > { %v1259_v52 = vunpack.c.l.b16 %v1252_v46  ;;  %v1079_v4 = vsel %vm1071_vm8, %v3027_v31, 0 }
  0xce   : > { %v1086_v2 = vunpack.c.h.b16 %v1079_v4  ;;  %v1085_v24 = vunpack.c.l.b16 %v1079_v4  ;;  %v3567_v4 = vld [vmem:[#allocation2 + $0xc] sm:$0xf] }
  0xcf   : > { %v1262_v57 = vpack.c.b16 %v1259_v52, %v1259_v52 }
  0xd0   : > { %1710 = vrot.lane.b32.xlu2 %v1709_v54, %s2671_s5  ;;  %v1151_v54 = vunpack.c.l.b16 %v1150_v49  ;;  %v1089_v20 = vpack.c.b16 %v1086_v2, %v1086_v2  ;;  %v1088_v38 = vpack.c.b16 %v1085_v24, %v1085_v24 }
  0xd1   : > { %1626 = vrot.lane.b32.xlu1 %v1625_v55, %s2682_s17  ;;  %586 = vrot.lane.b32.xlu0 %v582_v9, %s2670_s4  ;;  %v993_v55 = vsel %vm985_vm1, %v3027_v31, 0  ;;  %v1375_v9 = vpop.permute.xlu1 %1374  ;;  %vm3468_vm1 = vcmp.ne.s32.totalorder %v1238_v7, %v2896_v41  ;;  %v2037_v7 = vand.u32 5, %v3473_v17 }
  0xd2   : > { %vm3440_vm9 = vcmp.ne.s32.totalorder %v1151_v54, %v2893_v40  ;;  %v999_v62 = vunpack.c.l.b16 %v993_v55  ;;  %v1000_v14 = vunpack.c.h.b16 %v993_v55  ;;  %v1376_v8 = vrot.slane %v1375_v9, 4  ;;  %vm1243_vm13 = vmpackc.low %vm3468_vm1, %vm3463_vm0 }
  0xd3   : > { %vm1157_vm6 = vmpackc.low %vm3445_vm12, %vm3440_vm9  ;;  %v1251_v29 = vsel %vm1243_vm13, %v3027_v31, 0  ;;  %vm1183_vm9 = vcmask 56320   ;;  %vm1870_vm12 = vcmp.eq.s32.totalorder %v1869_v23, 77 }
  0xd4   : > { %v1002_v10 = vpack.c.b16 %v999_v62, %v999_v62  ;;  %v1165_v63 = vsel %vm1157_vm6, %v3027_v31, 0  ;;  %v1003_v21 = vpack.c.b16 %v1000_v14, %v1000_v14  ;;  %v1377_v22 = vsel %vm1269_vm10, %v1376_v8, %v1375_v9 }
  0xd5   : > { %v1172_v19 = vunpack.c.h.b16 %v1165_v63  ;;  %v1171_v27 = vunpack.c.l.b16 %v1165_v63  ;;  %v1378_v30 = vunpack.c.l.b16 %v1377_v22  ;;  %v1379_v37 = vunpack.c.h.b16 %v1377_v22 }
  0xd6   : > { %v1257_v42 = vunpack.c.l.b16 %v1251_v29  ;;  %v1871_v3 = vsel %vm1870_vm12, 1, %v2666_v11  ;;  %v1258_v44 = vunpack.c.h.b16 %v1251_v29 }
  0xd7   : > { %v1174_v39 = vpack.c.b16 %v1171_v27, %v1171_v27  ;;  %vm3493_vm6 = vcmp.ne.s32.totalorder %v1378_v30, %v2893_v40  ;;  %vm3498_vm0 = vcmp.ne.s32.totalorder %v1379_v37, %v2896_v41  ;;  %v1872_v49 = vperm.slane %v1871_v3, 0 }
  0xd8   : > { %754 = vrot.lane.b32.xlu2 %v750_v18, %s2667_s28  ;;  %v1785_v18 = vand.u32 13, %v3473_v17  ;;  %v1260_v36 = vpack.c.b16 %v1257_v42, %v1257_v42  ;;  %vm1384_vm1 = vmpackc.low %vm3498_vm0, %vm3493_vm6  ;;  %v1873_v50 = vperm.slane %v1871_v3, 1  ;;  %v1261_v53 = vpack.c.b16 %v1258_v44, %v1258_v44 }
  0xd9   : > { %1181 = vrot.lane.b32.xlu1 %v1176_v16, %s2680_s15  ;;  %668 = vrot.lane.b32.xlu0 %v665_v26, %s2669_s30  ;;  %v1175_v26 = vpack.c.b16 %v1172_v19, %v1172_v19  ;;  %vm3530_vm6 = vcmp.eq.s32.totalorder %v1872_v49, 1 }
  0xda   : > { %vm1786_vm8 = vcmp.eq.s32.totalorder %v1785_v18, 13  ;;  %vm3534_vm0 = vcmp.eq.s32.totalorder %v1873_v50, 1  ;;  %v3589_v18 = vld [vmem:[%s4223_s0 + $0x2] sm:$0x3] }
  0xe0   : > { %838 = vrot.lane.b32.xlu2 %v834_v56, %s2668_s29  ;;  %v1787_v56 = vsel %vm1786_vm8, 1, %v2666_v11 }
  0xe1   : > { %670 = vrot.lane.b32.xlu1 %v666_v61, %s2669_s30  ;;  %1095 = vrot.lane.b32.xlu0 %v1090_v34, %s2683_s18  ;;  %v3490_v61 = vrot.slane %v3425_v47, 4  ;;  %v1788_v34 = vperm.slane %v1787_v56, 0  ;;  %v1789_v1 = vperm.slane %v1787_v56, 1 }
  0xe3   : > { %v1461_v35 = vsel %vm1183_vm9, %v3490_v61, %v3425_v47  ;;  %vm3516_vm13 = vcmp.eq.s32.totalorder %v1788_v34, 1  ;;  %vm3520_vm8 = vcmp.eq.s32.totalorder %v1789_v1, 1  ;;  %v1392_v47 = vsel %vm1384_vm1, %v3514_v32, 0 }
  0xe4   : > { %v1462_v52 = vunpack.c.l.b16 %v1461_v35  ;;  %vm1792_vm12 = vmpackc.low %vm3520_vm8, %vm3516_vm13  ;;  %v1398_v54 = vunpack.c.l.b16 %v1392_v47  ;;  %v1463_v48 = vunpack.c.h.b16 %v1461_v35  ;;  %v1399_v6 = vunpack.c.h.b16 %v1392_v47 }
  0xe5   : > { %v1793_v59 = vsel %vm1792_vm12, 65537, %v2666_v11  ;;  %vm1876_vm13 = vmpackc.low %vm3534_vm0, %vm3530_vm6  ;;  %vm287_vm6 = vcmask 1043456   ;;  %v1469_v3 = vunpack.c.l.b16 %v3490_v61  ;;  %v1470_v35 = vunpack.c.h.b16 %v3490_v61 }
  0xe6   : > { %v1401_v58 = vpack.c.b16 %v1398_v54, %v1398_v54  ;;  %vm3558_vm8 = vcmp.ne.s32.totalorder %v1462_v52, %v2893_v40  ;;  %vm3563_vm4 = vcmp.ne.s32.totalorder %v1463_v48, %v2896_v41 }
  0xe7   : > { %vm1468_vm0 = vmpackc.low %vm3563_vm4, %vm3558_vm8  ;;  %vm283_vm4 = vcmask 64512  }
  0xe8   : > { %920 = vrot.lane.b32.xlu2 %v917_v51, %s2671_s5  ;;  %v1385_v51 = vunpack.c.l.b16 %v1376_v8  ;;  %v1476_v15 = vsel %vm1468_vm0, %v3514_v32, 0 }
  0xe9   : > { %752 = vrot.lane.b32.xlu1 %v749_v25, %s2667_s28  ;;  %922 = vrot.lane.b32.xlu0 %v918_v5, %s2671_s5  ;;  %v1386_v25 = vunpack.c.h.b16 %v1376_v8  ;;  %v1402_v8 = vpack.c.b16 %v1399_v6, %v1399_v6  ;;  %v1482_v22 = vunpack.c.l.b16 %v1476_v15  ;;  %v2549_v6 = vld [vmem:[%s4223_s0 + $0x4] sm:$0x3] }
  0xea   : > { %vm3539_vm14 = vcmp.ne.s32.totalorder %v1385_v51, %v2893_v40 }
  0xeb   : > { %vm3544_vm1 = vcmp.ne.s32.totalorder %v1386_v25, %v2896_v41 }
  0xec   : > { %vm1391_vm12 = vmpackc.low %vm3544_vm1, %vm3539_vm14  ;;  %vm2038_vm14 = vcmp.eq.s32.totalorder %v2037_v7, 5 }
  0xed   : > { %v1393_v2 = vsel %vm1391_vm12, %v3567_v4, 0  ;;  %v2039_v23 = vsel %vm2038_vm14, 1, %v2666_v11 }
  0xee   : > { %v1400_v16 = vunpack.c.l.b16 %v1393_v2  ;;  %v2040_v37 = vperm.slane %v2039_v23, 0  ;;  %v2041_v56 = vperm.slane %v2039_v23, 1  ;;  %v2121_v2 = vand.u32 69, %v3473_v17 }
  0xf0   : > { %1267 = vrot.lane.b32.xlu2 %v1262_v57, %s2681_s16  ;;  %vm2042_vm0 = vcmp.eq.s32.totalorder %v2040_v37, 1  ;;  %vm2043_vm14 = vcmp.eq.s32.totalorder %v2041_v56, 1  ;;  %v233_v57 = vld [vmem:[%s4223_s0] sm:$0x3] }
  0xf1   : > { %836 = vrot.lane.b32.xlu1 %v833_v0, %s2668_s29  ;;  %1005 = vrot.lane.b32.xlu0 %v1002_v10, %s2682_s17  ;;  %v1877_v10 = vsel %vm1876_vm13, 65537, %v2666_v11 }
  0xf2   : > { %v3458_v13 = vpop.permute.xlu2 %416 }
  0xf8   : > { %1093 = vrot.lane.b32.xlu2 %v1089_v20, %s2683_s18  ;;  %v1953_v20 = vand.u32 37, %v3473_v17 }
  0xf9   : > { %1007 = vrot.lane.b32.xlu1 %v1003_v21, %s2682_s17  ;;  %1179 = vrot.lane.b32.xlu0 %v1175_v26, %s2680_s15  ;;  %v1403_v26 = vpack.c.b16 %v1400_v16, %v1400_v16 }
  0xfa   : > { %v3484_v28 = vpop.permute.xlu2 %672  ;;  %vm1954_vm1 = vcmp.eq.s32.totalorder %v1953_v20, 37 }
  0xfb   : > { %v1955_v24 = vsel %vm1954_vm1, 1, %v2666_v11  ;;  %vm2044_vm1 = vmpackc.low %vm2043_vm14, %vm2042_vm0  ;;  %vm4398_vm0 = vcmask 449536   ;;  %vm2122_vm14 = vcmp.eq.s32.totalorder %v2121_v2, 69 }
  0xfc   : > { %v1956_v29 = vperm.slane %v1955_v24, 0  ;;  %v1957_v30 = vperm.slane %v1955_v24, 1  ;;  %v2123_v37 = vsel %vm2122_vm14, 1, %v2666_v11 }
  0xfe   : > { %vm1958_vm13 = vcmp.eq.s32.totalorder %v1956_v29, 1  ;;  %vm1959_vm8 = vcmp.eq.s32.totalorder %v1957_v30, 1 }
  0xff   : > { %vm1960_vm12 = vmpackc.low %vm1959_vm8, %vm1958_vm13  ;;  %vm1473_vm13 = vcmp.ne.s32.totalorder %v1469_v3, %v2893_v40  ;;  %vm1474_vm8 = vcmp.ne.s32.totalorder %v1470_v35, %v2896_v41  ;;  %v2124_v35 = vperm.slane %v2123_v37, 0 }
 0x100   : > { %1177 = vrot.lane.b32.xlu2 %v1174_v39, %s2680_s15  ;;  %v1483_v39 = vunpack.c.h.b16 %v1476_v15  ;;  %v1961_v33 = vsel %vm1960_vm12, 65537, %v2666_v11  ;;  %vm1475_vm12 = vmpackc.low %vm1474_vm8, %vm1473_vm13  ;;  %vm1011_vm13 = vcmask 72704  }
 0x101   : > { %1091 = vrot.lane.b32.xlu1 %v1088_v38, %s2683_s18  ;;  %1263 = vrot.lane.b32.xlu0 %v1260_v36, %s2681_s16  ;;  %v1485_v38 = vpack.c.b16 %v1482_v22, %v1482_v22  ;;  %v2045_v36 = vsel %vm2044_vm1, 65537, %v2666_v11  ;;  %v1477_v49 = vsel %vm1475_vm12, %v3567_v4, 0  ;;  %vm4399_vm1 = vcmask 465920  }
 0x102   : > { %v3508_v43 = vpop.permute.xlu2 %276  ;;  %v1486_v34 = vpack.c.b16 %v1483_v39, %v1483_v39  ;;  %v1484_v61 = vunpack.c.l.b16 %v1477_v49  ;;  %v2289_v49 = vand.u32 21, %v3473_v17 }
 0x104   : > { %v1487_v51 = vpack.c.b16 %v1484_v61, %v1484_v61 }
 0x108   : > { %1404 = vrot.lane.b32.xlu2 %v1401_v58, %s2679_s14 }
 0x109   : > { %1265 = vrot.lane.b32.xlu1 %v1261_v53, %s2681_s16  ;;  %1794 = vrot.lane.b32.xlu0 %v1793_v59, %s2668_s29 }
 0x10a   : > { %v3550_v60 = vpop.permute.xlu2 %328 }
 0x10b   : > { %v279_v9 = vpop.permute.xlu0 %278 }
 0x10c   : > { %v282_v14 = vsel %vm4235_vm3, %v3508_v43, %v279_v9 }
 0x10d   : > { %v292_v63 = vsel %vm287_vm6, %v282_v14, 0 }
 0x10e   : > { %314 = vmatpush.bf16.msra.mxu1 %v292_v63 }
 0x110   : > { %1962 = vrot.lane.b32.xlu2 %v1961_v33, %s2669_s30 }
 0x111   : > { %1878 = vrot.lane.b32.xlu1 %v1877_v10, %s2667_s28  ;;  %1406 = vrot.lane.b32.xlu0 %v1402_v8, %s2679_s14 }
 0x112   : > { %v3591_v19 = vpop.permute.xlu2 %1009  ;;  %2546 = vmatmul.msk.bf16.vlgmr.msra.gmra.mxu1 %vm283_vm4, %v3589_v18 }
 0x113   : > { %v333_v21 = vpop.permute.xlu1 %332  ;;  %v503_v27 = vpop.permute.xlu0 %502 }
 0x118   : > { %1492 = vrot.lane.b32.xlu2 %v1487_v51, %s2678_s13 }
 0x119   : > { %1408 = vrot.lane.b32.xlu1 %v1403_v26, %s2679_s14  ;;  %1488 = vrot.lane.b32.xlu0 %v1485_v38, %s2678_s13 }
 0x11a   : > { %v501_v42 = vpop.permute.xlu2 %500 }
 0x11b   : > { %v3601_v31 = vpop.permute.xlu1 %588  ;;  %v757_v1 = vpop.permute.xlu0 %756  ;;  %v506_v48 = vsel %vm4236_vm11, %v501_v42, %v503_v27  ;;  %v2552_v27 = vld [vmem:[%s4223_s0 + $0x6] sm:$0x3] }
 0x121   : > { %1490 = vrot.lane.b32.xlu1 %v1486_v34, %s2678_s13  ;;  %2046 = vrot.lane.b32.xlu0 %v2045_v36, %s2670_s4  ;;  %v2125_v36 = vperm.slane %v2123_v37, 1 }
 0x122   : > { %v3609_v44 = vpop.permute.xlu2 %584 }
 0x123   : > { %v3611_v45 = vpop.permute.xlu1 %924  ;;  %v3616_v46 = vpop.permute.xlu0 %840 }
 0x12a   : > { %v1711_v50 = vpop.permute.xlu2 %1710 }
 0x12b   : > { %v275_v25 = vpop.permute.xlu1 %274  ;;  %v331_v54 = vpop.permute.xlu0 %330  ;;  %v3646_v9 = vrot.slane %v1711_v50, 4 }
 0x12c   : > { %v281_v47 = vsel %vm4235_vm3, %v275_v25, %v3508_v43  ;;  %v335_v53 = vsel %vm4234_vm2, %v3550_v60, %v331_v54  ;;  %v336_v5 = vsel %vm4234_vm2, %v331_v54, %v333_v21  ;;  %v514_v43 = vsel %vm287_vm6, %v506_v48, 0 }
 0x12d   : > { %v289_v52 = vsel %vm287_vm6, %v281_v47, 0  ;;  %v341_v12 = vsel %vm287_vm6, %v335_v53, 0  ;;  %v344_v55 = vsel %vm287_vm6, %v336_v5, 0  ;;  %v1713_v14 = vsel %vm4398_vm0, %v3646_v9, %v1711_v50 }
 0x12e   : > { %301 = vmatpush.bf16.msra.mxu0 %v289_v52  ;;  %353 = vmatpush.bf16.msra.mxu2 %v341_v12  ;;  %v1715_v20 = vunpack.c.h.b16 %v1713_v14 }
 0x12f   : > { %366 = vmatpush.bf16.msra.mxu3 %v344_v55 }
 0x130   : > { %vm3671_vm12 = vcmp.ne.s32.totalorder %v1715_v20, %v2896_v41 }
 0x131   : > { %2545 = vmatmul.msk.bf16.vlgmr.msra.gmra.mxu0 %vm283_vm4, %v3589_v18  ;;  %2547 = vmatmul.msk.bf16.vlgmr.msra.gmra.mxu2 %vm283_vm4, %v233_v57  ;;  %v1714_v18 = vunpack.c.l.b16 %v1713_v14 }
 0x132   : > { %v3635_v59 = vpop.permute.xlu2 %754  ;;  %2548 = vmatmul.msk.bf16.vlgmr.msra.gmra.mxu3 %vm283_vm4, %v233_v57 }
 0x133   : > { %536 = vmatpush.bf16.msrb.mxu3 %v514_v43  ;;  %v415_v58 = vpop.permute.xlu1 %414  ;;  %v413_v0 = vpop.permute.xlu0 %412  ;;  %v759_v22 = vsel %vm4399_vm1, %v3635_v59, %v757_v1  ;;  %vm3666_vm8 = vcmp.ne.s32.totalorder %v1714_v18, %v2893_v40 }
 0x134   : > { %v420_v60 = vsel %vm4237_vm7, %v415_v58, %v3458_v13  ;;  %v419_v7 = vsel %vm4237_vm7, %v413_v0, %v415_v58  ;;  %v2555_v58 = vld [vmem:[%s4223_s0 + $0x8] sm:$0x3] }
 0x135   : > { %v428_v62 = vsel %vm287_vm6, %v420_v60, 0  ;;  %v425_v10 = vsel %vm287_vm6, %v419_v7, 0 }
 0x136   : > { %450 = vmatpush.bf16.msrb.mxu1 %v428_v62  ;;  %437 = vmatpush.bf16.msrb.mxu0 %v425_v10 }
 0x139   : > { %2551 = vmatmul.msk.bf16.vlgmr.msrb.gmra.mxu1 %vm283_vm4, %v2549_v6 }
 0x13a   : > { %v3654_v8 = vpop.permute.xlu2 %838 }
 0x13b   : > { %v499_v13 = vpop.permute.xlu1 %498  ;;  %v1543_v16 = vpop.permute.xlu0 %1542 }
 0x13c   : > { %v505_v63 = vsel %vm4236_vm11, %v499_v13, %v501_v42  ;;  %v1544_v21 = vrot.slane %v1543_v16, 4  ;;  %v767_v42 = vsel %vm287_vm6, %v759_v22, 0 }
 0x13d   : > { %v511_v15 = vsel %vm287_vm6, %v505_v63, 0 }
 0x13e   : > { %523 = vmatpush.bf16.msrb.mxu2 %v511_v15  ;;  %v1545_v23 = vsel %vm283_vm4, %v1544_v21, %v1543_v16  ;;  %v1553_v26 = vunpack.c.l.b16 %v1544_v21  ;;  %v1554_v24 = vunpack.c.h.b16 %v1544_v21 }
 0x13f   : > { %v1546_v29 = vunpack.c.l.b16 %v1545_v23  ;;  %v1547_v30 = vunpack.c.h.b16 %v1545_v23 }
 0x140   : > { %vm1557_vm0 = vcmp.ne.s32.totalorder %v1553_v26, %v2893_v40  ;;  %vm1558_vm1 = vcmp.ne.s32.totalorder %v1554_v24, %v2896_v41  ;;  %v2205_v26 = vand.u32 53, %v3473_v17 }
 0x141   : > { %2550 = vmatmul.msk.bf16.vlgmr.msrb.gmra.mxu0 %vm283_vm4, %v2549_v6  ;;  %vm3679_vm2 = vcmp.ne.s32.totalorder %v1546_v29, %v2893_v40  ;;  %vm3684_vm14 = vcmp.ne.s32.totalorder %v1547_v30, %v2896_v41  ;;  %vm1559_vm3 = vmpackc.low %vm1558_vm1, %vm1557_vm0  ;;  %2553 = vmatmul.msk.bf16.vlgmr.msrb.gmra.mxu2 %vm283_vm4, %v2552_v27  ;;  %vm4408_vm0 = vcmask 523264  }
 0x142   : > { %2554 = vmatmul.msk.bf16.vlgmr.msrb.gmra.mxu3 %vm283_vm4, %v2552_v27  ;;  %vm1552_vm11 = vmpackc.low %vm3684_vm14, %vm3679_vm2  ;;  %v1561_v3 = vsel %vm1559_vm3, %v3567_v4, 0  ;;  %v3697_v48 = vpop.permute.xlu2 %920  ;;  %vm3735_vm2 = vcmp.eq.s32.totalorder %v2124_v35, 1  ;;  %vm3739_vm14 = vcmp.eq.s32.totalorder %v2125_v36, 1 }
 0x143   : > { %v1627_v39 = vpop.permute.xlu1 %1626  ;;  %v587_v25 = vpop.permute.xlu0 %586  ;;  %v1568_v47 = vunpack.c.l.b16 %v1561_v3  ;;  %vm4409_vm1 = vmmov %vm4408_vm0  ;;  %v1560_v57 = vsel %vm1552_vm11, %v3514_v32, 0 }
 0x144   : > { %v1628_v1 = vrot.slane %v1627_v39, 4  ;;  %v590_v53 = vsel %vm4408_vm0, %v3609_v44, %v587_v25  ;;  %v591_v5 = vsel %vm4409_vm1, %v587_v25, %v3601_v31  ;;  %v1567_v44 = vunpack.c.h.b16 %v1560_v57 }
 0x145   : > { %v596_v12 = vsel %vm287_vm6, %v590_v53, 0  ;;  %v599_v55 = vsel %vm287_vm6, %v591_v5, 0  ;;  %v1571_v43 = vpack.c.b16 %v1568_v47, %v1568_v47  ;;  %v1566_v31 = vunpack.c.l.b16 %v1560_v57 }
 0x146   : > { %v1629_v61 = vsel %vm1011_vm13, %v1628_v1, %v1627_v39  ;;  %v1637_v50 = vunpack.c.l.b16 %v1628_v1  ;;  %v1638_v51 = vunpack.c.h.b16 %v1628_v1  ;;  %608 = vmatpush.bf16.msra.mxu0 %v596_v12  ;;  %621 = vmatpush.bf16.msra.mxu1 %v599_v55  ;;  %v1570_v62 = vpack.c.b16 %v1567_v44, %v1567_v44 }
 0x147   : > { %v1630_v52 = vunpack.c.l.b16 %v1629_v61  ;;  %v1631_v54 = vunpack.c.h.b16 %v1629_v61  ;;  %1576 = vrot.lane.b32.xlu0 %v1571_v43, %s2676_s10  ;;  %v1569_v0 = vpack.c.b16 %v1566_v31, %v1566_v31  ;;  %v1721_v31 = vunpack.c.l.b16 %v3646_v9 }
 0x148   : > { %vm3718_vm1 = vcmp.ne.s32.totalorder %v1637_v50, %v2893_v40  ;;  %vm3726_vm11 = vcmp.ne.s32.totalorder %v1638_v51, %v2896_v41  ;;  %1574 = vrot.lane.b32.xlu2 %v1570_v62, %s2676_s10  ;;  %v2561_v50 = vld [vmem:[%s4223_s0 + $0xc] sm:$0x3] }
 0x149   : > { %vm1634_vm3 = vcmp.ne.s32.totalorder %v1630_v52, %v2893_v40  ;;  %vm1635_vm7 = vcmp.ne.s32.totalorder %v1631_v54, %v2896_v41  ;;  %2557 = vmatmul.msk.bf16.vlgmr.msra.gmra.mxu1 %vm283_vm4, %v2555_v58  ;;  %1572 = vrot.lane.b32.xlu1 %v1569_v0, %s2676_s10 }
 0x14a   : > { %vm1636_vm0 = vmpackc.low %vm1635_vm7, %vm1634_vm3  ;;  %789 = vmatpush.bf16.msrb.mxu1 %v767_v42  ;;  %vm2290_vm3 = vcmp.eq.s32.totalorder %v2289_v49, 21  ;;  %v3757_v21 = vpop.permute.xlu2 %1267 }
 0x14b   : > { %v3722_v6 = vpop.permute.xlu1 %1181  ;;  %v1644_v7 = vsel %vm1636_vm0, %v3514_v32, 0  ;;  %vm1720_vm7 = vmpackc.low %vm3671_vm12, %vm3666_vm8  ;;  %v669_v15 = vpop.permute.xlu0 %668  ;;  %v2291_v20 = vsel %vm2290_vm3, 1, %v2666_v11  ;;  %vm4418_vm0 = vcmask 457728  }
 0x14c   : > { %v1651_v13 = vunpack.c.h.b16 %v1644_v7  ;;  %v1650_v63 = vunpack.c.l.b16 %v1644_v7  ;;  %vm1643_vm8 = vmpackc.low %vm3726_vm11, %vm3718_vm1  ;;  %v3754_v18 = vsel %vm1720_vm7, %v3514_v32, 0  ;;  %v843_v29 = vsel %vm4418_vm0, %v3654_v8, %v3616_v46 }
 0x14d   : > { %vm2128_vm12 = vmpackc.low %vm3739_vm14, %vm3735_vm2  ;;  %v1645_v22 = vsel %vm1643_vm8, %v3567_v4, 0  ;;  %v1734_v27 = vunpack.c.l.b16 %v3754_v18  ;;  %v2292_v37 = vperm.slane %v2291_v20, 0  ;;  %v2293_v56 = vperm.slane %v2291_v20, 1 }
 0x14e   : > { %v1654_v16 = vpack.c.b16 %v1651_v13, %v1651_v13  ;;  %v1653_v23 = vpack.c.b16 %v1650_v63, %v1650_v63  ;;  %v2129_v24 = vsel %vm2128_vm12, 65537, %v2666_v11  ;;  %vm2206_vm1 = vcmp.eq.s32.totalorder %v2205_v26, 53  ;;  %v2564_v13 = vld [vmem:[%s4223_s0 + $0xe] sm:$0x3] }
 0x14f   : > { %vm4419_vm11 = vcmask 515072   ;;  %v1652_v42 = vunpack.c.l.b16 %v1645_v22  ;;  %v2207_v33 = vsel %vm2206_vm1, 1, %v2666_v11  ;;  %v851_v35 = vsel %vm287_vm6, %v843_v29, 0 }
 0x150   : > { %1658 = vrot.lane.b32.xlu0 %v1654_v16, %s2677_s11  ;;  %vm4420_vm7 = vmmov %vm4419_vm11  ;;  %1656 = vrot.lane.b32.xlu2 %v1653_v23, %s2677_s11  ;;  %v2208_v46 = vperm.slane %v2207_v33, 0  ;;  %v2209_v3 = vperm.slane %v2207_v33, 1  ;;  %v1737_v49 = vpack.c.b16 %v1734_v27, %v1734_v27  ;;  %vm3785_vm8 = vcmp.eq.s32.totalorder %v2292_v37, 1 }
 0x151   : > { %2556 = vmatmul.msk.bf16.vlgmr.msra.gmra.mxu0 %vm283_vm4, %v2555_v58  ;;  %2130 = vrot.lane.b32.xlu1 %v2129_v24, %s2673_s7  ;;  %v1655_v61 = vpack.c.b16 %v1652_v42, %v1652_v42  ;;  %vm3789_vm12 = vcmp.eq.s32.totalorder %v2293_v56, 1  ;;  %vm4425_vm0 = vcmask 465920   ;;  %v1735_v12 = vunpack.c.h.b16 %v3754_v18 }
 0x152   : > { %vm2210_vm2 = vcmp.eq.s32.totalorder %v2208_v46, 1  ;;  %vm2211_vm14 = vcmp.eq.s32.totalorder %v2209_v3, 1  ;;  %v3795_v52 = vpop.permute.xlu2 %1093  ;;  %vm2296_vm1 = vmpackc.low %vm3789_vm12, %vm3785_vm8  ;;  %v1722_v58 = vunpack.c.h.b16 %v3646_v9  ;;  %v2373_v42 = vand.u32 85, %v3473_v17 }
 0x153   : > { %v671_v30 = vpop.permute.xlu1 %670  ;;  %v1096_v36 = vpop.permute.xlu0 %1095  ;;  %vm2212_vm3 = vmpackc.low %vm2211_vm14, %vm2210_vm2  ;;  %v2297_v44 = vsel %vm2296_vm1, 65537, %v2666_v11  ;;  %v1738_v7 = vpack.c.b16 %v1735_v12, %v1735_v12  ;;  %vm4428_vm2 = vcmask 457728   ;;  %vm1725_vm14 = vcmp.ne.s32.totalorder %v1721_v31, %v2893_v40 }
 0x154   : > { %v674_v38 = vsel %vm4419_vm11, %v669_v15, %v671_v30  ;;  %v675_v39 = vsel %vm4420_vm7, %v671_v30, %v3484_v28  ;;  %v2558_v28 = vld [vmem:[%s4223_s0 + $0xa] sm:$0x3]  ;;  %v2213_v47 = vsel %vm2212_vm3, 65537, %v2666_v11  ;;  %v1099_v55 = vsel %vm283_vm4, %v3795_v52, %v1096_v36  ;;  %vm4429_vm12 = vmmov %vm4428_vm2 }
 0x155   : > { %v680_v34 = vsel %vm287_vm6, %v674_v38, 0  ;;  %v683_v1 = vsel %vm287_vm6, %v675_v39, 0  ;;  %vm4426_vm11 = vcmask 449536   ;;  %v1107_v0 = vsel %vm287_vm6, %v1099_v55, 0 }
 0x156   : > { %692 = vmatpush.bf16.msra.mxu2 %v680_v34  ;;  %705 = vmatpush.bf16.msra.mxu3 %v683_v1  ;;  %vm4427_vm7 = vmmov %vm4426_vm11  ;;  %vm1726_vm3 = vcmp.ne.s32.totalorder %v1722_v58, %v2896_v41 }
 0x157   : > { %vm1727_vm8 = vmpackc.low %vm1726_vm3, %vm1725_vm14 }
 0x158   : > { %1740 = vrot.lane.b32.xlu0 %v1737_v49, %s2675_s9  ;;  %2214 = vrot.lane.b32.xlu2 %v2213_v47, %s2674_s8  ;;  %v1729_v2 = vsel %vm1727_vm8, %v3567_v4, 0  ;;  %v2573_v49 = vld [vmem:[%s4223_s0 + $0x14] sm:$0x3] }
 0x159   : > { %2560 = vmatmul.msk.bf16.vlgmr.msra.gmra.mxu3 %vm283_vm4, %v2558_v28  ;;  %2559 = vmatmul.msk.bf16.vlgmr.msra.gmra.mxu2 %vm283_vm4, %v2558_v28  ;;  %v1736_v14 = vunpack.c.l.b16 %v1729_v2  ;;  %v1309_v28 = vand.u32 1, %v3473_v17 }
 0x15a   : > { %873 = vmatpush.bf16.msrb.mxu3 %v851_v35  ;;  %2563 = vmatmul.msk.bf16.vlgmr.msrb.gmra.mxu1 %vm283_vm4, %v2561_v50  ;;  %v1178_v63 = vpop.permute.xlu2 %1177 }
 0x15b   : > { %v753_v54 = vpop.permute.xlu1 %752  ;;  %1660 = vrot.lane.b32.xlu1 %v1655_v61, %s2677_s11  ;;  %v923_v43 = vpop.permute.xlu0 %922  ;;  %v1739_v15 = vpack.c.b16 %v1736_v14, %v1736_v14 }
 0x15c   : > { %v758_v53 = vsel %vm4425_vm0, %v753_v54, %v3635_v59  ;;  %v926_v59 = vsel %vm4426_vm11, %v3697_v48, %v923_v43  ;;  %v927_v57 = vsel %vm4427_vm7, %v923_v43, %v3611_v45  ;;  %vm4430_vm0 = vcmask 515072  }
 0x15d   : > { %v764_v5 = vsel %vm287_vm6, %v758_v53, 0  ;;  %v932_v60 = vsel %vm287_vm6, %v926_v59, 0  ;;  %v935_v62 = vsel %vm287_vm6, %v927_v57, 0 }
 0x15e   : > { %776 = vmatpush.bf16.msrb.mxu0 %v764_v5  ;;  %957 = vmatpush.bf16.msra.mxu1 %v935_v62 }
 0x160   : > { %2298 = vrot.lane.b32.xlu0 %v2297_v44, %s2672_s6  ;;  %1744 = vrot.lane.b32.xlu2 %v1739_v15, %s2675_s9 }
 0x161   : > { %2562 = vmatmul.msk.bf16.vlgmr.msrb.gmra.mxu0 %vm283_vm4, %v2561_v50 }
 0x162   : > { %944 = vmatpush.bf16.msra.mxu0 %v932_v60  ;;  %1129 = vmatpush.bf16.msrb.mxu1 %v1107_v0 }
 0x163   : > { %v837_v48 = vpop.permute.xlu1 %836  ;;  %1742 = vrot.lane.b32.xlu1 %v1738_v7, %s2675_s9  ;;  %v1006_v10 = vpop.permute.xlu0 %1005 }
 0x164   : > { %v842_v45 = vsel %vm4428_vm2, %v837_v48, %v3654_v8  ;;  %v2567_v8 = vld [vmem:[%s4223_s0 + $0x10] sm:$0x3] }
 0x165   : > { %v848_v9 = vsel %vm287_vm6, %v842_v45, 0 }
 0x166   : > { %860 = vmatpush.bf16.msrb.mxu2 %v848_v9 }
 0x169   : > { %2565 = vmatmul.msk.bf16.vlgmr.msrb.gmra.mxu2 %vm283_vm4, %v2564_v13  ;;  %2566 = vmatmul.msk.bf16.vlgmr.msrb.gmra.mxu3 %vm283_vm4, %v2564_v13 }
 0x16a   : > { %2569 = vmatmul.msk.bf16.vlgmr.msra.gmra.mxu1 %vm283_vm4, %v2567_v8 }
 0x16b   : > { %v1008_v16 = vpop.permute.xlu1 %1007  ;;  %v1180_v26 = vpop.permute.xlu0 %1179 }
 0x16c   : > { %v1012_v18 = vsel %vm1011_vm13, %v1006_v10, %v1008_v16  ;;  %v1013_v20 = vsel %vm1011_vm13, %v1008_v16, %v3591_v19  ;;  %v1184_v24 = vsel %vm1183_vm9, %v1178_v63, %v1180_v26  ;;  %v1185_v27 = vsel %vm1183_vm9, %v1180_v26, %v3722_v6  ;;  %v1405_v19 = vpop.permute.xlu2 %1404  ;;  %v2570_v6 = vld [vmem:[%s4223_s0 + $0x12] sm:$0x3]  ;;  %v2576_v16 = vld [vmem:[%s4223_s0 + $0x16] sm:$0x3] }
 0x16d   : > { %v1018_v22 = vsel %vm287_vm6, %v1012_v18, 0  ;;  %v1021_v23 = vsel %vm287_vm6, %v1013_v20, 0  ;;  %v1190_v29 = vsel %vm287_vm6, %v1184_v24, 0  ;;  %v1193_v30 = vsel %vm287_vm6, %v1185_v27, 0 }
 0x16e   : > { %1030 = vmatpush.bf16.msra.mxu2 %v1018_v22  ;;  %1043 = vmatpush.bf16.msra.mxu3 %v1021_v23  ;;  %vm2374_vm9 = vcmp.eq.s32.totalorder %v2373_v42, 85  ;;  %vm1310_vm13 = vcmp.eq.s32.totalorder %v1309_v28, 1 }
 0x16f   : > { %v2375_v36 = vsel %vm2374_vm9, 1, %v2666_v11  ;;  %v1312_v25 = vsel %vm1310_vm13, 1, %v2666_v11 }
 0x170   : > { %v1313_v53 = vperm.slane %v1312_v25, 0  ;;  %v1314_v55 = vperm.slane %v1312_v25, 1  ;;  %v2377_v59 = vperm.slane %v2375_v36, 1 }
 0x171   : > { %2568 = vmatmul.msk.bf16.vlgmr.msra.gmra.mxu0 %vm283_vm4, %v2567_v8 }
 0x172   : > { %1202 = vmatpush.bf16.msrb.mxu2 %v1190_v29  ;;  %1215 = vmatpush.bf16.msrb.mxu3 %v1193_v30  ;;  %vm3879_vm7 = vcmp.eq.s32.totalorder %v1313_v53, 1  ;;  %vm3893_vm8 = vcmp.eq.s32.totalorder %v1314_v55, 1 }
 0x173   : > { %v1092_v37 = vpop.permute.xlu1 %1091  ;;  %v1264_v39 = vpop.permute.xlu0 %1263 }
 0x174   : > { %v1098_v56 = vsel %vm283_vm4, %v1092_v37, %v3795_v52  ;;  %v1963_v34 = vpop.permute.xlu2 %1962 }
 0x175   : > { %v1104_v38 = vsel %vm287_vm6, %v1098_v56, 0  ;;  %v3869_v50 = vrot.slane %v1963_v34, 4 }
 0x176   : > { %1116 = vmatpush.bf16.msrb.mxu0 %v1104_v38 }
 0x177   : > { %v1965_v17 = vsel %vm4430_vm0, %v3869_v50, %v1963_v34  ;;  %vm1317_vm0 = vmpackc.low %vm3893_vm8, %vm3879_vm7  ;;  %v1973_v28 = vunpack.c.l.b16 %v3869_v50 }
 0x178   : > { %v1966_v0 = vunpack.c.l.b16 %v1965_v17  ;;  %v1967_v7 = vunpack.c.h.b16 %v1965_v17 }
 0x179   : > { %2572 = vmatmul.msk.bf16.vlgmr.msra.gmra.mxu3 %vm283_vm4, %v2570_v6  ;;  %2571 = vmatmul.msk.bf16.vlgmr.msra.gmra.mxu2 %vm283_vm4, %v2570_v6 }
 0x17a   : > { %2575 = vmatmul.msk.bf16.vlgmr.msrb.gmra.mxu1 %vm283_vm4, %v2573_v49 }
 0x17b   : > { %v1266_v33 = vpop.permute.xlu1 %1265  ;;  %v1795_v61 = vpop.permute.xlu0 %1794 }
 0x17c   : > { %v1270_v1 = vsel %vm1269_vm10, %v1264_v39, %v1266_v33  ;;  %v1271_v46 = vsel %vm1269_vm10, %v1266_v33, %v3757_v21  ;;  %v1796_v51 = vrot.slane %v1795_v61, 4  ;;  %v2376_v21 = vperm.slane %v2375_v36, 0  ;;  %v1493_v53 = vpop.permute.xlu2 %1492 }
 0x17d   : > { %v1276_v3 = vsel %vm287_vm6, %v1270_v1, 0  ;;  %v1279_v35 = vsel %vm287_vm6, %v1271_v46, 0  ;;  %v2579_v1 = vld [vmem:[%s4223_s0 + $0x18] sm:$0x3] }
 0x17e   : > { %1288 = vmatpush.bf16.msra.mxu0 %v1276_v3  ;;  %1301 = vmatpush.bf16.msra.mxu1 %v1279_v35  ;;  %v1797_v47 = vsel %vm4429_vm12, %v1796_v51, %v1795_v61  ;;  %v1805_v52 = vunpack.c.l.b16 %v1796_v51  ;;  %v1806_v54 = vunpack.c.h.b16 %v1796_v51  ;;  %vm3902_vm13 = vcmp.eq.s32.totalorder %v2376_v21, 1 }
 0x17f   : > { %v1798_v5 = vunpack.c.l.b16 %v1797_v47  ;;  %v1799_v12 = vunpack.c.h.b16 %v1797_v47  ;;  %vm4441_vm12 = vcmask 465920   ;;  %v1974_v61 = vunpack.c.h.b16 %v3869_v50 }
 0x180   : > { %vm1809_vm1 = vcmp.ne.s32.totalorder %v1805_v52, %v2893_v40  ;;  %vm1810_vm11 = vcmp.ne.s32.totalorder %v1806_v54, %v2896_v41 }
 0x181   : > { %2574 = vmatmul.msk.bf16.vlgmr.msrb.gmra.mxu0 %vm283_vm4, %v2573_v49  ;;  %vm3884_vm2 = vcmp.ne.s32.totalorder %v1798_v5, %v2893_v40  ;;  %vm3889_vm14 = vcmp.ne.s32.totalorder %v1799_v12, %v2896_v41  ;;  %vm1811_vm3 = vmpackc.low %vm1810_vm11, %vm1809_vm1 }
 0x182   : > { %vm1804_vm9 = vmpackc.low %vm3889_vm14, %vm3884_vm2  ;;  %v1813_v62 = vsel %vm1811_vm3, %v3567_v4, 0  ;;  %vm3920_vm2 = vcmp.ne.s32.totalorder %v1966_v0, %v2893_v40  ;;  %vm3925_vm14 = vcmp.ne.s32.totalorder %v1967_v7, %v2896_v41 }
 0x183   : > { %v1879_v43 = vpop.permute.xlu1 %1878  ;;  %v1407_v13 = vpop.permute.xlu0 %1406  ;;  %v1820_v2 = vunpack.c.l.b16 %v1813_v62  ;;  %v1812_v15 = vsel %vm1804_vm9, %v3514_v32, 0  ;;  %vm3930_vm9 = vcmp.eq.s32.totalorder %v2377_v59, 1  ;;  %vm1972_vm7 = vmpackc.low %vm3925_vm14, %vm3920_vm2 }
 0x184   : > { %v1880_v58 = vrot.slane %v1879_v43, 4  ;;  %v1410_v8 = vsel %vm1235_vm15, %v1405_v19, %v1407_v13  ;;  %v1819_v22 = vunpack.c.h.b16 %v1812_v15  ;;  %v1818_v23 = vunpack.c.l.b16 %v1812_v15  ;;  %vm2380_vm8 = vmpackc.low %vm3930_vm9, %vm3902_vm13 }
 0x185   : > { %v1416_v18 = vsel %vm287_vm6, %v1410_v8, 0  ;;  %v1823_v20 = vpack.c.b16 %v1820_v2, %v1820_v2  ;;  %v1318_v19 = vsel %vm1317_vm0, %v3514_v32, 0  ;;  %v1980_v51 = vsel %vm1972_vm7, %v3514_v32, 0 }
 0x186   : > { %v1881_v45 = vsel %vm4441_vm12, %v1880_v58, %v1879_v43  ;;  %v1889_v9 = vunpack.c.l.b16 %v1880_v58  ;;  %v1890_v10 = vunpack.c.h.b16 %v1880_v58  ;;  %1428 = vmatpush.bf16.msrb.mxu0 %v1416_v18  ;;  %v1822_v27 = vpack.c.b16 %v1819_v22, %v1819_v22 }
 0x187   : > { %v1882_v14 = vunpack.c.l.b16 %v1881_v45  ;;  %v1883_v63 = vunpack.c.h.b16 %v1881_v45  ;;  %1828 = vrot.lane.b32.xlu0 %v1823_v20, %s2672_s6  ;;  %v1821_v29 = vpack.c.b16 %v1818_v23, %v1818_v23  ;;  %v1323_v6 = vunpack.c.h.b16 %v1318_v19  ;;  %v2582_v23 = vld [vmem:[%s4223_s0 + $0x1a] sm:$0x3] }
 0x188   : > { %vm3943_vm12 = vcmp.ne.s32.totalorder %v1889_v9, %v2893_v40  ;;  %1826 = vrot.lane.b32.xlu2 %v1822_v27, %s2672_s6  ;;  %v1322_v49 = vunpack.c.l.b16 %v1318_v19  ;;  %v2381_v52 = vsel %vm2380_vm8, 65537, %v2666_v11  ;;  %v1987_v50 = vunpack.c.h.b16 %v1980_v51  ;;  %v2588_v27 = vld [vmem:[%s4223_s0 + $0x1e] sm:$0x3] }
 0x189   : > { %vm1886_vm1 = vcmp.ne.s32.totalorder %v1882_v14, %v2893_v40  ;;  %vm1887_vm11 = vcmp.ne.s32.totalorder %v1883_v63, %v2896_v41  ;;  %2578 = vmatmul.msk.bf16.vlgmr.msrb.gmra.mxu3 %vm283_vm4, %v2576_v16  ;;  %2577 = vmatmul.msk.bf16.vlgmr.msrb.gmra.mxu2 %vm283_vm4, %v2576_v16  ;;  %v1325_v3 = vpack.c.b16 %v1323_v6, %v1323_v6  ;;  %v1986_v57 = vunpack.c.l.b16 %v1980_v51 }
 0x18a   : > { %vm1888_vm3 = vmpackc.low %vm1887_vm11, %vm1886_vm1  ;;  %vm3948_vm1 = vcmp.ne.s32.totalorder %v1890_v10, %v2896_v41  ;;  %1824 = vrot.lane.b32.xlu1 %v1821_v29, %s2672_s6  ;;  %2581 = vmatmul.msk.bf16.vlgmr.msra.gmra.mxu1 %vm283_vm4, %v2579_v1  ;;  %v1324_v47 = vpack.c.b16 %v1322_v49, %v1322_v49  ;;  %vm3987_vm0 = vcmp.ne.s32.totalorder %v1973_v28, %v2893_v40  ;;  %vm4457_vm7 = vcmask 982016  }
 0x18b   : > { %v1896_v37 = vsel %vm1888_vm3, %v3514_v32, 0  ;;  %v1409_v56 = vpop.permute.xlu1 %1408  ;;  %v1489_v35 = vpop.permute.xlu0 %1488  ;;  %v1333_v21 = vsel %vm287_vm6, %v1325_v3, 0  ;;  %vm3992_vm11 = vcmp.ne.s32.totalorder %v1974_v61, %v2896_v41  ;;  %v1990_v60 = vpack.c.b16 %v1987_v50, %v1987_v50  ;;  %vm4458_vm8 = vmmov %vm4457_vm7 }
 0x18c   : > { %v1903_v42 = vunpack.c.h.b16 %v1896_v37  ;;  %v1411_v33 = vsel %vm1235_vm15, %v1407_v13, %v1409_v56  ;;  %v1902_v34 = vunpack.c.l.b16 %v1896_v37  ;;  %vm1895_vm15 = vmpackc.low %vm3948_vm1, %vm3943_vm12  ;;  %1355 = vmatpush.bf16.msra.mxu3 %v1333_v21  ;;  %v1330_v5 = vsel %vm287_vm6, %v1324_v47, 0 }
 0x18d   : > { %v1419_v46 = vsel %vm287_vm6, %v1411_v33, 0  ;;  %v1897_v54 = vsel %vm1895_vm15, %v3567_v4, 0  ;;  %1342 = vmatpush.bf16.msra.mxu2 %v1330_v5  ;;  %vm1979_vm13 = vmpackc.low %vm3992_vm11, %vm3987_vm0  ;;  %v1989_v7 = vpack.c.b16 %v1986_v57, %v1986_v57  ;;  %v2591_v33 = vld [vmem:[%s4223_s0 + $0x20] sm:$0x3]  ;;  %vm4459_vm15 = vcmask 580608  }
 0x18e   : > { %v1906_v36 = vpack.c.b16 %v1903_v42, %v1903_v42  ;;  %1441 = vmatpush.bf16.msrb.mxu1 %v1419_v46  ;;  %v1905_v25 = vpack.c.b16 %v1902_v34, %v1902_v34  ;;  %v1904_v11 = vunpack.c.l.b16 %v1897_v54  ;;  %v1981_v10 = vsel %vm1979_vm13, %v3567_v4, 0  ;;  %v2594_v5 = vld [vmem:[%s4223_s0 + $0x22] sm:$0x3] }
 0x18f   : > { %v1988_v14 = vunpack.c.l.b16 %v1981_v10  ;;  %v316_v19 = vpop.f32.mrf.mxu1  ;;  %vm4460_vm0 = vcmask 973824   ;;  %v4086_v10 = vld [vmem:[#allocation2 + $0xc] sm:$0xf] }
 0x190   : > { %1910 = vrot.lane.b32.xlu0 %v1906_v36, %s2674_s8  ;;  %1908 = vrot.lane.b32.xlu2 %v1905_v25, %s2674_s8  ;;  %v1907_v0 = vpack.c.b16 %v1904_v11, %v1904_v11 }
 0x191   : > { %2580 = vmatmul.msk.bf16.vlgmr.msra.gmra.mxu0 %vm283_vm4, %v2579_v1  ;;  %v1991_v16 = vpack.c.b16 %v1988_v14, %v1988_v14  ;;  %v4089_v14 = vld [vmem:[#allocation2 + $0x4] sm:$0xff] }
 0x192   : > { %2382 = vrot.lane.b32.xlu1 %v2381_v52, %s2675_s9 }
 0x193   : > { %v1491_v12 = vpop.permute.xlu1 %1490  ;;  %v2047_v58 = vpop.permute.xlu0 %2046 }
 0x194   : > { %v1494_v43 = vsel %vm1149_vm5, %v1489_v35, %v1491_v12  ;;  %v1495_v59 = vsel %vm1149_vm5, %v1491_v12, %v1493_v53  ;;  %v2048_v62 = vrot.slane %v2047_v58, 4  ;;  %vm4456_vm5 = vcmask 523264  }
 0x195   : > { %v1500_v44 = vsel %vm287_vm6, %v1494_v43, 0  ;;  %v1503_v31 = vsel %vm287_vm6, %v1495_v59, 0 }
 0x196   : > { %1525 = vmatpush.bf16.msrb.mxu3 %v1503_v31  ;;  %1512 = vmatpush.bf16.msrb.mxu2 %v1500_v44  ;;  %v2049_v48 = vsel %vm4456_vm5, %v2048_v62, %v2047_v58  ;;  %v2057_v45 = vunpack.c.l.b16 %v2048_v62  ;;  %v2058_v9 = vunpack.c.h.b16 %v2048_v62 }
 0x197   : > { %v2050_v13 = vunpack.c.l.b16 %v2049_v48  ;;  %v2051_v2 = vunpack.c.h.b16 %v2049_v48  ;;  %v318_v46 = vpop.f32.mrf.mxu1 }
 0x198   : > { %1994 = vrot.lane.b32.xlu0 %v1990_v60, %s2673_s7  ;;  %vm2061_vm2 = vcmp.ne.s32.totalorder %v2057_v45, %v2893_v40  ;;  %vm2062_vm14 = vcmp.ne.s32.totalorder %v2058_v9, %v2896_v41  ;;  %1992 = vrot.lane.b32.xlu2 %v1989_v7, %s2673_s7 }
 0x199   : > { %vm2054_vm3 = vcmp.ne.s32.totalorder %v2050_v13, %v2893_v40  ;;  %vm2055_vm9 = vcmp.ne.s32.totalorder %v2051_v2, %v2896_v41  ;;  %vm2063_vm1 = vmpackc.low %vm2062_vm14, %vm2061_vm2  ;;  %2583 = vmatmul.msk.bf16.vlgmr.msra.gmra.mxu2 %vm283_vm4, %v2582_v23  ;;  %2584 = vmatmul.msk.bf16.vlgmr.msra.gmra.mxu3 %vm283_vm4, %v2582_v23  ;;  %vm4469_vm14 = vcmask 531456  }
 0x19a   : > { %1912 = vrot.lane.b32.xlu1 %v1907_v0, %s2674_s8  ;;  %vm2056_vm12 = vmpackc.low %vm2055_vm9, %vm2054_vm3  ;;  %v2065_v20 = vsel %vm2063_vm1, %v3567_v4, 0  ;;  %v2585_v4 = vld [vmem:[%s4223_s0 + $0x1c] sm:$0x3] }
 0x19b   : > { %v2064_v63 = vsel %vm2056_vm12, %v3514_v32, 0  ;;  %v2072_v26 = vunpack.c.l.b16 %v2065_v20  ;;  %2587 = vmatmul.msk.bf16.vlgmr.msrb.gmra.mxu1 %vm283_vm4, %v2585_v4 }
 0x19c   : > { %v2071_v8 = vunpack.c.h.b16 %v2064_v63  ;;  %v2070_v15 = vunpack.c.l.b16 %v2064_v63 }
 0x19d   : > { %v2075_v32 = vpack.c.b16 %v2072_v26, %v2072_v26 }
 0x19e   : > { %v2074_v18 = vpack.c.b16 %v2071_v8, %v2071_v8  ;;  %v2073_v22 = vpack.c.b16 %v2070_v15, %v2070_v15 }
 0x1a0   : > { %2078 = vrot.lane.b32.xlu0 %v2074_v18, %s2670_s4  ;;  %2076 = vrot.lane.b32.xlu2 %v2073_v22, %s2670_s4 }
 0x1a1   : > { %2586 = vmatmul.msk.bf16.vlgmr.msrb.gmra.mxu0 %vm283_vm4, %v2585_v4 }
 0x1a2   : > { %1996 = vrot.lane.b32.xlu1 %v1991_v16, %s2673_s7  ;;  %v1575_v24 = vpop.permute.xlu2 %1574 }
 0x1a9   : > { %2589 = vmatmul.msk.bf16.vlgmr.msrb.gmra.mxu2 %vm283_vm4, %v2588_v27  ;;  %2590 = vmatmul.msk.bf16.vlgmr.msrb.gmra.mxu3 %vm283_vm4, %v2588_v27 }
 0x1aa   : > { %2080 = vrot.lane.b32.xlu1 %v2075_v32, %s2670_s4  ;;  %v1657_v29 = vpop.permute.xlu2 %1656 }
 0x1ae   : > { %v303_v30 = vpop.f32.mrf.mxu0 }
 0x1b2   : > { %v2215_v37 = vpop.permute.xlu2 %2214 }
 0x1b3   : > { %v2216_v6 = vrot.slane %v2215_v37, 4 }
 0x1b4   : > { %v355_v61 = vpop.f32.mrf.mxu2 }
 0x1b5   : > { %v2217_v35 = vsel %vm4459_vm15, %v2216_v6, %v2215_v37  ;;  %v2225_v49 = vunpack.c.l.b16 %v2216_v6  ;;  %v2226_v28 = vunpack.c.h.b16 %v2216_v6  ;;  %v356_v47 = vadd.f32 %v355_v61, %v303_v30  ;;  %v368_v52 = vpop.f32.mrf.mxu3 }
 0x1b6   : > { %v305_v1 = vpop.f32.mrf.mxu0  ;;  %v2218_v21 = vunpack.c.l.b16 %v2217_v35  ;;  %v2219_v25 = vunpack.c.h.b16 %v2217_v35  ;;  %v369_v53 = vadd.f32 %v368_v52, %v316_v19  ;;  %v452_v43 = vpop.f32.mrf.mxu1 }
 0x1b7   : > { %vm4053_vm11 = vcmp.ne.s32.totalorder %v2225_v49, %v2893_v40  ;;  %vm4058_vm13 = vcmp.ne.s32.totalorder %v2226_v28, %v2896_v41 }
 0x1b8   : > { %vm4063_vm5 = vcmp.ne.s32.totalorder %v2218_v21, %v2893_v40  ;;  %vm4068_vm2 = vcmp.ne.s32.totalorder %v2219_v25, %v2896_v41  ;;  %v457_v31 = vadd.f32 %v452_v43, %v369_v53  ;;  %vm2231_vm3 = vmpackc.low %vm4058_vm13, %vm4053_vm11  ;;  %vm4471_vm11 = vcmask 588800   ;;  %v2597_v53 = vld [vmem:[%s4223_s0 + $0x24] sm:$0x3] }
 0x1b9   : > { %v1577_v56 = vpop.permute.xlu0 %1576  ;;  %vm2224_vm9 = vmpackc.low %vm4068_vm2, %vm4063_vm5  ;;  %v2233_v15 = vsel %vm2231_vm3, %v4086_v10, 0  ;;  %vm4472_vm13 = vcmask 596992  }
 0x1ba   : > { %v1579_v38 = vsel %vm4457_vm7, %v1575_v24, %v1577_v56  ;;  %v2232_v16 = vsel %vm2224_vm9, %v4089_v14, 0  ;;  %v2240_v27 = vunpack.c.l.b16 %v2233_v15  ;;  %vm4473_vm5 = vmmov %vm4472_vm13 }
 0x1bb   : > { %v1587_v39 = vsel %vm287_vm6, %v1579_v38, 0  ;;  %v1573_v42 = vpop.permute.xlu1 %1572  ;;  %v2238_v19 = vunpack.c.l.b16 %v2232_v16 }
 0x1bc   : > { %1609 = vmatpush.bf16.msra.mxu1 %v1587_v39  ;;  %v1578_v34 = vsel %vm4458_vm8, %v1573_v42, %v1575_v24  ;;  %v357_v45 = vpop.f32.mrf.mxu2  ;;  %v1745_v39 = vpop.permute.xlu2 %1744 }
 0x1bd   : > { %v1584_v3 = vsel %vm287_vm6, %v1578_v34, 0  ;;  %v370_v9 = vpop.f32.mrf.mxu3  ;;  %v2241_v49 = vpack.c.b16 %v2238_v19, %v2238_v19 }
 0x1be   : > { %1596 = vmatpush.bf16.msra.mxu0 %v1584_v3  ;;  %v439_v11 = vpop.f32.mrf.mxu0  ;;  %v454_v26 = vpop.f32.mrf.mxu1 }
 0x1bf   : > { %2593 = vmatmul.msk.bf16.vlgmr.msra.gmra.mxu1 %vm283_vm4, %v2591_v33  ;;  %v456_v44 = vadd.f32 %v439_v11, %v356_v47 }
 0x1c1   : > { %2592 = vmatmul.msk.bf16.vlgmr.msra.gmra.mxu0 %vm283_vm4, %v2591_v33  ;;  %v2243_v33 = vpack.c.b16 %v2240_v27, %v2240_v27 }
 0x1c2   : > { %v1659_v36 = vpop.permute.xlu0 %1658 }
 0x1c3   : > { %v1662_v51 = vsel %vm4460_vm0, %v1657_v29, %v1659_v36  ;;  %v2131_v50 = vpop.permute.xlu1 %2130  ;;  %v2239_v29 = vunpack.c.h.b16 %v2232_v16 }
 0x1c4   : > { %v1668_v54 = vsel %vm287_vm6, %v1662_v51, 0  ;;  %v2132_v12 = vrot.slane %v2131_v50, 4  ;;  %v525_v56 = vpop.f32.mrf.mxu2 }
 0x1c5   : > { %1680 = vmatpush.bf16.msra.mxu2 %v1668_v54  ;;  %v542_v6 = vadd.f32 %v525_v56, %v456_v44  ;;  %v538_v42 = vpop.f32.mrf.mxu3  ;;  %v2242_v34 = vpack.c.b16 %v2239_v29, %v2239_v29 }
 0x1c6   : > { %v2133_v58 = vsel %vm4469_vm14, %v2132_v12, %v2131_v50  ;;  %v2141_v60 = vunpack.c.l.b16 %v2132_v12  ;;  %v2142_v62 = vunpack.c.h.b16 %v2132_v12  ;;  %vm4470_vm14 = vcmask 973824   ;;  %v441_v23 = vpop.f32.mrf.mxu0  ;;  %v623_v47 = vpop.f32.mrf.mxu1 }
 0x1c7   : > { %v2134_v0 = vunpack.c.l.b16 %v2133_v58  ;;  %v2135_v7 = vunpack.c.h.b16 %v2133_v58  ;;  %v543_v1 = vadd.f32 %v538_v42, %v457_v31  ;;  %v2600_v42 = vld [vmem:[%s4223_s0 + $0x26] sm:$0x3] }
 0x1c8   : > { %2595 = vmatmul.msk.bf16.vlgmr.msra.gmra.mxu2 %vm283_vm4, %v2594_v5  ;;  %vm2145_vm12 = vcmp.ne.s32.totalorder %v2141_v60, %v2893_v40  ;;  %vm2146_vm1 = vcmp.ne.s32.totalorder %v2142_v62, %v2896_v41 }
 0x1c9   : > { %vm2138_vm7 = vcmp.ne.s32.totalorder %v2134_v0, %v2893_v40  ;;  %vm2139_vm8 = vcmp.ne.s32.totalorder %v2135_v7, %v2896_v41  ;;  %vm2147_vm15 = vmpackc.low %vm2146_vm1, %vm2145_vm12  ;;  %v628_v12 = vadd.f32 %v623_v47, %v543_v1  ;;  %v2603_v47 = vld [vmem:[%s4223_s0 + $0x28] sm:$0x3] }
 0x1ca   : > { %v1741_v48 = vpop.permute.xlu0 %1740  ;;  %vm2140_vm0 = vmpackc.low %vm2139_vm8, %vm2138_vm7  ;;  %v2149_v13 = vsel %vm2147_vm15, %v4086_v10, 0 }
 0x1cb   : > { %v2156_v2 = vunpack.c.l.b16 %v2149_v13  ;;  %v2148_v63 = vsel %vm2140_vm0, %v4089_v14, 0  ;;  %vm4474_vm8 = vmmov %vm4471_vm11  ;;  %vm4476_vm0 = vcmask 580608  }
 0x1cc   : > { %v2155_v18 = vunpack.c.h.b16 %v2148_v63  ;;  %v2154_v22 = vunpack.c.l.b16 %v2148_v63  ;;  %v527_v11 = vpop.f32.mrf.mxu2  ;;  %vm4475_vm15 = vmmov %vm4474_vm8 }
 0x1cd   : > { %v1661_v8 = vpop.permute.xlu1 %1660  ;;  %v2159_v32 = vpack.c.b16 %v2156_v2, %v2156_v2  ;;  %v540_v57 = vpop.f32.mrf.mxu3 }
 0x1ce   : > { %v1663_v20 = vsel %vm4470_vm14, %v1659_v36, %v1661_v8  ;;  %v2158_v4 = vpack.c.b16 %v2155_v18, %v2155_v18  ;;  %v2157_v30 = vpack.c.b16 %v2154_v22, %v2154_v22  ;;  %v610_v25 = vpop.f32.mrf.mxu0  ;;  %v625_v62 = vpop.f32.mrf.mxu1  ;;  %vm4477_vm14 = vmmov %vm4473_vm5 }
 0x1cf   : > { %v1671_v24 = vsel %vm287_vm6, %v1663_v20, 0  ;;  %2164 = vrot.lane.b32.xlu1 %v2159_v32, %s2669_s30  ;;  %v627_v50 = vadd.f32 %v610_v25, %v542_v6 }
 0x1d0   : > { %1693 = vmatpush.bf16.msra.mxu3 %v1671_v24  ;;  %2162 = vrot.lane.b32.xlu0 %v2158_v4, %s2669_s30 }
 0x1d1   : > { %2160 = vrot.lane.b32.xlu2 %v2157_v30, %s2669_s30 }
 0x1d2   : > { %v2299_v37 = vpop.permute.xlu0 %2298 }
 0x1d3   : > { %v2300_v38 = vrot.slane %v2299_v37, 4  ;;  %2596 = vmatmul.msk.bf16.vlgmr.msra.gmra.mxu3 %vm283_vm4, %v2594_v5 }
 0x1d5   : > { %v2301_v46 = vsel %vm4471_vm11, %v2300_v38, %v2299_v37  ;;  %v2309_v3 = vunpack.c.l.b16 %v2300_v38  ;;  %v2310_v35 = vunpack.c.h.b16 %v2300_v38  ;;  %v1743_v36 = vpop.permute.xlu1 %1742 }
 0x1d6   : > { %v2302_v28 = vunpack.c.l.b16 %v2301_v46  ;;  %v2303_v61 = vunpack.c.h.b16 %v2301_v46  ;;  %v1746_v51 = vsel %vm4472_vm13, %v1741_v48, %v1743_v36  ;;  %v1747_v21 = vsel %vm4473_vm5, %v1743_v36, %v1745_v39  ;;  %v612_v60 = vpop.f32.mrf.mxu0 }
 0x1d7   : > { %v1752_v52 = vsel %vm287_vm6, %v1746_v51, 0  ;;  %v1755_v54 = vsel %vm287_vm6, %v1747_v21, 0  ;;  %vm2313_vm2 = vcmp.ne.s32.totalorder %v2309_v3, %v2893_v40  ;;  %vm2314_vm3 = vcmp.ne.s32.totalorder %v2310_v35, %v2896_v41  ;;  %2248 = vrot.lane.b32.xlu1 %v2243_v33, %s2667_s28  ;;  %v791_v13 = vpop.f32.mrf.mxu1 }
 0x1d8   : > { %vm2306_vm9 = vcmp.ne.s32.totalorder %v2302_v28, %v2893_v40  ;;  %vm2307_vm12 = vcmp.ne.s32.totalorder %v2303_v61, %v2896_v41  ;;  %1777 = vmatpush.bf16.msrb.mxu1 %v1755_v54  ;;  %vm2315_vm1 = vmpackc.low %vm2314_vm3, %vm2313_vm2  ;;  %1764 = vmatpush.bf16.msrb.mxu0 %v1752_v52 }
 0x1d9   : > { %vm2308_vm7 = vmpackc.low %vm2307_vm12, %vm2306_vm9  ;;  %v2317_v5 = vsel %vm2315_vm1, %v4086_v10, 0  ;;  %2246 = vrot.lane.b32.xlu0 %v2242_v34, %s2667_s28  ;;  %2244 = vrot.lane.b32.xlu2 %v2241_v49, %s2667_s28  ;;  %vm4478_vm12 = vcmask 531456  }
 0x1da   : > { %v2324_v17 = vunpack.c.l.b16 %v2317_v5  ;;  %v2316_v55 = vsel %vm2308_vm7, %v4089_v14, 0  ;;  %vm4479_vm1 = vmmov %vm4476_vm0  ;;  %vm4480_vm7 = vcmask 523264  }
 0x1db   : > { %v2323_v43 = vunpack.c.h.b16 %v2316_v55  ;;  %2598 = vmatmul.msk.bf16.vlgmr.msrb.gmra.mxu0 %vm283_vm4, %v2597_v53  ;;  %2599 = vmatmul.msk.bf16.vlgmr.msrb.gmra.mxu1 %vm283_vm4, %v2597_v53  ;;  %v2322_v59 = vunpack.c.l.b16 %v2316_v55 }
 0x1dc   : > { %v2327_v44 = vpack.c.b16 %v2324_v17, %v2324_v17  ;;  %v694_v0 = vpop.f32.mrf.mxu2  ;;  %v707_v48 = vpop.f32.mrf.mxu3 }
 0x1dd   : > { %v2326_v31 = vpack.c.b16 %v2323_v43, %v2323_v43  ;;  %v2325_v58 = vpack.c.b16 %v2322_v59, %v2322_v59  ;;  %v711_v7 = vadd.f32 %v694_v0, %v627_v50  ;;  %v712_v45 = vadd.f32 %v707_v48, %v628_v12 }
 0x1de   : > { %v778_v9 = vpop.f32.mrf.mxu0 }
 0x1df   : > { %2332 = vrot.lane.b32.xlu1 %v2327_v44, %s2668_s29  ;;  %v795_v63 = vadd.f32 %v778_v9, %v711_v7  ;;  %v796_v8 = vadd.f32 %v791_v13, %v712_v45  ;;  %v793_v18 = vpop.f32.mrf.mxu1 }
 0x1e1   : > { %2330 = vrot.lane.b32.xlu0 %v2326_v31, %s2668_s29  ;;  %2328 = vrot.lane.b32.xlu2 %v2325_v58, %s2668_s29 }
 0x1e2   : > { %v1827_v32 = vpop.permute.xlu2 %1826 }
 0x1e4   : > { %v696_v2 = vpop.f32.mrf.mxu2  ;;  %v709_v15 = vpop.f32.mrf.mxu3 }
 0x1e6   : > { %v780_v16 = vpop.f32.mrf.mxu0 }
 0x1e7   : > { %v959_v4 = vpop.f32.mrf.mxu1 }
 0x1ea   : > { %v1909_v33 = vpop.permute.xlu2 %1908 }
 0x1ec   : > { %v862_v20 = vpop.f32.mrf.mxu2  ;;  %v875_v23 = vpop.f32.mrf.mxu3 }
 0x1ed   : > { %v879_v22 = vadd.f32 %v862_v20, %v795_v63  ;;  %v880_v26 = vadd.f32 %v875_v23, %v796_v8  ;;  %v2606_v8 = vld [vmem:[%s4223_s0 + $0x2a] sm:$0x3] }
 0x1ee   : > { %v946_v24 = vpop.f32.mrf.mxu0 }
 0x1ef   : > { %v963_v27 = vadd.f32 %v946_v24, %v879_v22  ;;  %v964_v29 = vadd.f32 %v959_v4, %v880_v26  ;;  %v961_v46 = vpop.f32.mrf.mxu1 }
 0x1f2   : > { %v1993_v12 = vpop.permute.xlu2 %1992 }
 0x1f4   : > { %v864_v19 = vpop.f32.mrf.mxu2  ;;  %v877_v56 = vpop.f32.mrf.mxu3 }
 0x1f6   : > { %v948_v1 = vpop.f32.mrf.mxu0 }
 0x1f7   : > { %v1131_v54 = vpop.f32.mrf.mxu1 }
 0x1f9   : > { %v1829_v30 = vpop.permute.xlu0 %1828 }
 0x1fa   : > { %v1831_v37 = vsel %vm4474_vm8, %v1827_v32, %v1829_v30  ;;  %vm4481_vm8 = vmmov %vm4478_vm12 }
 0x1fb   : > { %v1839_v38 = vsel %vm287_vm6, %v1831_v37, 0 }
 0x1fc   : > { %v1825_v39 = vpop.permute.xlu1 %1824  ;;  %1861 = vmatpush.bf16.msrb.mxu3 %v1839_v38  ;;  %v1032_v35 = vpop.f32.mrf.mxu2 }
 0x1fd   : > { %v1830_v6 = vsel %vm4475_vm15, %v1825_v39, %v1827_v32  ;;  %v1049_v49 = vadd.f32 %v1032_v35, %v963_v27  ;;  %v1045_v28 = vpop.f32.mrf.mxu3  ;;  %v2609_v27 = vld [vmem:[%s4223_s0 + $0x2c] sm:$0x3]  ;;  %vm4482_vm15 = vmmov %vm4480_vm7 }
 0x1fe   : > { %v1836_v34 = vsel %vm287_vm6, %v1830_v6, 0  ;;  %v1050_v21 = vadd.f32 %v1045_v28, %v964_v29  ;;  %v1118_v52 = vpop.f32.mrf.mxu0 }
 0x1ff   : > { %1848 = vmatpush.bf16.msrb.mxu2 %v1836_v34  ;;  %2602 = vmatmul.msk.bf16.vlgmr.msrb.gmra.mxu3 %vm283_vm4, %v2600_v42  ;;  %v1135_v17 = vadd.f32 %v1118_v52, %v1049_v49  ;;  %v1133_v2 = vpop.f32.mrf.mxu1 }
 0x200   : > { %v1136_v43 = vadd.f32 %v1131_v54, %v1050_v21 }
 0x202   : > { %2601 = vmatmul.msk.bf16.vlgmr.msrb.gmra.mxu2 %vm283_vm4, %v2600_v42  ;;  %v1911_v3 = vpop.permute.xlu0 %1910 }
 0x203   : > { %v1914_v36 = vsel %vm4476_vm0, %v1909_v33, %v1911_v3  ;;  %vm4483_vm0 = vcmask 515072  }
 0x204   : > { %v2383_v61 = vpop.permute.xlu1 %2382  ;;  %v1920_v51 = vsel %vm287_vm6, %v1914_v36, 0  ;;  %v1034_v57 = vpop.f32.mrf.mxu2 }
 0x205   : > { %v2384_v25 = vrot.slane %v2383_v61, 4  ;;  %1932 = vmatpush.bf16.msra.mxu0 %v1920_v51  ;;  %v1047_v58 = vpop.f32.mrf.mxu3 }
 0x206   : > { %v1120_v13 = vpop.f32.mrf.mxu0 }
 0x207   : > { %v2385_v53 = vsel %vm4477_vm14, %v2384_v25, %v2383_v61  ;;  %v2393_v50 = vunpack.c.l.b16 %v2384_v25  ;;  %v2394_v5 = vunpack.c.h.b16 %v2384_v25  ;;  %v1303_v30 = vpop.f32.mrf.mxu1  ;;  %vm4484_vm14 = vmmov %vm4483_vm0 }
 0x208   : > { %v2386_v55 = vunpack.c.l.b16 %v2385_v53  ;;  %v2387_v11 = vunpack.c.h.b16 %v2385_v53  ;;  %2604 = vmatmul.msk.bf16.vlgmr.msra.gmra.mxu0 %vm283_vm4, %v2603_v47 }
 0x209   : > { %vm2397_vm11 = vcmp.ne.s32.totalorder %v2393_v50, %v2893_v40  ;;  %vm2398_vm13 = vcmp.ne.s32.totalorder %v2394_v5, %v2896_v41 }
 0x20a   : > { %vm2390_vm5 = vcmp.ne.s32.totalorder %v2386_v55, %v2893_v40  ;;  %vm2391_vm2 = vcmp.ne.s32.totalorder %v2387_v11, %v2896_v41  ;;  %v1995_v59 = vpop.permute.xlu0 %1994  ;;  %vm2399_vm3 = vmpackc.low %vm2398_vm13, %vm2397_vm11  ;;  %vm4485_vm11 = vcmask 465920  }
 0x20b   : > { %vm2392_vm9 = vmpackc.low %vm2391_vm2, %vm2390_vm5  ;;  %v1998_v44 = vsel %vm4478_vm12, %v1993_v12, %v1995_v59  ;;  %v2401_v31 = vsel %vm2399_vm3, %v4086_v10, 0  ;;  %vm4487_vm5 = vcmask 457728   ;;  %vm4489_vm3 = vcmask 449536  }
 0x20c   : > { %v1913_v60 = vpop.permute.xlu1 %1912  ;;  %v2004_v62 = vsel %vm287_vm6, %v1998_v44, 0  ;;  %v2408_v0 = vunpack.c.l.b16 %v2401_v31  ;;  %v2400_v7 = vsel %vm2392_vm9, %v4089_v14, 0  ;;  %v2077_v14 = vpop.permute.xlu2 %2076  ;;  %vm4486_vm13 = vmmov %vm4485_vm11 }
 0x20d   : > { %v1915_v48 = vsel %vm4479_vm1, %v1911_v3, %v1913_v60  ;;  %2016 = vmatpush.bf16.msra.mxu2 %v2004_v62  ;;  %v2407_v40 = vunpack.c.h.b16 %v2400_v7  ;;  %v2406_v41 = vunpack.c.l.b16 %v2400_v7  ;;  %v1204_v15 = vpop.f32.mrf.mxu2  ;;  %v1217_v20 = vpop.f32.mrf.mxu3  ;;  %v2612_v7 = vld [vmem:[%s4223_s0 + $0x2e] sm:$0x3]  ;;  %vm4488_vm2 = vmmov %vm4487_vm5 }
 0x20e   : > { %v1923_v45 = vsel %vm287_vm6, %v1915_v48, 0  ;;  %v2411_v9 = vpack.c.b16 %v2408_v0, %v2408_v0  ;;  %v1221_v18 = vadd.f32 %v1204_v15, %v1135_v17  ;;  %v1222_v26 = vadd.f32 %v1217_v20, %v1136_v43  ;;  %v1290_v29 = vpop.f32.mrf.mxu0  ;;  %vm4490_vm9 = vmmov %vm4489_vm3 }
 0x20f   : > { %1945 = vmatpush.bf16.msra.mxu1 %v1923_v45  ;;  %v2410_v63 = vpack.c.b16 %v2407_v40, %v2407_v40  ;;  %v2409_v10 = vpack.c.b16 %v2406_v41, %v2406_v41  ;;  %v1305_v34 = vpop.f32.mrf.mxu1 }
 0x210   : > { %2416 = vrot.lane.b32.xlu1 %v2411_v9, %s2671_s5  ;;  %v1307_v19 = vadd.f32 %v1290_v29, %v1221_v18  ;;  %v1308_v37 = vadd.f32 %v1303_v30, %v1222_v26 }
 0x211   : > { %2414 = vrot.lane.b32.xlu0 %v2410_v63, %s2671_s5  ;;  %2412 = vrot.lane.b32.xlu2 %v2409_v10, %s2671_s5 }
 0x212   : > { %2605 = vmatmul.msk.bf16.vlgmr.msra.gmra.mxu1 %vm283_vm4, %v2603_v47  ;;  %2607 = vmatmul.msk.bf16.vlgmr.msra.gmra.mxu2 %vm283_vm4, %v2606_v8  ;;  %v2079_v16 = vpop.permute.xlu0 %2078 }
 0x213   : > { %v2082_v23 = vsel %vm4480_vm7, %v2077_v14, %v2079_v16  ;;  %v2615_v14 = vld [vmem:[%s4223_s0 + $0x30] sm:$0x3] }
 0x214   : > { %v1997_v22 = vpop.permute.xlu1 %1996  ;;  %v2088_v24 = vsel %vm287_vm6, %v2082_v23, 0 }
 0x215   : > { %v1999_v32 = vsel %vm4481_vm8, %v1995_v59, %v1997_v22  ;;  %2100 = vmatpush.bf16.msrb.mxu0 %v2088_v24  ;;  %v1206_v56 = vpop.f32.mrf.mxu2  ;;  %v1219_v38 = vpop.f32.mrf.mxu3 }
 0x216   : > { %v2007_v4 = vsel %vm287_vm6, %v1999_v32, 0  ;;  %v1292_v33 = vpop.f32.mrf.mxu0 }
 0x217   : > { %2029 = vmatpush.bf16.msra.mxu3 %v2007_v4  ;;  %v2618_v4 = vld [vmem:[%s4223_s0 + $0x32] sm:$0x3] }
 0x218   : > { %2610 = vmatmul.msk.bf16.vlgmr.msrb.gmra.mxu0 %vm283_vm4, %v2609_v27  ;;  %v1443_v28 = vpop.f32.mrf.mxu1 }
 0x21a   : > { %2608 = vmatmul.msk.bf16.vlgmr.msra.gmra.mxu3 %vm283_vm4, %v2606_v8 }
 0x21c   : > { %v2081_v39 = vpop.permute.xlu1 %2080 }
 0x21d   : > { %v2083_v6 = vsel %vm4482_vm15, %v2079_v16, %v2081_v39  ;;  %v1344_v1 = vpop.f32.mrf.mxu2  ;;  %v1357_v3 = vpop.f32.mrf.mxu3 }
 0x21e   : > { %v2091_v42 = vsel %vm287_vm6, %v2083_v6, 0  ;;  %v1361_v46 = vadd.f32 %v1344_v1, %v1307_v19  ;;  %v1430_v35 = vpop.f32.mrf.mxu0  ;;  %v1362_v36 = vadd.f32 %v1357_v3, %v1308_v37 }
 0x21f   : > { %2113 = vmatpush.bf16.msrb.mxu1 %v2091_v42 }
 0x220   : > { %v1447_v49 = vadd.f32 %v1430_v35, %v1361_v46  ;;  %v1448_v61 = vadd.f32 %v1443_v28, %v1362_v36  ;;  %v1445_v47 = vpop.f32.mrf.mxu1 }
 0x222   : > { %2611 = vmatmul.msk.bf16.vlgmr.msrb.gmra.mxu1 %vm283_vm4, %v2609_v27 }
 0x225   : > { %v1346_v51 = vpop.f32.mrf.mxu2  ;;  %v1359_v21 = vpop.f32.mrf.mxu3 }
 0x226   : > { %v1432_v25 = vpop.f32.mrf.mxu0  ;;  %v2621_v51 = vld [vmem:[%s4223_s0 + $0x34] sm:$0x3] }
 0x22b   : > { %v2161_v17 = vpop.permute.xlu2 %2160 }
 0x22d   : > { %v1514_v52 = vpop.f32.mrf.mxu2  ;;  %v1527_v53 = vpop.f32.mrf.mxu3 }
 0x22e   : > { %v1531_v54 = vadd.f32 %v1514_v52, %v1447_v49  ;;  %v1532_v50 = vadd.f32 %v1527_v53, %v1448_v61 }
 0x233   : > { %v2245_v48 = vpop.permute.xlu2 %2244 }
 0x235   : > { %v1516_v5 = vpop.f32.mrf.mxu2  ;;  %v1529_v11 = vpop.f32.mrf.mxu3 }
 0x23b   : > { %v2329_v15 = vpop.permute.xlu2 %2328 }
 0x23c   : > { %v1611_v12 = vpop.f32.mrf.mxu1 }
 0x23d   : > { %v1616_v55 = vadd.f32 %v1611_v12, %v1532_v50 }
 0x23e   : > { %v1598_v43 = vpop.f32.mrf.mxu0 }
 0x23f   : > { %v1615_v59 = vadd.f32 %v1598_v43, %v1531_v54 }
 0x241   : > { %v2165_v57 = vpop.permute.xlu1 %2164 }
 0x242   : > { %v2163_v44 = vpop.permute.xlu0 %2162 }
 0x243   : > { %v2166_v31 = vsel %vm4483_vm0, %v2161_v17, %v2163_v44  ;;  %v2167_v58 = vsel %vm4484_vm14, %v2163_v44, %v2165_v57 }
 0x244   : > { %v1613_v60 = vpop.f32.mrf.mxu1  ;;  %v2172_v62 = vsel %vm287_vm6, %v2166_v31, 0  ;;  %v2175_v0 = vsel %vm287_vm6, %v2167_v58, 0 }
 0x245   : > { %2184 = vmatpush.bf16.msrb.mxu2 %v2172_v62  ;;  %2197 = vmatpush.bf16.msrb.mxu3 %v2175_v0 }
 0x246   : > { %v1600_v40 = vpop.f32.mrf.mxu0 }
 0x248   : > { %2613 = vmatmul.msk.bf16.vlgmr.msrb.gmra.mxu2 %vm283_vm4, %v2612_v7  ;;  %2614 = vmatmul.msk.bf16.vlgmr.msrb.gmra.mxu3 %vm283_vm4, %v2612_v7 }
 0x249   : > { %v2249_v41 = vpop.permute.xlu1 %2248 }
 0x24b   : > { %v1682_v45 = vpop.f32.mrf.mxu2  ;;  %v2247_v9 = vpop.permute.xlu0 %2246 }
 0x24c   : > { %v1699_v13 = vadd.f32 %v1682_v45, %v1615_v59  ;;  %v2250_v2 = vsel %vm4485_vm11, %v2245_v48, %v2247_v9  ;;  %v2251_v63 = vsel %vm4486_vm13, %v2247_v9, %v2249_v41 }
 0x24d   : > { %v2256_v10 = vsel %vm287_vm6, %v2250_v2, 0  ;;  %v2259_v8 = vsel %vm287_vm6, %v2251_v63, 0 }
 0x24e   : > { %2268 = vmatpush.bf16.msra.mxu0 %v2256_v10  ;;  %2281 = vmatpush.bf16.msra.mxu1 %v2259_v8 }
 0x251   : > { %2616 = vmatmul.msk.bf16.vlgmr.msra.gmra.mxu0 %vm283_vm4, %v2615_v14  ;;  %2617 = vmatmul.msk.bf16.vlgmr.msra.gmra.mxu1 %vm283_vm4, %v2615_v14  ;;  %v2333_v16 = vpop.permute.xlu1 %2332 }
 0x253   : > { %v1684_v18 = vpop.f32.mrf.mxu2  ;;  %v2331_v20 = vpop.permute.xlu0 %2330 }
 0x254   : > { %v2334_v22 = vsel %vm4487_vm5, %v2329_v15, %v2331_v20  ;;  %v2335_v23 = vsel %vm4488_vm2, %v2331_v20, %v2333_v16 }
 0x255   : > { %v2340_v26 = vsel %vm287_vm6, %v2334_v22, 0  ;;  %v2343_v32 = vsel %vm287_vm6, %v2335_v23, 0 }
 0x256   : > { %v1695_v24 = vpop.f32.mrf.mxu3  ;;  %2352 = vmatpush.bf16.msra.mxu2 %v2340_v26  ;;  %2365 = vmatpush.bf16.msra.mxu3 %v2343_v32 }
 0x257   : > { %v1700_v27 = vadd.f32 %v1695_v24, %v1616_v55 }
 0x258   : > { %v1766_v29 = vpop.f32.mrf.mxu0  ;;  %v1779_v30 = vpop.f32.mrf.mxu1 }
 0x259   : > { %v1783_v19 = vadd.f32 %v1766_v29, %v1699_v13  ;;  %v1784_v37 = vadd.f32 %v1779_v30, %v1700_v27  ;;  %2619 = vmatmul.msk.bf16.vlgmr.msra.gmra.mxu2 %vm283_vm4, %v2618_v4  ;;  %2620 = vmatmul.msk.bf16.vlgmr.msra.gmra.mxu3 %vm283_vm4, %v2618_v4 }
 0x25e   : > { %v1697_v56 = vpop.f32.mrf.mxu3 }
 0x260   : > { %v1768_v38 = vpop.f32.mrf.mxu0  ;;  %v1781_v39 = vpop.f32.mrf.mxu1 }
 0x26b   : > { %v2413_v6 = vpop.permute.xlu2 %2412 }
 0x282   : > { %v2417_v42 = vpop.permute.xlu1 %2416  ;;  %v1863_v34 = vpop.f32.mrf.mxu3 }
 0x283   : > { %v2415_v33 = vpop.permute.xlu0 %2414  ;;  %v1868_v3 = vadd.f32 %v1863_v34, %v1784_v37 }
 0x284   : > { %v2418_v1 = vsel %vm4489_vm3, %v2413_v6, %v2415_v33  ;;  %v2419_v46 = vsel %vm4490_vm9, %v2415_v33, %v2417_v42 }
 0x285   : > { %v2424_v35 = vsel %vm287_vm6, %v2418_v1, 0  ;;  %v2427_v36 = vsel %vm287_vm6, %v2419_v46, 0  ;;  %v1850_v49 = vpop.f32.mrf.mxu2  ;;  %v1934_v28 = vpop.f32.mrf.mxu0 }
 0x286   : > { %v1867_v61 = vadd.f32 %v1850_v49, %v1783_v19  ;;  %2436 = vmatpush.bf16.msrb.mxu0 %v2424_v35  ;;  %2449 = vmatpush.bf16.msrb.mxu1 %v2427_v36 }
 0x288   : > { %v1951_v21 = vadd.f32 %v1934_v28, %v1867_v61 }
 0x289   : > { %2622 = vmatmul.msk.bf16.vlgmr.msrb.gmra.mxu0 %vm283_vm4, %v2621_v51  ;;  %2623 = vmatmul.msk.bf16.vlgmr.msrb.gmra.mxu1 %vm283_vm4, %v2621_v51  ;;  %vm2471_vm4 = vcmask 11264  }
 0x28a   : > { %v1865_v25 = vpop.f32.mrf.mxu3 }
 0x28d   : > { %v1852_v47 = vpop.f32.mrf.mxu2  ;;  %v1936_v52 = vpop.f32.mrf.mxu0 }
 0x28f   : > { %v1947_v54 = vpop.f32.mrf.mxu1 }
 0x290   : > { %v1952_v53 = vadd.f32 %v1947_v54, %v1868_v3 }
 0x295   : > { %v2018_v50 = vpop.f32.mrf.mxu2  ;;  %v2102_v12 = vpop.f32.mrf.mxu0 }
 0x296   : > { %v2035_v5 = vadd.f32 %v2018_v50, %v1951_v21 }
 0x297   : > { %v1949_v17 = vpop.f32.mrf.mxu1 }
 0x298   : > { %v2119_v55 = vadd.f32 %v2102_v12, %v2035_v5 }
 0x29d   : > { %v2031_v11 = vpop.f32.mrf.mxu3  ;;  %v2020_v43 = vpop.f32.mrf.mxu2 }
 0x29e   : > { %v2036_v59 = vadd.f32 %v2031_v11, %v1952_v53  ;;  %v2104_v57 = vpop.f32.mrf.mxu0 }
 0x29f   : > { %v2115_v44 = vpop.f32.mrf.mxu1 }
 0x2a0   : > { %v2120_v31 = vadd.f32 %v2115_v44, %v2036_v59 }
 0x2a5   : > { %v2033_v58 = vpop.f32.mrf.mxu3 }
 0x2a7   : > { %v2117_v60 = vpop.f32.mrf.mxu1 }
 0x2cb   : > { %v2186_v62 = vpop.f32.mrf.mxu2  ;;  %v2199_v0 = vpop.f32.mrf.mxu3 }
 0x2cc   : > { %v2203_v8 = vadd.f32 %v2186_v62, %v2119_v55  ;;  %v2204_v14 = vadd.f32 %v2199_v0, %v2120_v31 }
 0x2ce   : > { %v2270_v7 = vpop.f32.mrf.mxu0  ;;  %v2283_v48 = vpop.f32.mrf.mxu1 }
 0x2cf   : > { %v2287_v15 = vadd.f32 %v2270_v7, %v2203_v8  ;;  %v2288_v16 = vadd.f32 %v2283_v48, %v2204_v14 }
 0x2d3   : > { %v2188_v40 = vpop.f32.mrf.mxu2  ;;  %v2201_v41 = vpop.f32.mrf.mxu3 }
 0x2d6   : > { %v2272_v45 = vpop.f32.mrf.mxu0  ;;  %v2285_v9 = vpop.f32.mrf.mxu1 }
 0x2dc   : > { %v2354_v13 = vpop.f32.mrf.mxu2  ;;  %v2367_v2 = vpop.f32.mrf.mxu3 }
 0x2dd   : > { %v2371_v18 = vadd.f32 %v2354_v13, %v2287_v15  ;;  %v2372_v20 = vadd.f32 %v2367_v2, %v2288_v16 }
 0x2e4   : > { %v2356_v63 = vpop.f32.mrf.mxu2  ;;  %v2369_v10 = vpop.f32.mrf.mxu3 }
 0x306   : > { %v2438_v22 = vpop.f32.mrf.mxu0  ;;  %v2451_v23 = vpop.f32.mrf.mxu1 }
 0x307   : > { %v2455_v26 = vadd.f32 %v2438_v22, %v2371_v18  ;;  %v2456_v32 = vadd.f32 %v2451_v23, %v2372_v20 }
 0x309   : > { %v2462_v24 = vmul.f32 %v2455_v26, %v2455_v26  ;;  %v2463_v4 = vmul.f32 %v2456_v32, %v2456_v32  ;;  %v2457_v27 = vsel %vm287_vm6, %v2455_v26, 0.0  ;;  %v2458_v29 = vsel %vm287_vm6, %v2456_v32, 0.0 }
 0x30a   : > { %v2459_v30 = vadd.f32 %v2458_v29, %v2457_v27 }
 0x30b   : > { %v2464_v19 = vsel %vm287_vm6, %v2462_v24, 0.0  ;;  %v2465_v37 = vsel %vm287_vm6, %v2463_v4, 0.0 }
 0x30c   : > { %2460 = vadd.xlane.f32.xlu2 %v2459_v30  ;;  %v2466_v56 = vadd.f32 %v2465_v37, %v2464_v19 }
 0x30e   : > { %2467 = vadd.xlane.f32.xlu0 %v2466_v56  ;;  %v2440_v38 = vpop.f32.mrf.mxu0  ;;  %v2453_v39 = vpop.f32.mrf.mxu1 }
 0x37f   : > { %v2461_v6 = vpop.xlane.xlu2 %2460 }
 0x381   : > { %v2468_v42 = vpop.xlane.xlu0 %2467 }
 0x382   : > { %v2470_v33 = vsel %vm1269_vm10, %v2461_v6, %v2468_v42 }
 0x383   : > { %2472 = vst.msk [vmem:[%s2720_s23] sm:$0xf] %vm2471_vm4, %v2470_v33 }
 0x384 PF: > { %s13_s12 = sadd.s32 1, %s2664_s12  }
 0x385   : > { %p10_p5 = scmp.ge.s32.totalorder %s13_s12, 6  }
 0x387   :  { %12 = sbr.rel (!%p10_p5) target bundleno = 1 (0x1), region = 112 }
 0x38c   :  { %2492 = vsyncmov [#allocation3] }
 0x38f   :  { %s2493_s10 = vpop.sfrf %2492 }
 0x390   :  { %p2626_p6 = scmp.ne.s32.totalorder %s2493_s10, 0 }
 0x392   :  { %2497 = shalt.err (%p2626_p6)  }

// kernel: a_call__.7
= control target key start
LH: loop header
LB: loop body
LE: loop exit
PB: predicated region body
PF: predicated region fallthrough
CT: control target
= control target key end

     0   :  { %s2862_s21 = smov 0   ;;  %s4348_s0 = inlined_call_operand.vmem [shape: bf16[27,4,8], index: 0, kind: input, shape index: {}]   ;;  %s4349_s1 = inlined_call_operand.vmem [shape: bf16[8,1280], index: 1, kind: input, shape index: {}]   ;;  %s4350_s2 = inlined_call_operand.vmem [shape: s32[1,1024], index: 2, kind: input, shape index: {}]   ;;  %s4351_s3 = inlined_call_operand.vmem [shape: f32[4,1], index: 3, kind: input, shape index: {}]   ;;  %s4352_s4 = inlined_call_operand.vmem [shape: f32[4,1], index: 4, kind: input, shape index: {}]   ;;  %s4353_s5 = inlined_call_operand.vmem [shape: f32[4,1024], index: 5, kind: input, shape index: {}]   ;;  %s4354_s6 = inlined_call_operand.vmem [shape: f32[4,1024], index: 6, kind: output, shape index: {}]  }
   0x1 LB: > { %s2673_s22 = sadd.s32 4294967295, %s2807_s21   ;;  %p2677_p0 = scmp.ge.s32.totalorder %s2807_s21, 1  ;;  %s2807_s21 = sphi %s2862_s21, %s16_s21  }
   0x2   : > { %p223_p1 = scmp.lt.s32.totalorder %s2807_s21, 5 }
   0x4   : > { %p224_p2 = pnand %p2677_p0, %p223_p1 }
   0x5   : > { %s2678_s23 = sshll.u32 (!%p224_p2), %s2673_s22, 1  ;;  %s2683_s24 = sshll.u32 (!%p224_p2), %s2673_s22, 8 }
   0x6   : > { %227 = sbr.rel (%p224_p2) target bundleno = 794 (0x31a), region = 44  ;;  %p258_p3 = scmp.lt.s32.totalorder (!%p224_p2), %s2678_s23, 7 }
   0x7   : > { %s278_s25 = sshra.s32 (!%p224_p2), %s2683_s24, 7 }
   0x8   : > { %s2684_s26 = sshll.u32 (!%p224_p2), %s278_s25, 2 }
   0x9   : > { %s281_s29 = scalar_lea.vmem (!%p224_p2), %s4349_s1, %s2684_s26 }
   0xb   : > { %s4605_s23 = smov (!%p258_p3, %s2678_s23), 7  ;;  %v292_v0 = vld [vmem:[%s281_s29] sm:$0xff]  ;;  %v294_v1 = vld [vmem:[%s281_s29 + $0x8] sm:$0xff] }
   0xc   : > { %s2876_s8 = scalar_lea.vmem %s4350_s2, %s4605_s23  ;;  %s2680_s9 = sshll.u32 %s4605_s23, 2  ;;  %293 = vst [vmem:[#allocation2] sm:$0xff] %v292_v0 }
   0xd   : > { %s2881_s12 = scalar_lea.vmem %s4353_s5, %s2680_s9  ;;  %s2886_s15 = scalar_lea.vmem %s4354_s6, %s2680_s9  ;;  %295 = vst [vmem:[#allocation2 + $0x8] sm:$0xff] %v294_v1 }
   0xe   : > { %301 = vsyncadd [#allocation3], 256 }
   0xf   : > { %2803 = dma.done.wait [#allocation3], 256 }
  0x10   : > { %2804 = vsyncadd [#allocation3], 4294967040  ;;  %v2809_v2 = vmov 0   ;;  %v2891_v3 = vld [vmem:[%s2876_s8] sm:$0x3]  ;;  %s2810_s16 = smov 57  }
  0x11   : > { %2795 = vset.pattern.permute.xlu0 %v2809_v2  ;;  %2794 = vset.pattern.permute.xlu2 %v2809_v2  ;;  %v478_v4 = vand.u32 75, %v2891_v3  ;;  %v340_v5 = vand.u32 11, %v2891_v3  ;;  %v564_v6 = vand.u32 35, %v2891_v3  ;;  %v307_v7 = vand.u32 43, %v2891_v3  ;;  %s2811_s17 = smov 56   ;;  %s2812_s18 = smov 64  }
  0x12   : > { %v819_v8 = vand.u32 51, %v2891_v3  ;;  %v650_v9 = vand.u32 3, %v2891_v3  ;;  %v903_v10 = vand.u32 19, %v2891_v3  ;;  %v735_v11 = vand.u32 67, %v2891_v3  ;;  %s2813_s19 = smov 63   ;;  %s2814_s20 = smov 55  }
  0x13   : > { %vm479_vm0 = vcmp.eq.s32.totalorder %v478_v4, 75  ;;  %vm341_vm1 = vcmp.eq.s32.totalorder %v340_v5, 11  ;;  %vm565_vm2 = vcmp.eq.s32.totalorder %v564_v6, 35  ;;  %vm308_vm3 = vcmp.eq.s32.totalorder %v307_v7, 43  ;;  %s2815_s22 = smov 65   ;;  %s2816_s23 = smov 72  }
  0x14   : > { %v480_v12 = vsel %vm479_vm0, 1, %v2809_v2  ;;  %v342_v13 = vsel %vm341_vm1, 1, %v2809_v2  ;;  %v566_v14 = vsel %vm565_vm2, 1, %v2809_v2  ;;  %v311_v15 = vsel %vm308_vm3, 1, %v2809_v2  ;;  %s2817_s24 = smov 71   ;;  %s2818_s25 = smov 73  }
  0x15   : > { %v481_v16 = vperm.slane %v480_v12, 0  ;;  %v482_v17 = vperm.slane %v480_v12, 1  ;;  %v343_v18 = vperm.slane %v342_v13, 0  ;;  %v344_v19 = vperm.slane %v342_v13, 1  ;;  %s2819_s26 = smov 120   ;;  %s2820_s27 = smov 119  }
  0x16   : > { %v567_v20 = vperm.slane %v566_v14, 0  ;;  %v568_v21 = vperm.slane %v566_v14, 1  ;;  %v312_v22 = vperm.slane %v311_v15, 0  ;;  %v313_v23 = vperm.slane %v311_v15, 1  ;;  %s2821_s28 = smov 121   ;;  %s2822_s29 = smov 127  }
  0x17   : > { %vm483_vm4 = vcmp.eq.s32.totalorder %v481_v16, 1  ;;  %vm484_vm5 = vcmp.eq.s32.totalorder %v482_v17, 1  ;;  %vm345_vm6 = vcmp.eq.s32.totalorder %v343_v18, 1  ;;  %vm346_vm7 = vcmp.eq.s32.totalorder %v344_v19, 1  ;;  %s2823_s30 = smov 1   ;;  %s2824_s7 = smov 9  }
  0x18   : > { %vm485_vm8 = vmpackc.low %vm484_vm5, %vm483_vm4  ;;  %vm2905_vm9 = vcmp.eq.s32.totalorder %v567_v20, 1  ;;  %vm2909_vm10 = vcmp.eq.s32.totalorder %v568_v21, 1  ;;  %vm2913_vm11 = vcmp.eq.s32.totalorder %v312_v22, 1  ;;  %vm2917_vm12 = vcmp.eq.s32.totalorder %v313_v23, 1  ;;  %s2825_s9 = smov 8   ;;  %s2826_s10 = smov 7  }
  0x19   : > { %v486_v28 = vsel %vm485_vm8, 65537, %v2809_v2  ;;  %vm347_vm13 = vmpackc.low %vm346_vm7, %vm345_vm6  ;;  %vm820_vm14 = vcmp.eq.s32.totalorder %v819_v8, 51  ;;  %vm651_vm15 = vcmp.eq.s32.totalorder %v650_v9, 3  ;;  %vm904_vm0 = vcmp.eq.s32.totalorder %v903_v10, 19 }
  0x1a   : > { %487 = vrot.lane.b32.xlu1 %v486_v28, %s2810_s16  ;;  %v348_v29 = vsel %vm347_vm13, 65537, %v2809_v2  ;;  %vm571_vm1 = vmpackc.low %vm2909_vm10, %vm2905_vm9  ;;  %v652_v30 = vsel %vm651_vm15, 1, %v2809_v2  ;;  %v905_v31 = vsel %vm904_vm0, 1, %v2809_v2  ;;  %v821_v32 = vsel %vm820_vm14, 1, %v2809_v2 }
  0x1b   : > { %349 = vrot.lane.b32.xlu0 %v348_v29, %s2811_s17  ;;  %v653_v33 = vperm.slane %v652_v30, 0  ;;  %vm316_vm2 = vmpackc.low %vm2917_vm12, %vm2913_vm11  ;;  %v654_v34 = vperm.slane %v652_v30, 1  ;;  %v906_v35 = vperm.slane %v905_v31, 0  ;;  %v572_v36 = vsel %vm571_vm1, 65537, %v2809_v2 }
  0x1c   : > { %v907_v37 = vperm.slane %v905_v31, 1  ;;  %vm736_vm4 = vcmp.eq.s32.totalorder %v735_v11, 67  ;;  %v822_v38 = vperm.slane %v821_v32, 0  ;;  %v823_v39 = vperm.slane %v821_v32, 1 }
  0x1d   : > { %vm655_vm3 = vcmp.eq.s32.totalorder %v653_v33, 1  ;;  %vm656_vm5 = vcmp.eq.s32.totalorder %v654_v34, 1  ;;  %v737_v40 = vsel %vm736_vm4, 1, %v2809_v2  ;;  %v317_v41 = vsel %vm316_vm2, 65537, %v2809_v2 }
  0x1e   : > { %vm657_vm6 = vmpackc.low %vm656_vm5, %vm655_vm3  ;;  %v738_v42 = vperm.slane %v737_v40, 0  ;;  %v739_v43 = vperm.slane %v737_v40, 1  ;;  %v1071_v44 = vand.u32 41, %v2891_v3  ;;  %vm2941_vm7 = vcmp.eq.s32.totalorder %v906_v35, 1 }
  0x1f   : > { %v658_v45 = vsel %vm657_vm6, 65537, %v2809_v2  ;;  %v987_v47 = vand.u32 83, %v2891_v3  ;;  %v1157_v48 = vand.u32 9, %v2891_v3  ;;  %vm2948_vm8 = vcmp.eq.s32.totalorder %v907_v37, 1 }
  0x20   : > { %659 = vrot.lane.b32.xlu2 %v658_v45, %s2812_s18  ;;  %vm2952_vm9 = vcmp.eq.s32.totalorder %v738_v42, 1  ;;  %vm2956_vm10 = vcmp.eq.s32.totalorder %v739_v43, 1  ;;  %vm1072_vm11 = vcmp.eq.s32.totalorder %v1071_v44, 41  ;;  %vm2961_vm12 = vcmp.eq.s32.totalorder %v822_v38, 1  ;;  %vm910_vm1 = vmpackc.low %vm2948_vm8, %vm2941_vm7  ;;  %v3073_v44 = vld [vmem:[#allocation2 + $0x8] sm:$0xf] }
  0x21   : > { %vm2965_vm13 = vcmp.eq.s32.totalorder %v823_v39, 1  ;;  %vm988_vm14 = vcmp.eq.s32.totalorder %v987_v47, 83  ;;  %vm1158_vm15 = vcmp.eq.s32.totalorder %v1157_v48, 9  ;;  %vm742_vm0 = vmpackc.low %vm2956_vm10, %vm2952_vm9  ;;  %v1073_v54 = vsel %vm1072_vm11, 1, %v2809_v2 }
  0x22   : > { %573 = vrot.lane.b32.xlu1 %v572_v36, %s2813_s19  ;;  %v989_v55 = vsel %vm988_vm14, 1, %v2809_v2  ;;  %v1159_v58 = vsel %vm1158_vm15, 1, %v2809_v2  ;;  %v1329_v59 = vand.u32 33, %v2891_v3  ;;  %vm826_vm2 = vmpackc.low %vm2965_vm13, %vm2961_vm12  ;;  %v743_v62 = vsel %vm742_vm0, 65537, %v2809_v2 }
  0x23   : > { %318 = vrot.lane.b32.xlu0 %v317_v41, %s2814_s20  ;;  %v990_v56 = vperm.slane %v989_v55, 0  ;;  %v991_v57 = vperm.slane %v989_v55, 1  ;;  %v1160_v60 = vperm.slane %v1159_v58, 0  ;;  %v1161_v61 = vperm.slane %v1159_v58, 1 }
  0x24   : > { %v1074_v63 = vperm.slane %v1073_v54, 0  ;;  %v1075_v0 = vperm.slane %v1073_v54, 1  ;;  %v911_v1 = vsel %vm910_vm1, 65537, %v2809_v2  ;;  %v1243_v4 = vand.u32 73, %v2891_v3 }
  0x25   : > { %v827_v5 = vsel %vm826_vm2, 65537, %v2809_v2  ;;  %vm2990_vm3 = vcmp.eq.s32.totalorder %v990_v56, 1  ;;  %vm2994_vm4 = vcmp.eq.s32.totalorder %v991_v57, 1  ;;  %vm1330_vm5 = vcmp.eq.s32.totalorder %v1329_v59, 33 }
  0x26   : > { %vm2999_vm6 = vcmp.eq.s32.totalorder %v1160_v60, 1  ;;  %vm3003_vm7 = vcmp.eq.s32.totalorder %v1161_v61, 1  ;;  %vm1244_vm8 = vcmp.eq.s32.totalorder %v1243_v4, 73  ;;  %vm3008_vm9 = vcmp.eq.s32.totalorder %v1074_v63, 1  ;;  %vm994_vm11 = vmpackc.low %vm2994_vm4, %vm2990_vm3 }
  0x27   : > { %vm1077_vm10 = vcmp.eq.s32.totalorder %v1075_v0, 1  ;;  %v1245_v11 = vsel %vm1244_vm8, 1, %v2809_v2  ;;  %v1331_v12 = vsel %vm1330_vm5, 1, %v2809_v2  ;;  %vm1164_vm12 = vmpackc.low %vm3003_vm7, %vm2999_vm6  ;;  %v995_v15 = vsel %vm994_vm11, 65537, %v2809_v2 }
  0x28   : > { %744 = vrot.lane.b32.xlu2 %v743_v62, %s2815_s22  ;;  %v1246_v13 = vperm.slane %v1245_v11, 0  ;;  %v1247_v14 = vperm.slane %v1245_v11, 1  ;;  %vm1078_vm13 = vmpackc.low %vm1077_vm10, %vm3008_vm9  ;;  %v1332_v16 = vperm.slane %v1331_v12, 0  ;;  %v1333_v17 = vperm.slane %v1331_v12, 1 }
  0x29   : > { %v1165_v18 = vsel %vm1164_vm12, 65537, %v2809_v2  ;;  %v1079_v19 = vsel %vm1078_vm13, 65537, %v2809_v2  ;;  %v1469_v22 = vand.u32 65, %v2891_v3  ;;  %v3054_v35 = vunpack.c.l.b16 %v2809_v2 }
  0x2a   : > { %912 = vrot.lane.b32.xlu1 %v911_v1, %s2816_s23  ;;  %vm1248_vm14 = vcmp.eq.s32.totalorder %v1246_v13, 1  ;;  %vm1249_vm15 = vcmp.eq.s32.totalorder %v1247_v14, 1  ;;  %vm1334_vm0 = vcmp.eq.s32.totalorder %v1332_v16, 1  ;;  %vm1335_vm1 = vcmp.eq.s32.totalorder %v1333_v17, 1 }
  0x2b   : > { %828 = vrot.lane.b32.xlu0 %v827_v5, %s2817_s24  ;;  %vm1250_vm2 = vmpackc.low %vm1249_vm15, %vm1248_vm14  ;;  %vm1470_vm4 = vcmp.eq.s32.totalorder %v1469_v22, 65  ;;  %v3057_v36 = vunpack.c.h.b16 %v2809_v2  ;;  %vm4356_vm10 = vcmask 457728  }
  0x2c   : > { %vm1336_vm3 = vmpackc.low %vm1335_vm1, %vm1334_vm0  ;;  %v1251_v20 = vsel %vm1250_vm2, 65537, %v2809_v2  ;;  %v1473_v23 = vsel %vm1470_vm4, 1, %v2809_v2  ;;  %vm4366_vm2 = vcmask 449536  }
  0x2d   : > { %v1337_v21 = vsel %vm1336_vm3, 65537, %v2809_v2  ;;  %v1474_v24 = vperm.slane %v1473_v23, 0  ;;  %v1475_v25 = vperm.slane %v1473_v23, 1 }
  0x2f   : > { %vm1476_vm5 = vcmp.eq.s32.totalorder %v1474_v24, 1  ;;  %vm1477_vm6 = vcmp.eq.s32.totalorder %v1475_v25, 1 }
  0x30   : > { %996 = vrot.lane.b32.xlu2 %v995_v15, %s2818_s25  ;;  %vm1478_vm7 = vmpackc.low %vm1477_vm6, %vm1476_vm5 }
  0x31   : > { %v1479_v26 = vsel %vm1478_vm7, 65537, %v2809_v2 }
  0x32   : > { %1166 = vrot.lane.b32.xlu1 %v1165_v18, %s2819_s26 }
  0x33   : > { %1080 = vrot.lane.b32.xlu0 %v1079_v19, %s2820_s27 }
  0x38   : > { %1252 = vrot.lane.b32.xlu2 %v1251_v20, %s2821_s28 }
  0x3a   : > { %1480 = vrot.lane.b32.xlu1 %v1479_v26, %s2823_s30 }
  0x3b   : > { %1338 = vrot.lane.b32.xlu0 %v1337_v21, %s2822_s29 }
  0x7a   : > { %v3039_v27 = vpop.permute.xlu2 %659 }
  0x7b   : > { %v3080_v45 = vrot.slane %v3039_v27, 4 }
  0x7d   : > { %v671_v52 = vunpack.c.l.b16 %v3080_v45  ;;  %v672_v63 = vunpack.c.h.b16 %v3080_v45 }
  0x7f   : > { %vm3117_vm4 = vcmp.ne.s32.totalorder %v671_v52, %v3054_v35 }
  0x82   : > { %v3041_v28 = vpop.permute.xlu2 %744 }
  0x83   : > { %v3044_v29 = vrot.slane %v3041_v28, 4 }
  0x85   : > { %v755_v31 = vunpack.c.l.b16 %v3044_v29  ;;  %v756_v32 = vunpack.c.h.b16 %v3044_v29 }
  0x87   : > { %vm3062_vm8 = vcmp.ne.s32.totalorder %v755_v31, %v3054_v35  ;;  %vm3067_vm9 = vcmp.ne.s32.totalorder %v756_v32, %v3057_v36  ;;  %v3177_v32 = vld [vmem:[#allocation2] sm:$0xff] }
  0x88   : > { %vm761_vm13 = vmpackc.low %vm3067_vm9, %vm3062_vm8 }
  0x89   : > { %v763_v55 = vsel %vm761_vm13, %v3073_v44, 0 }
  0x8a   : > { %v3107_v62 = vpop.permute.xlu2 %996  ;;  %v770_v5 = vunpack.c.l.b16 %v763_v55 }
  0x8b   : > { %v3129_v10 = vrot.slane %v3107_v62, 4 }
  0x8c   : > { %v3046_v30 = vpop.permute.xlu1 %487  ;;  %v773_v25 = vpack.c.b16 %v770_v5, %v770_v5 }
  0x8d   : > { %v3051_v33 = vrot.slane %v3046_v30, 4  ;;  %v350_v34 = vpop.permute.xlu0 %349  ;;  %v1007_v18 = vunpack.c.l.b16 %v3129_v10  ;;  %v1008_v19 = vunpack.c.h.b16 %v3129_v10 }
  0x8e   : > { %v351_v37 = vrot.slane %v350_v34, 4 }
  0x8f   : > { %v499_v38 = vunpack.c.l.b16 %v3051_v33  ;;  %v500_v39 = vunpack.c.h.b16 %v3051_v33 }
  0x90   : > { %v361_v40 = vunpack.c.l.b16 %v351_v37  ;;  %v362_v43 = vunpack.c.h.b16 %v351_v37  ;;  %v353_v46 = vsel %vm4356_vm10, %v351_v37, %v350_v34 }
  0x91   : > { %vm503_vm11 = vcmp.ne.s32.totalorder %v499_v38, %v3054_v35  ;;  %vm504_vm12 = vcmp.ne.s32.totalorder %v500_v39, %v3057_v36  ;;  %v354_v56 = vunpack.c.l.b16 %v353_v46  ;;  %v355_v60 = vunpack.c.h.b16 %v353_v46 }
  0x92   : > { %vm3086_vm14 = vcmp.ne.s32.totalorder %v361_v40, %v3054_v35  ;;  %vm3091_vm15 = vcmp.ne.s32.totalorder %v362_v43, %v3057_v36  ;;  %vm505_vm0 = vmpackc.low %vm504_vm12, %vm503_vm11  ;;  %vm3156_vm12 = vcmp.ne.s32.totalorder %v672_v63, %v3057_v36 }
  0x93   : > { %v507_v54 = vsel %vm505_vm0, %v3073_v44, 0  ;;  %vm367_vm1 = vmpackc.low %vm3091_vm15, %vm3086_vm14  ;;  %vm3122_vm5 = vcmp.ne.s32.totalorder %v354_v56, %v3054_v35  ;;  %vm3132_vm7 = vcmp.ne.s32.totalorder %v355_v60, %v3057_v36  ;;  %vm3186_vm0 = vcmp.ne.s32.totalorder %v1007_v18, %v3054_v35 }
  0x94   : > { %v3083_v47 = vpop.permute.xlu1 %573  ;;  %v514_v59 = vunpack.c.l.b16 %v507_v54  ;;  %v369_v4 = vsel %vm367_vm1, %v3073_v44, 0  ;;  %vm360_vm14 = vmpackc.low %vm3132_vm7, %vm3122_vm5  ;;  %vm3191_vm1 = vcmp.ne.s32.totalorder %v1008_v19, %v3057_v36  ;;  %vm4355_vm7 = vcmask 973824  }
  0x95   : > { %v3096_v50 = vrot.slane %v3083_v47, 4  ;;  %v319_v51 = vpop.permute.xlu0 %318  ;;  %v376_v9 = vunpack.c.l.b16 %v369_v4  ;;  %vm677_vm15 = vmpackc.low %vm3156_vm12, %vm3117_vm4  ;;  %v3203_v48 = vsel %vm360_vm14, %v3177_v32, 0 }
  0x96   : > { %v320_v53 = vrot.slane %v319_v51, 4  ;;  %v517_v1 = vpack.c.b16 %v514_v59, %v514_v59  ;;  %v375_v56 = vunpack.c.h.b16 %v3203_v48 }
  0x97   : > { %v585_v57 = vunpack.c.l.b16 %v3096_v50  ;;  %v586_v58 = vunpack.c.h.b16 %v3096_v50  ;;  %v379_v16 = vpack.c.b16 %v376_v9, %v376_v9 }
  0x98   : > { %v330_v61 = vunpack.c.l.b16 %v320_v53  ;;  %v331_v0 = vunpack.c.h.b16 %v320_v53  ;;  %522 = vrot.lane.b32.xlu1 %v517_v1, %s2817_s24  ;;  %v322_v12 = vsel %vm4366_vm2, %v320_v53, %v319_v51  ;;  %v679_v51 = vsel %vm677_vm15, %v3073_v44, 0 }
  0x99   : > { %vm3112_vm3 = vcmp.ne.s32.totalorder %v585_v57, %v3054_v35  ;;  %vm590_vm6 = vcmp.ne.s32.totalorder %v586_v58, %v3057_v36  ;;  %v323_v24 = vunpack.c.l.b16 %v322_v12  ;;  %384 = vrot.lane.b32.xlu2 %v379_v16, %s2816_s23  ;;  %v324_v34 = vunpack.c.h.b16 %v322_v12 }
  0x9a   : > { %vm3138_vm8 = vcmp.ne.s32.totalorder %v330_v61, %v3054_v35  ;;  %vm3143_vm9 = vcmp.ne.s32.totalorder %v331_v0, %v3057_v36  ;;  %vm591_vm11 = vmpackc.low %vm590_vm6, %vm3112_vm3  ;;  %v686_v58 = vunpack.c.l.b16 %v679_v51  ;;  %v378_v6 = vpack.c.b16 %v375_v56, %v375_v56 }
  0x9b   : > { %v593_v22 = vsel %vm591_vm11, %v3073_v44, 0  ;;  %vm336_vm13 = vmpackc.low %vm3143_vm9, %vm3138_vm8  ;;  %vm3218_vm6 = vcmp.ne.s32.totalorder %v323_v24, %v3054_v35  ;;  %vm3223_vm5 = vcmp.ne.s32.totalorder %v324_v34, %v3057_v36  ;;  %v1555_v51 = vand.u32 49, %v2891_v3 }
  0x9c   : > { %v3147_v15 = vpop.permute.xlu1 %912  ;;  %v600_v26 = vunpack.c.l.b16 %v593_v22  ;;  %v338_v31 = vsel %vm336_vm13, %v3073_v44, 0  ;;  %vm1013_vm8 = vmpackc.low %vm3191_vm1, %vm3186_vm0  ;;  %vm4357_vm13 = vcmask 515072   ;;  %v689_v8 = vpack.c.b16 %v686_v58, %v686_v58 }
  0x9d   : > { %v3149_v17 = vpop.permute.xlu0 %828  ;;  %v3169_v23 = vrot.slane %v3147_v15, 4  ;;  %v430_v39 = vunpack.c.l.b16 %v338_v31  ;;  %vm329_vm14 = vmpackc.low %vm3223_vm5, %vm3218_vm6  ;;  %v1015_v7 = vsel %vm1013_vm8, %v3073_v44, 0  ;;  %v577_v13 = vsel %vm4357_vm13, %v3096_v50, %v3083_v47 }
  0x9e   : > { %v3161_v21 = vrot.slane %v3149_v17, 4  ;;  %v603_v49 = vpack.c.b16 %v600_v26, %v600_v26  ;;  %v337_v9 = vsel %vm329_vm14, %v3177_v32, 0  ;;  %v1022_v16 = vunpack.c.l.b16 %v1015_v7 }
  0x9f   : > { %v433_v42 = vpack.c.b16 %v430_v39, %v430_v39  ;;  %v923_v43 = vunpack.c.l.b16 %v3169_v23  ;;  %v924_v46 = vunpack.c.h.b16 %v3169_v23  ;;  %v428_v19 = vunpack.c.l.b16 %v337_v9 }
  0xa0   : > { %v839_v37 = vunpack.c.l.b16 %v3161_v21  ;;  %v840_v38 = vunpack.c.h.b16 %v3161_v21  ;;  %778 = vrot.lane.b32.xlu1 %v773_v25, %s2813_s19  ;;  %v578_v22 = vunpack.c.l.b16 %v577_v13  ;;  %v579_v47 = vunpack.c.h.b16 %v577_v13 }
  0xa1   : > { %438 = vrot.lane.b32.xlu0 %v433_v42, %s2818_s25  ;;  %vm3238_vm11 = vcmp.ne.s32.totalorder %v923_v43, %v3054_v35  ;;  %vm3243_vm12 = vcmp.ne.s32.totalorder %v924_v46, %v3057_v36  ;;  %608 = vrot.lane.b32.xlu2 %v603_v49, %s2815_s22  ;;  %v1025_v24 = vpack.c.b16 %v1022_v16, %v1022_v16  ;;  %vm662_vm6 = vcmask 523264  }
  0xa2   : > { %vm3208_vm3 = vcmp.ne.s32.totalorder %v839_v37, %v3054_v35  ;;  %vm3213_vm4 = vcmp.ne.s32.totalorder %v840_v38, %v3057_v36  ;;  %vm929_vm15 = vmpackc.low %vm3243_vm12, %vm3238_vm11  ;;  %v431_v34 = vpack.c.b16 %v428_v19, %v428_v19  ;;  %vm3288_vm5 = vcmp.ne.s32.totalorder %v578_v22, %v3054_v35 }
  0xa3   : > { %vm845_vm9 = vmpackc.low %vm3213_vm4, %vm3208_vm3  ;;  %vm4367_vm3 = vcmask 465920   ;;  %v931_v18 = vsel %vm929_vm15, %v3073_v44, 0  ;;  %vm3293_vm8 = vcmp.ne.s32.totalorder %v579_v47, %v3057_v36  ;;  %v663_v39 = vsel %vm662_vm6, %v3080_v45, %v3039_v27 }
  0xa4   : > { %v847_v63 = vsel %vm845_vm9, %v3073_v44, 0  ;;  %v491_v20 = vsel %vm4367_vm3, %v3051_v33, %v3046_v30  ;;  %v938_v50 = vunpack.c.l.b16 %v931_v18  ;;  %vm584_vm12 = vmpackc.low %vm3293_vm8, %vm3288_vm5  ;;  %v1639_v42 = vand.u32 17, %v2891_v3 }
  0xa5   : > { %v1081_v57 = vpop.permute.xlu0 %1080  ;;  %v854_v0 = vunpack.c.l.b16 %v847_v63  ;;  %v492_v26 = vunpack.c.l.b16 %v491_v20  ;;  %v493_v31 = vunpack.c.h.b16 %v491_v20  ;;  %v374_v27 = vunpack.c.l.b16 %v3203_v48 }
  0xa6   : > { %v1082_v59 = vrot.slane %v1081_v57, 4  ;;  %v941_v33 = vpack.c.b16 %v938_v50, %v938_v50  ;;  %v664_v45 = vunpack.c.l.b16 %v663_v39  ;;  %v665_v43 = vunpack.c.h.b16 %v663_v39 }
  0xa7   : > { %v857_v14 = vpack.c.b16 %v854_v0, %v854_v0  ;;  %vm3303_vm9 = vcmp.ne.s32.totalorder %v492_v26, %v3054_v35  ;;  %vm3308_vm11 = vcmp.ne.s32.totalorder %v493_v31, %v3057_v36  ;;  %v3324_v49 = vsel %vm584_vm12, %v3177_v32, 0 }
  0xa8   : > { %v3254_v1 = vsel %vm4355_vm7, %v1082_v59, %v1081_v57  ;;  %v1092_v4 = vunpack.c.l.b16 %v1082_v59  ;;  %v1093_v5 = vunpack.c.h.b16 %v1082_v59  ;;  %382 = vrot.lane.b32.xlu1 %v378_v6, %s2816_s23  ;;  %vm498_vm14 = vmpackc.low %vm3308_vm11, %vm3303_vm9  ;;  %v429_v52 = vunpack.c.h.b16 %v337_v9 }
  0xa9   : > { %694 = vrot.lane.b32.xlu0 %v689_v8, %s2812_s18  ;;  %862 = vrot.lane.b32.xlu2 %v857_v14, %s2810_s16  ;;  %vm1640_vm15 = vcmp.eq.s32.totalorder %v1639_v42, 17  ;;  %v377_v53 = vpack.c.b16 %v374_v27, %v374_v27  ;;  %v506_v55 = vsel %vm498_vm14, %v3177_v32, 0  ;;  %v599_v56 = vunpack.c.h.b16 %v3324_v49 }
  0xaa   : > { %vm3263_vm0 = vcmp.ne.s32.totalorder %v1092_v4, %v3054_v35  ;;  %vm3268_vm1 = vcmp.ne.s32.totalorder %v1093_v5, %v3057_v36  ;;  %v1641_v57 = vsel %vm1640_vm15, 1, %v2809_v2  ;;  %v1723_v58 = vand.u32 81, %v2891_v3 }
  0xab   : > { %vm1098_vm4 = vmpackc.low %vm3268_vm1, %vm3263_vm0  ;;  %vm3328_vm0 = vcmp.ne.s32.totalorder %v664_v45, %v3054_v35  ;;  %vm3333_vm1 = vcmp.ne.s32.totalorder %v665_v43, %v3057_v36  ;;  %v432_v59 = vpack.c.b16 %v429_v52, %v429_v52  ;;  %vm4364_vm8 = vcmask 580608  }
  0xac   : > { %v1100_v25 = vsel %vm1098_vm4, %v3073_v44, 0  ;;  %vm1556_vm4 = vcmp.eq.s32.totalorder %v1555_v51, 49  ;;  %vm670_vm5 = vmpackc.low %vm3333_vm1, %vm3328_vm0  ;;  %v513_v60 = vunpack.c.h.b16 %v506_v55  ;;  %v602_v61 = vpack.c.b16 %v599_v56, %v599_v56 }
  0xad   : > { %v1107_v38 = vunpack.c.l.b16 %v1100_v25  ;;  %v1642_v63 = vperm.slane %v1641_v57, 0  ;;  %v1643_v0 = vperm.slane %v1641_v57, 1  ;;  %v1557_v4 = vsel %vm1556_vm4, 1, %v2809_v2  ;;  %v3446_v51 = vpop.permute.xlu0 %1338 }
  0xae   : > { %vm1724_vm9 = vcmp.eq.s32.totalorder %v1723_v58, 81  ;;  %vm4365_vm11 = vcmask 531456   ;;  %v512_v5 = vunpack.c.l.b16 %v506_v55  ;;  %v3350_v6 = vsel %vm670_vm5, %v3177_v32, 0 }
  0xaf   : > { %v1110_v46 = vpack.c.b16 %v1107_v38, %v1107_v38  ;;  %v831_v7 = vsel %vm4364_vm8, %v3161_v21, %v3149_v17  ;;  %v516_v8 = vpack.c.b16 %v513_v60, %v513_v60  ;;  %v1558_v9 = vperm.slane %v1557_v4, 0 }
  0xb0   : > { %434 = vrot.lane.b32.xlu1 %v431_v34, %s2818_s25  ;;  %v1559_v11 = vperm.slane %v1557_v4, 1  ;;  %vm3356_vm12 = vcmp.eq.s32.totalorder %v1642_v63, 1  ;;  %vm3360_vm14 = vcmp.eq.s32.totalorder %v1643_v0, 1  ;;  %v1725_v14 = vsel %vm1724_vm9, 1, %v2809_v2 }
  0xb1   : > { %1030 = vrot.lane.b32.xlu0 %v1025_v24, %s2814_s20  ;;  %946 = vrot.lane.b32.xlu2 %v941_v33, %s2811_s17  ;;  %v747_v16 = vsel %vm4365_vm11, %v3044_v29, %v3041_v28  ;;  %v832_v17 = vunpack.c.l.b16 %v831_v7  ;;  %v833_v21 = vunpack.c.h.b16 %v831_v7  ;;  %v515_v18 = vpack.c.b16 %v512_v5, %v512_v5  ;;  %vm1646_vm15 = vmpackc.low %vm3360_vm14, %vm3356_vm12  ;;  %v3409_v33 = vpop.permute.xlu2 %1252 }
  0xb2   : > { %v684_v19 = vunpack.c.l.b16 %v3350_v6  ;;  %vm3374_vm0 = vcmp.eq.s32.totalorder %v1558_v9, 1  ;;  %vm3378_vm1 = vcmp.eq.s32.totalorder %v1559_v11, 1  ;;  %v1726_v28 = vperm.slane %v1725_v14, 0 }
  0xb3   : > { %v1727_v29 = vperm.slane %v1725_v14, 1  ;;  %v748_v47 = vunpack.c.l.b16 %v747_v16  ;;  %v749_v50 = vunpack.c.h.b16 %v747_v16  ;;  %vm4363_vm4 = vcmask 588800   ;;  %vm1562_vm12 = vmpackc.low %vm3378_vm1, %vm3374_vm0 }
  0xb4   : > { %vm3384_vm5 = vcmp.ne.s32.totalorder %v832_v17, %v3054_v35  ;;  %vm3389_vm9 = vcmp.ne.s32.totalorder %v833_v21, %v3057_v36  ;;  %v1647_v26 = vsel %vm1646_vm15, 65537, %v2809_v2  ;;  %v687_v31 = vpack.c.b16 %v684_v19, %v684_v19 }
  0xb5   : > { %v915_v34 = vsel %vm4363_vm4, %v3169_v23, %v3147_v15  ;;  %vm3401_vm14 = vcmp.eq.s32.totalorder %v1726_v28, 1  ;;  %vm3405_vm7 = vcmp.eq.s32.totalorder %v1727_v29, 1  ;;  %vm3412_vm15 = vcmp.ne.s32.totalorder %v748_v47, %v3054_v35  ;;  %v3422_v15 = vpop.permute.xlu1 %1166  ;;  %vm838_vm1 = vmpackc.low %vm3389_vm9, %vm3384_vm5 }
  0xb6   : > { %vm3417_vm0 = vcmp.ne.s32.totalorder %v749_v50, %v3057_v36  ;;  %v1563_v23 = vsel %vm1562_vm12, 65537, %v2809_v2  ;;  %v916_v40 = vunpack.c.l.b16 %v915_v34  ;;  %v917_v41 = vunpack.c.h.b16 %v915_v34  ;;  %vm1730_vm10 = vmpackc.low %vm3405_vm7, %vm3401_vm14 }
  0xb7   : > { %v3435_v42 = vrot.slane %v3409_v33, 4  ;;  %vm754_vm13 = vmpackc.low %vm3417_vm0, %vm3412_vm15  ;;  %v598_v27 = vunpack.c.l.b16 %v3324_v49  ;;  %v1168_v45 = vrot.slane %v3422_v15, 4  ;;  %v1731_v52 = vsel %vm1730_vm10, 65537, %v2809_v2 }
  0xb8   : > { %1115 = vrot.lane.b32.xlu1 %v1110_v46, %s2824_s7  ;;  %v3455_v49 = vsel %vm838_vm1, %v3177_v32, 0  ;;  %vm3458_vm7 = vcmp.ne.s32.totalorder %v916_v40, %v3054_v35  ;;  %vm3463_vm12 = vcmp.ne.s32.totalorder %v917_v41, %v3057_v36  ;;  %v685_v54 = vunpack.c.h.b16 %v3350_v6 }
  0xb9   : > { %380 = vrot.lane.b32.xlu0 %v377_v53, %s2816_s23  ;;  %436 = vrot.lane.b32.xlu2 %v432_v59, %s2818_s25  ;;  %v1264_v43 = vunpack.c.l.b16 %v3435_v42  ;;  %v1265_v46 = vunpack.c.h.b16 %v3435_v42  ;;  %v762_v55 = vsel %vm754_vm13, %v3177_v32, 0  ;;  %v601_v56 = vpack.c.b16 %v598_v27, %v598_v27  ;;  %vm922_vm13 = vmpackc.low %vm3463_vm12, %vm3458_vm7 }
  0xba   : > { %v1178_v57 = vunpack.c.l.b16 %v1168_v45  ;;  %v1179_v58 = vunpack.c.h.b16 %v1168_v45  ;;  %v3470_v59 = vrot.slane %v3446_v51, 4  ;;  %v853_v60 = vunpack.c.h.b16 %v3455_v49 }
  0xbb   : > { %vm3475_vm10 = vcmp.ne.s32.totalorder %v1264_v43, %v3054_v35  ;;  %vm3480_vm5 = vcmp.ne.s32.totalorder %v1265_v46, %v3057_v36  ;;  %v688_v0 = vpack.c.b16 %v685_v54, %v685_v54  ;;  %v769_v4 = vunpack.c.h.b16 %v762_v55  ;;  %v3685_v43 = vld [vmem:[#allocation2 + $0x4] sm:$0xff] }
  0xbc   : > { %v1350_v5 = vunpack.c.l.b16 %v3470_v59  ;;  %v1351_v6 = vunpack.c.h.b16 %v3470_v59  ;;  %vm1270_vm9 = vmpackc.low %vm3480_vm5, %vm3475_vm10  ;;  %vm3496_vm14 = vcmp.ne.s32.totalorder %v1178_v57, %v3054_v35  ;;  %vm3501_vm15 = vcmp.ne.s32.totalorder %v1179_v58, %v3057_v36 }
  0xbd   : > { %v856_v9 = vpack.c.b16 %v853_v60, %v853_v60  ;;  %vm4361_vm0 = vcmask 596992   ;;  %v3507_v11 = vsel %vm922_vm13, %v3177_v32, 0  ;;  %v1807_v12 = vand.u32 45, %v2891_v3  ;;  %vm1184_vm1 = vmpackc.low %vm3501_vm15, %vm3496_vm14  ;;  %v1481_v7 = vpop.permute.xlu1 %1480 }
  0xbe   : > { %v768_v13 = vunpack.c.l.b16 %v762_v55  ;;  %v1272_v14 = vsel %vm1270_vm9, %v3073_v44, 0  ;;  %v772_v16 = vpack.c.b16 %v769_v4, %v769_v4  ;;  %vm3516_vm7 = vcmp.ne.s32.totalorder %v1350_v5, %v3054_v35 }
  0xbf   : > { %vm3521_vm12 = vcmp.ne.s32.totalorder %v1351_v6, %v3057_v36  ;;  %v937_v19 = vunpack.c.h.b16 %v3507_v11  ;;  %v1279_v20 = vunpack.c.l.b16 %v1272_v14  ;;  %v1186_v22 = vsel %vm1184_vm1, %v3073_v44, 0 }
  0xc0   : > { %606 = vrot.lane.b32.xlu1 %v602_v61, %s2815_s22  ;;  %vm1808_vm10 = vcmp.eq.s32.totalorder %v1807_v12, 45  ;;  %v771_v28 = vpack.c.b16 %v768_v13, %v768_v13  ;;  %vm1356_vm5 = vmpackc.low %vm3521_vm12, %vm3516_vm7  ;;  %vm4358_vm13 = vcmask 982016   ;;  %v1085_v41 = vunpack.c.l.b16 %v3254_v1 }
  0xc1   : > { %520 = vrot.lane.b32.xlu0 %v516_v8, %s2817_s24  ;;  %518 = vrot.lane.b32.xlu2 %v515_v18, %s2817_s24  ;;  %v999_v18 = vsel %vm4361_vm0, %v3129_v10, %v3107_v62  ;;  %v1193_v62 = vunpack.c.l.b16 %v1186_v22  ;;  %v940_v10 = vpack.c.b16 %v937_v19, %v937_v19  ;;  %v1809_v50 = vsel %vm1808_vm10, 1, %v2809_v2  ;;  %v2685_v19 = vld [vmem:[%s4348_s0 + $0x2] sm:$0x3] }
  0xc2   : > { %v1000_v29 = vunpack.c.l.b16 %v999_v18  ;;  %v1001_v47 = vunpack.c.h.b16 %v999_v18  ;;  %v1282_v24 = vpack.c.b16 %v1279_v20, %v1279_v20  ;;  %v1358_v25 = vsel %vm1356_vm5, %v3073_v44, 0  ;;  %v3642_v20 = vld [vmem:[%s2876_s8] sm:$0x3] }
  0xc3   : > { %v1811_v34 = vperm.slane %v1809_v50, 1  ;;  %v1196_v38 = vpack.c.b16 %v1193_v62, %v1193_v62  ;;  %v1365_v39 = vunpack.c.l.b16 %v1358_v25  ;;  %v1086_v27 = vunpack.c.h.b16 %v3254_v1 }
  0xc4   : > { %vm3542_vm9 = vcmp.ne.s32.totalorder %v1000_v29, %v3054_v35  ;;  %vm3547_vm14 = vcmp.ne.s32.totalorder %v1001_v47, %v3057_v36  ;;  %vm4359_vm10 = vcmask 990208   ;;  %v936_v55 = vunpack.c.l.b16 %v3507_v11 }
  0xc5   : > { %vm1006_vm15 = vmpackc.low %vm3547_vm14, %vm3542_vm9  ;;  %vm1813_vm7 = vcmp.eq.s32.totalorder %v1811_v34, 1  ;;  %v1368_v40 = vpack.c.b16 %v1365_v39, %v1365_v39  ;;  %vm3576_vm14 = vcmp.ne.s32.totalorder %v1085_v41, %v3054_v35  ;;  %v1256_v48 = vsel %vm4359_vm10, %v3435_v42, %v3409_v33 }
  0xc6   : > { %v1258_v57 = vunpack.c.h.b16 %v1256_v48  ;;  %v939_v60 = vpack.c.b16 %v936_v55, %v936_v55  ;;  %v1975_v14 = vand.u32 77, %v2891_v3  ;;  %v1891_v22 = vand.u32 13, %v3642_v20 }
  0xc8   : > { %690 = vrot.lane.b32.xlu1 %v687_v31, %s2812_s18  ;;  %v1810_v31 = vperm.slane %v1809_v50, 0 }
  0xc9   : > { %1648 = vrot.lane.b32.xlu0 %v1647_v26, %s2825_s9  ;;  %1564 = vrot.lane.b32.xlu2 %v1563_v23, %s2826_s10  ;;  %v1170_v26 = vsel %vm4358_vm13, %v1168_v45, %v3422_v15  ;;  %v852_v23 = vunpack.c.l.b16 %v3455_v49  ;;  %v1014_v45 = vsel %vm1006_vm15, %v3177_v32, 0  ;;  %vm3581_vm15 = vcmp.ne.s32.totalorder %v1086_v27, %v3057_v36 }
  0xca   : > { %v1171_v44 = vunpack.c.l.b16 %v1170_v26  ;;  %v1172_v15 = vunpack.c.h.b16 %v1170_v26  ;;  %vm1812_vm1 = vcmp.eq.s32.totalorder %v1810_v31, 1  ;;  %v1020_v54 = vunpack.c.l.b16 %v1014_v45 }
  0xcb   : > { %vm1814_vm12 = vmpackc.low %vm1813_vm7, %vm1812_vm1  ;;  %v1021_v33 = vunpack.c.h.b16 %v1014_v45 }
  0xcc   : > { %vm3563_vm5 = vcmp.ne.s32.totalorder %v1171_v44, %v3054_v35  ;;  %vm3568_vm9 = vcmp.ne.s32.totalorder %v1172_v15, %v3057_v36  ;;  %v1815_v49 = vsel %vm1814_vm12, 65537, %v2809_v2  ;;  %vm1091_vm7 = vmpackc.low %vm3581_vm15, %vm3576_vm14  ;;  %v1023_v42 = vpack.c.b16 %v1020_v54, %v1020_v54 }
  0xcd   : > { %vm1177_vm1 = vmpackc.low %vm3568_vm9, %vm3563_vm5  ;;  %vm4360_vm12 = vcmask 1039360   ;;  %v1099_v61 = vsel %vm1091_vm7, %v3177_v32, 0  ;;  %vm3607_vm9 = vcmp.ne.s32.totalorder %v1258_v57, %v3057_v36  ;;  %v1024_v6 = vpack.c.b16 %v1021_v33, %v1021_v33  ;;  %v3703_v57 = vld [vmem:[#allocation2 + $0xc] sm:$0xf] }
  0xce   : > { %v1185_v58 = vsel %vm1177_vm1, %v3177_v32, 0  ;;  %v1342_v5 = vsel %vm4360_vm12, %v3470_v59, %v3446_v51  ;;  %v1106_v8 = vunpack.c.h.b16 %v1099_v61  ;;  %vm4362_vm15 = vcmask 7168  }
  0xcf   : > { %v1192_v63 = vunpack.c.h.b16 %v1185_v58  ;;  %v1343_v12 = vunpack.c.l.b16 %v1342_v5  ;;  %v1344_v13 = vunpack.c.h.b16 %v1342_v5  ;;  %v1105_v59 = vunpack.c.l.b16 %v1099_v61 }
  0xd0   : > { %1732 = vrot.lane.b32.xlu1 %v1731_v52, %s2824_s7  ;;  %v855_v52 = vpack.c.b16 %v852_v23, %v852_v23  ;;  %vm1976_vm1 = vcmp.eq.s32.totalorder %v1975_v14, 77  ;;  %v2059_v5 = vand.u32 37, %v3642_v20 }
  0xd1   : > { %604 = vrot.lane.b32.xlu0 %v601_v56, %s2815_s22  ;;  %692 = vrot.lane.b32.xlu2 %v688_v0, %s2812_s18  ;;  %v1257_v56 = vunpack.c.l.b16 %v1256_v48  ;;  %v1195_v11 = vpack.c.b16 %v1192_v63, %v1192_v63  ;;  %v1977_v18 = vsel %vm1976_vm1, 1, %v2809_v2  ;;  %vm3631_vm7 = vcmp.ne.s32.totalorder %v1343_v12, %v3054_v35 }
  0xd2   : > { %v1978_v50 = vperm.slane %v1977_v18, 0 }
  0xd3   : > { %vm3602_vm5 = vcmp.ne.s32.totalorder %v1257_v56, %v3054_v35 }
  0xd4   : > { %vm1263_vm14 = vmpackc.low %vm3607_vm9, %vm3602_vm5  ;;  %vm3636_vm5 = vcmp.ne.s32.totalorder %v1344_v13, %v3057_v36  ;;  %vm3662_vm10 = vcmp.eq.s32.totalorder %v1978_v50, 1 }
  0xd5   : > { %v1271_v17 = vsel %vm1263_vm14, %v3177_v32, 0  ;;  %vm1349_vm9 = vmpackc.low %vm3636_vm5, %vm3631_vm7  ;;  %vm1892_vm14 = vcmp.eq.s32.totalorder %v1891_v22, 13 }
  0xd6   : > { %v1277_v29 = vunpack.c.l.b16 %v1271_v17  ;;  %v1278_v26 = vunpack.c.h.b16 %v1271_v17  ;;  %v1357_v44 = vsel %vm1349_vm9, %v3177_v32, 0  ;;  %v1893_v15 = vsel %vm1892_vm14, 1, %v2809_v2 }
  0xd7   : > { %v1894_v41 = vperm.slane %v1893_v15, 0  ;;  %v1895_v27 = vperm.slane %v1893_v15, 1  ;;  %v1363_v1 = vunpack.c.l.b16 %v1357_v44 }
  0xd8   : > { %860 = vrot.lane.b32.xlu1 %v856_v9, %s2810_s16  ;;  %v3615_v9 = vrot.slane %v1481_v7, 4  ;;  %v1280_v31 = vpack.c.b16 %v1277_v29, %v1277_v29  ;;  %v1281_v23 = vpack.c.b16 %v1278_v26, %v1278_v26 }
  0xd9   : > { %776 = vrot.lane.b32.xlu0 %v772_v16, %s2813_s19  ;;  %774 = vrot.lane.b32.xlu2 %v771_v28, %s2813_s19  ;;  %v1109_v16 = vpack.c.b16 %v1106_v8, %v1106_v8  ;;  %v1108_v28 = vpack.c.b16 %v1105_v59, %v1105_v59  ;;  %v1366_v55 = vpack.c.b16 %v1363_v1, %v1363_v1 }
  0xda   : > { %v1483_v21 = vsel %vm4362_vm15, %v3615_v9, %v1481_v7  ;;  %v1491_v32 = vunpack.c.l.b16 %v3615_v9  ;;  %v1492_v45 = vunpack.c.h.b16 %v3615_v9 }
  0xdb   : > { %v1484_v47 = vunpack.c.l.b16 %v1483_v21  ;;  %v1485_v62 = vunpack.c.h.b16 %v1483_v21 }
  0xdc   : > { %vm1495_vm9 = vcmp.ne.s32.totalorder %v1491_v32, %v3054_v35  ;;  %vm1496_vm14 = vcmp.ne.s32.totalorder %v1492_v45, %v3057_v36 }
  0xdd   : > { %vm3653_vm1 = vcmp.ne.s32.totalorder %v1484_v47, %v3054_v35  ;;  %vm3658_vm13 = vcmp.ne.s32.totalorder %v1485_v62, %v3057_v36  ;;  %v2143_v62 = vand.u32 5, %v3642_v20 }
  0xde   : > { %vm1490_vm5 = vmpackc.low %vm3658_vm13, %vm3653_vm1  ;;  %vm3691_vm13 = vcmp.eq.s32.totalorder %v1894_v41, 1 }
  0xdf   : > { %vm1497_vm1 = vmpackc.low %vm1496_vm14, %vm1495_vm9  ;;  %vm389_vm14 = vcmask 64512  }
  0xe0   : > { %944 = vrot.lane.b32.xlu1 %v940_v10, %s2811_s17  ;;  %v1191_v10 = vunpack.c.l.b16 %v1185_v58 }
  0xe1   : > { %1287 = vrot.lane.b32.xlu0 %v1282_v24, %s2826_s10  ;;  %1201 = vrot.lane.b32.xlu2 %v1196_v38, %s2825_s9  ;;  %v1979_v24 = vperm.slane %v1977_v18, 1 }
  0xe2   : > { %v1194_v30 = vpack.c.b16 %v1191_v10, %v1191_v10 }
  0xe3   : > { %vm3666_vm7 = vcmp.eq.s32.totalorder %v1979_v24, 1 }
  0xe4   : > { %vm1982_vm12 = vmpackc.low %vm3666_vm7, %vm3662_vm10  ;;  %vm1897_vm10 = vcmp.eq.s32.totalorder %v1895_v27, 1  ;;  %vm2060_vm7 = vcmp.eq.s32.totalorder %v2059_v5, 37 }
  0xe5   : > { %v1983_v46 = vsel %vm1982_vm12, 65537, %v2809_v2  ;;  %vm1898_vm12 = vmpackc.low %vm1897_vm10, %vm3691_vm13  ;;  %v2061_v8 = vsel %vm2060_vm7, 1, %v2809_v2 }
  0xe6   : > { %v2063_v12 = vperm.slane %v2061_v8, 1 }
  0xe8   : > { %1373 = vrot.lane.b32.xlu1 %v1368_v40, %s2823_s30  ;;  %v1364_v40 = vunpack.c.h.b16 %v1357_v44  ;;  %vm2065_vm10 = vcmp.eq.s32.totalorder %v2063_v12, 1 }
  0xe9   : > { %858 = vrot.lane.b32.xlu0 %v855_v52, %s2810_s16  ;;  %1816 = vrot.lane.b32.xlu2 %v1815_v49, %s2814_s20  ;;  %v1498_v52 = vsel %vm1490_vm5, %v3685_v43, 0  ;;  %vm393_vm5 = vcmask 1043456  }
  0xea   : > { %v1367_v53 = vpack.c.b16 %v1364_v40, %v1364_v40  ;;  %v1504_v54 = vunpack.c.l.b16 %v1498_v52  ;;  %v1505_v61 = vunpack.c.h.b16 %v1498_v52 }
  0xec   : > { %v1507_v58 = vpack.c.b16 %v1504_v54, %v1504_v54  ;;  %v1508_v0 = vpack.c.b16 %v1505_v61, %v1505_v61 }
  0xf0   : > { %1026 = vrot.lane.b32.xlu1 %v1023_v42, %s2814_s20  ;;  %v1899_v42 = vsel %vm1898_vm12, 65537, %v2809_v2  ;;  %vm1289_vm12 = vcmask 56320  }
  0xf1   : > { %942 = vrot.lane.b32.xlu0 %v939_v60, %s2811_s17  ;;  %1028 = vrot.lane.b32.xlu2 %v1024_v6, %s2814_s20  ;;  %v1499_v60 = vsel %vm1497_vm1, %v3703_v57, 0  ;;  %vm2144_vm1 = vcmp.eq.s32.totalorder %v2143_v62, 5 }
  0xf2   : > { %v1506_v63 = vunpack.c.l.b16 %v1499_v60  ;;  %v2145_v39 = vsel %vm2144_vm1, 1, %v2809_v2 }
  0xf3   : > { %v3623_v51 = vpop.permute.xlu2 %384  ;;  %v2146_v27 = vperm.slane %v2145_v39, 0  ;;  %v2147_v32 = vperm.slane %v2145_v39, 1 }
  0xf4   : > { %v1509_v7 = vpack.c.b16 %v1506_v63, %v1506_v63  ;;  %v2227_v63 = vand.u32 69, %v3642_v20 }
  0xf5   : > { %vm3752_vm1 = vcmp.eq.s32.totalorder %v2146_v27, 1 }
  0xf8   : > { %1199 = vrot.lane.b32.xlu1 %v1195_v11, %s2825_s9  ;;  %v2062_v11 = vperm.slane %v2061_v8, 0 }
  0xf9   : > { %1113 = vrot.lane.b32.xlu0 %v1109_v16, %s2824_s7  ;;  %1111 = vrot.lane.b32.xlu2 %v1108_v28, %s2824_s7  ;;  %v339_v28 = vld [vmem:[%s4348_s0] sm:$0x3] }
  0xfa   : > { %vm2064_vm13 = vcmp.eq.s32.totalorder %v2062_v11, 1  ;;  %v2690_v11 = vld [vmem:[%s4348_s0 + $0x4] sm:$0x3] }
  0xfb   : > { %v3650_v25 = vpop.permute.xlu2 %608  ;;  %vm2066_vm9 = vmpackc.low %vm2065_vm10, %vm2064_vm13 }
  0xfc   : > { %v2067_v16 = vsel %vm2066_vm9, 65537, %v2809_v2 }
 0x100   : > { %1283 = vrot.lane.b32.xlu1 %v1280_v31, %s2826_s10 }
 0x101   : > { %1197 = vrot.lane.b32.xlu0 %v1194_v30, %s2825_s9  ;;  %1285 = vrot.lane.b32.xlu2 %v1281_v23, %s2826_s10 }
 0x103   : > { %v3689_v49 = vpop.permute.xlu2 %862 }
 0x108   : > { %1984 = vrot.lane.b32.xlu1 %v1983_v46, %s2810_s16 }
 0x109   : > { %1371 = vrot.lane.b32.xlu0 %v1367_v53, %s2823_s30  ;;  %1369 = vrot.lane.b32.xlu2 %v1366_v55, %s2823_s30 }
 0x10a   : > { %v3699_v56 = vpop.permute.xlu1 %522 }
 0x10b   : > { %v3706_v33 = vpop.permute.xlu2 %946 }
 0x110   : > { %1510 = vrot.lane.b32.xlu1 %v1507_v58, %s2822_s29 }
 0x111   : > { %1900 = vrot.lane.b32.xlu0 %v1899_v42, %s2811_s17  ;;  %1512 = vrot.lane.b32.xlu2 %v1508_v0, %s2822_s29 }
 0x112   : > { %v3712_v4 = vpop.permute.xlu1 %778 }
 0x113   : > { %v439_v6 = vpop.permute.xlu0 %438  ;;  %v437_v9 = vpop.permute.xlu2 %436 }
 0x114   : > { %v442_v13 = vsel %vm4361_vm0, %v437_v9, %v439_v6 }
 0x115   : > { %v450_v14 = vsel %vm393_vm5, %v442_v13, 0 }
 0x116   : > { %472 = vmatpush.bf16.msra.mxu3 %v450_v14 }
 0x119   : > { %1514 = vrot.lane.b32.xlu0 %v1509_v7, %s2822_s29  ;;  %2068 = vrot.lane.b32.xlu2 %v2067_v16, %s2813_s19 }
 0x11a   : > { %v383_v59 = vpop.permute.xlu1 %382  ;;  %2689 = vmatmul.msk.bf16.vlgmr.msra.gmra.mxu3 %vm389_vm14, %v339_v28 }
 0x11b   : > { %v695_v17 = vpop.permute.xlu0 %694  ;;  %v388_v21 = vsel %vm4363_vm4, %v383_v59, %v3623_v51  ;;  %v519_v3 = vpop.permute.xlu2 %518 }
 0x11c   : > { %v398_v18 = vsel %vm393_vm5, %v388_v21, 0 }
 0x11d   : > { %420 = vmatpush.bf16.msra.mxu1 %v398_v18 }
 0x120   : > { %2687 = vmatmul.msk.bf16.vlgmr.msra.gmra.mxu1 %vm389_vm14, %v2685_v19 }
 0x122   : > { %v435_v22 = vpop.permute.xlu1 %434 }
 0x123   : > { %v3732_v29 = vpop.permute.xlu0 %1030  ;;  %v441_v51 = vsel %vm4361_vm0, %v435_v22, %v437_v9  ;;  %v1565_v10 = vpop.permute.xlu2 %1564 }
 0x124   : > { %v447_v47 = vsel %vm393_vm5, %v441_v51, 0  ;;  %v1566_v50 = vrot.slane %v1565_v10, 4 }
 0x125   : > { %459 = vmatpush.bf16.msra.mxu2 %v447_v47 }
 0x126   : > { %v1567_v24 = vsel %vm1289_vm12, %v1566_v50, %v1565_v10  ;;  %v1575_v26 = vunpack.c.l.b16 %v1566_v50  ;;  %v1576_v31 = vunpack.c.h.b16 %v1566_v50 }
 0x127   : > { %v1568_v34 = vunpack.c.l.b16 %v1567_v24  ;;  %v1569_v37 = vunpack.c.h.b16 %v1567_v24 }
 0x128   : > { %2688 = vmatmul.msk.bf16.vlgmr.msra.gmra.mxu2 %vm389_vm14, %v339_v28  ;;  %vm1579_vm7 = vcmp.ne.s32.totalorder %v1575_v26, %v3054_v35  ;;  %vm1580_vm13 = vcmp.ne.s32.totalorder %v1576_v31, %v3057_v36 }
 0x129   : > { %vm1572_vm10 = vcmp.ne.s32.totalorder %v1568_v34, %v3054_v35  ;;  %vm1573_vm9 = vcmp.ne.s32.totalorder %v1569_v37, %v3057_v36  ;;  %vm1581_vm0 = vmpackc.low %vm1580_vm13, %vm1579_vm7  ;;  %vm2228_vm7 = vcmp.eq.s32.totalorder %v2227_v63, 69 }
 0x12a   : > { %v3740_v30 = vpop.permute.xlu1 %1115  ;;  %vm1574_vm15 = vmpackc.low %vm1573_vm9, %vm1572_vm10  ;;  %v1583_v23 = vsel %vm1581_vm0, %v3703_v57, 0  ;;  %vm3756_vm0 = vcmp.eq.s32.totalorder %v2147_v32, 1  ;;  %v2229_v14 = vsel %vm2228_vm7, 1, %v2809_v2  ;;  %vm1117_vm7 = vcmask 72704  }
 0x12b   : > { %v381_v38 = vpop.permute.xlu0 %380  ;;  %v693_v40 = vpop.permute.xlu2 %692  ;;  %v1582_v41 = vsel %vm1574_vm15, %v3685_v43, 0  ;;  %v1590_v45 = vunpack.c.l.b16 %v1583_v23  ;;  %vm2150_vm15 = vmpackc.low %vm3756_vm0, %vm3752_vm1  ;;  %v2230_v18 = vperm.slane %v2229_v14, 0  ;;  %v2231_v51 = vperm.slane %v2229_v14, 1 }
 0x12c   : > { %v387_v44 = vsel %vm4363_vm4, %v381_v38, %v383_v59  ;;  %v1589_v46 = vunpack.c.h.b16 %v1582_v41  ;;  %v1588_v52 = vunpack.c.l.b16 %v1582_v41  ;;  %v697_v42 = vsel %vm662_vm6, %v693_v40, %v695_v17 }
 0x12d   : > { %v395_v15 = vsel %vm393_vm5, %v387_v44, 0  ;;  %v1593_v1 = vpack.c.b16 %v1590_v45, %v1590_v45  ;;  %v705_v9 = vsel %vm393_vm5, %v697_v42, 0  ;;  %v2151_v12 = vsel %vm2150_vm15, 65537, %v2809_v2 }
 0x12e   : > { %407 = vmatpush.bf16.msra.mxu0 %v395_v15  ;;  %v1592_v53 = vpack.c.b16 %v1589_v46, %v1589_v46  ;;  %v1591_v48 = vpack.c.b16 %v1588_v52, %v1588_v52  ;;  %vm3805_vm4 = vcmp.eq.s32.totalorder %v2230_v18, 1 }
 0x12f   : > { %1598 = vrot.lane.b32.xlu1 %v1593_v1, %s2821_s28 }
 0x130   : > { %1596 = vrot.lane.b32.xlu0 %v1592_v53, %s2821_s28  ;;  %1594 = vrot.lane.b32.xlu2 %v1591_v48, %s2821_s28  ;;  %v2696_v53 = vld [vmem:[%s4348_s0 + $0x8] sm:$0x3] }
 0x131   : > { %2686 = vmatmul.msk.bf16.vlgmr.msra.gmra.mxu0 %vm389_vm14, %v2685_v19 }
 0x132   : > { %v607_v54 = vpop.permute.xlu1 %606 }
 0x133   : > { %v521_v60 = vpop.permute.xlu0 %520  ;;  %v612_v61 = vsel %vm4365_vm11, %v607_v54, %v3650_v25  ;;  %v3780_v25 = vld [vmem:[%s4348_s0 + $0x6] sm:$0x3] }
 0x134   : > { %v525_v0 = vsel %vm4364_vm8, %v519_v3, %v521_v60  ;;  %v526_v5 = vsel %vm4364_vm8, %v521_v60, %v3699_v56  ;;  %v620_v6 = vsel %vm393_vm5, %v612_v61, 0  ;;  %v3783_v56 = vpop.permute.xlu2 %774  ;;  %vm3809_vm8 = vcmp.eq.s32.totalorder %v2231_v51, 1  ;;  %v2699_v51 = vld [vmem:[%s4348_s0 + $0xa] sm:$0x3] }
 0x135   : > { %v531_v7 = vsel %vm393_vm5, %v525_v0, 0  ;;  %v534_v8 = vsel %vm393_vm5, %v526_v5, 0  ;;  %642 = vmatpush.bf16.msrb.mxu3 %v620_v6  ;;  %v2395_v0 = vand.u32 21, %v3642_v20 }
 0x136   : > { %543 = vmatpush.bf16.msrb.mxu0 %v531_v7  ;;  %556 = vmatpush.bf16.msrb.mxu1 %v534_v8 }
 0x138   : > { %2695 = vmatmul.msk.bf16.vlgmr.msrb.gmra.mxu3 %vm389_vm14, %v3780_v25  ;;  %2152 = vrot.lane.b32.xlu0 %v2151_v12, %s2812_s18 }
 0x139   : > { %2692 = vmatmul.msk.bf16.vlgmr.msrb.gmra.mxu1 %vm389_vm14, %v2690_v11 }
 0x13a   : > { %727 = vmatpush.bf16.msra.mxu1 %v705_v9  ;;  %v691_v13 = vpop.permute.xlu1 %690 }
 0x13b   : > { %v696_v59 = vsel %vm662_vm6, %v691_v13, %v693_v40  ;;  %v1649_v16 = vpop.permute.xlu0 %1648 }
 0x13c   : > { %v702_v17 = vsel %vm393_vm5, %v696_v59, 0  ;;  %v1650_v21 = vrot.slane %v1649_v16, 4  ;;  %v3796_v19 = vpop.permute.xlu2 %1201  ;;  %v2311_v59 = vand.u32 53, %v3642_v20 }
 0x13d   : > { %714 = vmatpush.bf16.msra.mxu0 %v702_v17 }
 0x13e   : > { %v1651_v3 = vsel %vm389_vm14, %v1650_v21, %v1649_v16  ;;  %v1659_v22 = vunpack.c.l.b16 %v1650_v21  ;;  %v1660_v28 = vunpack.c.h.b16 %v1650_v21 }
 0x13f   : > { %v1652_v47 = vunpack.c.l.b16 %v1651_v3  ;;  %v1653_v62 = vunpack.c.h.b16 %v1651_v3 }
 0x140   : > { %vm1663_vm13 = vcmp.ne.s32.totalorder %v1659_v22, %v3054_v35  ;;  %vm1664_vm10 = vcmp.ne.s32.totalorder %v1660_v28, %v3057_v36 }
 0x141   : > { %vm1656_vm9 = vcmp.ne.s32.totalorder %v1652_v47, %v3054_v35  ;;  %vm1657_vm1 = vcmp.ne.s32.totalorder %v1653_v62, %v3057_v36  ;;  %vm1665_vm0 = vmpackc.low %vm1664_vm10, %vm1663_vm13  ;;  %2691 = vmatmul.msk.bf16.vlgmr.msrb.gmra.mxu0 %vm389_vm14, %v2690_v11 }
 0x142   : > { %vm1658_vm15 = vmpackc.low %vm1657_vm1, %vm1656_vm9  ;;  %v1733_v10 = vpop.permute.xlu1 %1732  ;;  %v1667_v50 = vsel %vm1665_vm0, %v3703_v57, 0 }
 0x143   : > { %v1734_v31 = vrot.slane %v1733_v10, 4  ;;  %v605_v34 = vpop.permute.xlu0 %604  ;;  %v1674_v37 = vunpack.c.l.b16 %v1667_v50  ;;  %v1666_v38 = vsel %vm1658_vm15, %v3685_v43, 0  ;;  %vm2234_vm13 = vmpackc.low %vm3809_vm8, %vm3805_vm4 }
 0x144   : > { %v611_v39 = vsel %vm4365_vm11, %v605_v34, %v607_v54  ;;  %v1673_v44 = vunpack.c.h.b16 %v1666_v38  ;;  %v1672_v15 = vunpack.c.l.b16 %v1666_v38  ;;  %v1817_v32 = vpop.permute.xlu2 %1816  ;;  %v2235_v42 = vsel %vm2234_vm13, 65537, %v2809_v2 }
 0x145   : > { %v1735_v23 = vsel %vm1117_vm7, %v1734_v31, %v1733_v10  ;;  %v1743_v40 = vunpack.c.l.b16 %v1734_v31  ;;  %v1744_v41 = vunpack.c.h.b16 %v1734_v31  ;;  %v617_v27 = vsel %vm393_vm5, %v611_v39, 0 }
 0x146   : > { %v1736_v45 = vunpack.c.l.b16 %v1735_v23  ;;  %v1737_v46 = vunpack.c.h.b16 %v1735_v23  ;;  %629 = vmatpush.bf16.msrb.mxu2 %v617_v27  ;;  %v1677_v52 = vpack.c.b16 %v1674_v37, %v1674_v37  ;;  %v1676_v1 = vpack.c.b16 %v1673_v44, %v1673_v44 }
 0x147   : > { %v1818_v48 = vrot.slane %v1817_v32, 4  ;;  %v1675_v54 = vpack.c.b16 %v1672_v15, %v1672_v15  ;;  %vm1747_vm10 = vcmp.ne.s32.totalorder %v1743_v40, %v3054_v35  ;;  %vm1748_vm9 = vcmp.ne.s32.totalorder %v1744_v41, %v3057_v36 }
 0x148   : > { %vm3827_vm1 = vcmp.ne.s32.totalorder %v1736_v45, %v3054_v35  ;;  %vm3832_vm0 = vcmp.ne.s32.totalorder %v1737_v46, %v3057_v36  ;;  %1682 = vrot.lane.b32.xlu2 %v1677_v52, %s2819_s26  ;;  %1680 = vrot.lane.b32.xlu1 %v1676_v1, %s2819_s26  ;;  %vm1749_vm15 = vmpackc.low %vm1748_vm9, %vm1747_vm10  ;;  %vm4530_vm13 = vcmask 515072   ;;  %vm3870_vm9 = vcmp.eq.s32.totalorder %v2395_v0, 21  ;;  %v2702_v45 = vld [vmem:[%s4348_s0 + $0xc] sm:$0x3] }
 0x149   : > { %v1819_v60 = vsel %vm4366_vm2, %v1818_v48, %v1817_v32  ;;  %v1827_v61 = vunpack.c.l.b16 %v1818_v48  ;;  %vm1742_vm11 = vmpackc.low %vm3832_vm0, %vm3827_vm1  ;;  %1678 = vrot.lane.b32.xlu0 %v1675_v54, %s2819_s26  ;;  %2698 = vmatmul.msk.bf16.vlgmr.msra.gmra.mxu1 %vm389_vm14, %v2696_v53  ;;  %v1751_v63 = vsel %vm1749_vm15, %v3703_v57, 0  ;;  %v1828_v11 = vunpack.c.h.b16 %v1818_v48 }
 0x14a   : > { %v1820_v5 = vunpack.c.l.b16 %v1819_v60  ;;  %v1821_v6 = vunpack.c.h.b16 %v1819_v60  ;;  %v3853_v7 = vpop.permute.xlu1 %860  ;;  %v1758_v8 = vunpack.c.l.b16 %v1751_v63  ;;  %2694 = vmatmul.msk.bf16.vlgmr.msrb.gmra.mxu2 %vm389_vm14, %v3780_v25  ;;  %v1750_v9 = vsel %vm1742_vm11, %v3685_v43, 0  ;;  %vm4531_vm11 = vmmov %vm4530_vm13  ;;  %v2705_v60 = vld [vmem:[%s4348_s0 + $0xe] sm:$0x3] }
 0x14b   : > { %v865_v12 = vsel %vm4367_vm3, %v3853_v7, %v3689_v49  ;;  %v777_v13 = vpop.permute.xlu0 %776  ;;  %v1757_v14 = vunpack.c.h.b16 %v1750_v9  ;;  %vm2312_vm1 = vcmp.eq.s32.totalorder %v2311_v59, 53  ;;  %v1756_v47 = vunpack.c.l.b16 %v1750_v9 }
 0x14c   : > { %vm1824_vm8 = vcmp.ne.s32.totalorder %v1820_v5, %v3054_v35  ;;  %vm1825_vm4 = vcmp.ne.s32.totalorder %v1821_v6, %v3057_v36  ;;  %v873_v16 = vsel %vm393_vm5, %v865_v12, 0  ;;  %v780_v25 = vsel %vm4530_vm13, %v3783_v56, %v777_v13  ;;  %v3874_v3 = vpop.permute.xlu2 %1028 }
 0x14d   : > { %vm1826_vm10 = vmpackc.low %vm1825_vm4, %vm1824_vm8  ;;  %v781_v17 = vsel %vm4531_vm11, %v777_v13, %v3712_v4  ;;  %v786_v21 = vsel %vm393_vm5, %v780_v25, 0  ;;  %895 = vmatpush.bf16.msrb.mxu1 %v873_v16  ;;  %v1761_v49 = vpack.c.b16 %v1758_v8, %v1758_v8  ;;  %v1760_v56 = vpack.c.b16 %v1757_v14, %v1757_v14 }
 0x14e   : > { %v789_v22 = vsel %vm393_vm5, %v781_v17, 0  ;;  %798 = vmatpush.bf16.msra.mxu2 %v786_v21  ;;  %v3878_v28 = vsel %vm1826_vm10, %v3685_v43, 0  ;;  %v1033_v4 = vsel %vm4366_vm2, %v3874_v3, %v3732_v29  ;;  %v2313_v62 = vsel %vm2312_vm1, 1, %v2809_v2 }
 0x14f   : > { %811 = vmatpush.bf16.msra.mxu3 %v789_v22  ;;  %vm3888_vm0 = vcmp.ne.s32.totalorder %v1827_v61, %v3054_v35  ;;  %v1041_v50 = vsel %vm393_vm5, %v1033_v4, 0  ;;  %v2314_v29 = vperm.slane %v2313_v62, 0  ;;  %v2315_v24 = vperm.slane %v2313_v62, 1 }
 0x150   : > { %2236 = vrot.lane.b32.xlu1 %v2235_v42, %s2815_s22  ;;  %1764 = vrot.lane.b32.xlu2 %v1760_v56, %s2820_s27  ;;  %vm3896_vm15 = vcmp.ne.s32.totalorder %v1828_v11, %v3057_v36  ;;  %v1841_v31 = vunpack.c.h.b16 %v3878_v28  ;;  %v2397_v34 = vsel %vm3870_vm9, 1, %v2809_v2  ;;  %vm4538_vm10 = vcmask 457728   ;;  %v2708_v11 = vld [vmem:[%s4348_s0 + $0x10] sm:$0x3] }
 0x151   : > { %1063 = vmatpush.bf16.msra.mxu1 %v1041_v50  ;;  %1766 = vrot.lane.b32.xlu0 %v1761_v49, %s2820_s27  ;;  %vm2316_vm8 = vcmp.eq.s32.totalorder %v2314_v29, 1  ;;  %vm2317_vm4 = vcmp.eq.s32.totalorder %v2315_v24, 1  ;;  %vm1833_vm13 = vmpackc.low %vm3896_vm15, %vm3888_vm0  ;;  %v2398_v15 = vperm.slane %v2397_v34, 0  ;;  %v2399_v23 = vperm.slane %v2397_v34, 1  ;;  %v2711_v24 = vld [vmem:[%s4348_s0 + $0x12] sm:$0x3] }
 0x152   : > { %v945_v37 = vpop.permute.xlu1 %944  ;;  %2697 = vmatmul.msk.bf16.vlgmr.msra.gmra.mxu0 %vm389_vm14, %v2696_v53  ;;  %2701 = vmatmul.msk.bf16.vlgmr.msra.gmra.mxu3 %vm389_vm14, %v2699_v51  ;;  %vm2318_vm11 = vmpackc.low %vm2317_vm4, %vm2316_vm8  ;;  %v1759_v40 = vpack.c.b16 %v1756_v47, %v1756_v47  ;;  %v1844_v41 = vpack.c.b16 %v1841_v31, %v1841_v31  ;;  %v1835_v32 = vsel %vm1833_vm13, %v3703_v57, 0  ;;  %v1840_v63 = vunpack.c.l.b16 %v3878_v28  ;;  %v2714_v47 = vld [vmem:[%s4348_s0 + $0x14] sm:$0x3] }
 0x153   : > { %v949_v38 = vsel %vm4538_vm10, %v945_v37, %v3706_v33  ;;  %v1288_v39 = vpop.permute.xlu0 %1287  ;;  %v2319_v27 = vsel %vm2318_vm11, 65537, %v2809_v2  ;;  %vm3919_vm9 = vcmp.eq.s32.totalorder %v2398_v15, 1  ;;  %vm3923_vm1 = vcmp.eq.s32.totalorder %v2399_v23, 1  ;;  %vm4543_vm15 = vmmov %vm4538_vm10 }
 0x154   : > { %v957_v44 = vsel %vm393_vm5, %v949_v38, 0  ;;  %v1842_v52 = vunpack.c.l.b16 %v1835_v32  ;;  %vm2402_vm0 = vmpackc.low %vm3923_vm1, %vm3919_vm9  ;;  %v1112_v55 = vpop.permute.xlu2 %1111  ;;  %v1843_v8 = vpack.c.b16 %v1840_v63, %v1840_v63  ;;  %v2479_v50 = vand.u32 85, %v3642_v20 }
 0x155   : > { %979 = vmatpush.bf16.msrb.mxu3 %v957_v44  ;;  %v2403_v42 = vsel %vm2402_vm0, 65537, %v2809_v2  ;;  %vm4546_vm4 = vcmask 1039360   ;;  %vm4551_vm11 = vmmov %vm4543_vm15  ;;  %vm4552_vm9 = vcmask 515072  }
 0x156   : > { %v1845_v54 = vpack.c.b16 %v1842_v52, %v1842_v52  ;;  %vm2480_vm8 = vcmp.eq.s32.totalorder %v2479_v50, 85 }
 0x157   : > { %v2481_v15 = vsel %vm2480_vm8, 1, %v2809_v2 }
 0x158   : > { %1762 = vrot.lane.b32.xlu1 %v1759_v40, %s2820_s27  ;;  %2320 = vrot.lane.b32.xlu2 %v2319_v27, %s2817_s24  ;;  %v2482_v52 = vperm.slane %v2481_v15, 0 }
 0x159   : > { %1848 = vrot.lane.b32.xlu0 %v1844_v41, %s2818_s25  ;;  %2704 = vmatmul.msk.bf16.vlgmr.msrb.gmra.mxu1 %vm389_vm14, %v2702_v45 }
 0x15a   : > { %v3931_v1 = vpop.permute.xlu1 %1373  ;;  %2700 = vmatmul.msk.bf16.vlgmr.msra.gmra.mxu2 %vm389_vm14, %v2699_v51 }
 0x15b   : > { %v859_v53 = vpop.permute.xlu0 %858 }
 0x15c   : > { %v864_v48 = vsel %vm4367_vm3, %v859_v53, %v3853_v7  ;;  %v1286_v12 = vpop.permute.xlu2 %1285 }
 0x15d   : > { %v870_v58 = vsel %vm393_vm5, %v864_v48, 0  ;;  %v1291_v14 = vsel %vm1289_vm12, %v1286_v12, %v1288_v39 }
 0x15e   : > { %882 = vmatpush.bf16.msrb.mxu0 %v870_v58 }
 0x160   : > { %1850 = vrot.lane.b32.xlu1 %v1845_v54, %s2818_s25  ;;  %1846 = vrot.lane.b32.xlu2 %v1843_v8, %s2818_s25 }
 0x161   : > { %2404 = vrot.lane.b32.xlu0 %v2403_v42, %s2816_s23 }
 0x162   : > { %v1027_v61 = vpop.permute.xlu1 %1026  ;;  %2703 = vmatmul.msk.bf16.vlgmr.msrb.gmra.mxu0 %vm389_vm14, %v2702_v45  ;;  %2707 = vmatmul.msk.bf16.vlgmr.msrb.gmra.mxu3 %vm389_vm14, %v2705_v60 }
 0x163   : > { %v1032_v0 = vsel %vm4366_vm2, %v1027_v61, %v3874_v3  ;;  %v943_v5 = vpop.permute.xlu0 %942  ;;  %v1299_v3 = vsel %vm393_vm5, %v1291_v14, 0 }
 0x164   : > { %v1038_v6 = vsel %vm393_vm5, %v1032_v0, 0  ;;  %v948_v7 = vsel %vm4543_vm15, %v943_v5, %v945_v37  ;;  %v1370_v22 = vpop.permute.xlu2 %1369  ;;  %vm4013_vm15 = vcmp.eq.s32.totalorder %v2482_v52, 1 }
 0x165   : > { %v954_v9 = vsel %vm393_vm5, %v948_v7, 0  ;;  %1050 = vmatpush.bf16.msra.mxu0 %v1038_v6 }
 0x166   : > { %966 = vmatpush.bf16.msrb.mxu2 %v954_v9 }
 0x169   : > { %2710 = vmatmul.msk.bf16.vlgmr.msra.gmra.mxu1 %vm389_vm14, %v2708_v11 }
 0x16a   : > { %v1200_v13 = vpop.permute.xlu1 %1199  ;;  %2706 = vmatmul.msk.bf16.vlgmr.msrb.gmra.mxu2 %vm389_vm14, %v2705_v60  ;;  %v2483_v60 = vperm.slane %v2481_v15, 1 }
 0x16b   : > { %v1205_v59 = vsel %vm389_vm14, %v1200_v13, %v3796_v19  ;;  %v1114_v16 = vpop.permute.xlu0 %1113 }
 0x16c   : > { %v1213_v25 = vsel %vm393_vm5, %v1205_v59, 0  ;;  %v1118_v17 = vsel %vm1117_vm7, %v1112_v55, %v1114_v16  ;;  %v1119_v21 = vsel %vm1117_vm7, %v1114_v16, %v3740_v30  ;;  %v3979_v62 = vpop.permute.xlu2 %1512 }
 0x16d   : > { %v1124_v49 = vsel %vm393_vm5, %v1118_v17, 0  ;;  %v1127_v18 = vsel %vm393_vm5, %v1119_v21, 0  ;;  %1235 = vmatpush.bf16.msrb.mxu1 %v1213_v25  ;;  %v2717_v17 = vld [vmem:[%s4348_s0 + $0x16] sm:$0x3]  ;;  %v1415_v21 = vand.u32 1, %v3642_v20 }
 0x16e   : > { %1136 = vmatpush.bf16.msra.mxu2 %v1124_v49  ;;  %1149 = vmatpush.bf16.msra.mxu3 %v1127_v18 }
 0x172   : > { %1321 = vmatpush.bf16.msrb.mxu3 %v1299_v3  ;;  %v1284_v19 = vpop.permute.xlu1 %1283  ;;  %2709 = vmatmul.msk.bf16.vlgmr.msra.gmra.mxu0 %vm389_vm14, %v2708_v11 }
 0x173   : > { %v1290_v28 = vsel %vm1289_vm12, %v1284_v19, %v1286_v12  ;;  %v1198_v56 = vpop.permute.xlu0 %1197  ;;  %vm4544_vm12 = vcmask 7168   ;;  %2713 = vmatmul.msk.bf16.vlgmr.msra.gmra.mxu3 %vm389_vm14, %v2711_v24 }
 0x174   : > { %v1296_v4 = vsel %vm393_vm5, %v1290_v28, 0  ;;  %v1204_v30 = vsel %vm389_vm14, %v1198_v56, %v1200_v13  ;;  %vm4545_vm7 = vmmov %vm4544_vm12  ;;  %v2069_v27 = vpop.permute.xlu2 %2068 }
 0x175   : > { %v1210_v51 = vsel %vm393_vm5, %v1204_v30, 0  ;;  %1308 = vmatpush.bf16.msrb.mxu2 %v1296_v4  ;;  %v2070_v46 = vrot.slane %v2069_v27, 4 }
 0x176   : > { %1222 = vmatpush.bf16.msrb.mxu0 %v1210_v51 }
 0x177   : > { %v2071_v0 = vsel %vm4552_vm9, %v2070_v46, %v2069_v27  ;;  %v2079_v5 = vunpack.c.l.b16 %v2070_v46  ;;  %v2080_v12 = vunpack.c.h.b16 %v2070_v46 }
 0x178   : > { %v2072_v11 = vunpack.c.l.b16 %v2071_v0  ;;  %v2073_v16 = vunpack.c.h.b16 %v2071_v0 }
 0x179   : > { %2716 = vmatmul.msk.bf16.vlgmr.msrb.gmra.mxu1 %vm389_vm14, %v2714_v47 }
 0x17a   : > { %v1985_v10 = vpop.permute.xlu1 %1984  ;;  %2712 = vmatmul.msk.bf16.vlgmr.msra.gmra.mxu2 %vm389_vm14, %v2711_v24 }
 0x17b   : > { %v1372_v29 = vpop.permute.xlu0 %1371  ;;  %v1986_v38 = vrot.slane %v1985_v10, 4 }
 0x17c   : > { %v1376_v26 = vsel %vm4544_vm12, %v1370_v22, %v1372_v29  ;;  %v1377_v31 = vsel %vm4545_vm7, %v1372_v29, %v3931_v1 }
 0x17d   : > { %v1382_v34 = vsel %vm393_vm5, %v1376_v26, 0  ;;  %v1385_v37 = vsel %vm393_vm5, %v1377_v31, 0  ;;  %v1995_v39 = vunpack.c.l.b16 %v1986_v38  ;;  %v1996_v44 = vunpack.c.h.b16 %v1986_v38  ;;  %v2732_v26 = vld [vmem:[%s4348_s0 + $0x20] sm:$0x3] }
 0x17e   : > { %1394 = vmatpush.bf16.msra.mxu0 %v1382_v34  ;;  %1407 = vmatpush.bf16.msra.mxu1 %v1385_v37  ;;  %v1987_v23 = vsel %vm4367_vm3, %v1986_v38, %v1985_v10  ;;  %vm4034_vm3 = vcmp.eq.s32.totalorder %v2483_v60, 1  ;;  %v2720_v34 = vld [vmem:[%s4348_s0 + $0x18] sm:$0x3] }
 0x17f   : > { %v1988_v1 = vunpack.c.l.b16 %v1987_v23  ;;  %v1989_v53 = vunpack.c.h.b16 %v1987_v23  ;;  %vm4000_vm13 = vcmp.ne.s32.totalorder %v1995_v39, %v3054_v35  ;;  %vm4005_vm10 = vcmp.ne.s32.totalorder %v1996_v44, %v3057_v36 }
 0x180   : > { %vm2001_vm12 = vmpackc.low %vm4005_vm10, %vm4000_vm13  ;;  %vm4083_vm10 = vcmp.ne.s32.totalorder %v2072_v11, %v3054_v35 }
 0x181   : > { %v2003_v20 = vsel %vm2001_vm12, %v3703_v57, 0  ;;  %vm2486_vm13 = vmpackc.low %vm4034_vm3, %vm4013_vm15  ;;  %vm4088_vm12 = vcmp.ne.s32.totalorder %v2073_v16, %v3057_v36  ;;  %vm4570_vm3 = vcmask 990208  }
 0x182   : > { %v1511_v40 = vpop.permute.xlu1 %1510  ;;  %2715 = vmatmul.msk.bf16.vlgmr.msrb.gmra.mxu0 %vm389_vm14, %v2714_v47  ;;  %v2010_v50 = vunpack.c.l.b16 %v2003_v20  ;;  %v2487_v15 = vsel %vm2486_vm13, 65537, %v2809_v2  ;;  %vm4571_vm15 = vmmov %vm4570_vm3 }
 0x183   : > { %v1901_v41 = vpop.permute.xlu0 %1900  ;;  %v1516_v32 = vsel %vm4546_vm4, %v1511_v40, %v3979_v62  ;;  %vm4024_vm4 = vcmp.ne.s32.totalorder %v1988_v1, %v3054_v35  ;;  %2719 = vmatmul.msk.bf16.vlgmr.msrb.gmra.mxu3 %vm389_vm14, %v2717_v17 }
 0x184   : > { %v1902_v45 = vrot.slane %v1901_v41, 4  ;;  %v1522_v33 = vsel %vm393_vm5, %v1516_v32, 0  ;;  %v2013_v38 = vpack.c.b16 %v2010_v50, %v2010_v50 }
 0x185   : > { %1534 = vmatpush.bf16.msrb.mxu0 %v1522_v33 }
 0x186   : > { %v1903_v55 = vsel %vm4551_vm11, %v1902_v45, %v1901_v41  ;;  %v1911_v58 = vunpack.c.l.b16 %v1902_v45  ;;  %v1912_v42 = vunpack.c.h.b16 %v1902_v45  ;;  %vm4029_vm11 = vcmp.ne.s32.totalorder %v1989_v53, %v3057_v36  ;;  %v2723_v53 = vld [vmem:[%s4348_s0 + $0x1a] sm:$0x3] }
 0x187   : > { %v1904_v61 = vunpack.c.l.b16 %v1903_v55  ;;  %v1905_v63 = vunpack.c.h.b16 %v1903_v55 }
 0x188   : > { %vm1915_vm1 = vcmp.ne.s32.totalorder %v1911_v58, %v3054_v35  ;;  %vm1916_vm0 = vcmp.ne.s32.totalorder %v1912_v42, %v3057_v36  ;;  %v2726_v42 = vld [vmem:[%s4348_s0 + $0x1c] sm:$0x3] }
 0x189   : > { %vm1908_vm7 = vcmp.ne.s32.totalorder %v1904_v61, %v3054_v35  ;;  %vm1909_vm8 = vcmp.ne.s32.totalorder %v1905_v63, %v3057_v36  ;;  %vm1917_vm9 = vmpackc.low %vm1916_vm0, %vm1915_vm1  ;;  %vm4561_vm0 = vcmask 1039360   ;;  %2722 = vmatmul.msk.bf16.vlgmr.msra.gmra.mxu1 %vm389_vm14, %v2720_v34 }
 0x18a   : > { %vm1910_vm2 = vmpackc.low %vm1909_vm8, %vm1908_vm7  ;;  %v1919_v9 = vsel %vm1917_vm9, %v3703_v57, 0  ;;  %2718 = vmatmul.msk.bf16.vlgmr.msrb.gmra.mxu2 %vm389_vm14, %v2717_v17  ;;  %vm1416_vm7 = vcmp.eq.s32.totalorder %v1415_v21, 1  ;;  %vm4064_vm8 = vcmp.ne.s32.totalorder %v2080_v12, %v3057_v36  ;;  %v1595_v52 = vpop.permute.xlu2 %1594 }
 0x18b   : > { %v1926_v14 = vunpack.c.l.b16 %v1919_v9  ;;  %v1918_v59 = vsel %vm1910_vm2, %v3685_v43, 0  ;;  %v1515_v25 = vpop.permute.xlu0 %1514  ;;  %vm1994_vm1 = vmpackc.low %vm4029_vm11, %vm4024_vm4  ;;  %vm4050_vm2 = vcmp.ne.s32.totalorder %v2079_v5, %v3054_v35  ;;  %v1418_v51 = vsel %vm1416_vm7, 1, %v2809_v2  ;;  %v2729_v9 = vld [vmem:[%s4348_s0 + $0x1e] sm:$0x3] }
 0x18c   : > { %v1925_v49 = vunpack.c.h.b16 %v1918_v59  ;;  %v1924_v18 = vunpack.c.l.b16 %v1918_v59  ;;  %v1517_v3 = vsel %vm4561_vm0, %v3979_v62, %v1515_v25  ;;  %v2002_v47 = vsel %vm1994_vm1, %v3685_v43, 0  ;;  %vm2085_vm4 = vmpackc.low %vm4064_vm8, %vm4050_vm2 }
 0x18d   : > { %v1929_v19 = vpack.c.b16 %v1926_v14, %v1926_v14  ;;  %v1525_v28 = vsel %vm393_vm5, %v1517_v3, 0  ;;  %v1419_v62 = vperm.slane %v1418_v51, 0  ;;  %v1420_v10 = vperm.slane %v1418_v51, 1  ;;  %vm2078_vm0 = vmpackc.low %vm4088_vm12, %vm4083_vm10 }
 0x18e   : > { %v1928_v56 = vpack.c.b16 %v1925_v49, %v1925_v49  ;;  %v1927_v4 = vpack.c.b16 %v1924_v18, %v1924_v18  ;;  %1547 = vmatpush.bf16.msrb.mxu1 %v1525_v28  ;;  %v2009_v29 = vunpack.c.h.b16 %v2002_v47  ;;  %v2087_v39 = vsel %vm2085_vm4, %v3703_v57, 0 }
 0x18f   : > { %1934 = vrot.lane.b32.xlu2 %v1929_v19, %s2816_s23  ;;  %vm1421_vm11 = vcmp.eq.s32.totalorder %v1419_v62, 1  ;;  %vm1422_vm9 = vcmp.eq.s32.totalorder %v1420_v10, 1  ;;  %v2094_v41 = vunpack.c.l.b16 %v2087_v39  ;;  %v2086_v27 = vsel %vm2078_vm0, %v3685_v43, 0 }
 0x190   : > { %1932 = vrot.lane.b32.xlu1 %v1928_v56, %s2816_s23  ;;  %1930 = vrot.lane.b32.xlu0 %v1927_v4, %s2816_s23  ;;  %vm1423_vm1 = vmpackc.low %vm1422_vm9, %vm1421_vm11  ;;  %v2012_v31 = vpack.c.b16 %v2009_v29, %v2009_v29  ;;  %v2008_v32 = vunpack.c.l.b16 %v2002_v47  ;;  %v2093_v45 = vunpack.c.h.b16 %v2086_v27  ;;  %v2092_v55 = vunpack.c.l.b16 %v2086_v27 }
 0x191   : > { %v1424_v37 = vsel %vm1423_vm1, %v3685_v43, 0  ;;  %v2097_v54 = vpack.c.b16 %v2094_v41, %v2094_v41  ;;  %vm4572_vm4 = vcmask 982016   ;;  %vm4574_vm9 = vcmask 580608  }
 0x192   : > { %2721 = vmatmul.msk.bf16.vlgmr.msra.gmra.mxu0 %vm389_vm14, %v2720_v34  ;;  %v1429_v44 = vunpack.c.h.b16 %v1424_v37  ;;  %v1428_v23 = vunpack.c.l.b16 %v1424_v37  ;;  %v2096_v1 = vpack.c.b16 %v2093_v45, %v2093_v45  ;;  %v2011_v48 = vpack.c.b16 %v2008_v32, %v2008_v32  ;;  %vm4573_vm11 = vmmov %vm4572_vm4 }
 0x193   : > { %v2095_v60 = vpack.c.b16 %v2092_v55, %v2092_v55 }
 0x194   : > { %v1431_v40 = vpack.c.b16 %v1429_v44, %v1429_v44  ;;  %v1430_v46 = vpack.c.b16 %v1428_v23, %v1428_v23 }
 0x196   : > { %v1439_v33 = vsel %vm393_vm5, %v1431_v40, 0  ;;  %v1436_v2 = vsel %vm393_vm5, %v1430_v46, 0 }
 0x197   : > { %2016 = vrot.lane.b32.xlu2 %v2012_v31, %s2817_s24  ;;  %1461 = vmatpush.bf16.msra.mxu3 %v1439_v33 }
 0x198   : > { %2488 = vrot.lane.b32.xlu1 %v2487_v15, %s2818_s25  ;;  %2018 = vrot.lane.b32.xlu0 %v2013_v38, %s2817_s24 }
 0x199   : > { %1448 = vmatpush.bf16.msra.mxu2 %v1436_v2  ;;  %2728 = vmatmul.msk.bf16.vlgmr.msrb.gmra.mxu1 %vm389_vm14, %v2726_v42 }
 0x19a   : > { %2725 = vmatmul.msk.bf16.vlgmr.msra.gmra.mxu3 %vm389_vm14, %v2723_v53 }
 0x19c   : > { %2724 = vmatmul.msk.bf16.vlgmr.msra.gmra.mxu2 %vm389_vm14, %v2723_v53 }
 0x19d   : > { %v422_v17 = vpop.f32.mrf.mxu1  ;;  %v474_v37 = vpop.f32.mrf.mxu3 }
 0x19e   : > { %v475_v44 = vadd.f32 %v474_v37, %v422_v17 }
 0x19f   : > { %2100 = vrot.lane.b32.xlu2 %v2096_v1, %s2815_s22 }
 0x1a0   : > { %2014 = vrot.lane.b32.xlu1 %v2011_v48, %s2817_s24  ;;  %2102 = vrot.lane.b32.xlu0 %v2097_v54, %s2815_s22 }
 0x1a1   : > { %v1599_v63 = vpop.permute.xlu1 %1598 }
 0x1a2   : > { %v1683_v58 = vpop.permute.xlu2 %1682  ;;  %2727 = vmatmul.msk.bf16.vlgmr.msrb.gmra.mxu0 %vm389_vm14, %v2726_v42  ;;  %v1597_v61 = vpop.permute.xlu0 %1596  ;;  %v2735_v42 = vld [vmem:[%s4348_s0 + $0x22] sm:$0x3] }
 0x1a3   : > { %v1600_v0 = vsel %vm4570_vm3, %v1595_v52, %v1597_v61  ;;  %v1601_v5 = vsel %vm4571_vm15, %v1597_v61, %v1599_v63  ;;  %vm4579_vm3 = vcmask 973824   ;;  %v4205_v63 = vld [vmem:[#allocation2 + $0xc] sm:$0xf] }
 0x1a4   : > { %v1606_v6 = vsel %vm393_vm5, %v1600_v0, 0  ;;  %v1609_v7 = vsel %vm393_vm5, %v1601_v5, 0 }
 0x1a5   : > { %1618 = vmatpush.bf16.msrb.mxu2 %v1606_v6  ;;  %1631 = vmatpush.bf16.msrb.mxu3 %v1609_v7  ;;  %v424_v51 = vpop.f32.mrf.mxu1 }
 0x1a8   : > { %2098 = vrot.lane.b32.xlu1 %v2095_v60, %s2815_s22  ;;  %v476_v60 = vpop.f32.mrf.mxu3 }
 0x1aa   : > { %v4137_v8 = vpop.permute.xlu2 %1764  ;;  %2731 = vmatmul.msk.bf16.vlgmr.msrb.gmra.mxu3 %vm389_vm14, %v2729_v9  ;;  %v2153_v11 = vpop.permute.xlu0 %2152 }
 0x1ab   : > { %v2154_v12 = vrot.slane %v2153_v11, 4  ;;  %v461_v15 = vpop.f32.mrf.mxu2 }
 0x1ac   : > { %2730 = vmatmul.msk.bf16.vlgmr.msrb.gmra.mxu2 %vm389_vm14, %v2729_v9 }
 0x1ad   : > { %v2155_v13 = vsel %vm662_vm6, %v2154_v12, %v2153_v11  ;;  %v2163_v14 = vunpack.c.l.b16 %v2154_v12  ;;  %v2164_v59 = vunpack.c.h.b16 %v2154_v12  ;;  %v4210_v12 = vld [vmem:[#allocation2 + $0x4] sm:$0xff] }
 0x1ae   : > { %v2156_v16 = vunpack.c.l.b16 %v2155_v13  ;;  %v2157_v25 = vunpack.c.h.b16 %v2155_v13  ;;  %v4149_v21 = vpop.f32.mrf.mxu0 }
 0x1af   : > { %vm2167_vm2 = vcmp.ne.s32.totalorder %v2163_v14, %v3054_v35  ;;  %vm2168_vm7 = vcmp.ne.s32.totalorder %v2164_v59, %v3057_v36  ;;  %v462_v5 = vadd.f32 %v461_v15, %v4149_v21 }
 0x1b0   : > { %vm2160_vm8 = vcmp.ne.s32.totalorder %v2156_v16, %v3054_v35  ;;  %vm2161_vm13 = vcmp.ne.s32.totalorder %v2157_v25, %v3057_v36  ;;  %vm2169_vm10 = vmpackc.low %vm2168_vm7, %vm2167_vm2  ;;  %vm4584_vm7 = vcmask 531456  }
 0x1b1   : > { %vm2162_vm12 = vmpackc.low %vm2161_vm13, %vm2160_vm8  ;;  %v2171_v49 = vsel %vm2169_vm10, %v3703_v57, 0 }
 0x1b2   : > { %v2178_v18 = vunpack.c.l.b16 %v2171_v49  ;;  %v2170_v3 = vsel %vm2162_vm12, %v3685_v43, 0  ;;  %v2321_v22 = vpop.permute.xlu2 %2320 }
 0x1b3   : > { %v2176_v19 = vunpack.c.l.b16 %v2170_v3  ;;  %v2177_v28 = vunpack.c.h.b16 %v2170_v3  ;;  %v2322_v4 = vrot.slane %v2321_v22, 4  ;;  %v463_v7 = vpop.f32.mrf.mxu2 }
 0x1b4   : > { %v2181_v20 = vpack.c.b16 %v2178_v18, %v2178_v18 }
 0x1b5   : > { %v2179_v56 = vpack.c.b16 %v2176_v19, %v2176_v19  ;;  %v2180_v30 = vpack.c.b16 %v2177_v28, %v2177_v28  ;;  %v2323_v29 = vsel %vm4574_vm9, %v2322_v4, %v2321_v22  ;;  %v2331_v38 = vunpack.c.l.b16 %v2322_v4 }
 0x1b6   : > { %2186 = vrot.lane.b32.xlu0 %v2181_v20, %s2812_s18  ;;  %v411_v57 = vpop.f32.mrf.mxu0  ;;  %v2324_v31 = vunpack.c.l.b16 %v2323_v29  ;;  %v2325_v34 = vunpack.c.h.b16 %v2323_v29  ;;  %v2332_v39 = vunpack.c.h.b16 %v2322_v4  ;;  %v558_v23 = vpop.f32.mrf.mxu1 }
 0x1b7   : > { %2182 = vrot.lane.b32.xlu1 %v2179_v56, %s2812_s18  ;;  %2184 = vrot.lane.b32.xlu2 %v2180_v30, %s2812_s18  ;;  %vm4179_vm15 = vcmp.ne.s32.totalorder %v2331_v38, %v3054_v35  ;;  %v563_v6 = vadd.f32 %v558_v23, %v475_v44 }
 0x1b8   : > { %vm4167_vm1 = vcmp.ne.s32.totalorder %v2324_v31, %v3054_v35  ;;  %vm4172_vm0 = vcmp.ne.s32.totalorder %v2325_v34, %v3057_v36  ;;  %vm4184_vm2 = vcmp.ne.s32.totalorder %v2332_v39, %v3057_v36 }
 0x1b9   : > { %vm2330_vm8 = vmpackc.low %vm4172_vm0, %vm4167_vm1  ;;  %vm4588_vm0 = vcmask 588800  }
 0x1ba   : > { %v1681_v47 = vpop.permute.xlu1 %1680  ;;  %vm2337_vm12 = vmpackc.low %vm4184_vm2, %vm4179_vm15  ;;  %v1847_v61 = vpop.permute.xlu2 %1846  ;;  %v2338_v22 = vsel %vm2330_vm8, %v4210_v12, 0  ;;  %vm4586_vm15 = vcmask 596992  }
 0x1bb   : > { %v1685_v62 = vsel %vm4572_vm4, %v1681_v47, %v1683_v58  ;;  %v1679_v10 = vpop.permute.xlu0 %1678  ;;  %v2339_v14 = vsel %vm2337_vm12, %v4205_v63, 0  ;;  %v2344_v30 = vunpack.c.l.b16 %v2338_v22  ;;  %v2345_v51 = vunpack.c.h.b16 %v2338_v22  ;;  %vm4587_vm1 = vmmov %vm4586_vm15 }
 0x1bc   : > { %v1693_v43 = vsel %vm393_vm5, %v1685_v62, 0  ;;  %v1684_v50 = vsel %vm4573_vm11, %v1679_v10, %v1681_v47  ;;  %v2346_v4 = vunpack.c.l.b16 %v2339_v14  ;;  %v644_v47 = vpop.f32.mrf.mxu3  ;;  %v2738_v62 = vld [vmem:[%s4348_s0 + $0x24] sm:$0x3] }
 0x1bd   : > { %v1690_v24 = vsel %vm393_vm5, %v1684_v50, 0  ;;  %1715 = vmatpush.bf16.msra.mxu1 %v1693_v43  ;;  %v649_v10 = vadd.f32 %v644_v47, %v563_v6  ;;  %v2347_v34 = vpack.c.b16 %v2344_v30, %v2344_v30  ;;  %v2348_v38 = vpack.c.b16 %v2345_v51, %v2345_v51 }
 0x1be   : > { %1702 = vmatpush.bf16.msra.mxu0 %v1690_v24  ;;  %v545_v46 = vpop.f32.mrf.mxu0  ;;  %v560_v9 = vpop.f32.mrf.mxu1  ;;  %v2349_v50 = vpack.c.b16 %v2346_v4, %v2346_v4 }
 0x1bf   : > { %v562_v49 = vadd.f32 %v545_v46, %v462_v5 }
 0x1c0   : > { %2734 = vmatmul.msk.bf16.vlgmr.msra.gmra.mxu1 %vm389_vm14, %v2732_v26 }
 0x1c1   : > { %2733 = vmatmul.msk.bf16.vlgmr.msra.gmra.mxu0 %vm389_vm14, %v2732_v26 }
 0x1c2   : > { %v2237_v40 = vpop.permute.xlu1 %2236 }
 0x1c3   : > { %v2238_v41 = vrot.slane %v2237_v40, 4  ;;  %v1767_v27 = vpop.permute.xlu0 %1766 }
 0x1c4   : > { %v1769_v33 = vsel %vm4579_vm3, %v4137_v8, %v1767_v27  ;;  %v646_v46 = vpop.f32.mrf.mxu3 }
 0x1c5   : > { %v2239_v1 = vsel %vm4584_vm7, %v2238_v41, %v2237_v40  ;;  %v2247_v53 = vunpack.c.l.b16 %v2238_v41  ;;  %v2248_v48 = vunpack.c.h.b16 %v2238_v41  ;;  %v1777_v54 = vsel %vm393_vm5, %v1769_v33, 0 }
 0x1c6   : > { %v2240_v55 = vunpack.c.l.b16 %v2239_v1  ;;  %v2241_v58 = vunpack.c.h.b16 %v2239_v1  ;;  %1799 = vmatpush.bf16.msra.mxu3 %v1777_v54  ;;  %vm4585_vm7 = vcmask 973824   ;;  %v547_v18 = vpop.f32.mrf.mxu0  ;;  %v729_v43 = vpop.f32.mrf.mxu1 }
 0x1c7   : > { %vm2251_vm13 = vcmp.ne.s32.totalorder %v2247_v53, %v3054_v35  ;;  %vm2252_vm10 = vcmp.ne.s32.totalorder %v2248_v48, %v3057_v36  ;;  %v734_v26 = vadd.f32 %v729_v43, %v649_v10 }
 0x1c8   : > { %vm2244_vm4 = vcmp.ne.s32.totalorder %v2240_v55, %v3054_v35  ;;  %vm2245_vm11 = vcmp.ne.s32.totalorder %v2241_v58, %v3057_v36  ;;  %vm2253_vm9 = vmpackc.low %vm2252_vm10, %vm2251_vm13 }
 0x1c9   : > { %vm2246_vm3 = vmpackc.low %vm2245_vm11, %vm2244_vm4  ;;  %v2255_v0 = vsel %vm2253_vm9, %v4205_v63, 0  ;;  %2737 = vmatmul.msk.bf16.vlgmr.msra.gmra.mxu3 %vm389_vm14, %v2735_v42 }
 0x1ca   : > { %v2262_v11 = vunpack.c.l.b16 %v2255_v0  ;;  %v2254_v13 = vsel %vm2246_vm3, %v4210_v12, 0  ;;  %v1763_v59 = vpop.permute.xlu1 %1762  ;;  %vm4589_vm11 = vmmov %vm4588_vm0  ;;  %vm4591_vm3 = vcmask 580608  }
 0x1cb   : > { %v1849_v16 = vpop.permute.xlu0 %1848  ;;  %v2260_v25 = vunpack.c.l.b16 %v2254_v13  ;;  %v1768_v17 = vsel %vm4585_vm7, %v1763_v59, %v4137_v8  ;;  %v2261_v21 = vunpack.c.h.b16 %v2254_v13  ;;  %vm4590_vm9 = vmmov %vm4588_vm0 }
 0x1cc   : > { %v2265_v3 = vpack.c.b16 %v2262_v11, %v2262_v11  ;;  %v1774_v19 = vsel %vm393_vm5, %v1768_v17, 0  ;;  %v1852_v20 = vsel %vm4586_vm15, %v1847_v61, %v1849_v16  ;;  %vm4592_vm7 = vmmov %vm4587_vm1 }
 0x1cd   : > { %v2263_v28 = vpack.c.b16 %v2260_v25, %v2260_v25  ;;  %1786 = vmatpush.bf16.msra.mxu2 %v1774_v19  ;;  %v1858_v56 = vsel %vm393_vm5, %v1852_v20, 0  ;;  %v2264_v8 = vpack.c.b16 %v2261_v21, %v2261_v21  ;;  %v631_v57 = vpop.f32.mrf.mxu2 }
 0x1ce   : > { %2270 = vrot.lane.b32.xlu0 %v2265_v3, %s2813_s19  ;;  %1870 = vmatpush.bf16.msrb.mxu0 %v1858_v56  ;;  %v648_v24 = vadd.f32 %v631_v57, %v562_v49  ;;  %v731_v52 = vpop.f32.mrf.mxu1 }
 0x1cf   : > { %2266 = vrot.lane.b32.xlu1 %v2263_v28, %s2813_s19  ;;  %2268 = vrot.lane.b32.xlu2 %v2264_v8, %s2813_s19  ;;  %v716_v39 = vpop.f32.mrf.mxu0  ;;  %v2744_v52 = vld [vmem:[%s4348_s0 + $0x28] sm:$0x3] }
 0x1d0   : > { %2736 = vmatmul.msk.bf16.vlgmr.msra.gmra.mxu2 %vm389_vm14, %v2735_v42  ;;  %v733_v23 = vadd.f32 %v716_v39, %v648_v24 }
 0x1d1   : > { %2739 = vmatmul.msk.bf16.vlgmr.msrb.gmra.mxu0 %vm389_vm14, %v2738_v62 }
 0x1d2   : > { %v1851_v29 = vpop.permute.xlu1 %1850 }
 0x1d3   : > { %v2405_v31 = vpop.permute.xlu0 %2404  ;;  %v1853_v37 = vsel %vm4587_vm1, %v1849_v16, %v1851_v29 }
 0x1d4   : > { %v2406_v44 = vrot.slane %v2405_v31, 4  ;;  %v1861_v15 = vsel %vm393_vm5, %v1853_v37, 0 }
 0x1d5   : > { %1883 = vmatpush.bf16.msrb.mxu1 %v1861_v15  ;;  %v633_v33 = vpop.f32.mrf.mxu2  ;;  %v813_v61 = vpop.f32.mrf.mxu3 }
 0x1d6   : > { %v2407_v40 = vsel %vm4588_vm0, %v2406_v44, %v2405_v31  ;;  %v2415_v41 = vunpack.c.l.b16 %v2406_v44  ;;  %v2416_v27 = vunpack.c.h.b16 %v2406_v44  ;;  %2354 = vrot.lane.b32.xlu0 %v2349_v50, %s2810_s16  ;;  %v897_v5 = vpop.f32.mrf.mxu1  ;;  %v818_v7 = vadd.f32 %v813_v61, %v734_v26 }
 0x1d7   : > { %v2408_v32 = vunpack.c.l.b16 %v2407_v40  ;;  %v2409_v45 = vunpack.c.h.b16 %v2407_v40  ;;  %2350 = vrot.lane.b32.xlu1 %v2347_v34, %s2810_s16  ;;  %2352 = vrot.lane.b32.xlu2 %v2348_v38, %s2810_s16  ;;  %v718_v48 = vpop.f32.mrf.mxu0  ;;  %v2741_v34 = vld [vmem:[%s4348_s0 + $0x26] sm:$0x3] }
 0x1d8   : > { %vm2419_vm2 = vcmp.ne.s32.totalorder %v2415_v41, %v3054_v35  ;;  %vm2420_vm8 = vcmp.ne.s32.totalorder %v2416_v27, %v3057_v36  ;;  %2740 = vmatmul.msk.bf16.vlgmr.msrb.gmra.mxu1 %vm389_vm14, %v2738_v62  ;;  %v902_v13 = vadd.f32 %v897_v5, %v818_v7 }
 0x1d9   : > { %vm2412_vm13 = vcmp.ne.s32.totalorder %v2408_v32, %v3054_v35  ;;  %vm2413_vm10 = vcmp.ne.s32.totalorder %v2409_v45, %v3057_v36  ;;  %vm2421_vm12 = vmpackc.low %vm2420_vm8, %vm2419_vm2 }
 0x1da   : > { %vm2414_vm4 = vmpackc.low %vm2413_vm10, %vm2412_vm13  ;;  %v2423_v2 = vsel %vm2421_vm12, %v4205_v63, 0  ;;  %vm4594_vm12 = vcmask 531456  }
 0x1db   : > { %v2430_v1 = vunpack.c.l.b16 %v2423_v2  ;;  %v2422_v53 = vsel %vm2414_vm4, %v4210_v12, 0  ;;  %vm4593_vm10 = vmmov %vm4591_vm3 }
 0x1dc   : > { %v2428_v54 = vunpack.c.l.b16 %v2422_v53  ;;  %v2429_v55 = vunpack.c.h.b16 %v2422_v53  ;;  %vm4595_vm4 = vmmov %vm4594_vm12 }
 0x1dd   : > { %v2433_v58 = vpack.c.b16 %v2430_v1, %v2430_v1  ;;  %v800_v0 = vpop.f32.mrf.mxu2  ;;  %v815_v9 = vpop.f32.mrf.mxu3 }
 0x1de   : > { %v2431_v42 = vpack.c.b16 %v2428_v54, %v2428_v54  ;;  %v2432_v60 = vpack.c.b16 %v2429_v55, %v2429_v55  ;;  %v817_v11 = vadd.f32 %v800_v0, %v733_v23  ;;  %v899_v59 = vpop.f32.mrf.mxu1 }
 0x1df   : > { %2438 = vrot.lane.b32.xlu0 %v2433_v58, %s2811_s17  ;;  %v884_v6 = vpop.f32.mrf.mxu0 }
 0x1e0   : > { %2434 = vrot.lane.b32.xlu1 %v2431_v42, %s2811_s17  ;;  %2436 = vrot.lane.b32.xlu2 %v2432_v60, %s2811_s17  ;;  %v901_v17 = vadd.f32 %v884_v6, %v817_v11 }
 0x1e5   : > { %v802_v14 = vpop.f32.mrf.mxu2  ;;  %v981_v25 = vpop.f32.mrf.mxu3 }
 0x1e6   : > { %v1065_v49 = vpop.f32.mrf.mxu1  ;;  %v986_v3 = vadd.f32 %v981_v25, %v902_v13 }
 0x1e7   : > { %v886_v16 = vpop.f32.mrf.mxu0 }
 0x1e8   : > { %v1070_v20 = vadd.f32 %v1065_v49, %v986_v3  ;;  %v2747_v49 = vld [vmem:[%s4348_s0 + $0x2a] sm:$0x3] }
 0x1e9   : > { %v1935_v30 = vpop.permute.xlu2 %1934 }
 0x1ed   : > { %v968_v21 = vpop.f32.mrf.mxu2  ;;  %v983_v22 = vpop.f32.mrf.mxu3 }
 0x1ee   : > { %v985_v19 = vadd.f32 %v968_v21, %v901_v17  ;;  %v1067_v56 = vpop.f32.mrf.mxu1 }
 0x1ef   : > { %v1052_v18 = vpop.f32.mrf.mxu0 }
 0x1f0   : > { %v1069_v4 = vadd.f32 %v1052_v18, %v985_v19 }
 0x1f1   : > { %v2017_v37 = vpop.permute.xlu2 %2016 }
 0x1f5   : > { %v970_v28 = vpop.f32.mrf.mxu2 }
 0x1f6   : > { %v1151_v51 = vpop.f32.mrf.mxu3  ;;  %v1237_v29 = vpop.f32.mrf.mxu1 }
 0x1f7   : > { %v1054_v8 = vpop.f32.mrf.mxu0  ;;  %v1156_v47 = vadd.f32 %v1151_v51, %v1070_v20 }
 0x1f9   : > { %v1242_v48 = vadd.f32 %v1237_v29, %v1156_v47  ;;  %v2101_v55 = vpop.permute.xlu2 %2100 }
 0x1fd   : > { %v1138_v62 = vpop.f32.mrf.mxu2 }
 0x1fe   : > { %v1153_v38 = vpop.f32.mrf.mxu3  ;;  %v1239_v41 = vpop.f32.mrf.mxu1  ;;  %v1155_v53 = vadd.f32 %v1138_v62, %v1069_v4 }
 0x1ff   : > { %v1224_v24 = vpop.f32.mrf.mxu0 }
 0x200   : > { %v1241_v58 = vadd.f32 %v1224_v24, %v1155_v53 }
 0x202   : > { %v1933_v10 = vpop.permute.xlu1 %1932  ;;  %v1931_v57 = vpop.permute.xlu0 %1930 }
 0x203   : > { %v1937_v43 = vsel %vm4589_vm11, %v1933_v10, %v1935_v30  ;;  %v1936_v50 = vsel %vm4590_vm9, %v1931_v57, %v1933_v10  ;;  %vm4598_vm9 = vcmask 465920  }
 0x204   : > { %v1945_v26 = vsel %vm393_vm5, %v1937_v43, 0  ;;  %v1942_v31 = vsel %vm393_vm5, %v1936_v50, 0 }
 0x205   : > { %1954 = vmatpush.bf16.msrb.mxu2 %v1942_v31  ;;  %1967 = vmatpush.bf16.msrb.mxu3 %v1945_v26  ;;  %v1140_v39 = vpop.f32.mrf.mxu2 }
 0x206   : > { %v1323_v54 = vpop.f32.mrf.mxu3  ;;  %v1409_v14 = vpop.f32.mrf.mxu1 }
 0x207   : > { %v1226_v27 = vpop.f32.mrf.mxu0  ;;  %v1328_v7 = vadd.f32 %v1323_v54, %v1242_v48 }
 0x208   : > { %2742 = vmatmul.msk.bf16.vlgmr.msrb.gmra.mxu2 %vm389_vm14, %v2741_v34  ;;  %2743 = vmatmul.msk.bf16.vlgmr.msrb.gmra.mxu3 %vm389_vm14, %v2741_v34 }
 0x209   : > { %v1414_v17 = vadd.f32 %v1409_v14, %v1328_v7  ;;  %v2756_v14 = vld [vmem:[%s4348_s0 + $0x30] sm:$0x3] }
 0x20a   : > { %v2489_v44 = vpop.permute.xlu1 %2488  ;;  %v2019_v15 = vpop.permute.xlu0 %2018 }
 0x20b   : > { %v2490_v23 = vrot.slane %v2489_v44, 4  ;;  %v2021_v40 = vsel %vm4591_vm3, %v2017_v37, %v2019_v15  ;;  %vm4599_vm3 = vmmov %vm4598_vm9 }
 0x20c   : > { %v2029_v32 = vsel %vm393_vm5, %v2021_v40, 0 }
 0x20d   : > { %v2491_v45 = vsel %vm4592_vm7, %v2490_v23, %v2489_v44  ;;  %v2499_v46 = vunpack.c.l.b16 %v2490_v23  ;;  %v2500_v33 = vunpack.c.h.b16 %v2490_v23  ;;  %2051 = vmatpush.bf16.msra.mxu1 %v2029_v32  ;;  %v1310_v60 = vpop.f32.mrf.mxu2  ;;  %v2750_v23 = vld [vmem:[%s4348_s0 + $0x2c] sm:$0x3]  ;;  %vm4600_vm7 = vcmask 457728  }
 0x20e   : > { %v2492_v2 = vunpack.c.l.b16 %v2491_v45  ;;  %v2493_v1 = vunpack.c.h.b16 %v2491_v45  ;;  %v1327_v9 = vadd.f32 %v1310_v60, %v1241_v58  ;;  %v1325_v3 = vpop.f32.mrf.mxu3  ;;  %v1411_v28 = vpop.f32.mrf.mxu1 }
 0x20f   : > { %vm2503_vm15 = vcmp.ne.s32.totalorder %v2499_v46, %v3054_v35  ;;  %vm2504_vm1 = vcmp.ne.s32.totalorder %v2500_v33, %v3057_v36  ;;  %v1396_v59 = vpop.f32.mrf.mxu0 }
 0x210   : > { %vm2496_vm0 = vcmp.ne.s32.totalorder %v2492_v2, %v3054_v35  ;;  %vm2497_vm2 = vcmp.ne.s32.totalorder %v2493_v1, %v3057_v36  ;;  %2746 = vmatmul.msk.bf16.vlgmr.msra.gmra.mxu1 %vm389_vm14, %v2744_v52  ;;  %vm2505_vm8 = vmpackc.low %vm2504_vm1, %vm2503_vm15  ;;  %v1413_v18 = vadd.f32 %v1396_v59, %v1327_v9  ;;  %vm4602_vm1 = vcmask 449536  }
 0x211   : > { %vm2498_vm13 = vmpackc.low %vm2497_vm2, %vm2496_vm0  ;;  %v2507_v42 = vsel %vm2505_vm8, %v4205_v63, 0  ;;  %v2185_v57 = vpop.permute.xlu2 %2184 }
 0x212   : > { %v2015_v61 = vpop.permute.xlu1 %2014  ;;  %v2103_v0 = vpop.permute.xlu0 %2102  ;;  %v2514_v5 = vunpack.c.l.b16 %v2507_v42  ;;  %v2506_v6 = vsel %vm2498_vm13, %v4210_v12, 0  ;;  %vm4601_vm15 = vmmov %vm4600_vm7 }
 0x213   : > { %v2020_v35 = vsel %vm4593_vm10, %v2015_v61, %v2017_v37  ;;  %v2105_v36 = vsel %vm4594_vm12, %v2101_v55, %v2103_v0  ;;  %v2513_v11 = vunpack.c.h.b16 %v2506_v6  ;;  %v2512_v13 = vunpack.c.l.b16 %v2506_v6  ;;  %v2753_v61 = vld [vmem:[%s4348_s0 + $0x2e] sm:$0x3]  ;;  %vm4603_vm0 = vmmov %vm4602_vm1 }
 0x214   : > { %v2026_v16 = vsel %vm393_vm5, %v2020_v35, 0  ;;  %v2113_v63 = vsel %vm393_vm5, %v2105_v36, 0  ;;  %v2517_v25 = vpack.c.b16 %v2514_v5, %v2514_v5 }
 0x215   : > { %2038 = vmatpush.bf16.msra.mxu0 %v2026_v16  ;;  %2135 = vmatpush.bf16.msra.mxu3 %v2113_v63  ;;  %v2516_v21 = vpack.c.b16 %v2513_v11, %v2513_v11  ;;  %v2515_v12 = vpack.c.b16 %v2512_v13, %v2512_v13  ;;  %v1312_v22 = vpop.f32.mrf.mxu2 }
 0x216   : > { %2522 = vrot.lane.b32.xlu0 %v2517_v25, %s2814_s20  ;;  %v1549_v51 = vpop.f32.mrf.mxu1 }
 0x217   : > { %2520 = vrot.lane.b32.xlu2 %v2516_v21, %s2814_s20  ;;  %2518 = vrot.lane.b32.xlu1 %v2515_v12, %s2814_s20  ;;  %v1398_v56 = vpop.f32.mrf.mxu0 }
 0x218   : > { %2745 = vmatmul.msk.bf16.vlgmr.msra.gmra.mxu0 %vm389_vm14, %v2744_v52  ;;  %2749 = vmatmul.msk.bf16.vlgmr.msra.gmra.mxu3 %vm389_vm14, %v2747_v49 }
 0x21a   : > { %v2099_v19 = vpop.permute.xlu1 %2098 }
 0x21b   : > { %v2104_v20 = vsel %vm4595_vm4, %v2099_v19, %v2101_v55  ;;  %v2759_v19 = vld [vmem:[%s4348_s0 + $0x32] sm:$0x3] }
 0x21c   : > { %v2110_v8 = vsel %vm393_vm5, %v2104_v20, 0 }
 0x21d   : > { %2122 = vmatpush.bf16.msra.mxu2 %v2110_v8  ;;  %v1463_v4 = vpop.f32.mrf.mxu3 }
 0x21e   : > { %v1468_v62 = vadd.f32 %v1463_v4, %v1414_v17  ;;  %v1551_v26 = vpop.f32.mrf.mxu1 }
 0x21f   : > { %v1450_v30 = vpop.f32.mrf.mxu2  ;;  %v1536_v47 = vpop.f32.mrf.mxu0 }
 0x220   : > { %2748 = vmatmul.msk.bf16.vlgmr.msra.gmra.mxu2 %vm389_vm14, %v2747_v49  ;;  %v1467_v29 = vadd.f32 %v1450_v30, %v1413_v18  ;;  %v1554_v24 = vadd.f32 %v1549_v51, %v1468_v62  ;;  %v2571_v62 = vld [vmem:[%s4352_s4] sm:$0xf] }
 0x221   : > { %2574 = vperm.xlu0 %2795, %v2571_v62  }
 0x222   : > { %v1553_v44 = vadd.f32 %v1536_v47, %v1467_v29 }
 0x225   : > { %v1465_v10 = vpop.f32.mrf.mxu3 }
 0x227   : > { %v1452_v43 = vpop.f32.mrf.mxu2  ;;  %v1538_v37 = vpop.f32.mrf.mxu0 }
 0x228   : > { %v2187_v50 = vpop.permute.xlu0 %2186  ;;  %v2762_v37 = vld [vmem:[%s4348_s0 + $0x34] sm:$0x3] }
 0x229   : > { %v2189_v31 = vsel %vm662_vm6, %v2185_v57, %v2187_v50  ;;  %v2183_v34 = vpop.permute.xlu1 %2182  ;;  %v2269_v33 = vpop.permute.xlu2 %2268 }
 0x22a   : > { %v2197_v38 = vsel %vm393_vm5, %v2189_v31, 0  ;;  %v2188_v39 = vsel %vm662_vm6, %v2183_v34, %v2185_v57  ;;  %vm4596_vm6 = vcmask 515072  }
 0x22b   : > { %v2194_v15 = vsel %vm393_vm5, %v2188_v39, 0  ;;  %2219 = vmatpush.bf16.msrb.mxu1 %v2197_v38  ;;  %vm4597_vm11 = vmmov %vm4596_vm6 }
 0x22c   : > { %2206 = vmatpush.bf16.msrb.mxu0 %v2194_v15 }
 0x22d   : > { %v1633_v40 = vpop.f32.mrf.mxu3 }
 0x22e   : > { %2752 = vmatmul.msk.bf16.vlgmr.msrb.gmra.mxu1 %vm389_vm14, %v2750_v23  ;;  %v1638_v32 = vadd.f32 %v1633_v40, %v1554_v24 }
 0x22f   : > { %v1620_v41 = vpop.f32.mrf.mxu2  ;;  %2751 = vmatmul.msk.bf16.vlgmr.msrb.gmra.mxu0 %vm389_vm14, %v2750_v23  ;;  %v2563_v23 = vld [vmem:[%s4351_s3] sm:$0xf] }
 0x230   : > { %v1637_v45 = vadd.f32 %v1620_v41, %v1553_v44  ;;  %2566 = vperm.xlu2 %2794, %v2563_v23  }
 0x231   : > { %v2353_v0 = vpop.permute.xlu2 %2352 }
 0x235   : > { %v1635_v27 = vpop.f32.mrf.mxu3 }
 0x237   : > { %v1622_v46 = vpop.f32.mrf.mxu2 }
 0x23a   : > { %v2437_v25 = vpop.permute.xlu2 %2436 }
 0x23d   : > { %v1717_v52 = vpop.f32.mrf.mxu1 }
 0x23e   : > { %v1722_v2 = vadd.f32 %v1717_v52, %v1638_v32  ;;  %v1704_v1 = vpop.f32.mrf.mxu0 }
 0x23f   : > { %v1721_v53 = vadd.f32 %v1704_v1, %v1637_v45 }
 0x240   : > { %v2271_v48 = vpop.permute.xlu0 %2270 }
 0x241   : > { %v2273_v54 = vsel %vm4596_vm6, %v2269_v33, %v2271_v48  ;;  %v2267_v55 = vpop.permute.xlu1 %2266 }
 0x242   : > { %v2281_v58 = vsel %vm393_vm5, %v2273_v54, 0  ;;  %v2272_v42 = vsel %vm4597_vm11, %v2267_v55, %v2269_v33 }
 0x243   : > { %v2278_v60 = vsel %vm393_vm5, %v2272_v42, 0  ;;  %2303 = vmatpush.bf16.msrb.mxu3 %v2281_v58 }
 0x244   : > { %2290 = vmatpush.bf16.msrb.mxu2 %v2278_v60 }
 0x245   : > { %v1719_v5 = vpop.f32.mrf.mxu1 }
 0x246   : > { %2755 = vmatmul.msk.bf16.vlgmr.msrb.gmra.mxu3 %vm389_vm14, %v2753_v61  ;;  %v1706_v6 = vpop.f32.mrf.mxu0 }
 0x247   : > { %2754 = vmatmul.msk.bf16.vlgmr.msrb.gmra.mxu2 %vm389_vm14, %v2753_v61 }
 0x248   : > { %v2355_v7 = vpop.permute.xlu0 %2354 }
 0x249   : > { %v2357_v9 = vsel %vm4598_vm9, %v2353_v0, %v2355_v7  ;;  %v2351_v35 = vpop.permute.xlu1 %2350 }
 0x24a   : > { %v2365_v36 = vsel %vm393_vm5, %v2357_v9, 0  ;;  %v2356_v11 = vsel %vm4599_vm3, %v2351_v35, %v2353_v0 }
 0x24b   : > { %v2362_v13 = vsel %vm393_vm5, %v2356_v11, 0  ;;  %2387 = vmatpush.bf16.msra.mxu1 %v2365_v36 }
 0x24c   : > { %2374 = vmatpush.bf16.msra.mxu0 %v2362_v13  ;;  %v1801_v59 = vpop.f32.mrf.mxu3 }
 0x24d   : > { %v1806_v16 = vadd.f32 %v1801_v59, %v1722_v2 }
 0x24e   : > { %2758 = vmatmul.msk.bf16.vlgmr.msra.gmra.mxu1 %vm389_vm14, %v2756_v14  ;;  %v1872_v63 = vpop.f32.mrf.mxu0 }
 0x24f   : > { %2757 = vmatmul.msk.bf16.vlgmr.msra.gmra.mxu0 %vm389_vm14, %v2756_v14 }
 0x251   : > { %v2439_v17 = vpop.permute.xlu0 %2438 }
 0x252   : > { %v2441_v21 = vsel %vm4600_vm7, %v2437_v25, %v2439_v17  ;;  %v2435_v12 = vpop.permute.xlu1 %2434 }
 0x253   : > { %v2449_v49 = vsel %vm393_vm5, %v2441_v21, 0  ;;  %v2440_v18 = vsel %vm4601_vm15, %v2435_v12, %v2437_v25  ;;  %v1788_v3 = vpop.f32.mrf.mxu2 }
 0x254   : > { %v2446_v22 = vsel %vm393_vm5, %v2440_v18, 0  ;;  %2471 = vmatpush.bf16.msra.mxu3 %v2449_v49  ;;  %v1805_v20 = vadd.f32 %v1788_v3, %v1721_v53  ;;  %v1803_v28 = vpop.f32.mrf.mxu3 }
 0x255   : > { %2458 = vmatpush.bf16.msra.mxu2 %v2446_v22  ;;  %v1885_v56 = vpop.f32.mrf.mxu1 }
 0x256   : > { %v1890_v8 = vadd.f32 %v1885_v56, %v1806_v16  ;;  %v1889_v4 = vadd.f32 %v1872_v63, %v1805_v20  ;;  %v1874_v30 = vpop.f32.mrf.mxu0  ;;  %v2579_v63 = vld [vmem:[%s2881_s12] sm:$0xff] }
 0x257   : > { %2761 = vmatmul.msk.bf16.vlgmr.msra.gmra.mxu3 %vm389_vm14, %v2759_v19  ;;  %2581 = vst [vmem:[#allocation1] ss:$2 sm:$0xff] %v2579_v63 }
 0x258   : > { %2760 = vmatmul.msk.bf16.vlgmr.msra.gmra.mxu2 %vm389_vm14, %v2759_v19 }
 0x25b   : > { %v1790_v51 = vpop.f32.mrf.mxu2 }
 0x25d   : > { %v1887_v47 = vpop.f32.mrf.mxu1 }
 0x25e   : > { %v2583_v30 = vld.sshfl [vmem:[#allocation1 + $0x8] sm:$0xff pattern:$0x75316420]  ;;  %v2582_v51 = vld.sshfl [vmem:[#allocation1] sm:$0xff pattern:$0x75316420] }
 0x271   : > { %v2521_v10 = vpop.permute.xlu2 %2520 }
 0x288   : > { %v2523_v57 = vpop.permute.xlu0 %2522 }
 0x289   : > { %v2525_v43 = vsel %vm4602_vm1, %v2521_v10, %v2523_v57  ;;  %v2519_v50 = vpop.permute.xlu1 %2518 }
 0x28a   : > { %v2533_v29 = vsel %vm393_vm5, %v2525_v43, 0  ;;  %v2524_v24 = vsel %vm4603_vm0, %v2519_v50, %v2521_v10  ;;  %v2567_v22 = vpop.permute.xlu2 %2566 }
 0x28b   : > { %v2530_v26 = vsel %vm393_vm5, %v2524_v24, 0  ;;  %v1956_v31 = vpop.f32.mrf.mxu2  ;;  %v1969_v34 = vpop.f32.mrf.mxu3  ;;  %2555 = vmatpush.bf16.msrb.mxu1 %v2533_v29 }
 0x28c   : > { %v1973_v38 = vadd.f32 %v1956_v31, %v1889_v4  ;;  %v1974_v39 = vadd.f32 %v1969_v34, %v1890_v8  ;;  %2542 = vmatpush.bf16.msrb.mxu0 %v2530_v26 }
 0x28d   : > { %v2053_v44 = vpop.f32.mrf.mxu1 }
 0x28e   : > { %v2058_v15 = vadd.f32 %v2053_v44, %v1974_v39  ;;  %2764 = vmatmul.msk.bf16.vlgmr.msrb.gmra.mxu1 %vm389_vm14, %v2762_v37 }
 0x28f   : > { %2763 = vmatmul.msk.bf16.vlgmr.msrb.gmra.mxu0 %vm389_vm14, %v2762_v37 }
 0x293   : > { %v1971_v40 = vpop.f32.mrf.mxu3  ;;  %v1958_v41 = vpop.f32.mrf.mxu2 }
 0x294   : > { %v2575_v56 = vpop.permute.xlu0 %2574 }
 0x295   : > { %v2040_v27 = vpop.f32.mrf.mxu0  ;;  %v2055_v32 = vpop.f32.mrf.mxu1 }
 0x296   : > { %v2057_v45 = vadd.f32 %v2040_v27, %v1973_v38 }
 0x29b   : > { %v2137_v46 = vpop.f32.mrf.mxu3 }
 0x29c   : > { %v2142_v33 = vadd.f32 %v2137_v46, %v2058_v15 }
 0x29d   : > { %v2042_v52 = vpop.f32.mrf.mxu0 }
 0x2a3   : > { %v2124_v2 = vpop.f32.mrf.mxu2  ;;  %v2139_v1 = vpop.f32.mrf.mxu3 }
 0x2a4   : > { %v2141_v53 = vadd.f32 %v2124_v2, %v2057_v45 }
 0x2ab   : > { %v2126_v48 = vpop.f32.mrf.mxu2  ;;  %v2221_v54 = vpop.f32.mrf.mxu1 }
 0x2ac   : > { %v2226_v55 = vadd.f32 %v2221_v54, %v2142_v33  ;;  %v2208_v58 = vpop.f32.mrf.mxu0 }
 0x2ad   : > { %v2225_v42 = vadd.f32 %v2208_v58, %v2141_v53 }
 0x2b3   : > { %v2223_v60 = vpop.f32.mrf.mxu1 }
 0x2b4   : > { %v2210_v61 = vpop.f32.mrf.mxu0 }
 0x2c9   : > { %v2305_v0 = vpop.f32.mrf.mxu3 }
 0x2ca   : > { %v2292_v5 = vpop.f32.mrf.mxu2  ;;  %v2310_v25 = vadd.f32 %v2305_v0, %v2226_v55 }
 0x2cb   : > { %v2389_v6 = vpop.f32.mrf.mxu1  ;;  %v2309_v17 = vadd.f32 %v2292_v5, %v2225_v42 }
 0x2cc   : > { %v2376_v7 = vpop.f32.mrf.mxu0  ;;  %v2394_v21 = vadd.f32 %v2389_v6, %v2310_v25 }
 0x2cd   : > { %v2393_v12 = vadd.f32 %v2376_v7, %v2309_v17 }
 0x2d1   : > { %v2307_v9 = vpop.f32.mrf.mxu3 }
 0x2d2   : > { %v2294_v35 = vpop.f32.mrf.mxu2 }
 0x2d3   : > { %v2391_v36 = vpop.f32.mrf.mxu1 }
 0x2d4   : > { %v2378_v11 = vpop.f32.mrf.mxu0 }
 0x2da   : > { %v2473_v13 = vpop.f32.mrf.mxu3 }
 0x2db   : > { %v2460_v14 = vpop.f32.mrf.mxu2  ;;  %v2478_v49 = vadd.f32 %v2473_v13, %v2394_v21 }
 0x2dc   : > { %v2477_v18 = vadd.f32 %v2460_v14, %v2393_v12 }
 0x2e2   : > { %v2475_v59 = vpop.f32.mrf.mxu3 }
 0x2e3   : > { %v2462_v16 = vpop.f32.mrf.mxu2 }
 0x30b   : > { %v2557_v3 = vpop.f32.mrf.mxu1 }
 0x30c   : > { %v2562_v19 = vadd.f32 %v2557_v3, %v2478_v49  ;;  %v2544_v20 = vpop.f32.mrf.mxu0 }
 0x30d   : > { %v2561_v28 = vadd.f32 %v2544_v20, %v2477_v18 }
 0x30e   : > { %v2570_v8 = vmul.f32 %v2567_v22, %v2562_v19 }
 0x30f   : > { %v2569_v4 = vmul.f32 %v2567_v22, %v2561_v28 }
 0x310   : > { %v2578_v47 = vadd.f32 %v2575_v56, %v2570_v8 }
 0x311   : > { %v2577_v62 = vadd.f32 %v2575_v56, %v2569_v4 }
 0x312   : > { %v2587_v10 = vadd.f32 %v2583_v30, %v2578_v47 }
 0x313   : > { %v2586_v57 = vadd.f32 %v2582_v51, %v2577_v62  ;;  %v2559_v43 = vpop.f32.mrf.mxu1 }
 0x314   : > { %v2589_v50 = vmax.f32 %v2587_v10, 0.0  ;;  %v2546_v29 = vpop.f32.mrf.mxu0 }
 0x315   : > { %v2588_v24 = vmax.f32 %v2586_v57, 0.0 }
 0x316   : > { %v2592_v26 = vrot.slane %v2589_v50, 4 }
 0x318   : > { %v2593_v31 = vsel %vm393_vm5, %v2588_v24, %v2592_v26 }
 0x319   : > { %2595 = vst [vmem:[%s2886_s15] sm:$0xff] %v2593_v31 }
 0x31a PF: > { %s16_s21 = sadd.s32 1, %s2807_s21  }
 0x31b   : > { %p13_p4 = scmp.ge.s32.totalorder %s16_s21, 6  }
 0x31d   :  { %15 = sbr.rel (!%p13_p4) target bundleno = 1 (0x1), region = 127 }
 0x322   :  { %2618 = vsyncmov [#allocation3] }
 0x325   :  { %s2619_s12 = vpop.sfrf %2618 }
 0x326   :  { %p2767_p5 = scmp.ne.s32.totalorder %s2619_s12, 0 }
 0x328   :  { %2623 = shalt.err (%p2767_p5)  }

// kernel: a_call__.5
= control target key start
LH: loop header
LB: loop body
LE: loop exit
PB: predicated region body
PF: predicated region fallthrough
CT: control target
= control target key end

     0   :  { %s2788_s18 = smov 0   ;;  %s4310_s0 = inlined_call_operand.vmem [shape: bf16[27,4,8], index: 0, kind: input, shape index: {}]   ;;  %s4311_s1 = inlined_call_operand.vmem [shape: bf16[8,1280], index: 1, kind: input, shape index: {}]   ;;  %s4312_s2 = inlined_call_operand.vmem [shape: s32[1,1024], index: 2, kind: input, shape index: {}]   ;;  %s4313_s3 = inlined_call_operand.vmem [shape: f32[4,1], index: 3, kind: input, shape index: {}]   ;;  %s4314_s4 = inlined_call_operand.vmem [shape: f32[4,1], index: 4, kind: input, shape index: {}]   ;;  %s4315_s5 = inlined_call_operand.vmem [shape: bf16[4,1024], index: 5, kind: output, shape index: {}]  }
   0x1 LB: > { %s2606_s19 = sadd.s32 4294967295, %s2738_s18   ;;  %p2610_p0 = scmp.ge.s32.totalorder %s2738_s18, 1  ;;  %s2738_s18 = sphi %s2788_s18, %s15_s18  }
   0x2   : > { %p187_p1 = scmp.lt.s32.totalorder %s2738_s18, 5 }
   0x4   : > { %p188_p2 = pnand %p2610_p0, %p187_p1 }
   0x5   : > { %s2611_s20 = sshll.u32 (!%p188_p2), %s2606_s19, 1  ;;  %s2614_s21 = sshll.u32 (!%p188_p2), %s2606_s19, 8 }
   0x6   : > { %191 = sbr.rel (%p188_p2) target bundleno = 789 (0x315), region = 40  ;;  %p215_p3 = scmp.lt.s32.totalorder (!%p188_p2), %s2611_s20, 7 }
   0x7   : > { %s229_s22 = sshra.s32 (!%p188_p2), %s2614_s21, 7 }
   0x8   : > { %s2615_s23 = sshll.u32 (!%p188_p2), %s229_s22, 2 }
   0x9   : > { %s232_s26 = scalar_lea.vmem (!%p188_p2), %s4311_s1, %s2615_s23 }
   0xb   : > { %s4580_s20 = smov (!%p215_p3, %s2611_s20), 7  ;;  %v243_v0 = vld [vmem:[%s232_s26] sm:$0xff]  ;;  %v245_v1 = vld [vmem:[%s232_s26 + $0x8] sm:$0xff] }
   0xc   : > { %s2802_s29 = scalar_lea.vmem %s4312_s2, %s4580_s20  ;;  %s2613_s30 = sshll.u32 %s4580_s20, 1  ;;  %244 = vst [vmem:[#allocation2] sm:$0xff] %v243_v0 }
   0xd   : > { %s2807_s8 = scalar_lea.vmem %s4315_s5, %s2613_s30  ;;  %246 = vst [vmem:[#allocation2 + $0x8] sm:$0xff] %v245_v1 }
   0xe   : > { %252 = vsyncadd [#allocation3], 256 }
   0xf   : > { %2734 = dma.done.wait [#allocation3], 256 }
  0x10   : > { %2735 = vsyncadd [#allocation3], 4294967040  ;;  %v2740_v2 = vmov 0   ;;  %v2812_v3 = vld [vmem:[%s2802_s29] sm:$0x3]  ;;  %s2741_s9 = smov 57  }
  0x11   : > { %2726 = vset.pattern.permute.xlu0 %v2740_v2  ;;  %2725 = vset.pattern.permute.xlu2 %v2740_v2  ;;  %v429_v4 = vand.u32 75, %v2812_v3  ;;  %v291_v5 = vand.u32 11, %v2812_v3  ;;  %v515_v6 = vand.u32 35, %v2812_v3  ;;  %v258_v7 = vand.u32 43, %v2812_v3  ;;  %s2742_s10 = smov 56   ;;  %s2743_s11 = smov 63  }
  0x12   : > { %v770_v8 = vand.u32 51, %v2812_v3  ;;  %v854_v9 = vand.u32 19, %v2812_v3  ;;  %v601_v10 = vand.u32 3, %v2812_v3  ;;  %v686_v11 = vand.u32 67, %v2812_v3  ;;  %s2744_s12 = smov 64   ;;  %s2745_s13 = smov 55  }
  0x13   : > { %vm430_vm0 = vcmp.eq.s32.totalorder %v429_v4, 75  ;;  %vm292_vm1 = vcmp.eq.s32.totalorder %v291_v5, 11  ;;  %vm516_vm2 = vcmp.eq.s32.totalorder %v515_v6, 35  ;;  %vm259_vm3 = vcmp.eq.s32.totalorder %v258_v7, 43  ;;  %s2746_s14 = smov 72   ;;  %s2747_s15 = smov 65  }
  0x14   : > { %v431_v12 = vsel %vm430_vm0, 1, %v2740_v2  ;;  %v293_v13 = vsel %vm292_vm1, 1, %v2740_v2  ;;  %v517_v14 = vsel %vm516_vm2, 1, %v2740_v2  ;;  %v262_v15 = vsel %vm259_vm3, 1, %v2740_v2  ;;  %s2748_s16 = smov 71   ;;  %s2749_s17 = smov 73  }
  0x15   : > { %v432_v16 = vperm.slane %v431_v12, 0  ;;  %v433_v17 = vperm.slane %v431_v12, 1  ;;  %v294_v18 = vperm.slane %v293_v13, 0  ;;  %v295_v19 = vperm.slane %v293_v13, 1  ;;  %s2750_s19 = smov 120   ;;  %s2751_s20 = smov 119  }
  0x16   : > { %v518_v20 = vperm.slane %v517_v14, 0  ;;  %v519_v21 = vperm.slane %v517_v14, 1  ;;  %v263_v22 = vperm.slane %v262_v15, 0  ;;  %v264_v23 = vperm.slane %v262_v15, 1  ;;  %s2752_s21 = smov 121   ;;  %s2753_s22 = smov 127  }
  0x17   : > { %vm434_vm4 = vcmp.eq.s32.totalorder %v432_v16, 1  ;;  %vm435_vm5 = vcmp.eq.s32.totalorder %v433_v17, 1  ;;  %vm296_vm6 = vcmp.eq.s32.totalorder %v294_v18, 1  ;;  %vm297_vm7 = vcmp.eq.s32.totalorder %v295_v19, 1  ;;  %s2754_s23 = smov 7   ;;  %s2755_s24 = smov 1  }
  0x18   : > { %vm436_vm8 = vmpackc.low %vm435_vm5, %vm434_vm4  ;;  %vm2826_vm9 = vcmp.eq.s32.totalorder %v518_v20, 1  ;;  %vm2830_vm10 = vcmp.eq.s32.totalorder %v519_v21, 1  ;;  %vm2834_vm11 = vcmp.eq.s32.totalorder %v263_v22, 1  ;;  %vm2838_vm12 = vcmp.eq.s32.totalorder %v264_v23, 1  ;;  %v3010_v53 = vld [vmem:[#allocation2 + $0x8] sm:$0xf] }
  0x19   : > { %v437_v28 = vsel %vm436_vm8, 65537, %v2740_v2  ;;  %vm298_vm13 = vmpackc.low %vm297_vm7, %vm296_vm6  ;;  %vm771_vm14 = vcmp.eq.s32.totalorder %v770_v8, 51  ;;  %vm855_vm15 = vcmp.eq.s32.totalorder %v854_v9, 19  ;;  %vm602_vm0 = vcmp.eq.s32.totalorder %v601_v10, 3  ;;  %s2756_s25 = smov 9   ;;  %s2757_s26 = smov 8  }
  0x1a   : > { %438 = vrot.lane.b32.xlu1 %v437_v28, %s2741_s9  ;;  %v299_v29 = vsel %vm298_vm13, 65537, %v2740_v2  ;;  %vm522_vm1 = vmpackc.low %vm2830_vm10, %vm2826_vm9  ;;  %v772_v30 = vsel %vm771_vm14, 1, %v2740_v2  ;;  %v856_v31 = vsel %vm855_vm15, 1, %v2740_v2  ;;  %v603_v32 = vsel %vm602_vm0, 1, %v2740_v2 }
  0x1b   : > { %300 = vrot.lane.b32.xlu0 %v299_v29, %s2742_s10  ;;  %vm267_vm2 = vmpackc.low %vm2838_vm12, %vm2834_vm11  ;;  %v857_v33 = vperm.slane %v856_v31, 0  ;;  %v858_v34 = vperm.slane %v856_v31, 1  ;;  %v604_v35 = vperm.slane %v603_v32, 0  ;;  %v605_v36 = vperm.slane %v603_v32, 1 }
  0x1c   : > { %v523_v37 = vsel %vm522_vm1, 65537, %v2740_v2  ;;  %v773_v38 = vperm.slane %v772_v30, 0  ;;  %vm687_vm3 = vcmp.eq.s32.totalorder %v686_v11, 67  ;;  %v774_v39 = vperm.slane %v772_v30, 1 }
  0x1d   : > { %vm606_vm4 = vcmp.eq.s32.totalorder %v604_v35, 1  ;;  %vm607_vm5 = vcmp.eq.s32.totalorder %v605_v36, 1  ;;  %v688_v40 = vsel %vm687_vm3, 1, %v2740_v2  ;;  %v268_v41 = vsel %vm267_vm2, 65537, %v2740_v2 }
  0x1e   : > { %v689_v42 = vperm.slane %v688_v40, 0  ;;  %v690_v43 = vperm.slane %v688_v40, 1  ;;  %v1022_v44 = vand.u32 41, %v2812_v3  ;;  %vm2861_vm6 = vcmp.eq.s32.totalorder %v857_v33, 1  ;;  %vm608_vm8 = vmpackc.low %vm607_vm5, %vm606_vm4 }
  0x1f   : > { %vm2865_vm7 = vcmp.eq.s32.totalorder %v858_v34, 1  ;;  %v938_v47 = vand.u32 83, %v2812_v3  ;;  %v1108_v48 = vand.u32 9, %v2812_v3  ;;  %v609_v49 = vsel %vm608_vm8, 65537, %v2740_v2 }
  0x20   : > { %vm2872_vm9 = vcmp.eq.s32.totalorder %v689_v42, 1  ;;  %vm2876_vm10 = vcmp.eq.s32.totalorder %v690_v43, 1  ;;  %vm1023_vm11 = vcmp.eq.s32.totalorder %v1022_v44, 41  ;;  %vm2881_vm12 = vcmp.eq.s32.totalorder %v773_v38, 1  ;;  %610 = vrot.lane.b32.xlu2 %v609_v49, %s2744_s12  ;;  %vm861_vm0 = vmpackc.low %vm2865_vm7, %vm2861_vm6 }
  0x21   : > { %vm2885_vm13 = vcmp.eq.s32.totalorder %v774_v39, 1  ;;  %vm939_vm14 = vcmp.eq.s32.totalorder %v938_v47, 83  ;;  %vm1109_vm15 = vcmp.eq.s32.totalorder %v1108_v48, 9  ;;  %v1024_v54 = vsel %vm1023_vm11, 1, %v2740_v2  ;;  %vm693_vm1 = vmpackc.low %vm2876_vm10, %vm2872_vm9 }
  0x22   : > { %524 = vrot.lane.b32.xlu1 %v523_v37, %s2743_s11  ;;  %v940_v55 = vsel %vm939_vm14, 1, %v2740_v2  ;;  %v1194_v56 = vand.u32 73, %v2812_v3  ;;  %v1110_v59 = vsel %vm1109_vm15, 1, %v2740_v2  ;;  %vm777_vm2 = vmpackc.low %vm2885_vm13, %vm2881_vm12  ;;  %v1025_v62 = vperm.slane %v1024_v54, 0 }
  0x23   : > { %269 = vrot.lane.b32.xlu0 %v268_v41, %s2745_s13  ;;  %v941_v57 = vperm.slane %v940_v55, 0  ;;  %v942_v58 = vperm.slane %v940_v55, 1  ;;  %v1111_v60 = vperm.slane %v1110_v59, 0  ;;  %v1112_v61 = vperm.slane %v1110_v59, 1 }
  0x24   : > { %v1026_v63 = vperm.slane %v1024_v54, 1  ;;  %v862_v0 = vsel %vm861_vm0, 65537, %v2740_v2  ;;  %v694_v1 = vsel %vm693_vm1, 65537, %v2740_v2  ;;  %vm1195_vm3 = vcmp.eq.s32.totalorder %v1194_v56, 73 }
  0x25   : > { %v1280_v4 = vand.u32 33, %v2812_v3  ;;  %v778_v5 = vsel %vm777_vm2, 65537, %v2740_v2  ;;  %vm2911_vm4 = vcmp.eq.s32.totalorder %v941_v57, 1  ;;  %vm2915_vm5 = vcmp.eq.s32.totalorder %v942_v58, 1 }
  0x26   : > { %vm2919_vm6 = vcmp.eq.s32.totalorder %v1111_v60, 1  ;;  %vm2923_vm7 = vcmp.eq.s32.totalorder %v1112_v61, 1  ;;  %vm2929_vm9 = vcmp.eq.s32.totalorder %v1025_v62, 1  ;;  %vm1028_vm10 = vcmp.eq.s32.totalorder %v1026_v63, 1  ;;  %vm945_vm11 = vmpackc.low %vm2915_vm5, %vm2911_vm4 }
  0x27   : > { %vm1281_vm8 = vcmp.eq.s32.totalorder %v1280_v4, 33  ;;  %v1196_v11 = vsel %vm1195_vm3, 1, %v2740_v2  ;;  %vm1115_vm12 = vmpackc.low %vm2923_vm7, %vm2919_vm6  ;;  %v946_v17 = vsel %vm945_vm11, 65537, %v2740_v2  ;;  %v1506_v22 = vand.u32 49, %v2812_v3 }
  0x28   : > { %695 = vrot.lane.b32.xlu2 %v694_v1, %s2747_s15  ;;  %v1282_v12 = vsel %vm1281_vm8, 1, %v2740_v2  ;;  %vm1029_vm13 = vmpackc.low %vm1028_vm10, %vm2929_vm9  ;;  %v1197_v13 = vperm.slane %v1196_v11, 0  ;;  %v1198_v14 = vperm.slane %v1196_v11, 1  ;;  %v1116_v18 = vsel %vm1115_vm12, 65537, %v2740_v2 }
  0x29   : > { %v1283_v15 = vperm.slane %v1282_v12, 0  ;;  %v1284_v16 = vperm.slane %v1282_v12, 1  ;;  %v1030_v19 = vsel %vm1029_vm13, 65537, %v2740_v2  ;;  %v1420_v23 = vand.u32 65, %v2812_v3 }
  0x2a   : > { %863 = vrot.lane.b32.xlu1 %v862_v0, %s2746_s14  ;;  %vm1199_vm14 = vcmp.eq.s32.totalorder %v1197_v13, 1  ;;  %vm1200_vm15 = vcmp.eq.s32.totalorder %v1198_v14, 1  ;;  %vm1507_vm4 = vcmp.eq.s32.totalorder %v1506_v22, 49  ;;  %v2979_v40 = vunpack.c.l.b16 %v2740_v2 }
  0x2b   : > { %779 = vrot.lane.b32.xlu0 %v778_v5, %s2748_s16  ;;  %vm1285_vm0 = vcmp.eq.s32.totalorder %v1283_v15, 1  ;;  %vm1286_vm1 = vcmp.eq.s32.totalorder %v1284_v16, 1  ;;  %vm1201_vm2 = vmpackc.low %vm1200_vm15, %vm1199_vm14  ;;  %v1508_v24 = vsel %vm1507_vm4, 1, %v2740_v2  ;;  %vm1421_vm5 = vcmp.eq.s32.totalorder %v1420_v23, 65 }
  0x2c   : > { %vm1287_vm3 = vmpackc.low %vm1286_vm1, %vm1285_vm0  ;;  %v1202_v20 = vsel %vm1201_vm2, 65537, %v2740_v2  ;;  %v1509_v25 = vperm.slane %v1508_v24, 0  ;;  %v1510_v26 = vperm.slane %v1508_v24, 1  ;;  %v1424_v27 = vsel %vm1421_vm5, 1, %v2740_v2 }
  0x2d   : > { %v1288_v21 = vsel %vm1287_vm3, 65537, %v2740_v2  ;;  %v1425_v28 = vperm.slane %v1424_v27, 0  ;;  %v1426_v29 = vperm.slane %v1424_v27, 1  ;;  %v2982_v41 = vunpack.c.h.b16 %v2740_v2 }
  0x2e   : > { %vm1511_vm6 = vcmp.eq.s32.totalorder %v1509_v25, 1  ;;  %vm1512_vm7 = vcmp.eq.s32.totalorder %v1510_v26, 1  ;;  %vm4317_vm12 = vcmask 457728   ;;  %vm4320_vm5 = vcmask 449536  }
  0x2f   : > { %vm1513_vm8 = vmpackc.low %vm1512_vm7, %vm1511_vm6  ;;  %vm1427_vm9 = vcmp.eq.s32.totalorder %v1425_v28, 1  ;;  %vm1428_vm10 = vcmp.eq.s32.totalorder %v1426_v29, 1 }
  0x30   : > { %947 = vrot.lane.b32.xlu2 %v946_v17, %s2749_s17  ;;  %v1514_v30 = vsel %vm1513_vm8, 65537, %v2740_v2  ;;  %vm1429_vm11 = vmpackc.low %vm1428_vm10, %vm1427_vm9 }
  0x31   : > { %v1430_v31 = vsel %vm1429_vm11, 65537, %v2740_v2 }
  0x32   : > { %1117 = vrot.lane.b32.xlu1 %v1116_v18, %s2750_s19 }
  0x33   : > { %1031 = vrot.lane.b32.xlu0 %v1030_v19, %s2751_s20 }
  0x38   : > { %1203 = vrot.lane.b32.xlu2 %v1202_v20, %s2752_s21 }
  0x3a   : > { %1431 = vrot.lane.b32.xlu1 %v1430_v31, %s2755_s24  ;;  %v3113_v31 = vld [vmem:[#allocation2] sm:$0xff] }
  0x3b   : > { %1289 = vrot.lane.b32.xlu0 %v1288_v21, %s2753_s22 }
  0x40   : > { %1515 = vrot.lane.b32.xlu2 %v1514_v30, %s2754_s23 }
  0x7a   : > { %v2964_v32 = vpop.permute.xlu2 %610 }
  0x7b   : > { %v2987_v45 = vrot.slane %v2964_v32, 4 }
  0x7d   : > { %v622_v54 = vunpack.c.l.b16 %v2987_v45  ;;  %v623_v55 = vunpack.c.h.b16 %v2987_v45 }
  0x7f   : > { %vm3051_vm7 = vcmp.ne.s32.totalorder %v622_v54, %v2979_v40  ;;  %vm3056_vm8 = vcmp.ne.s32.totalorder %v623_v55, %v2982_v41 }
  0x82   : > { %v2966_v33 = vpop.permute.xlu2 %695 }
  0x83   : > { %v2969_v34 = vrot.slane %v2966_v33, 4 }
  0x85   : > { %v706_v38 = vunpack.c.l.b16 %v2969_v34  ;;  %v707_v39 = vunpack.c.h.b16 %v2969_v34 }
  0x87   : > { %vm2990_vm13 = vcmp.ne.s32.totalorder %v706_v38, %v2979_v40  ;;  %vm2995_vm14 = vcmp.ne.s32.totalorder %v707_v39, %v2982_v41 }
  0x88   : > { %vm712_vm3 = vmpackc.low %vm2995_vm14, %vm2990_vm13 }
  0x89   : > { %v714_v7 = vsel %vm712_vm3, %v3010_v53, 0  ;;  %vm628_vm14 = vmpackc.low %vm3056_vm8, %vm3051_vm7 }
  0x8a   : > { %v3037_v63 = vpop.permute.xlu2 %947  ;;  %v721_v17 = vunpack.c.l.b16 %v714_v7  ;;  %v630_v49 = vsel %vm628_vm14, %v3010_v53, 0 }
  0x8b   : > { %v3048_v9 = vrot.slane %v3037_v63, 4 }
  0x8c   : > { %v2971_v35 = vpop.permute.xlu1 %438  ;;  %v724_v28 = vpack.c.b16 %v721_v17, %v721_v17 }
  0x8d   : > { %v2974_v36 = vrot.slane %v2971_v35, 4  ;;  %v301_v37 = vpop.permute.xlu0 %300  ;;  %v958_v26 = vunpack.c.l.b16 %v3048_v9  ;;  %v959_v30 = vunpack.c.h.b16 %v3048_v9 }
  0x8e   : > { %v302_v42 = vrot.slane %v301_v37, 4 }
  0x8f   : > { %v450_v43 = vunpack.c.l.b16 %v2974_v36  ;;  %v451_v44 = vunpack.c.h.b16 %v2974_v36 }
  0x90   : > { %v312_v46 = vunpack.c.l.b16 %v302_v42  ;;  %v313_v47 = vunpack.c.h.b16 %v302_v42  ;;  %v304_v50 = vsel %vm4317_vm12, %v302_v42, %v301_v37 }
  0x91   : > { %vm3001_vm15 = vcmp.ne.s32.totalorder %v450_v43, %v2979_v40  ;;  %vm3006_vm0 = vcmp.ne.s32.totalorder %v451_v44, %v2982_v41  ;;  %v305_v59 = vunpack.c.l.b16 %v304_v50  ;;  %v306_v60 = vunpack.c.h.b16 %v304_v50 }
  0x92   : > { %vm3017_vm1 = vcmp.ne.s32.totalorder %v312_v46, %v2979_v40  ;;  %vm3022_vm2 = vcmp.ne.s32.totalorder %v313_v47, %v2982_v41  ;;  %vm456_vm4 = vmpackc.low %vm3006_vm0, %vm3001_vm15 }
  0x93   : > { %v458_v1 = vsel %vm456_vm4, %v3010_v53, 0  ;;  %vm318_vm6 = vmpackc.low %vm3022_vm2, %vm3017_vm1  ;;  %vm3061_vm9 = vcmp.ne.s32.totalorder %v305_v59, %v2979_v40  ;;  %vm3066_vm10 = vcmp.ne.s32.totalorder %v306_v60, %v2982_v41  ;;  %vm3137_vm4 = vcmp.ne.s32.totalorder %v958_v26, %v2979_v40 }
  0x94   : > { %v3014_v56 = vpop.permute.xlu1 %524  ;;  %v465_v6 = vunpack.c.l.b16 %v458_v1  ;;  %v320_v16 = vsel %vm318_vm6, %v3010_v53, 0  ;;  %vm311_vm15 = vmpackc.low %vm3066_vm10, %vm3061_vm9  ;;  %vm3144_vm6 = vcmp.ne.s32.totalorder %v959_v30, %v2982_v41  ;;  %v1758_v59 = vand.u32 45, %v2812_v3 }
  0x95   : > { %v3031_v61 = vrot.slane %v3014_v56, 4  ;;  %v270_v62 = vpop.permute.xlu0 %269  ;;  %v327_v19 = vunpack.c.l.b16 %v320_v16  ;;  %v3128_v48 = vsel %vm311_vm15, %v3113_v31, 0 }
  0x96   : > { %v271_v0 = vrot.slane %v270_v62, 4  ;;  %v468_v15 = vpack.c.b16 %v465_v6, %v465_v6  ;;  %v3283_v6 = vpop.permute.xlu2 %1203 }
  0x97   : > { %v536_v4 = vunpack.c.l.b16 %v3031_v61  ;;  %v537_v5 = vunpack.c.h.b16 %v3031_v61  ;;  %v330_v23 = vpack.c.b16 %v327_v19, %v327_v19 }
  0x98   : > { %v281_v8 = vunpack.c.l.b16 %v271_v0  ;;  %v282_v14 = vunpack.c.h.b16 %v271_v0  ;;  %473 = vrot.lane.b32.xlu2 %v468_v15, %s2748_s16  ;;  %v273_v20 = vsel %vm4320_vm5, %v271_v0, %v270_v62  ;;  %v637_v62 = vunpack.c.l.b16 %v630_v49 }
  0x99   : > { %vm3072_vm11 = vcmp.ne.s32.totalorder %v536_v4, %v2979_v40  ;;  %vm541_vm13 = vcmp.ne.s32.totalorder %v537_v5, %v2982_v41  ;;  %v274_v37 = vunpack.c.l.b16 %v273_v20  ;;  %v275_v38 = vunpack.c.h.b16 %v273_v20  ;;  %335 = vrot.lane.b32.xlu0 %v330_v23, %s2746_s14 }
  0x9a   : > { %vm3088_vm0 = vcmp.ne.s32.totalorder %v281_v8, %v2979_v40  ;;  %vm3093_vm1 = vcmp.ne.s32.totalorder %v282_v14, %v2982_v41  ;;  %vm542_vm2 = vmpackc.low %vm541_vm13, %vm3072_vm11  ;;  %v326_v0 = vunpack.c.h.b16 %v3128_v48  ;;  %v640_v8 = vpack.c.b16 %v637_v62, %v637_v62 }
  0x9b   : > { %v544_v29 = vsel %vm542_vm2, %v3010_v53, 0  ;;  %vm287_vm3 = vmpackc.low %vm3093_vm1, %vm3088_vm0  ;;  %vm3156_vm9 = vcmp.ne.s32.totalorder %v274_v37, %v2979_v40  ;;  %vm3161_vm10 = vcmp.ne.s32.totalorder %v275_v38, %v2982_v41  ;;  %vm4316_vm2 = vcmask 515072  }
  0x9c   : > { %v3101_v25 = vpop.permute.xlu1 %863  ;;  %v551_v39 = vunpack.c.l.b16 %v544_v29  ;;  %v289_v42 = vsel %vm287_vm3, %v3010_v53, 0  ;;  %vm964_vm11 = vmpackc.low %vm3144_vm6, %vm3137_vm4  ;;  %v329_v13 = vpack.c.b16 %v326_v0, %v326_v0  ;;  %vm4319_vm6 = vcmask 465920  }
  0x9d   : > { %v3097_v24 = vpop.permute.xlu0 %779  ;;  %v381_v46 = vunpack.c.l.b16 %v289_v42  ;;  %v3120_v47 = vrot.slane %v3101_v25, 4  ;;  %vm280_vm0 = vmpackc.low %vm3161_vm10, %vm3156_vm9  ;;  %v966_v14 = vsel %vm964_vm11, %v3010_v53, 0  ;;  %v528_v21 = vsel %vm4316_vm2, %v3031_v61, %v3014_v56 }
  0x9e   : > { %v3105_v27 = vrot.slane %v3097_v24, 4  ;;  %v554_v57 = vpack.c.b16 %v551_v39, %v551_v39  ;;  %v288_v15 = vsel %vm280_vm0, %v3113_v31, 0  ;;  %v973_v19 = vunpack.c.l.b16 %v966_v14 }
  0x9f   : > { %v384_v51 = vpack.c.b16 %v381_v46, %v381_v46  ;;  %v874_v52 = vunpack.c.l.b16 %v3120_v47  ;;  %v875_v54 = vunpack.c.h.b16 %v3120_v47  ;;  %v379_v22 = vunpack.c.l.b16 %v288_v15 }
  0xa0   : > { %v790_v43 = vunpack.c.l.b16 %v3105_v27  ;;  %v791_v44 = vunpack.c.h.b16 %v3105_v27  ;;  %729 = vrot.lane.b32.xlu2 %v724_v28, %s2743_s11  ;;  %v442_v23 = vsel %vm4319_vm6, %v2974_v36, %v2971_v35  ;;  %v529_v28 = vunpack.c.l.b16 %v528_v21 }
  0xa1   : > { %389 = vrot.lane.b32.xlu1 %v384_v51, %s2749_s17  ;;  %vm3179_vm14 = vcmp.ne.s32.totalorder %v874_v52, %v2979_v40  ;;  %vm3184_vm15 = vcmp.ne.s32.totalorder %v875_v54, %v2982_v41  ;;  %559 = vrot.lane.b32.xlu0 %v554_v57, %s2747_s15  ;;  %v530_v29 = vunpack.c.h.b16 %v528_v21  ;;  %v976_v30 = vpack.c.b16 %v973_v19, %v973_v19 }
  0xa2   : > { %vm3150_vm7 = vcmp.ne.s32.totalorder %v790_v43, %v2979_v40  ;;  %vm795_vm8 = vcmp.ne.s32.totalorder %v791_v44, %v2982_v41  ;;  %vm880_vm1 = vmpackc.low %vm3184_vm15, %vm3179_vm14  ;;  %v443_v56 = vunpack.c.l.b16 %v442_v23  ;;  %v444_v61 = vunpack.c.h.b16 %v442_v23 }
  0xa3   : > { %vm796_vm13 = vmpackc.low %vm795_vm8, %vm3150_vm7  ;;  %v882_v20 = vsel %vm880_vm1, %v3010_v53, 0  ;;  %vm4318_vm8 = vcmask 523264   ;;  %v382_v38 = vpack.c.b16 %v379_v22, %v379_v22  ;;  %vm3232_vm9 = vcmp.ne.s32.totalorder %v529_v28, %v2979_v40 }
  0xa4   : > { %v798_v7 = vsel %vm796_vm13, %v3010_v53, 0  ;;  %v889_v26 = vunpack.c.l.b16 %v882_v20  ;;  %v614_v39 = vsel %vm4318_vm8, %v2987_v45, %v2964_v32  ;;  %vm3237_vm10 = vcmp.ne.s32.totalorder %v530_v29, %v2982_v41 }
  0xa5   : > { %v3167_v1 = vpop.permute.xlu0 %1031  ;;  %v805_v10 = vunpack.c.l.b16 %v798_v7  ;;  %vm3243_vm11 = vcmp.ne.s32.totalorder %v443_v56, %v2979_v40  ;;  %vm3248_vm13 = vcmp.ne.s32.totalorder %v444_v61, %v2982_v41  ;;  %v615_v45 = vunpack.c.l.b16 %v614_v39  ;;  %vm535_vm14 = vmpackc.low %vm3237_vm10, %vm3232_vm9 }
  0xa6   : > { %v3176_v4 = vrot.slane %v3167_v1, 4  ;;  %v892_v42 = vpack.c.b16 %v889_v26, %v889_v26  ;;  %v616_v46 = vunpack.c.h.b16 %v614_v39  ;;  %v325_v49 = vunpack.c.l.b16 %v3128_v48  ;;  %vm449_vm15 = vmpackc.low %vm3248_vm13, %vm3243_vm11 }
  0xa7   : > { %v808_v18 = vpack.c.b16 %v805_v10, %v805_v10  ;;  %v1590_v51 = vand.u32 17, %v2812_v3  ;;  %v380_v52 = vunpack.c.h.b16 %v288_v15  ;;  %vm3264_vm0 = vcmp.ne.s32.totalorder %v615_v45, %v2979_v40 }
  0xa8   : > { %v1043_v11 = vunpack.c.l.b16 %v3176_v4  ;;  %v1044_v12 = vunpack.c.h.b16 %v3176_v4  ;;  %333 = vrot.lane.b32.xlu2 %v329_v13, %s2746_s14  ;;  %vm3269_vm1 = vcmp.ne.s32.totalorder %v616_v46, %v2982_v41  ;;  %v328_v55 = vpack.c.b16 %v325_v49, %v325_v49 }
  0xa9   : > { %645 = vrot.lane.b32.xlu1 %v640_v8, %s2744_s12  ;;  %813 = vrot.lane.b32.xlu0 %v808_v18, %s2741_s9  ;;  %v543_v57 = vsel %vm535_vm14, %v3113_v31, 0  ;;  %v457_v58 = vsel %vm449_vm15, %v3113_v31, 0  ;;  %v383_v60 = vpack.c.b16 %v380_v52, %v380_v52  ;;  %v1674_v0 = vand.u32 81, %v2812_v3 }
  0xaa   : > { %vm3203_vm3 = vcmp.ne.s32.totalorder %v1043_v11, %v2979_v40  ;;  %vm3208_vm4 = vcmp.ne.s32.totalorder %v1044_v12, %v2982_v41  ;;  %v550_v62 = vunpack.c.h.b16 %v543_v57  ;;  %v464_v5 = vunpack.c.h.b16 %v457_v58 }
  0xab   : > { %vm1049_vm7 = vmpackc.low %vm3208_vm4, %vm3203_vm3  ;;  %vm1591_vm3 = vcmp.eq.s32.totalorder %v1590_v51, 17  ;;  %vm1759_vm9 = vcmp.eq.s32.totalorder %v1758_v59, 45  ;;  %v463_v10 = vunpack.c.l.b16 %v457_v58  ;;  %v3291_v12 = vrot.slane %v3283_v6, 4  ;;  %v3369_v51 = vpop.permute.xlu1 %1117 }
  0xac   : > { %v1051_v37 = vsel %vm1049_vm7, %v3010_v53, 0  ;;  %vm621_vm4 = vmpackc.low %vm3269_vm1, %vm3264_vm0  ;;  %v1592_v7 = vsel %vm1591_vm3, 1, %v2740_v2  ;;  %vm4326_vm7 = vcmask 580608   ;;  %v553_v11 = vpack.c.b16 %v550_v62, %v550_v62 }
  0xad   : > { %v1058_v35 = vunpack.c.l.b16 %v1051_v37  ;;  %v3288_v8 = vsel %vm621_vm4, %v3113_v31, 0  ;;  %vm1675_vm10 = vcmp.eq.s32.totalorder %v1674_v0, 81  ;;  %v467_v13 = vpack.c.b16 %v464_v5, %v464_v5 }
  0xae   : > { %v1593_v14 = vperm.slane %v1592_v7, 0  ;;  %v1594_v15 = vperm.slane %v1592_v7, 1  ;;  %v635_v16 = vunpack.c.l.b16 %v3288_v8  ;;  %v1760_v17 = vsel %vm1759_vm9, 1, %v2740_v2 }
  0xaf   : > { %v1061_v50 = vpack.c.b16 %v1058_v35, %v1058_v35  ;;  %vm4325_vm11 = vcmask 531456   ;;  %v782_v18 = vsel %vm4326_vm7, %v3105_v27, %v3097_v24  ;;  %v1676_v19 = vsel %vm1675_vm10, 1, %v2740_v2 }
  0xb0   : > { %385 = vrot.lane.b32.xlu2 %v382_v38, %s2749_s17  ;;  %v466_v20 = vpack.c.b16 %v463_v10, %v463_v10  ;;  %v549_v21 = vunpack.c.l.b16 %v543_v57  ;;  %v1215_v22 = vunpack.c.l.b16 %v3291_v12  ;;  %v1216_v23 = vunpack.c.h.b16 %v3291_v12 }
  0xb1   : > { %981 = vrot.lane.b32.xlu1 %v976_v30, %s2745_s13  ;;  %897 = vrot.lane.b32.xlu0 %v892_v42, %s2742_s10  ;;  %vm3303_vm13 = vcmp.eq.s32.totalorder %v1593_v14, 1  ;;  %vm3307_vm14 = vcmp.eq.s32.totalorder %v1594_v15, 1  ;;  %v1761_v29 = vperm.slane %v1760_v17, 0  ;;  %v1762_v24 = vperm.slane %v1760_v17, 1 }
  0xb2   : > { %v638_v27 = vpack.c.b16 %v635_v16, %v635_v16  ;;  %v1677_v30 = vperm.slane %v1676_v19, 0  ;;  %v1678_v37 = vperm.slane %v1676_v19, 1  ;;  %v698_v56 = vsel %vm4325_vm11, %v2969_v34, %v2966_v33  ;;  %vm1597_vm15 = vmpackc.low %vm3307_vm14, %vm3303_vm13 }
  0xb3   : > { %v783_v61 = vunpack.c.l.b16 %v782_v18  ;;  %v784_v38 = vunpack.c.h.b16 %v782_v18  ;;  %vm3320_vm0 = vcmp.ne.s32.totalorder %v1215_v22, %v2979_v40  ;;  %vm3325_vm1 = vcmp.ne.s32.totalorder %v1216_v23, %v2982_v41 }
  0xb4   : > { %vm4324_vm3 = vcmask 588800   ;;  %v552_v35 = vpack.c.b16 %v549_v21, %v549_v21  ;;  %vm3329_vm4 = vcmp.eq.s32.totalorder %v1761_v29, 1  ;;  %vm3333_vm9 = vcmp.eq.s32.totalorder %v1762_v24, 1  ;;  %vm1221_vm12 = vmpackc.low %vm3325_vm1, %vm3320_vm0 }
  0xb5   : > { %v699_v36 = vunpack.c.l.b16 %v698_v56  ;;  %v700_v43 = vunpack.c.h.b16 %v698_v56  ;;  %vm3338_vm10 = vcmp.eq.s32.totalorder %v1677_v30, 1  ;;  %vm3342_vm13 = vcmp.eq.s32.totalorder %v1678_v37, 1  ;;  %vm1765_vm8 = vmpackc.low %vm3333_vm9, %vm3329_vm4 }
  0xb6   : > { %vm3347_vm14 = vcmp.ne.s32.totalorder %v783_v61, %v2979_v40  ;;  %vm3352_vm2 = vcmp.ne.s32.totalorder %v784_v38, %v2982_v41  ;;  %v1598_v49 = vsel %vm1597_vm15, 65537, %v2740_v2  ;;  %vm1681_vm15 = vmpackc.low %vm3342_vm13, %vm3338_vm10  ;;  %v1766_v48 = vsel %vm1765_vm8, 65537, %v2740_v2 }
  0xb7   : > { %vm3376_vm6 = vcmp.ne.s32.totalorder %v699_v36, %v2979_v40  ;;  %vm3381_vm5 = vcmp.ne.s32.totalorder %v700_v43, %v2982_v41  ;;  %vm789_vm4 = vmpackc.low %vm3352_vm2, %vm3347_vm14  ;;  %v1682_v57 = vsel %vm1681_vm15, 65537, %v2740_v2  ;;  %v636_v58 = vunpack.c.h.b16 %v3288_v8 }
  0xb8   : > { %1066 = vrot.lane.b32.xlu2 %v1061_v50, %s2756_s25  ;;  %v866_v50 = vsel %vm4324_vm3, %v3120_v47, %v3101_v25  ;;  %v1223_v59 = vsel %vm1221_vm12, %v3010_v53, 0  ;;  %vm4323_vm2 = vcmask 596992   ;;  %v3401_v0 = vsel %vm789_vm4, %v3113_v31, 0  ;;  %vm705_vm8 = vmpackc.low %vm3381_vm5, %vm3376_vm6 }
  0xb9   : > { %331 = vrot.lane.b32.xlu1 %v328_v55, %s2746_s14  ;;  %387 = vrot.lane.b32.xlu0 %v383_v60, %s2749_s17  ;;  %v867_v47 = vunpack.c.l.b16 %v866_v50  ;;  %v868_v54 = vunpack.c.h.b16 %v866_v50  ;;  %v1119_v55 = vrot.slane %v3369_v51, 4  ;;  %v1230_v8 = vunpack.c.l.b16 %v1223_v59 }
  0xba   : > { %v950_v10 = vsel %vm4323_vm2, %v3048_v9, %v3037_v63  ;;  %v713_v14 = vsel %vm705_vm8, %v3113_v31, 0  ;;  %v3439_v63 = vpop.permute.xlu0 %1289  ;;  %vm4321_vm14 = vcmask 973824   ;;  %vm4322_vm4 = vcmask 982016  }
  0xbb   : > { %v1129_v60 = vunpack.c.l.b16 %v1119_v55  ;;  %v1130_v62 = vunpack.c.h.b16 %v1119_v55  ;;  %vm3409_vm9 = vcmp.ne.s32.totalorder %v867_v47, %v2979_v40  ;;  %vm3414_vm12 = vcmp.ne.s32.totalorder %v868_v54, %v2982_v41  ;;  %v3511_v54 = vpop.permute.xlu2 %1515 }
  0xbc   : > { %vm873_vm0 = vmpackc.low %vm3414_vm12, %vm3409_vm9  ;;  %v951_v9 = vunpack.c.l.b16 %v950_v10  ;;  %v952_v17 = vunpack.c.h.b16 %v950_v10  ;;  %v1233_v18 = vpack.c.b16 %v1230_v8, %v1230_v8  ;;  %v719_v19 = vunpack.c.l.b16 %v713_v14 }
  0xbd   : > { %vm3425_vm5 = vcmp.ne.s32.totalorder %v1129_v60, %v2979_v40  ;;  %vm3430_vm6 = vcmp.ne.s32.totalorder %v1130_v62, %v2982_v41  ;;  %v3446_v21 = vsel %vm873_vm0, %v3113_v31, 0  ;;  %v1291_v22 = vrot.slane %v3439_v63, 4 }
  0xbe   : > { %vm1135_vm1 = vmpackc.low %vm3430_vm6, %vm3425_vm5  ;;  %vm3451_vm10 = vcmp.ne.s32.totalorder %v951_v9, %v2979_v40  ;;  %vm3456_vm13 = vcmp.ne.s32.totalorder %v952_v17, %v2982_v41  ;;  %v722_v29 = vpack.c.b16 %v719_v19, %v719_v19  ;;  %v888_v24 = vunpack.c.h.b16 %v3446_v21 }
  0xbf   : > { %v1137_v28 = vsel %vm1135_vm1, %v3010_v53, 0  ;;  %v1301_v30 = vunpack.c.l.b16 %v1291_v22  ;;  %v1302_v37 = vunpack.c.h.b16 %v1291_v22  ;;  %vm957_vm15 = vmpackc.low %vm3456_vm13, %vm3451_vm10  ;;  %v1035_v61 = vsel %vm4321_vm14, %v3176_v4, %v3167_v1 }
  0xc0   : > { %557 = vrot.lane.b32.xlu2 %v553_v11, %s2747_s15  ;;  %v639_v11 = vpack.c.b16 %v636_v58, %v636_v58  ;;  %v1144_v56 = vunpack.c.l.b16 %v1137_v28  ;;  %v891_v38 = vpack.c.b16 %v888_v24, %v888_v24  ;;  %v965_v42 = vsel %vm957_vm15, %v3113_v31, 0  ;;  %v3567_v28 = vld [vmem:[%s2802_s29] sm:$0x3] }
  0xc1   : > { %471 = vrot.lane.b32.xlu1 %v467_v13, %s2748_s16  ;;  %469 = vrot.lane.b32.xlu0 %v466_v20, %s2748_s16  ;;  %v804_v13 = vunpack.c.h.b16 %v3401_v0  ;;  %vm3473_vm8 = vcmp.ne.s32.totalorder %v1301_v30, %v2979_v40  ;;  %vm3478_vm9 = vcmp.ne.s32.totalorder %v1302_v37, %v2982_v41  ;;  %v1036_v34 = vunpack.c.l.b16 %v1035_v61 }
  0xc2   : > { %v1147_v36 = vpack.c.b16 %v1144_v56, %v1144_v56  ;;  %v1037_v1 = vunpack.c.h.b16 %v1035_v61  ;;  %v1121_v4 = vsel %vm4322_vm4, %v1119_v55, %v3369_v51  ;;  %v971_v43 = vunpack.c.l.b16 %v965_v42  ;;  %vm1307_vm12 = vmpackc.low %vm3478_vm9, %vm3473_vm8 }
  0xc3   : > { %v807_v20 = vpack.c.b16 %v804_v13, %v804_v13  ;;  %vm1206_vm5 = vcmask 990208   ;;  %v803_v44 = vunpack.c.l.b16 %v3401_v0  ;;  %vm3492_vm6 = vcmp.ne.s32.totalorder %v1036_v34, %v2979_v40  ;;  %v1432_v13 = vpop.permute.xlu1 %1431 }
  0xc4   : > { %vm3498_vm0 = vcmp.ne.s32.totalorder %v1037_v1, %v2982_v41  ;;  %v1122_v46 = vunpack.c.l.b16 %v1121_v4  ;;  %v1309_v50 = vsel %vm1307_vm12, %v3010_v53, 0  ;;  %v1207_v51 = vsel %vm1206_vm5, %v3291_v12, %v3283_v6 }
  0xc5   : > { %v972_v52 = vunpack.c.h.b16 %v965_v42  ;;  %v974_v25 = vpack.c.b16 %v971_v43, %v971_v43  ;;  %v806_v47 = vpack.c.b16 %v803_v44, %v803_v44  ;;  %vm1042_vm1 = vmpackc.low %vm3498_vm0, %vm3492_vm6  ;;  %v1208_v55 = vunpack.c.l.b16 %v1207_v51 }
  0xc6   : > { %vm3514_vm10 = vcmp.ne.s32.totalorder %v1122_v46, %v2979_v40  ;;  %vm1292_vm15 = vcmask 1039360   ;;  %v887_v12 = vunpack.c.l.b16 %v3446_v21  ;;  %v1050_v58 = vsel %vm1042_vm1, %v3113_v31, 0  ;;  %v3600_v46 = vld [vmem:[#allocation2 + $0x4] sm:$0xff] }
  0xc7   : > { %v975_v6 = vpack.c.b16 %v972_v52, %v972_v52  ;;  %vm3526_vm9 = vcmp.ne.s32.totalorder %v1208_v55, %v2979_v40  ;;  %v1293_v0 = vsel %vm1292_vm15, %v1291_v22, %v3439_v63  ;;  %v1056_v5 = vunpack.c.l.b16 %v1050_v58 }
  0xc8   : > { %641 = vrot.lane.b32.xlu2 %v638_v27, %s2744_s12  ;;  %v720_v27 = vunpack.c.h.b16 %v713_v14  ;;  %v890_v7 = vpack.c.b16 %v887_v12, %v887_v12  ;;  %v1294_v10 = vunpack.c.l.b16 %v1293_v0  ;;  %v1057_v63 = vunpack.c.h.b16 %v1050_v58 }
  0xc9   : > { %555 = vrot.lane.b32.xlu1 %v552_v35, %s2747_s15  ;;  %1599 = vrot.lane.b32.xlu0 %v1598_v49, %s2757_s26  ;;  %v1123_v49 = vunpack.c.h.b16 %v1121_v4  ;;  %v1059_v14 = vpack.c.b16 %v1056_v5, %v1056_v5  ;;  %v1433_v17 = vrot.slane %v1432_v13, 4 }
  0xca   : > { %v723_v39 = vpack.c.b16 %v720_v27, %v720_v27  ;;  %vm3549_vm0 = vcmp.ne.s32.totalorder %v1294_v10, %v2979_v40  ;;  %v1060_v23 = vpack.c.b16 %v1057_v63, %v1057_v63 }
  0xcb   : > { %vm1127_vm13 = vcmp.ne.s32.totalorder %v1123_v49, %v2982_v41 }
  0xcc   : > { %vm1128_vm8 = vmpackc.low %vm1127_vm13, %vm3514_vm10  ;;  %vm1326_vm10 = vcmask 7168  }
  0xcd   : > { %v1136_v8 = vsel %vm1128_vm8, %v3113_v31, 0  ;;  %v1434_v26 = vsel %vm1326_vm10, %v1433_v17, %v1432_v13 }
  0xce   : > { %v1143_v16 = vunpack.c.h.b16 %v1136_v8  ;;  %v1142_v27 = vunpack.c.l.b16 %v1136_v8  ;;  %v1435_v56 = vunpack.c.l.b16 %v1434_v26  ;;  %v1436_v61 = vunpack.c.h.b16 %v1434_v26  ;;  %v3653_v8 = vld [vmem:[#allocation2 + $0xc] sm:$0xf] }
  0xd0   : > { %1767 = vrot.lane.b32.xlu2 %v1766_v48, %s2745_s13  ;;  %v1316_v48 = vunpack.c.l.b16 %v1309_v50  ;;  %v1146_v22 = vpack.c.b16 %v1143_v16, %v1143_v16  ;;  %v1145_v42 = vpack.c.b16 %v1142_v27, %v1142_v27 }
  0xd1   : > { %1683 = vrot.lane.b32.xlu1 %v1682_v57, %s2756_s25  ;;  %643 = vrot.lane.b32.xlu0 %v639_v11, %s2744_s12  ;;  %v1209_v57 = vunpack.c.h.b16 %v1207_v51  ;;  %v1295_v11 = vunpack.c.h.b16 %v1293_v0 }
  0xd2   : > { %v1319_v59 = vpack.c.b16 %v1316_v48, %v1316_v48 }
  0xd3   : > { %vm3531_vm12 = vcmp.ne.s32.totalorder %v1209_v57, %v2982_v41  ;;  %vm3554_vm1 = vcmp.ne.s32.totalorder %v1295_v11, %v2982_v41  ;;  %v2094_v11 = vand.u32 5, %v3567_v28 }
  0xd4   : > { %vm1214_vm6 = vmpackc.low %vm3531_vm12, %vm3526_vm9  ;;  %vm1240_vm9 = vcmask 56320  }
  0xd5   : > { %v1222_v9 = vsel %vm1214_vm6, %v3113_v31, 0  ;;  %vm1300_vm13 = vmpackc.low %vm3554_vm1, %vm3549_vm0  ;;  %vm3579_vm6 = vcmp.ne.s32.totalorder %v1435_v56, %v2979_v40  ;;  %vm3584_vm0 = vcmp.ne.s32.totalorder %v1436_v61, %v2982_v41 }
  0xd6   : > { %v1229_v21 = vunpack.c.h.b16 %v1222_v9  ;;  %v1228_v30 = vunpack.c.l.b16 %v1222_v9  ;;  %v1308_v37 = vsel %vm1300_vm13, %v3113_v31, 0  ;;  %vm1441_vm1 = vmpackc.low %vm3584_vm0, %vm3579_vm6 }
  0xd7   : > { %v1314_v33 = vunpack.c.l.b16 %v1308_v37  ;;  %v1315_v45 = vunpack.c.h.b16 %v1308_v37 }
  0xd8   : > { %811 = vrot.lane.b32.xlu2 %v807_v20, %s2741_s9  ;;  %v1842_v20 = vand.u32 13, %v2812_v3  ;;  %v1232_v3 = vpack.c.b16 %v1229_v21, %v1229_v21  ;;  %v1231_v35 = vpack.c.b16 %v1228_v30, %v1228_v30 }
  0xd9   : > { %1238 = vrot.lane.b32.xlu1 %v1233_v18, %s2754_s23  ;;  %725 = vrot.lane.b32.xlu0 %v722_v29, %s2743_s11  ;;  %v1926_v29 = vand.u32 77, %v3567_v28  ;;  %v1317_v44 = vpack.c.b16 %v1314_v33, %v1314_v33  ;;  %v1318_v53 = vpack.c.b16 %v1315_v45, %v1315_v45 }
  0xda   : > { %vm1843_vm8 = vcmp.eq.s32.totalorder %v1842_v20, 13  ;;  %v3675_v20 = vld [vmem:[%s4310_s0 + $0x2] sm:$0x3] }
  0xdb   : > { %vm1927_vm12 = vcmp.eq.s32.totalorder %v1926_v29, 77 }
  0xdc   : > { %v1928_v4 = vsel %vm1927_vm12, 1, %v2740_v2 }
  0xdd   : > { %v1929_v51 = vperm.slane %v1928_v4, 0  ;;  %v1930_v52 = vperm.slane %v1928_v4, 1 }
  0xdf   : > { %vm3616_vm6 = vcmp.eq.s32.totalorder %v1929_v51, 1  ;;  %vm3620_vm0 = vcmp.eq.s32.totalorder %v1930_v52, 1 }
  0xe0   : > { %895 = vrot.lane.b32.xlu2 %v891_v38, %s2742_s10  ;;  %v1844_v38 = vsel %vm1843_vm8, 1, %v2740_v2 }
  0xe1   : > { %727 = vrot.lane.b32.xlu1 %v723_v39, %s2743_s11  ;;  %1152 = vrot.lane.b32.xlu0 %v1147_v36, %s2757_s26  ;;  %v3576_v39 = vrot.slane %v3511_v54, 4  ;;  %v1845_v36 = vperm.slane %v1844_v38, 0  ;;  %v1846_v1 = vperm.slane %v1844_v38, 1 }
  0xe3   : > { %v1518_v43 = vsel %vm1240_vm9, %v3576_v39, %v3511_v54  ;;  %vm3602_vm13 = vcmp.eq.s32.totalorder %v1845_v36, 1  ;;  %vm3606_vm8 = vcmp.eq.s32.totalorder %v1846_v1, 1  ;;  %v1449_v54 = vsel %vm1441_vm1, %v3600_v46, 0 }
  0xe4   : > { %v1519_v48 = vunpack.c.l.b16 %v1518_v43  ;;  %vm1849_vm12 = vmpackc.low %vm3606_vm8, %vm3602_vm13  ;;  %v1455_v55 = vunpack.c.l.b16 %v1449_v54  ;;  %v1520_v57 = vunpack.c.h.b16 %v1518_v43  ;;  %v1456_v10 = vunpack.c.h.b16 %v1449_v54 }
  0xe5   : > { %v1850_v62 = vsel %vm1849_vm12, 65537, %v2740_v2  ;;  %vm1933_vm13 = vmpackc.low %vm3620_vm0, %vm3616_vm6  ;;  %vm344_vm6 = vcmask 1043456   ;;  %v1526_v4 = vunpack.c.l.b16 %v3576_v39  ;;  %v1527_v43 = vunpack.c.h.b16 %v3576_v39 }
  0xe6   : > { %v1458_v60 = vpack.c.b16 %v1455_v55, %v1455_v55  ;;  %vm3644_vm8 = vcmp.ne.s32.totalorder %v1519_v48, %v2979_v40  ;;  %vm3649_vm4 = vcmp.ne.s32.totalorder %v1520_v57, %v2982_v41 }
  0xe7   : > { %vm1525_vm0 = vmpackc.low %vm3649_vm4, %vm3644_vm8  ;;  %vm340_vm4 = vcmask 64512  }
  0xe8   : > { %977 = vrot.lane.b32.xlu2 %v974_v25, %s2745_s13  ;;  %v1442_v25 = vunpack.c.l.b16 %v1433_v17  ;;  %v1533_v18 = vsel %vm1525_vm0, %v3600_v46, 0 }
  0xe9   : > { %809 = vrot.lane.b32.xlu1 %v806_v47, %s2741_s9  ;;  %979 = vrot.lane.b32.xlu0 %v975_v6, %s2745_s13  ;;  %v1443_v47 = vunpack.c.h.b16 %v1433_v17  ;;  %v1459_v17 = vpack.c.b16 %v1456_v10, %v1456_v10  ;;  %v1539_v26 = vunpack.c.l.b16 %v1533_v18  ;;  %v2621_v10 = vld [vmem:[%s4310_s0 + $0x4] sm:$0x3] }
  0xea   : > { %vm3625_vm14 = vcmp.ne.s32.totalorder %v1442_v25, %v2979_v40 }
  0xeb   : > { %vm3630_vm1 = vcmp.ne.s32.totalorder %v1443_v47, %v2982_v41 }
  0xec   : > { %vm1448_vm12 = vmpackc.low %vm3630_vm1, %vm3625_vm14  ;;  %vm2095_vm14 = vcmp.eq.s32.totalorder %v2094_v11, 5 }
  0xed   : > { %v1450_v16 = vsel %vm1448_vm12, %v3653_v8, 0  ;;  %v2096_v29 = vsel %vm2095_vm14, 1, %v2740_v2 }
  0xee   : > { %v1457_v19 = vunpack.c.l.b16 %v1450_v16  ;;  %v2097_v61 = vperm.slane %v2096_v29, 0  ;;  %v2098_v38 = vperm.slane %v2096_v29, 1  ;;  %v2178_v16 = vand.u32 69, %v3567_v28 }
  0xf0   : > { %1324 = vrot.lane.b32.xlu2 %v1319_v59, %s2755_s24  ;;  %vm2099_vm0 = vcmp.eq.s32.totalorder %v2097_v61, 1  ;;  %vm2100_vm14 = vcmp.eq.s32.totalorder %v2098_v38, 1  ;;  %v290_v59 = vld [vmem:[%s4310_s0] sm:$0x3] }
  0xf1   : > { %893 = vrot.lane.b32.xlu1 %v890_v7, %s2742_s10  ;;  %1062 = vrot.lane.b32.xlu0 %v1059_v14, %s2756_s25  ;;  %v1934_v14 = vsel %vm1933_vm13, 65537, %v2740_v2 }
  0xf2   : > { %v3544_v15 = vpop.permute.xlu2 %473 }
  0xf8   : > { %1150 = vrot.lane.b32.xlu2 %v1146_v22, %s2757_s26  ;;  %v2010_v22 = vand.u32 37, %v3567_v28 }
  0xf9   : > { %1064 = vrot.lane.b32.xlu1 %v1060_v23, %s2756_s25  ;;  %1236 = vrot.lane.b32.xlu0 %v1232_v3, %s2754_s23  ;;  %v1460_v3 = vpack.c.b16 %v1457_v19, %v1457_v19 }
  0xfa   : > { %v3570_v24 = vpop.permute.xlu2 %729  ;;  %vm2011_vm1 = vcmp.eq.s32.totalorder %v2010_v22, 37 }
  0xfb   : > { %v2012_v27 = vsel %vm2011_vm1, 1, %v2740_v2  ;;  %vm2101_vm1 = vmpackc.low %vm2100_vm14, %vm2099_vm0  ;;  %vm4487_vm0 = vcmask 449536   ;;  %vm2179_vm14 = vcmp.eq.s32.totalorder %v2178_v16, 69 }
  0xfc   : > { %v2013_v37 = vperm.slane %v2012_v27, 0  ;;  %v2014_v56 = vperm.slane %v2012_v27, 1  ;;  %v2180_v61 = vsel %vm2179_vm14, 1, %v2740_v2 }
  0xfe   : > { %vm2015_vm13 = vcmp.eq.s32.totalorder %v2013_v37, 1  ;;  %vm2016_vm8 = vcmp.eq.s32.totalorder %v2014_v56, 1 }
  0xff   : > { %vm2017_vm12 = vmpackc.low %vm2016_vm8, %vm2015_vm13  ;;  %vm1530_vm13 = vcmp.ne.s32.totalorder %v1526_v4, %v2979_v40  ;;  %vm1531_vm8 = vcmp.ne.s32.totalorder %v1527_v43, %v2982_v41  ;;  %v2181_v43 = vperm.slane %v2180_v61, 0 }
 0x100   : > { %1234 = vrot.lane.b32.xlu2 %v1231_v35, %s2754_s23  ;;  %v1540_v35 = vunpack.c.h.b16 %v1533_v18  ;;  %v2018_v34 = vsel %vm2017_vm12, 65537, %v2740_v2  ;;  %vm1532_vm12 = vmpackc.low %vm1531_vm8, %vm1530_vm13  ;;  %vm1068_vm13 = vcmask 72704  }
 0x101   : > { %1148 = vrot.lane.b32.xlu1 %v1145_v42, %s2757_s26  ;;  %1320 = vrot.lane.b32.xlu0 %v1317_v44, %s2755_s24  ;;  %v1542_v42 = vpack.c.b16 %v1539_v26, %v1539_v26  ;;  %v2102_v44 = vsel %vm2101_vm1, 65537, %v2740_v2  ;;  %v1534_v51 = vsel %vm1532_vm12, %v3653_v8, 0  ;;  %vm4488_vm1 = vcmask 465920  }
 0x102   : > { %v3594_v32 = vpop.permute.xlu2 %333  ;;  %v1543_v36 = vpack.c.b16 %v1540_v35, %v1540_v35  ;;  %v1541_v39 = vunpack.c.l.b16 %v1534_v51  ;;  %v2346_v51 = vand.u32 21, %v3567_v28 }
 0x104   : > { %v1544_v25 = vpack.c.b16 %v1541_v39, %v1541_v39 }
 0x108   : > { %1461 = vrot.lane.b32.xlu2 %v1458_v60, %s2753_s22 }
 0x109   : > { %1322 = vrot.lane.b32.xlu1 %v1318_v53, %s2755_s24  ;;  %1851 = vrot.lane.b32.xlu0 %v1850_v62, %s2742_s10 }
 0x10a   : > { %v3636_v0 = vpop.permute.xlu2 %385 }
 0x10b   : > { %v336_v13 = vpop.permute.xlu0 %335 }
 0x10c   : > { %v339_v63 = vsel %vm4324_vm3, %v3594_v32, %v336_v13 }
 0x10d   : > { %v349_v9 = vsel %vm344_vm6, %v339_v63, 0 }
 0x10e   : > { %371 = vmatpush.bf16.msra.mxu1 %v349_v9 }
 0x110   : > { %2019 = vrot.lane.b32.xlu2 %v2018_v34, %s2743_s11 }
 0x111   : > { %1935 = vrot.lane.b32.xlu1 %v1934_v14, %s2741_s9  ;;  %1463 = vrot.lane.b32.xlu0 %v1459_v17, %s2753_s22 }
 0x112   : > { %v3677_v21 = vpop.permute.xlu2 %1066  ;;  %2618 = vmatmul.msk.bf16.vlgmr.msra.gmra.mxu1 %vm340_vm4, %v3675_v20 }
 0x113   : > { %v390_v23 = vpop.permute.xlu1 %389  ;;  %v560_v30 = vpop.permute.xlu0 %559 }
 0x118   : > { %1549 = vrot.lane.b32.xlu2 %v1544_v25, %s2752_s21 }
 0x119   : > { %1465 = vrot.lane.b32.xlu1 %v1460_v3, %s2753_s22  ;;  %1545 = vrot.lane.b32.xlu0 %v1542_v42, %s2752_s21 }
 0x11a   : > { %v558_v33 = vpop.permute.xlu2 %557 }
 0x11b   : > { %v3687_v31 = vpop.permute.xlu1 %645  ;;  %v814_v1 = vpop.permute.xlu0 %813  ;;  %v563_v57 = vsel %vm4325_vm11, %v558_v33, %v560_v30  ;;  %v2624_v30 = vld [vmem:[%s4310_s0 + $0x6] sm:$0x3] }
 0x121   : > { %1547 = vrot.lane.b32.xlu1 %v1543_v36, %s2752_s21  ;;  %2103 = vrot.lane.b32.xlu0 %v2102_v44, %s2744_s12  ;;  %v2182_v44 = vperm.slane %v2180_v61, 1 }
 0x122   : > { %v3695_v45 = vpop.permute.xlu2 %641 }
 0x123   : > { %v3697_v49 = vpop.permute.xlu1 %981  ;;  %v3702_v50 = vpop.permute.xlu0 %897 }
 0x12a   : > { %v1768_v52 = vpop.permute.xlu2 %1767 }
 0x12b   : > { %v332_v47 = vpop.permute.xlu1 %331  ;;  %v388_v55 = vpop.permute.xlu0 %387  ;;  %v3732_v13 = vrot.slane %v1768_v52, 4 }
 0x12c   : > { %v338_v54 = vsel %vm4324_vm3, %v332_v47, %v3594_v32  ;;  %v392_v53 = vsel %vm4323_vm2, %v3636_v0, %v388_v55  ;;  %v393_v6 = vsel %vm4323_vm2, %v388_v55, %v390_v23  ;;  %v571_v32 = vsel %vm344_vm6, %v563_v57, 0 }
 0x12d   : > { %v346_v48 = vsel %vm344_vm6, %v338_v54, 0  ;;  %v398_v12 = vsel %vm344_vm6, %v392_v53, 0  ;;  %v401_v58 = vsel %vm344_vm6, %v393_v6, 0  ;;  %v1770_v63 = vsel %vm4487_vm0, %v3732_v13, %v1768_v52 }
 0x12e   : > { %358 = vmatpush.bf16.msra.mxu0 %v346_v48  ;;  %410 = vmatpush.bf16.msra.mxu2 %v398_v12  ;;  %v1772_v22 = vunpack.c.h.b16 %v1770_v63 }
 0x12f   : > { %423 = vmatpush.bf16.msra.mxu3 %v401_v58 }
 0x130   : > { %vm3757_vm12 = vcmp.ne.s32.totalorder %v1772_v22, %v2982_v41 }
 0x131   : > { %2617 = vmatmul.msk.bf16.vlgmr.msra.gmra.mxu0 %vm340_vm4, %v3675_v20  ;;  %2619 = vmatmul.msk.bf16.vlgmr.msra.gmra.mxu2 %vm340_vm4, %v290_v59  ;;  %v1771_v20 = vunpack.c.l.b16 %v1770_v63 }
 0x132   : > { %v3721_v62 = vpop.permute.xlu2 %811  ;;  %2620 = vmatmul.msk.bf16.vlgmr.msra.gmra.mxu3 %vm340_vm4, %v290_v59 }
 0x133   : > { %593 = vmatpush.bf16.msrb.mxu3 %v571_v32  ;;  %v472_v60 = vpop.permute.xlu1 %471  ;;  %v470_v7 = vpop.permute.xlu0 %469  ;;  %v816_v26 = vsel %vm4488_vm1, %v3721_v62, %v814_v1  ;;  %vm3752_vm8 = vcmp.ne.s32.totalorder %v1771_v20, %v2979_v40 }
 0x134   : > { %v477_v0 = vsel %vm4326_vm7, %v472_v60, %v3544_v15  ;;  %v476_v11 = vsel %vm4326_vm7, %v470_v7, %v472_v60  ;;  %v2627_v60 = vld [vmem:[%s4310_s0 + $0x8] sm:$0x3] }
 0x135   : > { %v485_v5 = vsel %vm344_vm6, %v477_v0, 0  ;;  %v482_v14 = vsel %vm344_vm6, %v476_v11, 0 }
 0x136   : > { %507 = vmatpush.bf16.msrb.mxu1 %v485_v5  ;;  %494 = vmatpush.bf16.msrb.mxu0 %v482_v14 }
 0x139   : > { %2623 = vmatmul.msk.bf16.vlgmr.msrb.gmra.mxu1 %vm340_vm4, %v2621_v10 }
 0x13a   : > { %v3740_v17 = vpop.permute.xlu2 %895 }
 0x13b   : > { %v556_v15 = vpop.permute.xlu1 %555  ;;  %v1600_v19 = vpop.permute.xlu0 %1599 }
 0x13c   : > { %v562_v9 = vsel %vm4325_vm11, %v556_v15, %v558_v33  ;;  %v1601_v23 = vrot.slane %v1600_v19, 4  ;;  %v824_v33 = vsel %vm344_vm6, %v816_v26, 0 }
 0x13d   : > { %v568_v18 = vsel %vm344_vm6, %v562_v9, 0 }
 0x13e   : > { %580 = vmatpush.bf16.msrb.mxu2 %v568_v18  ;;  %v1602_v29 = vsel %vm340_vm4, %v1601_v23, %v1600_v19  ;;  %v1610_v3 = vunpack.c.l.b16 %v1601_v23  ;;  %v1611_v27 = vunpack.c.h.b16 %v1601_v23 }
 0x13f   : > { %v1603_v37 = vunpack.c.l.b16 %v1602_v29  ;;  %v1604_v56 = vunpack.c.h.b16 %v1602_v29 }
 0x140   : > { %vm1614_vm0 = vcmp.ne.s32.totalorder %v1610_v3, %v2979_v40  ;;  %vm1615_vm1 = vcmp.ne.s32.totalorder %v1611_v27, %v2982_v41  ;;  %v2262_v3 = vand.u32 53, %v3567_v28 }
 0x141   : > { %2622 = vmatmul.msk.bf16.vlgmr.msrb.gmra.mxu0 %vm340_vm4, %v2621_v10  ;;  %vm3765_vm2 = vcmp.ne.s32.totalorder %v1603_v37, %v2979_v40  ;;  %vm3770_vm14 = vcmp.ne.s32.totalorder %v1604_v56, %v2982_v41  ;;  %vm1616_vm3 = vmpackc.low %vm1615_vm1, %vm1614_vm0  ;;  %2625 = vmatmul.msk.bf16.vlgmr.msrb.gmra.mxu2 %vm340_vm4, %v2624_v30  ;;  %vm4497_vm0 = vcmask 523264  }
 0x142   : > { %2626 = vmatmul.msk.bf16.vlgmr.msrb.gmra.mxu3 %vm340_vm4, %v2624_v30  ;;  %vm1609_vm11 = vmpackc.low %vm3770_vm14, %vm3765_vm2  ;;  %v1618_v4 = vsel %vm1616_vm3, %v3653_v8, 0  ;;  %v3783_v57 = vpop.permute.xlu2 %977  ;;  %vm3821_vm2 = vcmp.eq.s32.totalorder %v2181_v43, 1  ;;  %vm3825_vm14 = vcmp.eq.s32.totalorder %v2182_v44, 1 }
 0x143   : > { %v1684_v35 = vpop.permute.xlu1 %1683  ;;  %v644_v47 = vpop.permute.xlu0 %643  ;;  %v1625_v54 = vunpack.c.l.b16 %v1618_v4  ;;  %vm4498_vm1 = vmmov %vm4497_vm0  ;;  %v1617_v59 = vsel %vm1609_vm11, %v3600_v46, 0 }
 0x144   : > { %v1685_v1 = vrot.slane %v1684_v35, 4  ;;  %v647_v53 = vsel %vm4497_vm0, %v3695_v45, %v644_v47  ;;  %v648_v6 = vsel %vm4498_vm1, %v644_v47, %v3687_v31  ;;  %v1624_v45 = vunpack.c.h.b16 %v1617_v59 }
 0x145   : > { %v653_v12 = vsel %vm344_vm6, %v647_v53, 0  ;;  %v656_v58 = vsel %vm344_vm6, %v648_v6, 0  ;;  %v1628_v32 = vpack.c.b16 %v1625_v54, %v1625_v54  ;;  %v1623_v31 = vunpack.c.l.b16 %v1617_v59 }
 0x146   : > { %v1686_v39 = vsel %vm1068_vm13, %v1685_v1, %v1684_v35  ;;  %v1694_v52 = vunpack.c.l.b16 %v1685_v1  ;;  %v1695_v25 = vunpack.c.h.b16 %v1685_v1  ;;  %665 = vmatpush.bf16.msra.mxu0 %v653_v12  ;;  %678 = vmatpush.bf16.msra.mxu1 %v656_v58  ;;  %v1627_v5 = vpack.c.b16 %v1624_v45, %v1624_v45 }
 0x147   : > { %v1687_v48 = vunpack.c.l.b16 %v1686_v39  ;;  %v1688_v55 = vunpack.c.h.b16 %v1686_v39  ;;  %1633 = vrot.lane.b32.xlu0 %v1628_v32, %s2750_s19  ;;  %v1626_v7 = vpack.c.b16 %v1623_v31, %v1623_v31  ;;  %v1778_v31 = vunpack.c.l.b16 %v3732_v13 }
 0x148   : > { %vm3804_vm1 = vcmp.ne.s32.totalorder %v1694_v52, %v2979_v40  ;;  %vm3812_vm11 = vcmp.ne.s32.totalorder %v1695_v25, %v2982_v41  ;;  %1631 = vrot.lane.b32.xlu2 %v1627_v5, %s2750_s19  ;;  %v2633_v52 = vld [vmem:[%s4310_s0 + $0xc] sm:$0x3] }
 0x149   : > { %vm1691_vm3 = vcmp.ne.s32.totalorder %v1687_v48, %v2979_v40  ;;  %vm1692_vm7 = vcmp.ne.s32.totalorder %v1688_v55, %v2982_v41  ;;  %2629 = vmatmul.msk.bf16.vlgmr.msra.gmra.mxu1 %vm340_vm4, %v2627_v60  ;;  %1629 = vrot.lane.b32.xlu1 %v1626_v7, %s2750_s19 }
 0x14a   : > { %vm1693_vm0 = vmpackc.low %vm1692_vm7, %vm1691_vm3  ;;  %846 = vmatpush.bf16.msrb.mxu1 %v824_v33  ;;  %vm2347_vm3 = vcmp.eq.s32.totalorder %v2346_v51, 21  ;;  %v3843_v23 = vpop.permute.xlu2 %1324 }
 0x14b   : > { %v3808_v10 = vpop.permute.xlu1 %1238  ;;  %v1701_v11 = vsel %vm1693_vm0, %v3600_v46, 0  ;;  %vm1777_vm7 = vmpackc.low %vm3757_vm12, %vm3752_vm8  ;;  %v726_v18 = vpop.permute.xlu0 %725  ;;  %v2348_v22 = vsel %vm2347_vm3, 1, %v2740_v2  ;;  %vm4507_vm0 = vcmask 457728  }
 0x14c   : > { %v1708_v15 = vunpack.c.h.b16 %v1701_v11  ;;  %v1707_v9 = vunpack.c.l.b16 %v1701_v11  ;;  %vm1700_vm8 = vmpackc.low %vm3812_vm11, %vm3804_vm1  ;;  %v3840_v20 = vsel %vm1777_vm7, %v3600_v46, 0  ;;  %v900_v37 = vsel %vm4507_vm0, %v3740_v17, %v3702_v50 }
 0x14d   : > { %vm2185_vm12 = vmpackc.low %vm3825_vm14, %vm3821_vm2  ;;  %v1702_v26 = vsel %vm1700_vm8, %v3653_v8, 0  ;;  %v1791_v30 = vunpack.c.l.b16 %v3840_v20  ;;  %v2349_v61 = vperm.slane %v2348_v22, 0  ;;  %v2350_v38 = vperm.slane %v2348_v22, 1 }
 0x14e   : > { %v1711_v19 = vpack.c.b16 %v1708_v15, %v1708_v15  ;;  %v1710_v29 = vpack.c.b16 %v1707_v9, %v1707_v9  ;;  %v2186_v27 = vsel %vm2185_vm12, 65537, %v2740_v2  ;;  %vm2263_vm1 = vcmp.eq.s32.totalorder %v2262_v3, 53  ;;  %v2636_v15 = vld [vmem:[%s4310_s0 + $0xe] sm:$0x3] }
 0x14f   : > { %vm4508_vm11 = vcmask 515072   ;;  %v1709_v33 = vunpack.c.l.b16 %v1702_v26  ;;  %v2264_v34 = vsel %vm2263_vm1, 1, %v2740_v2  ;;  %v908_v43 = vsel %vm344_vm6, %v900_v37, 0 }
 0x150   : > { %1715 = vrot.lane.b32.xlu0 %v1711_v19, %s2751_s20  ;;  %vm4509_vm7 = vmmov %vm4508_vm11  ;;  %1713 = vrot.lane.b32.xlu2 %v1710_v29, %s2751_s20  ;;  %v2265_v50 = vperm.slane %v2264_v34, 0  ;;  %v2266_v4 = vperm.slane %v2264_v34, 1  ;;  %v1794_v51 = vpack.c.b16 %v1791_v30, %v1791_v30  ;;  %vm3871_vm8 = vcmp.eq.s32.totalorder %v2349_v61, 1 }
 0x151   : > { %2628 = vmatmul.msk.bf16.vlgmr.msra.gmra.mxu0 %vm340_vm4, %v2627_v60  ;;  %2187 = vrot.lane.b32.xlu1 %v2186_v27, %s2747_s15  ;;  %v1712_v39 = vpack.c.b16 %v1709_v33, %v1709_v33  ;;  %vm3875_vm12 = vcmp.eq.s32.totalorder %v2350_v38, 1  ;;  %vm4514_vm0 = vcmask 465920   ;;  %v1792_v12 = vunpack.c.h.b16 %v3840_v20 }
 0x152   : > { %vm2267_vm2 = vcmp.eq.s32.totalorder %v2265_v50, 1  ;;  %vm2268_vm14 = vcmp.eq.s32.totalorder %v2266_v4, 1  ;;  %v3881_v48 = vpop.permute.xlu2 %1150  ;;  %vm2353_vm1 = vmpackc.low %vm3875_vm12, %vm3871_vm8  ;;  %v1779_v60 = vunpack.c.h.b16 %v3732_v13  ;;  %v2430_v33 = vand.u32 85, %v3567_v28 }
 0x153   : > { %v728_v56 = vpop.permute.xlu1 %727  ;;  %v1153_v44 = vpop.permute.xlu0 %1152  ;;  %vm2269_vm3 = vmpackc.low %vm2268_vm14, %vm2267_vm2  ;;  %v2354_v45 = vsel %vm2353_vm1, 65537, %v2740_v2  ;;  %v1795_v11 = vpack.c.b16 %v1792_v12, %v1792_v12  ;;  %vm4517_vm2 = vcmask 457728   ;;  %vm1782_vm14 = vcmp.ne.s32.totalorder %v1778_v31, %v2979_v40 }
 0x154   : > { %v731_v42 = vsel %vm4508_vm11, %v726_v18, %v728_v56  ;;  %v732_v35 = vsel %vm4509_vm7, %v728_v56, %v3570_v24  ;;  %v2630_v24 = vld [vmem:[%s4310_s0 + $0xa] sm:$0x3]  ;;  %v2270_v54 = vsel %vm2269_vm3, 65537, %v2740_v2  ;;  %v1156_v58 = vsel %vm340_vm4, %v3881_v48, %v1153_v44 }
 0x155   : > { %v737_v36 = vsel %vm344_vm6, %v731_v42, 0  ;;  %v740_v1 = vsel %vm344_vm6, %v732_v35, 0  ;;  %vm4515_vm11 = vcmask 449536   ;;  %v1164_v7 = vsel %vm344_vm6, %v1156_v58, 0 }
 0x156   : > { %749 = vmatpush.bf16.msra.mxu2 %v737_v36  ;;  %762 = vmatpush.bf16.msra.mxu3 %v740_v1  ;;  %vm4516_vm7 = vmmov %vm4515_vm11  ;;  %vm1783_vm3 = vcmp.ne.s32.totalorder %v1779_v60, %v2982_v41  ;;  %vm4519_vm12 = vcmask 515072  }
 0x157   : > { %vm1784_vm8 = vmpackc.low %vm1783_vm3, %vm1782_vm14 }
 0x158   : > { %1797 = vrot.lane.b32.xlu0 %v1794_v51, %s2749_s17  ;;  %2271 = vrot.lane.b32.xlu2 %v2270_v54, %s2748_s16  ;;  %v1786_v16 = vsel %vm1784_vm8, %v3653_v8, 0  ;;  %v2645_v51 = vld [vmem:[%s4310_s0 + $0x14] sm:$0x3] }
 0x159   : > { %2632 = vmatmul.msk.bf16.vlgmr.msra.gmra.mxu3 %vm340_vm4, %v2630_v24  ;;  %2631 = vmatmul.msk.bf16.vlgmr.msra.gmra.mxu2 %vm340_vm4, %v2630_v24  ;;  %v1793_v63 = vunpack.c.l.b16 %v1786_v16  ;;  %v1366_v24 = vand.u32 1, %v3567_v28 }
 0x15a   : > { %930 = vmatpush.bf16.msrb.mxu3 %v908_v43  ;;  %2635 = vmatmul.msk.bf16.vlgmr.msrb.gmra.mxu1 %vm340_vm4, %v2633_v52  ;;  %v1235_v9 = vpop.permute.xlu2 %1234 }
 0x15b   : > { %v810_v55 = vpop.permute.xlu1 %809  ;;  %1717 = vrot.lane.b32.xlu1 %v1712_v39, %s2751_s20  ;;  %v980_v32 = vpop.permute.xlu0 %979  ;;  %v1796_v18 = vpack.c.b16 %v1793_v63, %v1793_v63 }
 0x15c   : > { %v815_v53 = vsel %vm4514_vm0, %v810_v55, %v3721_v62  ;;  %v983_v62 = vsel %vm4515_vm11, %v3783_v57, %v980_v32  ;;  %v984_v59 = vsel %vm4516_vm7, %v980_v32, %v3697_v49 }
 0x15d   : > { %v821_v6 = vsel %vm344_vm6, %v815_v53, 0  ;;  %v989_v0 = vsel %vm344_vm6, %v983_v62, 0  ;;  %v992_v5 = vsel %vm344_vm6, %v984_v59, 0 }
 0x15e   : > { %833 = vmatpush.bf16.msrb.mxu0 %v821_v6  ;;  %1014 = vmatpush.bf16.msra.mxu1 %v992_v5 }
 0x160   : > { %2355 = vrot.lane.b32.xlu0 %v2354_v45, %s2746_s14  ;;  %1801 = vrot.lane.b32.xlu2 %v1796_v18, %s2749_s17 }
 0x161   : > { %2634 = vmatmul.msk.bf16.vlgmr.msrb.gmra.mxu0 %vm340_vm4, %v2633_v52 }
 0x162   : > { %1001 = vmatpush.bf16.msra.mxu0 %v989_v0  ;;  %1186 = vmatpush.bf16.msrb.mxu1 %v1164_v7 }
 0x163   : > { %v894_v57 = vpop.permute.xlu1 %893  ;;  %1799 = vrot.lane.b32.xlu1 %v1795_v11, %s2749_s17  ;;  %v1063_v14 = vpop.permute.xlu0 %1062 }
 0x164   : > { %v899_v49 = vsel %vm4517_vm2, %v894_v57, %v3740_v17  ;;  %v2639_v17 = vld [vmem:[%s4310_s0 + $0x10] sm:$0x3] }
 0x165   : > { %v905_v13 = vsel %vm344_vm6, %v899_v49, 0 }
 0x166   : > { %917 = vmatpush.bf16.msrb.mxu2 %v905_v13 }
 0x169   : > { %2637 = vmatmul.msk.bf16.vlgmr.msrb.gmra.mxu2 %vm340_vm4, %v2636_v15  ;;  %2638 = vmatmul.msk.bf16.vlgmr.msrb.gmra.mxu3 %vm340_vm4, %v2636_v15 }
 0x16a   : > { %2641 = vmatmul.msk.bf16.vlgmr.msra.gmra.mxu1 %vm340_vm4, %v2639_v17 }
 0x16b   : > { %v1065_v19 = vpop.permute.xlu1 %1064  ;;  %v1237_v3 = vpop.permute.xlu0 %1236 }
 0x16c   : > { %v1069_v20 = vsel %vm1068_vm13, %v1063_v14, %v1065_v19  ;;  %v1070_v22 = vsel %vm1068_vm13, %v1065_v19, %v3677_v21  ;;  %v1241_v27 = vsel %vm1240_vm9, %v1235_v9, %v1237_v3  ;;  %v1242_v30 = vsel %vm1240_vm9, %v1237_v3, %v3808_v10  ;;  %v1462_v21 = vpop.permute.xlu2 %1461  ;;  %v2642_v10 = vld [vmem:[%s4310_s0 + $0x12] sm:$0x3]  ;;  %v2648_v19 = vld [vmem:[%s4310_s0 + $0x16] sm:$0x3] }
 0x16d   : > { %v1075_v26 = vsel %vm344_vm6, %v1069_v20, 0  ;;  %v1078_v29 = vsel %vm344_vm6, %v1070_v22, 0  ;;  %v1247_v37 = vsel %vm344_vm6, %v1241_v27, 0  ;;  %v1250_v56 = vsel %vm344_vm6, %v1242_v30, 0 }
 0x16e   : > { %1087 = vmatpush.bf16.msra.mxu2 %v1075_v26  ;;  %1100 = vmatpush.bf16.msra.mxu3 %v1078_v29  ;;  %vm2431_vm9 = vcmp.eq.s32.totalorder %v2430_v33, 85  ;;  %vm1367_vm13 = vcmp.eq.s32.totalorder %v1366_v24, 1 }
 0x16f   : > { %v2432_v44 = vsel %vm2431_vm9, 1, %v2740_v2  ;;  %v1369_v47 = vsel %vm1367_vm13, 1, %v2740_v2  ;;  %vm4530_vm13 = vcmask 465920  }
 0x170   : > { %v1370_v53 = vperm.slane %v1369_v47, 0  ;;  %v1371_v58 = vperm.slane %v1369_v47, 1  ;;  %v2434_v62 = vperm.slane %v2432_v44, 1 }
 0x171   : > { %2640 = vmatmul.msk.bf16.vlgmr.msra.gmra.mxu0 %vm340_vm4, %v2639_v17 }
 0x172   : > { %1259 = vmatpush.bf16.msrb.mxu2 %v1247_v37  ;;  %1272 = vmatpush.bf16.msrb.mxu3 %v1250_v56  ;;  %vm3965_vm11 = vcmp.eq.s32.totalorder %v1370_v53, 1  ;;  %vm3979_vm3 = vcmp.eq.s32.totalorder %v1371_v58, 1 }
 0x173   : > { %v1149_v61 = vpop.permute.xlu1 %1148  ;;  %v1321_v35 = vpop.permute.xlu0 %1320 }
 0x174   : > { %v1155_v38 = vsel %vm340_vm4, %v1149_v61, %v3881_v48  ;;  %v2020_v36 = vpop.permute.xlu2 %2019 }
 0x175   : > { %v1161_v42 = vsel %vm344_vm6, %v1155_v38, 0  ;;  %v3955_v52 = vrot.slane %v2020_v36, 4 }
 0x176   : > { %1173 = vmatpush.bf16.msrb.mxu0 %v1161_v42 }
 0x177   : > { %v2022_v28 = vsel %vm4519_vm12, %v3955_v52, %v2020_v36  ;;  %v2030_v24 = vunpack.c.l.b16 %v3955_v52 }
 0x178   : > { %v2023_v7 = vunpack.c.l.b16 %v2022_v28  ;;  %v2024_v11 = vunpack.c.h.b16 %v2022_v28 }
 0x179   : > { %2644 = vmatmul.msk.bf16.vlgmr.msra.gmra.mxu3 %vm340_vm4, %v2642_v10  ;;  %2643 = vmatmul.msk.bf16.vlgmr.msra.gmra.mxu2 %vm340_vm4, %v2642_v10 }
 0x17a   : > { %2647 = vmatmul.msk.bf16.vlgmr.msrb.gmra.mxu1 %vm340_vm4, %v2645_v51 }
 0x17b   : > { %v1323_v34 = vpop.permute.xlu1 %1322  ;;  %v1852_v39 = vpop.permute.xlu0 %1851 }
 0x17c   : > { %v1327_v1 = vsel %vm1326_vm10, %v1321_v35, %v1323_v34  ;;  %v1328_v50 = vsel %vm1326_vm10, %v1323_v34, %v3843_v23  ;;  %v1853_v25 = vrot.slane %v1852_v39, 4  ;;  %v2433_v23 = vperm.slane %v2432_v44, 0  ;;  %vm4518_vm10 = vmmov %vm4517_vm2  ;;  %v1550_v53 = vpop.permute.xlu2 %1549 }
 0x17d   : > { %v1333_v4 = vsel %vm344_vm6, %v1327_v1, 0  ;;  %v1336_v43 = vsel %vm344_vm6, %v1328_v50, 0  ;;  %v2651_v1 = vld [vmem:[%s4310_s0 + $0x18] sm:$0x3] }
 0x17e   : > { %1345 = vmatpush.bf16.msra.mxu0 %v1333_v4  ;;  %1358 = vmatpush.bf16.msra.mxu1 %v1336_v43  ;;  %v1854_v54 = vsel %vm4518_vm10, %v1853_v25, %v1852_v39  ;;  %v1862_v48 = vunpack.c.l.b16 %v1853_v25  ;;  %v1863_v55 = vunpack.c.h.b16 %v1853_v25  ;;  %vm3988_vm9 = vcmp.eq.s32.totalorder %v2433_v23, 1  ;;  %vm1374_vm10 = vmpackc.low %vm3979_vm3, %vm3965_vm11 }
 0x17f   : > { %v1855_v6 = vunpack.c.l.b16 %v1854_v54  ;;  %v1856_v12 = vunpack.c.h.b16 %v1854_v54  ;;  %v2031_v39 = vunpack.c.h.b16 %v3955_v52 }
 0x180   : > { %vm1866_vm0 = vcmp.ne.s32.totalorder %v1862_v48, %v2979_v40  ;;  %vm1867_vm1 = vcmp.ne.s32.totalorder %v1863_v55, %v2982_v41 }
 0x181   : > { %2646 = vmatmul.msk.bf16.vlgmr.msrb.gmra.mxu0 %vm340_vm4, %v2645_v51  ;;  %vm3970_vm7 = vcmp.ne.s32.totalorder %v1855_v6, %v2979_v40  ;;  %vm3975_vm2 = vcmp.ne.s32.totalorder %v1856_v12, %v2982_v41  ;;  %vm1868_vm14 = vmpackc.low %vm1867_vm1, %vm1866_vm0  ;;  %vm4006_vm1 = vcmp.ne.s32.totalorder %v2023_v7, %v2979_v40 }
 0x182   : > { %vm1861_vm8 = vmpackc.low %vm3975_vm2, %vm3970_vm7  ;;  %v1870_v5 = vsel %vm1868_vm14, %v3653_v8, 0  ;;  %vm4011_vm7 = vcmp.ne.s32.totalorder %v2024_v11, %v2982_v41  ;;  %vm4016_vm14 = vcmp.eq.s32.totalorder %v2434_v62, 1 }
 0x183   : > { %v1936_v32 = vpop.permute.xlu1 %1935  ;;  %v1464_v15 = vpop.permute.xlu0 %1463  ;;  %v1877_v16 = vunpack.c.l.b16 %v1870_v5  ;;  %v1869_v18 = vsel %vm1861_vm8, %v3600_v46, 0  ;;  %vm2029_vm11 = vmpackc.low %vm4011_vm7, %vm4006_vm1 }
 0x184   : > { %v1937_v60 = vrot.slane %v1936_v32, 4  ;;  %v1467_v17 = vsel %vm1292_vm15, %v1462_v21, %v1464_v15  ;;  %v1876_v26 = vunpack.c.h.b16 %v1869_v18  ;;  %v1875_v29 = vunpack.c.l.b16 %v1869_v18  ;;  %vm2437_vm3 = vmpackc.low %vm4016_vm14, %vm3988_vm9 }
 0x185   : > { %v1473_v20 = vsel %vm344_vm6, %v1467_v17, 0  ;;  %v1880_v22 = vpack.c.b16 %v1877_v16, %v1877_v16  ;;  %v1375_v21 = vsel %vm1374_vm10, %v3600_v46, 0  ;;  %v2037_v25 = vsel %vm2029_vm11, %v3600_v46, 0 }
 0x186   : > { %v1938_v49 = vsel %vm4530_vm13, %v1937_v60, %v1936_v32  ;;  %v1946_v13 = vunpack.c.l.b16 %v1937_v60  ;;  %v1947_v14 = vunpack.c.h.b16 %v1937_v60  ;;  %1485 = vmatpush.bf16.msrb.mxu0 %v1473_v20  ;;  %v1879_v30 = vpack.c.b16 %v1876_v26, %v1876_v26 }
 0x187   : > { %v1939_v63 = vunpack.c.l.b16 %v1938_v49  ;;  %v1940_v9 = vunpack.c.h.b16 %v1938_v49  ;;  %1885 = vrot.lane.b32.xlu0 %v1880_v22, %s2746_s14  ;;  %v1878_v37 = vpack.c.b16 %v1875_v29, %v1875_v29  ;;  %v1380_v10 = vunpack.c.h.b16 %v1375_v21  ;;  %v2654_v29 = vld [vmem:[%s4310_s0 + $0x1a] sm:$0x3] }
 0x188   : > { %vm4029_vm8 = vcmp.ne.s32.totalorder %v1946_v13, %v2979_v40  ;;  %vm4034_vm13 = vcmp.ne.s32.totalorder %v1947_v14, %v2982_v41  ;;  %1883 = vrot.lane.b32.xlu2 %v1879_v30, %s2746_s14  ;;  %v1379_v51 = vunpack.c.l.b16 %v1375_v21  ;;  %v2438_v48 = vsel %vm2437_vm3, 65537, %v2740_v2  ;;  %v2660_v30 = vld [vmem:[%s4310_s0 + $0x1e] sm:$0x3] }
 0x189   : > { %vm1943_vm12 = vcmp.ne.s32.totalorder %v1939_v63, %v2979_v40  ;;  %vm1944_vm0 = vcmp.ne.s32.totalorder %v1940_v9, %v2982_v41  ;;  %2650 = vmatmul.msk.bf16.vlgmr.msrb.gmra.mxu3 %vm340_vm4, %v2648_v19  ;;  %2649 = vmatmul.msk.bf16.vlgmr.msrb.gmra.mxu2 %vm340_vm4, %v2648_v19  ;;  %v1382_v4 = vpack.c.b16 %v1380_v10, %v1380_v10  ;;  %v2044_v52 = vunpack.c.h.b16 %v2037_v25 }
 0x18a   : > { %vm1945_vm2 = vmpackc.low %vm1944_vm0, %vm1943_vm12  ;;  %1881 = vrot.lane.b32.xlu1 %v1878_v37, %s2746_s14  ;;  %2653 = vmatmul.msk.bf16.vlgmr.msra.gmra.mxu1 %vm340_vm4, %v2651_v1  ;;  %v1381_v54 = vpack.c.b16 %v1379_v51, %v1379_v51  ;;  %vm4073_vm10 = vcmp.ne.s32.totalorder %v2030_v24, %v2979_v40  ;;  %vm4078_vm12 = vcmp.ne.s32.totalorder %v2031_v39, %v2982_v41  ;;  %v2043_v59 = vunpack.c.l.b16 %v2037_v25 }
 0x18b   : > { %v1953_v61 = vsel %vm1945_vm2, %v3600_v46, 0  ;;  %v1466_v38 = vpop.permute.xlu1 %1465  ;;  %v1546_v43 = vpop.permute.xlu0 %1545  ;;  %v1390_v23 = vsel %vm344_vm6, %v1382_v4, 0  ;;  %v2047_v0 = vpack.c.b16 %v2044_v52, %v2044_v52  ;;  %vm2036_vm9 = vmpackc.low %vm4078_vm12, %vm4073_vm10  ;;  %vm4548_vm3 = vcmask 580608  }
 0x18c   : > { %v1960_v33 = vunpack.c.h.b16 %v1953_v61  ;;  %v1468_v34 = vsel %vm1292_vm15, %v1464_v15, %v1466_v38  ;;  %v1959_v36 = vunpack.c.l.b16 %v1953_v61  ;;  %vm1952_vm15 = vmpackc.low %vm4034_vm13, %vm4029_vm8  ;;  %1412 = vmatpush.bf16.msra.mxu3 %v1390_v23  ;;  %v1387_v6 = vsel %vm344_vm6, %v1381_v54, 0 }
 0x18d   : > { %v1476_v50 = vsel %vm344_vm6, %v1468_v34, 0  ;;  %v1954_v55 = vsel %vm1952_vm15, %v3653_v8, 0  ;;  %1399 = vmatpush.bf16.msra.mxu2 %v1387_v6  ;;  %v2046_v11 = vpack.c.b16 %v2043_v59, %v2043_v59  ;;  %v2038_v14 = vsel %vm2036_vm9, %v3653_v8, 0  ;;  %v2663_v34 = vld [vmem:[%s4310_s0 + $0x20] sm:$0x3] }
 0x18e   : > { %v1963_v44 = vpack.c.b16 %v1960_v33, %v1960_v33  ;;  %1498 = vmatpush.bf16.msrb.mxu1 %v1476_v50  ;;  %v1962_v47 = vpack.c.b16 %v1959_v36, %v1959_v36  ;;  %v1961_v2 = vunpack.c.l.b16 %v1954_v55  ;;  %v2045_v63 = vunpack.c.l.b16 %v2038_v14  ;;  %v2666_v6 = vld [vmem:[%s4310_s0 + $0x22] sm:$0x3]  ;;  %v4172_v14 = vld [vmem:[#allocation2 + $0xc] sm:$0xf] }
 0x18f   : > { %v373_v21 = vpop.f32.mrf.mxu1  ;;  %vm4546_vm13 = vcmask 982016   ;;  %vm4549_vm15 = vcmask 973824  }
 0x190   : > { %1967 = vrot.lane.b32.xlu0 %v1963_v44, %s2748_s16  ;;  %1965 = vrot.lane.b32.xlu2 %v1962_v47, %s2748_s16  ;;  %v1964_v7 = vpack.c.b16 %v1961_v2, %v1961_v2  ;;  %v2048_v19 = vpack.c.b16 %v2045_v63, %v2045_v63  ;;  %vm4547_vm11 = vmmov %vm4546_vm13  ;;  %v4175_v63 = vld [vmem:[#allocation2 + $0x4] sm:$0xff] }
 0x191   : > { %2652 = vmatmul.msk.bf16.vlgmr.msra.gmra.mxu0 %vm340_vm4, %v2651_v1 }
 0x192   : > { %2439 = vrot.lane.b32.xlu1 %v2438_v48, %s2749_s17 }
 0x193   : > { %v1548_v12 = vpop.permute.xlu1 %1547  ;;  %v2104_v60 = vpop.permute.xlu0 %2103 }
 0x194   : > { %v1551_v32 = vsel %vm1206_vm5, %v1546_v43, %v1548_v12  ;;  %v1552_v62 = vsel %vm1206_vm5, %v1548_v12, %v1550_v53  ;;  %v2105_v5 = vrot.slane %v2104_v60, 4  ;;  %vm4545_vm5 = vcmask 523264  }
 0x195   : > { %v1557_v45 = vsel %vm344_vm6, %v1551_v32, 0  ;;  %v1560_v31 = vsel %vm344_vm6, %v1552_v62, 0 }
 0x196   : > { %1582 = vmatpush.bf16.msrb.mxu3 %v1560_v31  ;;  %1569 = vmatpush.bf16.msrb.mxu2 %v1557_v45  ;;  %v2106_v57 = vsel %vm4545_vm5, %v2105_v5, %v2104_v60  ;;  %v2114_v49 = vunpack.c.l.b16 %v2105_v5  ;;  %v2115_v13 = vunpack.c.h.b16 %v2105_v5 }
 0x197   : > { %v2107_v15 = vunpack.c.l.b16 %v2106_v57  ;;  %v2108_v16 = vunpack.c.h.b16 %v2106_v57  ;;  %v375_v50 = vpop.f32.mrf.mxu1 }
 0x198   : > { %2051 = vrot.lane.b32.xlu0 %v2047_v0, %s2747_s15  ;;  %vm2118_vm0 = vcmp.ne.s32.totalorder %v2114_v49, %v2979_v40  ;;  %vm2119_vm1 = vcmp.ne.s32.totalorder %v2115_v13, %v2982_v41  ;;  %2049 = vrot.lane.b32.xlu2 %v2046_v11, %s2747_s15 }
 0x199   : > { %vm2111_vm7 = vcmp.ne.s32.totalorder %v2107_v15, %v2979_v40  ;;  %vm2112_vm2 = vcmp.ne.s32.totalorder %v2108_v16, %v2982_v41  ;;  %vm2120_vm8 = vmpackc.low %vm2119_vm1, %vm2118_vm0  ;;  %2655 = vmatmul.msk.bf16.vlgmr.msra.gmra.mxu2 %vm340_vm4, %v2654_v29  ;;  %2656 = vmatmul.msk.bf16.vlgmr.msra.gmra.mxu3 %vm340_vm4, %v2654_v29  ;;  %vm4558_vm0 = vcmask 531456  }
 0x19a   : > { %1969 = vrot.lane.b32.xlu1 %v1964_v7, %s2748_s16  ;;  %vm2113_vm14 = vmpackc.low %vm2112_vm2, %vm2111_vm7  ;;  %v2122_v22 = vsel %vm2120_vm8, %v3653_v8, 0  ;;  %v2657_v8 = vld [vmem:[%s4310_s0 + $0x1c] sm:$0x3] }
 0x19b   : > { %v2121_v9 = vsel %vm2113_vm14, %v3600_v46, 0  ;;  %v2129_v3 = vunpack.c.l.b16 %v2122_v22  ;;  %2659 = vmatmul.msk.bf16.vlgmr.msrb.gmra.mxu1 %vm340_vm4, %v2657_v8 }
 0x19c   : > { %v2128_v17 = vunpack.c.h.b16 %v2121_v9  ;;  %v2127_v18 = vunpack.c.l.b16 %v2121_v9 }
 0x19d   : > { %v2132_v46 = vpack.c.b16 %v2129_v3, %v2129_v3 }
 0x19e   : > { %v2131_v20 = vpack.c.b16 %v2128_v17, %v2128_v17  ;;  %v2130_v26 = vpack.c.b16 %v2127_v18, %v2127_v18 }
 0x1a0   : > { %2135 = vrot.lane.b32.xlu0 %v2131_v20, %s2744_s12  ;;  %2133 = vrot.lane.b32.xlu2 %v2130_v26, %s2744_s12 }
 0x1a1   : > { %2658 = vmatmul.msk.bf16.vlgmr.msrb.gmra.mxu0 %vm340_vm4, %v2657_v8 }
 0x1a2   : > { %2053 = vrot.lane.b32.xlu1 %v2048_v19, %s2747_s15  ;;  %v1632_v27 = vpop.permute.xlu2 %1631 }
 0x1a9   : > { %2661 = vmatmul.msk.bf16.vlgmr.msrb.gmra.mxu2 %vm340_vm4, %v2660_v30  ;;  %2662 = vmatmul.msk.bf16.vlgmr.msrb.gmra.mxu3 %vm340_vm4, %v2660_v30 }
 0x1aa   : > { %2137 = vrot.lane.b32.xlu1 %v2132_v46, %s2744_s12  ;;  %v1714_v37 = vpop.permute.xlu2 %1713 }
 0x1ae   : > { %v360_v56 = vpop.f32.mrf.mxu0 }
 0x1b2   : > { %v2272_v61 = vpop.permute.xlu2 %2271 }
 0x1b3   : > { %v2273_v10 = vrot.slane %v2272_v61, 4 }
 0x1b4   : > { %v412_v39 = vpop.f32.mrf.mxu2 }
 0x1b5   : > { %v2274_v43 = vsel %vm4548_vm3, %v2273_v10, %v2272_v61  ;;  %v2282_v51 = vunpack.c.l.b16 %v2273_v10  ;;  %v2283_v24 = vunpack.c.h.b16 %v2273_v10  ;;  %v413_v54 = vadd.f32 %v412_v39, %v360_v56  ;;  %v425_v48 = vpop.f32.mrf.mxu3 }
 0x1b6   : > { %v362_v1 = vpop.f32.mrf.mxu0  ;;  %v2275_v23 = vunpack.c.l.b16 %v2274_v43  ;;  %v2276_v47 = vunpack.c.h.b16 %v2274_v43  ;;  %v426_v53 = vadd.f32 %v425_v48, %v373_v21  ;;  %v509_v32 = vpop.f32.mrf.mxu1 }
 0x1b7   : > { %vm4139_vm10 = vcmp.ne.s32.totalorder %v2282_v51, %v2979_v40  ;;  %vm4144_vm12 = vcmp.ne.s32.totalorder %v2283_v24, %v2982_v41 }
 0x1b8   : > { %vm4149_vm9 = vcmp.ne.s32.totalorder %v2275_v23, %v2979_v40  ;;  %vm4154_vm5 = vcmp.ne.s32.totalorder %v2276_v47, %v2982_v41  ;;  %v514_v31 = vadd.f32 %v509_v32, %v426_v53  ;;  %vm2288_vm1 = vmpackc.low %vm4144_vm12, %vm4139_vm10  ;;  %vm4559_vm10 = vcmask 588800   ;;  %v2669_v53 = vld [vmem:[%s4310_s0 + $0x24] sm:$0x3] }
 0x1b9   : > { %v1634_v38 = vpop.permute.xlu0 %1633  ;;  %vm2281_vm7 = vmpackc.low %vm4154_vm5, %vm4149_vm9  ;;  %v2290_v18 = vsel %vm2288_vm1, %v4172_v14, 0  ;;  %vm4560_vm12 = vcmask 596992  }
 0x1ba   : > { %v1636_v42 = vsel %vm4546_vm13, %v1632_v27, %v1634_v38  ;;  %v2289_v19 = vsel %vm2281_vm7, %v4175_v63, 0  ;;  %v2297_v30 = vunpack.c.l.b16 %v2290_v18  ;;  %vm4561_vm9 = vmmov %vm4560_vm12 }
 0x1bb   : > { %v1644_v35 = vsel %vm344_vm6, %v1636_v42, 0  ;;  %v1630_v33 = vpop.permute.xlu1 %1629  ;;  %v2295_v21 = vunpack.c.l.b16 %v2289_v19 }
 0x1bc   : > { %1666 = vmatpush.bf16.msra.mxu1 %v1644_v35  ;;  %v1635_v36 = vsel %vm4547_vm11, %v1630_v33, %v1632_v27  ;;  %v414_v49 = vpop.f32.mrf.mxu2  ;;  %v1802_v35 = vpop.permute.xlu2 %1801 }
 0x1bd   : > { %v1641_v4 = vsel %vm344_vm6, %v1635_v36, 0  ;;  %v427_v13 = vpop.f32.mrf.mxu3  ;;  %v2298_v51 = vpack.c.b16 %v2295_v21, %v2295_v21 }
 0x1be   : > { %1653 = vmatpush.bf16.msra.mxu0 %v1641_v4  ;;  %v496_v2 = vpop.f32.mrf.mxu0  ;;  %v511_v3 = vpop.f32.mrf.mxu1 }
 0x1bf   : > { %2665 = vmatmul.msk.bf16.vlgmr.msra.gmra.mxu1 %vm340_vm4, %v2663_v34  ;;  %v513_v45 = vadd.f32 %v496_v2, %v413_v54 }
 0x1c1   : > { %2664 = vmatmul.msk.bf16.vlgmr.msra.gmra.mxu0 %vm340_vm4, %v2663_v34  ;;  %v2300_v34 = vpack.c.b16 %v2297_v30, %v2297_v30 }
 0x1c2   : > { %v1716_v44 = vpop.permute.xlu0 %1715 }
 0x1c3   : > { %v1719_v25 = vsel %vm4549_vm15, %v1714_v37, %v1716_v44  ;;  %v2188_v52 = vpop.permute.xlu1 %2187  ;;  %v2296_v37 = vunpack.c.h.b16 %v2289_v19 }
 0x1c4   : > { %v1725_v55 = vsel %vm344_vm6, %v1719_v25, 0  ;;  %v2189_v12 = vrot.slane %v2188_v52, 4  ;;  %v582_v38 = vpop.f32.mrf.mxu2 }
 0x1c5   : > { %1737 = vmatpush.bf16.msra.mxu2 %v1725_v55  ;;  %v599_v10 = vadd.f32 %v582_v38, %v513_v45  ;;  %v595_v33 = vpop.f32.mrf.mxu3  ;;  %v2299_v36 = vpack.c.b16 %v2296_v37, %v2296_v37 }
 0x1c6   : > { %v2190_v60 = vsel %vm4558_vm0, %v2189_v12, %v2188_v52  ;;  %v2198_v0 = vunpack.c.l.b16 %v2189_v12  ;;  %v2199_v5 = vunpack.c.h.b16 %v2189_v12  ;;  %v498_v29 = vpop.f32.mrf.mxu0  ;;  %v600_v1 = vadd.f32 %v595_v33, %v514_v31  ;;  %v680_v54 = vpop.f32.mrf.mxu1  ;;  %v2672_v33 = vld [vmem:[%s4310_s0 + $0x26] sm:$0x3] }
 0x1c7   : > { %v2191_v7 = vunpack.c.l.b16 %v2190_v60  ;;  %v2192_v11 = vunpack.c.h.b16 %v2190_v60 }
 0x1c8   : > { %2667 = vmatmul.msk.bf16.vlgmr.msra.gmra.mxu2 %vm340_vm4, %v2666_v6  ;;  %vm2202_vm2 = vcmp.ne.s32.totalorder %v2198_v0, %v2979_v40  ;;  %vm2203_vm14 = vcmp.ne.s32.totalorder %v2199_v5, %v2982_v41  ;;  %v685_v12 = vadd.f32 %v680_v54, %v600_v1  ;;  %v2675_v54 = vld [vmem:[%s4310_s0 + $0x28] sm:$0x3] }
 0x1c9   : > { %vm2195_vm8 = vcmp.ne.s32.totalorder %v2191_v7, %v2979_v40  ;;  %vm2196_vm13 = vcmp.ne.s32.totalorder %v2192_v11, %v2982_v41  ;;  %vm2204_vm11 = vmpackc.low %vm2203_vm14, %vm2202_vm2 }
 0x1ca   : > { %v1798_v57 = vpop.permute.xlu0 %1797  ;;  %vm2197_vm3 = vmpackc.low %vm2196_vm13, %vm2195_vm8  ;;  %v2206_v15 = vsel %vm2204_vm11, %v4172_v14, 0  ;;  %vm4564_vm11 = vcmask 580608  }
 0x1cb   : > { %v2213_v16 = vunpack.c.l.b16 %v2206_v15  ;;  %v2205_v9 = vsel %vm2197_vm3, %v4175_v63, 0  ;;  %vm4562_vm8 = vmmov %vm4559_vm10 }
 0x1cc   : > { %v2212_v20 = vunpack.c.h.b16 %v2205_v9  ;;  %v2211_v26 = vunpack.c.l.b16 %v2205_v9  ;;  %v584_v2 = vpop.f32.mrf.mxu2  ;;  %vm4563_vm13 = vmmov %vm4562_vm8 }
 0x1cd   : > { %v1718_v17 = vpop.permute.xlu1 %1717  ;;  %v2216_v46 = vpack.c.b16 %v2213_v16, %v2213_v16  ;;  %v597_v59 = vpop.f32.mrf.mxu3  ;;  %vm4565_vm3 = vmmov %vm4561_vm9 }
 0x1ce   : > { %v1720_v22 = vsel %vm4549_vm15, %v1716_v44, %v1718_v17  ;;  %v2215_v8 = vpack.c.b16 %v2212_v20, %v2212_v20  ;;  %v2214_v56 = vpack.c.b16 %v2211_v26, %v2211_v26  ;;  %v667_v47 = vpop.f32.mrf.mxu0  ;;  %v682_v5 = vpop.f32.mrf.mxu1 }
 0x1cf   : > { %v1728_v27 = vsel %vm344_vm6, %v1720_v22, 0  ;;  %2221 = vrot.lane.b32.xlu1 %v2216_v46, %s2743_s11  ;;  %v684_v52 = vadd.f32 %v667_v47, %v599_v10 }
 0x1d0   : > { %1750 = vmatpush.bf16.msra.mxu3 %v1728_v27  ;;  %2219 = vrot.lane.b32.xlu0 %v2215_v8, %s2743_s11 }
 0x1d1   : > { %2217 = vrot.lane.b32.xlu2 %v2214_v56, %s2743_s11 }
 0x1d2   : > { %v2356_v61 = vpop.permute.xlu0 %2355 }
 0x1d3   : > { %v2357_v42 = vrot.slane %v2356_v61, 4  ;;  %2668 = vmatmul.msk.bf16.vlgmr.msra.gmra.mxu3 %vm340_vm4, %v2666_v6 }
 0x1d5   : > { %v2358_v50 = vsel %vm4559_vm10, %v2357_v42, %v2356_v61  ;;  %v2366_v4 = vunpack.c.l.b16 %v2357_v42  ;;  %v2367_v43 = vunpack.c.h.b16 %v2357_v42  ;;  %v1800_v44 = vpop.permute.xlu1 %1799 }
 0x1d6   : > { %v2359_v24 = vunpack.c.l.b16 %v2358_v50  ;;  %v2360_v39 = vunpack.c.h.b16 %v2358_v50  ;;  %v1803_v25 = vsel %vm4560_vm12, %v1798_v57, %v1800_v44  ;;  %v1804_v23 = vsel %vm4561_vm9, %v1800_v44, %v1802_v35  ;;  %v669_v0 = vpop.f32.mrf.mxu0 }
 0x1d7   : > { %v1809_v48 = vsel %vm344_vm6, %v1803_v25, 0  ;;  %v1812_v55 = vsel %vm344_vm6, %v1804_v23, 0  ;;  %vm2370_vm5 = vcmp.ne.s32.totalorder %v2366_v4, %v2979_v40  ;;  %vm2371_vm0 = vcmp.ne.s32.totalorder %v2367_v43, %v2982_v41  ;;  %2305 = vrot.lane.b32.xlu1 %v2300_v34, %s2741_s9  ;;  %v848_v15 = vpop.f32.mrf.mxu1 }
 0x1d8   : > { %vm2363_vm1 = vcmp.ne.s32.totalorder %v2359_v24, %v2979_v40  ;;  %vm2364_vm7 = vcmp.ne.s32.totalorder %v2360_v39, %v2982_v41  ;;  %1834 = vmatpush.bf16.msrb.mxu1 %v1812_v55  ;;  %vm2372_vm2 = vmpackc.low %vm2371_vm0, %vm2370_vm5  ;;  %1821 = vmatpush.bf16.msrb.mxu0 %v1809_v48 }
 0x1d9   : > { %vm2365_vm14 = vmpackc.low %vm2364_vm7, %vm2363_vm1  ;;  %v2374_v6 = vsel %vm2372_vm2, %v4172_v14, 0  ;;  %2303 = vrot.lane.b32.xlu0 %v2299_v36, %s2741_s9  ;;  %2301 = vrot.lane.b32.xlu2 %v2298_v51, %s2741_s9  ;;  %vm4566_vm1 = vcmask 531456   ;;  %vm4568_vm2 = vcmask 523264  }
 0x1da   : > { %v2381_v28 = vunpack.c.l.b16 %v2374_v6  ;;  %v2373_v58 = vsel %vm2365_vm14, %v4175_v63, 0  ;;  %vm4567_vm7 = vmmov %vm4564_vm11 }
 0x1db   : > { %v2380_v32 = vunpack.c.h.b16 %v2373_v58  ;;  %2670 = vmatmul.msk.bf16.vlgmr.msrb.gmra.mxu0 %vm340_vm4, %v2669_v53  ;;  %2671 = vmatmul.msk.bf16.vlgmr.msrb.gmra.mxu1 %vm340_vm4, %v2669_v53  ;;  %v2379_v62 = vunpack.c.l.b16 %v2373_v58  ;;  %vm4569_vm14 = vmmov %vm4566_vm1 }
 0x1dc   : > { %v2384_v45 = vpack.c.b16 %v2381_v28, %v2381_v28  ;;  %v751_v7 = vpop.f32.mrf.mxu2  ;;  %v764_v57 = vpop.f32.mrf.mxu3 }
 0x1dd   : > { %v2383_v31 = vpack.c.b16 %v2380_v32, %v2380_v32  ;;  %v2382_v60 = vpack.c.b16 %v2379_v62, %v2379_v62  ;;  %v768_v11 = vadd.f32 %v751_v7, %v684_v52  ;;  %v769_v49 = vadd.f32 %v764_v57, %v685_v12 }
 0x1de   : > { %v835_v13 = vpop.f32.mrf.mxu0 }
 0x1df   : > { %2389 = vrot.lane.b32.xlu1 %v2384_v45, %s2742_s10  ;;  %v852_v9 = vadd.f32 %v835_v13, %v768_v11  ;;  %v853_v17 = vadd.f32 %v848_v15, %v769_v49  ;;  %v850_v20 = vpop.f32.mrf.mxu1 }
 0x1e1   : > { %2387 = vrot.lane.b32.xlu0 %v2383_v31, %s2742_s10  ;;  %2385 = vrot.lane.b32.xlu2 %v2382_v60, %s2742_s10 }
 0x1e2   : > { %v1884_v46 = vpop.permute.xlu2 %1883 }
 0x1e4   : > { %v753_v16 = vpop.f32.mrf.mxu2  ;;  %v766_v18 = vpop.f32.mrf.mxu3 }
 0x1e6   : > { %v837_v19 = vpop.f32.mrf.mxu0 }
 0x1e7   : > { %v1016_v8 = vpop.f32.mrf.mxu1 }
 0x1ea   : > { %v1966_v34 = vpop.permute.xlu2 %1965 }
 0x1ec   : > { %v919_v22 = vpop.f32.mrf.mxu2  ;;  %v932_v29 = vpop.f32.mrf.mxu3 }
 0x1ed   : > { %v936_v26 = vadd.f32 %v919_v22, %v852_v9  ;;  %v937_v3 = vadd.f32 %v932_v29, %v853_v17  ;;  %v2678_v17 = vld [vmem:[%s4310_s0 + $0x2a] sm:$0x3] }
 0x1ee   : > { %v1003_v27 = vpop.f32.mrf.mxu0 }
 0x1ef   : > { %v1020_v30 = vadd.f32 %v1003_v27, %v936_v26  ;;  %v1021_v37 = vadd.f32 %v1016_v8, %v937_v3  ;;  %v1018_v50 = vpop.f32.mrf.mxu1 }
 0x1f2   : > { %v2050_v12 = vpop.permute.xlu2 %2049 }
 0x1f4   : > { %v921_v21 = vpop.f32.mrf.mxu2  ;;  %v934_v38 = vpop.f32.mrf.mxu3 }
 0x1f6   : > { %v1005_v1 = vpop.f32.mrf.mxu0 }
 0x1f7   : > { %v1188_v55 = vpop.f32.mrf.mxu1 }
 0x1f9   : > { %v1886_v56 = vpop.permute.xlu0 %1885 }
 0x1fa   : > { %v1888_v61 = vsel %vm4562_vm8, %v1884_v46, %v1886_v56  ;;  %vm4570_vm8 = vmmov %vm4568_vm2 }
 0x1fb   : > { %v1896_v42 = vsel %vm344_vm6, %v1888_v61, 0 }
 0x1fc   : > { %v1882_v35 = vpop.permute.xlu1 %1881  ;;  %1918 = vmatpush.bf16.msrb.mxu3 %v1896_v42  ;;  %v1089_v43 = vpop.f32.mrf.mxu2 }
 0x1fd   : > { %v1887_v10 = vsel %vm4563_vm13, %v1882_v35, %v1884_v46  ;;  %v1106_v51 = vadd.f32 %v1089_v43, %v1020_v30  ;;  %v1102_v24 = vpop.f32.mrf.mxu3  ;;  %v2681_v30 = vld [vmem:[%s4310_s0 + $0x2c] sm:$0x3]  ;;  %vm4571_vm13 = vcmask 515072  }
 0x1fe   : > { %v1893_v36 = vsel %vm344_vm6, %v1887_v10, 0  ;;  %v1107_v23 = vadd.f32 %v1102_v24, %v1021_v37  ;;  %v1175_v48 = vpop.f32.mrf.mxu0 }
 0x1ff   : > { %1905 = vmatpush.bf16.msrb.mxu2 %v1893_v36  ;;  %2674 = vmatmul.msk.bf16.vlgmr.msrb.gmra.mxu3 %vm340_vm4, %v2672_v33  ;;  %v1192_v28 = vadd.f32 %v1175_v48, %v1106_v51  ;;  %v1190_v16 = vpop.f32.mrf.mxu1 }
 0x200   : > { %v1193_v32 = vadd.f32 %v1188_v55, %v1107_v23 }
 0x202   : > { %2673 = vmatmul.msk.bf16.vlgmr.msrb.gmra.mxu2 %vm340_vm4, %v2672_v33  ;;  %v1968_v4 = vpop.permute.xlu0 %1967 }
 0x203   : > { %v1971_v44 = vsel %vm4564_vm11, %v1966_v34, %v1968_v4  ;;  %vm4572_vm11 = vmmov %vm4571_vm13 }
 0x204   : > { %v2440_v39 = vpop.permute.xlu1 %2439  ;;  %v1977_v25 = vsel %vm344_vm6, %v1971_v44, 0  ;;  %v1091_v59 = vpop.f32.mrf.mxu2 }
 0x205   : > { %v2441_v47 = vrot.slane %v2440_v39, 4  ;;  %1989 = vmatpush.bf16.msra.mxu0 %v1977_v25  ;;  %v1104_v60 = vpop.f32.mrf.mxu3 }
 0x206   : > { %v1177_v15 = vpop.f32.mrf.mxu0 }
 0x207   : > { %v2442_v53 = vsel %vm4565_vm3, %v2441_v47, %v2440_v39  ;;  %v2450_v52 = vunpack.c.l.b16 %v2441_v47  ;;  %v2451_v6 = vunpack.c.h.b16 %v2441_v47  ;;  %v1360_v56 = vpop.f32.mrf.mxu1  ;;  %vm4573_vm3 = vcmask 465920  }
 0x208   : > { %v2443_v58 = vunpack.c.l.b16 %v2442_v53  ;;  %v2444_v2 = vunpack.c.h.b16 %v2442_v53  ;;  %2676 = vmatmul.msk.bf16.vlgmr.msra.gmra.mxu0 %vm340_vm4, %v2675_v54 }
 0x209   : > { %vm2454_vm15 = vcmp.ne.s32.totalorder %v2450_v52, %v2979_v40  ;;  %vm2455_vm10 = vcmp.ne.s32.totalorder %v2451_v6, %v2982_v41 }
 0x20a   : > { %vm2447_vm12 = vcmp.ne.s32.totalorder %v2443_v58, %v2979_v40  ;;  %vm2448_vm9 = vcmp.ne.s32.totalorder %v2444_v2, %v2982_v41  ;;  %v2052_v62 = vpop.permute.xlu0 %2051  ;;  %vm2456_vm5 = vmpackc.low %vm2455_vm10, %vm2454_vm15  ;;  %vm4575_vm10 = vcmask 457728  }
 0x20b   : > { %vm2449_vm0 = vmpackc.low %vm2448_vm9, %vm2447_vm12  ;;  %v2055_v45 = vsel %vm4566_vm1, %v2050_v12, %v2052_v62  ;;  %v2458_v31 = vsel %vm2456_vm5, %v4172_v14, 0  ;;  %vm4577_vm9 = vcmask 449536  }
 0x20c   : > { %v1970_v0 = vpop.permute.xlu1 %1969  ;;  %v2061_v5 = vsel %vm344_vm6, %v2055_v45, 0  ;;  %v2465_v7 = vunpack.c.l.b16 %v2458_v31  ;;  %v2457_v11 = vsel %vm2449_vm0, %v4175_v63, 0  ;;  %v2134_v63 = vpop.permute.xlu2 %2133  ;;  %vm4574_vm15 = vmmov %vm4573_vm3 }
 0x20d   : > { %v1972_v57 = vsel %vm4567_vm7, %v1968_v4, %v1970_v0  ;;  %2073 = vmatpush.bf16.msra.mxu2 %v2061_v5  ;;  %v2464_v40 = vunpack.c.h.b16 %v2457_v11  ;;  %v2463_v41 = vunpack.c.l.b16 %v2457_v11  ;;  %v1261_v18 = vpop.f32.mrf.mxu2  ;;  %v1274_v22 = vpop.f32.mrf.mxu3  ;;  %v2684_v11 = vld [vmem:[%s4310_s0 + $0x2e] sm:$0x3]  ;;  %vm4576_vm12 = vmmov %vm4575_vm10 }
 0x20e   : > { %v1980_v49 = vsel %vm344_vm6, %v1972_v57, 0  ;;  %v2468_v13 = vpack.c.b16 %v2465_v7, %v2465_v7  ;;  %v1278_v20 = vadd.f32 %v1261_v18, %v1192_v28  ;;  %v1279_v3 = vadd.f32 %v1274_v22, %v1193_v32  ;;  %v1347_v37 = vpop.f32.mrf.mxu0  ;;  %vm4578_vm5 = vmmov %vm4577_vm9 }
 0x20f   : > { %2002 = vmatpush.bf16.msra.mxu1 %v1980_v49  ;;  %v2467_v9 = vpack.c.b16 %v2464_v40, %v2464_v40  ;;  %v2466_v14 = vpack.c.b16 %v2463_v41, %v2463_v41  ;;  %v1362_v36 = vpop.f32.mrf.mxu1 }
 0x210   : > { %2473 = vrot.lane.b32.xlu1 %v2468_v13, %s2745_s13  ;;  %v1364_v21 = vadd.f32 %v1347_v37, %v1278_v20  ;;  %v1365_v61 = vadd.f32 %v1360_v56, %v1279_v3 }
 0x211   : > { %2471 = vrot.lane.b32.xlu0 %v2467_v9, %s2745_s13  ;;  %2469 = vrot.lane.b32.xlu2 %v2466_v14, %s2745_s13 }
 0x212   : > { %2677 = vmatmul.msk.bf16.vlgmr.msra.gmra.mxu1 %vm340_vm4, %v2675_v54  ;;  %2679 = vmatmul.msk.bf16.vlgmr.msra.gmra.mxu2 %vm340_vm4, %v2678_v17  ;;  %v2136_v19 = vpop.permute.xlu0 %2135 }
 0x213   : > { %v2139_v29 = vsel %vm4568_vm2, %v2134_v63, %v2136_v19  ;;  %v2687_v63 = vld [vmem:[%s4310_s0 + $0x30] sm:$0x3] }
 0x214   : > { %v2054_v26 = vpop.permute.xlu1 %2053  ;;  %v2145_v27 = vsel %vm344_vm6, %v2139_v29, 0 }
 0x215   : > { %v2056_v46 = vsel %vm4569_vm14, %v2052_v62, %v2054_v26  ;;  %2157 = vmatpush.bf16.msrb.mxu0 %v2145_v27  ;;  %v1263_v38 = vpop.f32.mrf.mxu2  ;;  %v1276_v42 = vpop.f32.mrf.mxu3 }
 0x216   : > { %v2064_v8 = vsel %vm344_vm6, %v2056_v46, 0  ;;  %v1349_v34 = vpop.f32.mrf.mxu0 }
 0x217   : > { %2086 = vmatpush.bf16.msra.mxu3 %v2064_v8  ;;  %v2690_v8 = vld [vmem:[%s4310_s0 + $0x32] sm:$0x3] }
 0x218   : > { %2682 = vmatmul.msk.bf16.vlgmr.msrb.gmra.mxu0 %vm340_vm4, %v2681_v30  ;;  %v1500_v24 = vpop.f32.mrf.mxu1 }
 0x21a   : > { %2680 = vmatmul.msk.bf16.vlgmr.msra.gmra.mxu3 %vm340_vm4, %v2678_v17 }
 0x21c   : > { %v2138_v35 = vpop.permute.xlu1 %2137 }
 0x21d   : > { %v2140_v10 = vsel %vm4570_vm8, %v2136_v19, %v2138_v35  ;;  %v1401_v1 = vpop.f32.mrf.mxu2  ;;  %v1414_v4 = vpop.f32.mrf.mxu3 }
 0x21e   : > { %v2148_v33 = vsel %vm344_vm6, %v2140_v10, 0  ;;  %v1418_v50 = vadd.f32 %v1401_v1, %v1364_v21  ;;  %v1487_v43 = vpop.f32.mrf.mxu0  ;;  %v1419_v44 = vadd.f32 %v1414_v4, %v1365_v61  ;;  %v2522_v10 = vld [vmem:[%s4314_s4] sm:$0xf] }
 0x21f   : > { %2170 = vmatpush.bf16.msrb.mxu1 %v2148_v33  ;;  %2525 = vperm.xlu0 %2726, %v2522_v10   ;;  %v2514_v33 = vld [vmem:[%s4313_s3] sm:$0xf] }
 0x220   : > { %v1504_v51 = vadd.f32 %v1487_v43, %v1418_v50  ;;  %v1505_v39 = vadd.f32 %v1500_v24, %v1419_v44  ;;  %v1502_v54 = vpop.f32.mrf.mxu1  ;;  %2517 = vperm.xlu2 %2725, %v2514_v33  }
 0x222   : > { %2683 = vmatmul.msk.bf16.vlgmr.msrb.gmra.mxu1 %vm340_vm4, %v2681_v30 }
 0x225   : > { %v1403_v25 = vpop.f32.mrf.mxu2  ;;  %v1416_v23 = vpop.f32.mrf.mxu3 }
 0x226   : > { %v1489_v47 = vpop.f32.mrf.mxu0 }
 0x227   : > { %v2693_v47 = vld [vmem:[%s4310_s0 + $0x34] sm:$0x3] }
 0x22b   : > { %v2218_v28 = vpop.permute.xlu2 %2217 }
 0x22d   : > { %v1571_v48 = vpop.f32.mrf.mxu2  ;;  %v1584_v53 = vpop.f32.mrf.mxu3 }
 0x22e   : > { %v1588_v55 = vadd.f32 %v1571_v48, %v1504_v51  ;;  %v1589_v52 = vadd.f32 %v1584_v53, %v1505_v39 }
 0x233   : > { %v2302_v57 = vpop.permute.xlu2 %2301 }
 0x235   : > { %v1573_v6 = vpop.f32.mrf.mxu2  ;;  %v1586_v2 = vpop.f32.mrf.mxu3 }
 0x23b   : > { %v2386_v18 = vpop.permute.xlu2 %2385 }
 0x23c   : > { %v1668_v12 = vpop.f32.mrf.mxu1 }
 0x23d   : > { %v1673_v58 = vadd.f32 %v1668_v12, %v1589_v52 }
 0x23e   : > { %v1655_v32 = vpop.f32.mrf.mxu0 }
 0x23f   : > { %v1672_v62 = vadd.f32 %v1655_v32, %v1588_v55 }
 0x241   : > { %v2222_v59 = vpop.permute.xlu1 %2221 }
 0x242   : > { %v2220_v45 = vpop.permute.xlu0 %2219 }
 0x243   : > { %v2223_v31 = vsel %vm4571_vm13, %v2218_v28, %v2220_v45  ;;  %v2224_v60 = vsel %vm4572_vm11, %v2220_v45, %v2222_v59 }
 0x244   : > { %v1670_v0 = vpop.f32.mrf.mxu1  ;;  %v2229_v5 = vsel %vm344_vm6, %v2223_v31, 0  ;;  %v2232_v7 = vsel %vm344_vm6, %v2224_v60, 0 }
 0x245   : > { %2241 = vmatpush.bf16.msrb.mxu2 %v2229_v5  ;;  %2254 = vmatpush.bf16.msrb.mxu3 %v2232_v7 }
 0x246   : > { %v1657_v40 = vpop.f32.mrf.mxu0 }
 0x248   : > { %2685 = vmatmul.msk.bf16.vlgmr.msrb.gmra.mxu2 %vm340_vm4, %v2684_v11  ;;  %2686 = vmatmul.msk.bf16.vlgmr.msrb.gmra.mxu3 %vm340_vm4, %v2684_v11 }
 0x249   : > { %v2306_v41 = vpop.permute.xlu1 %2305 }
 0x24b   : > { %v1739_v49 = vpop.f32.mrf.mxu2  ;;  %v2304_v13 = vpop.permute.xlu0 %2303 }
 0x24c   : > { %v1756_v15 = vadd.f32 %v1739_v49, %v1672_v62  ;;  %v2307_v16 = vsel %vm4573_vm3, %v2302_v57, %v2304_v13  ;;  %v2308_v9 = vsel %vm4574_vm15, %v2304_v13, %v2306_v41 }
 0x24d   : > { %v2313_v14 = vsel %vm344_vm6, %v2307_v16, 0  ;;  %v2316_v17 = vsel %vm344_vm6, %v2308_v9, 0 }
 0x24e   : > { %2325 = vmatpush.bf16.msra.mxu0 %v2313_v14  ;;  %2338 = vmatpush.bf16.msra.mxu1 %v2316_v17 }
 0x251   : > { %2688 = vmatmul.msk.bf16.vlgmr.msra.gmra.mxu0 %vm340_vm4, %v2687_v63  ;;  %2689 = vmatmul.msk.bf16.vlgmr.msra.gmra.mxu1 %vm340_vm4, %v2687_v63  ;;  %v2390_v19 = vpop.permute.xlu1 %2389 }
 0x253   : > { %v1741_v20 = vpop.f32.mrf.mxu2  ;;  %v2388_v22 = vpop.permute.xlu0 %2387 }
 0x254   : > { %v2391_v26 = vsel %vm4575_vm10, %v2386_v18, %v2388_v22  ;;  %v2392_v29 = vsel %vm4576_vm12, %v2388_v22, %v2390_v19 }
 0x255   : > { %v2397_v3 = vsel %vm344_vm6, %v2391_v26, 0  ;;  %v2400_v46 = vsel %vm344_vm6, %v2392_v29, 0 }
 0x256   : > { %v1752_v27 = vpop.f32.mrf.mxu3  ;;  %2409 = vmatpush.bf16.msra.mxu2 %v2397_v3  ;;  %2422 = vmatpush.bf16.msra.mxu3 %v2400_v46 }
 0x257   : > { %v1757_v30 = vadd.f32 %v1752_v27, %v1673_v58 }
 0x258   : > { %v1823_v37 = vpop.f32.mrf.mxu0  ;;  %v1836_v56 = vpop.f32.mrf.mxu1 }
 0x259   : > { %v1840_v21 = vadd.f32 %v1823_v37, %v1756_v15  ;;  %v1841_v61 = vadd.f32 %v1836_v56, %v1757_v30  ;;  %2691 = vmatmul.msk.bf16.vlgmr.msra.gmra.mxu2 %vm340_vm4, %v2690_v8  ;;  %2692 = vmatmul.msk.bf16.vlgmr.msra.gmra.mxu3 %vm340_vm4, %v2690_v8 }
 0x25e   : > { %v1754_v38 = vpop.f32.mrf.mxu3 }
 0x260   : > { %v1825_v42 = vpop.f32.mrf.mxu0  ;;  %v1838_v35 = vpop.f32.mrf.mxu1 }
 0x26b   : > { %v2470_v34 = vpop.permute.xlu2 %2469 }
 0x27a   : > { %v2518_v3 = vpop.permute.xlu2 %2517 }
 0x282   : > { %v2474_v36 = vpop.permute.xlu1 %2473  ;;  %v1920_v50 = vpop.f32.mrf.mxu3 }
 0x283   : > { %v2472_v1 = vpop.permute.xlu0 %2471  ;;  %v1925_v44 = vadd.f32 %v1920_v50, %v1841_v61 }
 0x284   : > { %v2475_v4 = vsel %vm4577_vm9, %v2470_v34, %v2472_v1  ;;  %v2476_v43 = vsel %vm4578_vm5, %v2472_v1, %v2474_v36 }
 0x285   : > { %v2481_v51 = vsel %vm344_vm6, %v2475_v4, 0  ;;  %v2484_v24 = vsel %vm344_vm6, %v2476_v43, 0  ;;  %v1907_v39 = vpop.f32.mrf.mxu2  ;;  %v1991_v25 = vpop.f32.mrf.mxu0  ;;  %vm2535_vm6 = vcmask 1041408  }
 0x286   : > { %v1924_v23 = vadd.f32 %v1907_v39, %v1840_v21  ;;  %2493 = vmatpush.bf16.msrb.mxu0 %v2481_v51  ;;  %2506 = vmatpush.bf16.msrb.mxu1 %v2484_v24 }
 0x288   : > { %v2008_v54 = vadd.f32 %v1991_v25, %v1924_v23 }
 0x289   : > { %2694 = vmatmul.msk.bf16.vlgmr.msrb.gmra.mxu0 %vm340_vm4, %v2693_v47  ;;  %2695 = vmatmul.msk.bf16.vlgmr.msrb.gmra.mxu1 %vm340_vm4, %v2693_v47 }
 0x28a   : > { %v1922_v48 = vpop.f32.mrf.mxu3 }
 0x28d   : > { %v1909_v55 = vpop.f32.mrf.mxu2  ;;  %v1993_v53 = vpop.f32.mrf.mxu0 }
 0x28f   : > { %v2004_v52 = vpop.f32.mrf.mxu1 }
 0x290   : > { %v2009_v6 = vadd.f32 %v2004_v52, %v1925_v44 }
 0x291   : > { %v2526_v37 = vpop.permute.xlu0 %2525 }
 0x295   : > { %v2075_v12 = vpop.f32.mrf.mxu2  ;;  %v2159_v58 = vpop.f32.mrf.mxu0 }
 0x296   : > { %v2092_v28 = vadd.f32 %v2075_v12, %v2008_v54 }
 0x297   : > { %v2006_v2 = vpop.f32.mrf.mxu1 }
 0x298   : > { %v2176_v32 = vadd.f32 %v2159_v58, %v2092_v28 }
 0x29d   : > { %v2088_v62 = vpop.f32.mrf.mxu3  ;;  %v2077_v59 = vpop.f32.mrf.mxu2 }
 0x29e   : > { %v2093_v45 = vadd.f32 %v2088_v62, %v2009_v6  ;;  %v2161_v31 = vpop.f32.mrf.mxu0 }
 0x29f   : > { %v2172_v60 = vpop.f32.mrf.mxu1 }
 0x2a0   : > { %v2177_v0 = vadd.f32 %v2172_v60, %v2093_v45 }
 0x2a5   : > { %v2090_v5 = vpop.f32.mrf.mxu3 }
 0x2a7   : > { %v2174_v7 = vpop.f32.mrf.mxu1 }
 0x2cb   : > { %v2243_v11 = vpop.f32.mrf.mxu2  ;;  %v2256_v57 = vpop.f32.mrf.mxu3 }
 0x2cc   : > { %v2260_v18 = vadd.f32 %v2243_v11, %v2176_v32  ;;  %v2261_v19 = vadd.f32 %v2256_v57, %v2177_v0 }
 0x2ce   : > { %v2327_v40 = vpop.f32.mrf.mxu0  ;;  %v2340_v41 = vpop.f32.mrf.mxu1 }
 0x2cf   : > { %v2344_v20 = vadd.f32 %v2327_v40, %v2260_v18  ;;  %v2345_v22 = vadd.f32 %v2340_v41, %v2261_v19 }
 0x2d3   : > { %v2245_v49 = vpop.f32.mrf.mxu2  ;;  %v2258_v13 = vpop.f32.mrf.mxu3 }
 0x2d6   : > { %v2329_v15 = vpop.f32.mrf.mxu0  ;;  %v2342_v16 = vpop.f32.mrf.mxu1 }
 0x2dc   : > { %v2411_v9 = vpop.f32.mrf.mxu2  ;;  %v2424_v14 = vpop.f32.mrf.mxu3 }
 0x2dd   : > { %v2428_v26 = vadd.f32 %v2411_v9, %v2344_v20  ;;  %v2429_v29 = vadd.f32 %v2424_v14, %v2345_v22 }
 0x2e4   : > { %v2413_v17 = vpop.f32.mrf.mxu2  ;;  %v2426_v63 = vpop.f32.mrf.mxu3 }
 0x306   : > { %v2495_v46 = vpop.f32.mrf.mxu0  ;;  %v2508_v27 = vpop.f32.mrf.mxu1 }
 0x307   : > { %v2512_v8 = vadd.f32 %v2495_v46, %v2428_v26  ;;  %v2513_v30 = vadd.f32 %v2508_v27, %v2429_v29 }
 0x309   : > { %v2520_v56 = vmul.f32 %v2518_v3, %v2512_v8  ;;  %v2521_v21 = vmul.f32 %v2518_v3, %v2513_v30 }
 0x30b   : > { %v2528_v61 = vadd.f32 %v2526_v37, %v2520_v56  ;;  %v2529_v38 = vadd.f32 %v2526_v37, %v2521_v21 }
 0x30d   : > { %v2530_v42 = vmax.f32 %v2528_v61, 0.0  ;;  %v2531_v35 = vmax.f32 %v2529_v38, 0.0 }
 0x30e   : > { %v2497_v10 = vpop.f32.mrf.mxu0  ;;  %v2510_v33 = vpop.f32.mrf.mxu1 }
 0x30f   : > { %v2532_v34 = vpack.c.bf16 %v2531_v35, %v2530_v42 }
 0x311   : > { %v2534_v36 = vrot.slane %v2532_v34, 2 }
 0x313   : > { %v2538_v1 = vsel %vm2535_vm6, %v2532_v34, %v2534_v36 }
 0x314   : > { %2540 = vst [vmem:[%s2807_s8] sm:$0xf] %v2538_v1 }
 0x315 PF: > { %s15_s18 = sadd.s32 1, %s2738_s18  }
 0x316   : > { %p12_p4 = scmp.ge.s32.totalorder %s15_s18, 6  }
 0x318   :  { %14 = sbr.rel (!%p12_p4) target bundleno = 1 (0x1), region = 120 }
 0x31d   :  { %2563 = vsyncmov [#allocation3] }
 0x320   :  { %s2564_s29 = vpop.sfrf %2563 }
 0x321   :  { %p2698_p5 = scmp.ne.s32.totalorder %s2564_s29, 0 }
 0x323   :  { %2568 = shalt.err (%p2698_p5)  }

</bundles_post_ra>
